<compile_context>
chip_gen: v7x
topology: tpu7x:2x2x1
jax: 0.10.0
libtpu: 0.0.40
codegen_flags: <defaults>
</compile_context>

<pallas_src>
import functools

import jax
import jax.numpy as jnp
from jax.experimental import pallas as pl
from jax.experimental.pallas import tpu as pltpu


def _gelu_exact(x):
    # Reference path (outside the kernel): PyTorch nn.GELU() default (erf GELU).
    return jax.nn.gelu(x, approximate=False)


def _erf_poly(x):
    # Abramowitz & Stegun 7.1.26, |abs err| < 1.5e-7.  Only mul/add/exp/where.
    a1, a2, a3, a4, a5 = (0.254829592, -0.284496736, 1.421413741,
                          -1.453152027, 1.061405429)
    p = 0.3275911
    sgn = jnp.where(x >= 0.0, 1.0, -1.0)
    z = jnp.abs(x)
    t = 1.0 / (1.0 + p * z)
    poly = ((((a5 * t + a4) * t + a3) * t + a2) * t + a1) * t
    return sgn * (1.0 - poly * jnp.exp(-z * z))


def _gelu_kernel(x):
    # Exact-GELU via the erf polynomial (error << 1e-5).
    return 0.5 * x * (1.0 + _erf_poly(x * 0.7071067811865476))


# ----------------------------------------------------------------------------
# Fused per-batch kernel: PRB -> 3x3 conv -> GroupNorm -> GELU -> 1x1 conv
#                          + global-avg-pool -> grade / subtype MLP heads
# ----------------------------------------------------------------------------
def fused_kernel(x_ref, w1s_ref, b1s_ref, w2_ref, b2_ref, a_ref,
                 wc_ref, bc_ref, maskl_ref, maskr_ref,
                 gmask_ref, gamma_ref, beta_ref, wseg_ref, bseg_ref,
                 wh1_ref, bh1_ref, wg2_ref, bg2_ref, ws2_ref, bs2_ref,
                 seg_ref, grade_ref, sub_ref,
                 *, H, W, C, P1, gn_groups, gn_ch):
    HW = H * W
    x = x_ref[0]                                                    # (HW, C)

    # ---- PRB: y = a*conv2(gelu(conv1(x))) + (1-a)*skip(x), all 1x1 convs ----
    a = a_ref[0]                                                    # SMEM scalar
    t = jnp.dot(x, w1s_ref[...],
                preferred_element_type=jnp.float32) + b1s_ref[...]  # (HW, P1+C)
    h = _gelu_kernel(t[:, :4 * C])                                  # (HW, 4C)
    skip = t[:, P1:]                                                # (HW, C) 128-aligned
    y = jnp.dot(h, w2_ref[...],
                preferred_element_type=jnp.float32) + b2_ref[...]   # (HW, C)
    feat = a * y + (1.0 - a) * skip                                 # (HW, C)

    # ---- 3x3 "same" conv: 9 shifted-row matmuls on the flat (HW, C) block ----
    zrow = jnp.zeros((W + 1, C), jnp.float32)
    fpad = jnp.concatenate([zrow, feat, zrow], axis=0)              # (HW+2W+2, C)
    ml = maskl_ref[...]                                             # (HW,1) col>0
    mr = maskr_ref[...]                                             # (HW,1) col<W-1
    acc = jnp.zeros((HW, gn_ch), jnp.float32)
    for dy in range(3):
        for dx in range(3):
            off = (dy - 1) * W + (dx - 1)
            start = W + 1 + off                                     # static int
            win = fpad[start:start + HW, :]                         # (HW, C)
            if dx == 0:
                win = win * ml
            elif dx == 2:
                win = win * mr
            k = dy * 3 + dx
            acc = acc + jnp.dot(win, wc_ref[k * C:(k + 1) * C, :],
                                preferred_element_type=jnp.float32)
    yconv = acc + bc_ref[...]                                       # (HW, 64)

    # ---- GroupNorm(8, 64): two-pass stats, reductions on the MXU ----
    n = jnp.float32(HW * (gn_ch // gn_groups))
    ones_hw = jnp.ones((1, HW), jnp.float32)
    csum = jnp.dot(ones_hw, yconv, preferred_element_type=jnp.float32)   # (1,64)
    mean = jnp.dot(csum, gmask_ref[...],
                   preferred_element_type=jnp.float32) / n               # (1,64)
    yc = yconv - mean
    c2 = jnp.dot(ones_hw, yc * yc, preferred_element_type=jnp.float32)   # (1,64)
    var = jnp.dot(c2, gmask_ref[...],
                  preferred_element_type=jnp.float32) / n                # biased
    yn = yc * jax.lax.rsqrt(var + 1e-5)
    yg = _gelu_kernel(yn * gamma_ref[...] + beta_ref[...])

    # ---- final 1x1 conv; output channels padded to 128 (lane-dense store) ----
    seg_ref[0] = (jnp.dot(yg, wseg_ref[...],
                          preferred_element_type=jnp.float32) + bseg_ref[...])

    # ---- classification heads on the ORIGINAL x (pool fused in-kernel) ----
    pooled = jnp.dot(ones_hw, x,
                     preferred_element_type=jnp.float32) / jnp.float32(HW)  # (1,C)
    hh = _gelu_kernel(jnp.dot(pooled, wh1_ref[...],
                              preferred_element_type=jnp.float32)
                      + bh1_ref[...])                                # (1,256)
    hg = hh[:, :128]
    hs = hh[:, 128:]
    grade_ref[0] = (jnp.dot(hg, wg2_ref[...],
                            preferred_element_type=jnp.float32) + bg2_ref[...])
    sub_ref[0] = (jnp.dot(hs, ws2_ref[...],
                          preferred_element_type=jnp.float32) + bs2_ref[...])


def decoder_fused_forward(x_bsc, kp, *, H, W, ncp, p1, gn_groups=8, gn_ch=64):
    B, HW, C = x_bsc.shape

    # Column-wrap masks for the 3x3 conv row-shift trick (computed once by XLA).
    col = jnp.arange(HW, dtype=jnp.int32) % W
    maskl = (col >= 1).astype(jnp.float32).reshape(HW, 1)
    maskr = (col <= W - 2).astype(jnp.float32).reshape(HW, 1)

    full2 = lambda b: (0, 0)
    kernel = functools.partial(fused_kernel, H=H, W=W, C=C, P1=p1,
                               gn_groups=gn_groups, gn_ch=gn_ch)
    return pl.pallas_call(
        kernel,
        out_shape=(jax.ShapeDtypeStruct((B, HW, ncp), jnp.float32),
                   jax.ShapeDtypeStruct((B, 1, 128), jnp.float32),
                   jax.ShapeDtypeStruct((B, 1, 128), jnp.float32)),
        grid_spec=pltpu.PrefetchScalarGridSpec(
            num_scalar_prefetch=0,
            grid=(B,),
            in_specs=[
                pl.BlockSpec((1, HW, C), lambda b: (b, 0, 0)),        # x
                pl.BlockSpec((C, p1 + C), full2),                     # [w1|0|ws]
                pl.BlockSpec((1, p1 + C), full2),                     # [b1|0|bs]
                pl.BlockSpec((4 * C, C), full2),                      # w2
                pl.BlockSpec((1, C), full2),                          # b2
                pl.BlockSpec(memory_space=pltpu.MemorySpace.SMEM),    # alpha
                pl.BlockSpec((9 * C, gn_ch), full2),                  # 3x3 conv w
                pl.BlockSpec((1, gn_ch), full2),                      # conv bias
                pl.BlockSpec((HW, 1), full2),                         # left mask
                pl.BlockSpec((HW, 1), full2),                         # right mask
                pl.BlockSpec((gn_ch, gn_ch), full2),                  # group mask
                pl.BlockSpec((1, gn_ch), full2),                      # gamma
                pl.BlockSpec((1, gn_ch), full2),                      # beta
                pl.BlockSpec((gn_ch, ncp), full2),                    # seg 1x1 w
                pl.BlockSpec((1, ncp), full2),                        # seg 1x1 b
                pl.BlockSpec((C, 256), full2),                        # [wg1|ws1]
                pl.BlockSpec((1, 256), full2),                        # [bg1|bs1]
                pl.BlockSpec((128, 128), full2),                      # wg2 (pad)
                pl.BlockSpec((1, 128), full2),                        # bg2 (pad)
                pl.BlockSpec((128, 128), full2),                      # ws2 (pad)
                pl.BlockSpec((1, 128), full2),                        # bs2 (pad)
            ],
            out_specs=(pl.BlockSpec((1, HW, ncp), lambda b: (b, 0, 0)),
                       pl.BlockSpec((1, 1, 128), lambda b: (b, 0, 0)),
                       pl.BlockSpec((1, 1, 128), lambda b: (b, 0, 0))),
        ),
        compiler_params=pltpu.CompilerParams(
            dimension_semantics=("parallel",)),
    )(x_bsc, kp["w1s"], kp["b1s"], kp["w2"], kp["b2"], kp["alpha"],
      kp["wc2d"], kp["bc"], maskl, maskr,
      kp["gmask"], kp["gamma"], kp["beta"], kp["wseg"], kp["bseg"],
      kp["wh1"], kp["bh1"], kp["wg2"], kp["bg2"], kp["ws2"], kp["bs2"])


# ----------------------------------------------------------------------------
# Parameter init, packing, wrapper forward, pure-JAX reference
# ----------------------------------------------------------------------------
def init_params(key, in_channels, num_classes, num_subtypes):
    C = in_channels
    ks = jax.random.split(key, 16)
    rnd = lambda k, shape, scale: (scale * jax.random.normal(k, shape)
                                   ).astype(jnp.float32)
    prb = {
        "w1": rnd(ks[0], (C, 4 * C), 0.1),
        "b1": rnd(ks[1], (1, 4 * C), 0.01),
        "w2": rnd(ks[2], (4 * C, C), 0.1),
        "b2": rnd(ks[3], (1, C), 0.01),
        "ws": rnd(ks[4], (C, C), 0.1),
        "bs": rnd(ks[5], (1, C), 0.01),
        "alpha": jnp.full((1,), 0.5, jnp.float32),
    }
    groups, ch = 8, 64
    gidx = jnp.arange(ch) // (ch // groups)
    gmask = (gidx[:, None] == gidx[None, :]).astype(jnp.float32)
    seg = {
        # 3x3 conv weight as (kh, kw, c_in, c_out); from PyTorch (out,in,kh,kw)
        # this is w.transpose(2, 3, 1, 0).
        "wc": rnd(ks[6], (3, 3, C, ch), 0.05),
        "bc": rnd(ks[7], (1, ch), 0.01),
        "gmask": gmask,
        "gamma": jnp.ones((1, ch), jnp.float32),
        "beta": jnp.zeros((1, ch), jnp.float32),
        "w2": rnd(ks[8], (ch, num_classes), 0.1),
        "b2": rnd(ks[9], (1, num_classes), 0.01),
    }
    heads = {
        "wg1": rnd(ks[10], (C, 128), 0.1),
        "bg1": rnd(ks[11], (1, 128), 0.01),
        "wg2": rnd(ks[12], (128, 1), 0.1),
        "bg2": jnp.zeros((1, 1), jnp.float32),
        "ws1": rnd(ks[13], (C, 128), 0.1),
        "bs1": rnd(ks[14], (1, 128), 0.01),
        "ws2": rnd(ks[15], (128, num_subtypes), 0.1),
        "bs2": jnp.zeros((1, num_subtypes), jnp.float32),
    }
    return {"prb": prb, "seg": seg, "heads": heads}


def _pack_params(params, ncp, p1):
    prb, seg, heads = params["prb"], params["seg"], params["heads"]
    C = prb["w1"].shape[0]
    ch = seg["bc"].shape[1]

    def pad_cols(w, n):
        return jnp.pad(w, ((0, 0), (0, n - w.shape[1])))

    # PRB input convs fused: conv1 in cols [0, 4C), skip in cols [p1, p1+C)
    # (p1 is a multiple of 128 so both kernel-side slices are lane-aligned).
    w1s = jnp.zeros((C, p1 + C), jnp.float32)
    w1s = w1s.at[:, :4 * C].set(prb["w1"]).at[:, p1:].set(prb["ws"])
    b1s = jnp.zeros((1, p1 + C), jnp.float32)
    b1s = b1s.at[:, :4 * C].set(prb["b1"]).at[:, p1:].set(prb["bs"])

    return {
        "w1s": w1s, "b1s": b1s,
        "w2": prb["w2"], "b2": prb["b2"],
        "alpha": prb["alpha"],
        "wc2d": seg["wc"].reshape(9 * C, ch), "bc": seg["bc"],
        "gmask": seg["gmask"], "gamma": seg["gamma"], "beta": seg["beta"],
        "wseg": pad_cols(seg["w2"], ncp), "bseg": pad_cols(seg["b2"], ncp),
        "wh1": jnp.concatenate([heads["wg1"], heads["ws1"]], axis=1),
        "bh1": jnp.concatenate([heads["bg1"], heads["bs1"]], axis=1),
        "wg2": pad_cols(heads["wg2"], 128), "bg2": pad_cols(heads["bg2"], 128),
        "ws2": pad_cols(heads["ws2"], 128), "bs2": pad_cols(heads["bs2"], 128),
    }


@functools.partial(jax.jit, static_argnames=("num_classes", "num_subtypes"))
def multi_task_decoder_forward(x_nchw, params, num_classes, num_subtypes):
    B, C, H, W = x_nchw.shape
    HW = H * W
    assert num_subtypes <= 128
    ncp = max(128, ((num_classes + 127) // 128) * 128)
    p1 = ((4 * C + 127) // 128) * 128

    x_bsc = jnp.transpose(x_nchw, (0, 2, 3, 1)).astype(jnp.float32
                                                       ).reshape(B, HW, C)
    kp = _pack_params(params, ncp, p1)

    seg_pad, grade_pad, sub_pad = decoder_fused_forward(
        x_bsc, kp, H=H, W=W, ncp=ncp, p1=p1)

    seg_out = jnp.transpose(
        seg_pad[:, :, :num_classes].reshape(B, H, W, num_classes), (0, 3, 1, 2))
    grade_out = grade_pad[:, 0, 0]                                  # (B,)
    subtype_out = sub_pad[:, 0, :num_subtypes]                      # (B, ns)
    return seg_out, grade_out, subtype_out


def _reference_forward(x_nchw, params, num_classes, num_subtypes):
    """Pure-JAX reference mirroring the PyTorch module."""
    B, C, H, W = x_nchw.shape
    x = jnp.transpose(x_nchw, (0, 2, 3, 1)).astype(jnp.float32)     # NHWC
    prb, seg, heads = params["prb"], params["seg"], params["heads"]

    h = _gelu_exact(x @ prb["w1"] + prb["b1"])
    y = h @ prb["w2"] + prb["b2"]
    s = x @ prb["ws"] + prb["bs"]
    a = prb["alpha"][0]
    feat = a * y + (1.0 - a) * s                                    # (B,H,W,C)

    xp = jnp.pad(feat, ((0, 0), (1, 1), (1, 1), (0, 0)))
    conv = sum(xp[:, dy:dy + H, dx:dx + W, :] @ seg["wc"][dy, dx]
               for dy in range(3) for dx in range(3)) + seg["bc"]   # (B,H,W,64)

    g, ch = 8, 64
    c4 = conv.reshape(B, H * W, g, ch // g)
    mean = c4.mean(axis=(1, 3), keepdims=True)
    var = c4.var(axis=(1, 3), keepdims=True)
    cn = ((c4 - mean) / jnp.sqrt(var + 1e-5)).reshape(B, H, W, ch)
    cn = cn * seg["gamma"].reshape(ch) + seg["beta"].reshape(ch)
    seg_out = _gelu_exact(cn) @ seg["w2"] + seg["b2"]
    seg_out = jnp.transpose(seg_out, (0, 3, 1, 2))

    pooled = x.mean(axis=(1, 2))                                    # (B, C)
    grade = (_gelu_exact(pooled @ heads["wg1"] + heads["bg1"]) @ heads["wg2"]
             + heads["bg2"])
    subtype = (_gelu_exact(pooled @ heads["ws1"] + heads["bs1"]) @ heads["ws2"]
               + heads["bs2"])
    return seg_out, grade[:, 0], subtype


if __name__ == "__main__":
    B, C, H, W = 2, 8, 16, 16
    num_classes, num_subtypes = 3, 4

    key = jax.random.PRNGKey(0)
    kx, kp = jax.random.split(key)
    x = jax.random.normal(kx, (B, C, H, W), dtype=jnp.float32)
    params = init_params(kp, C, num_classes, num_subtypes)

    seg_out, grade_out, subtype_out = multi_task_decoder_forward(
        x, params, num_classes, num_subtypes)
    jax.block_until_ready((seg_out, grade_out, subtype_out))

    assert seg_out.shape == (B, num_classes, H, W)
    assert grade_out.shape == (B,)
    assert subtype_out.shape == (B, num_subtypes)

    seg_r, grade_r, sub_r = _reference_forward(x, params, num_classes,
                                               num_subtypes)
    assert jnp.allclose(seg_out, seg_r, atol=1e-3, rtol=1e-3)
    assert jnp.allclose(grade_out, grade_r, atol=1e-3, rtol=1e-3)
    assert jnp.allclose(subtype_out, sub_r, atol=1e-3, rtol=1e-3)
    print("KERNEL_OK")
</pallas_src>

<mosaic_0001>
module attributes {stable_mosaic.version = 11 : i64} {
  func.func @fused_kernel(%arg0: i32, %arg1: memref<1x256x8xf32, #tpu.memory_space<vmem>>, %arg2: memref<8x136xf32, #tpu.memory_space<vmem>>, %arg3: memref<1x136xf32, #tpu.memory_space<vmem>>, %arg4: memref<32x8xf32, #tpu.memory_space<vmem>>, %arg5: memref<1x8xf32, #tpu.memory_space<vmem>>, %arg6: memref<1xf32, #tpu.memory_space<smem>>, %arg7: memref<72x64xf32, #tpu.memory_space<vmem>>, %arg8: memref<1x64xf32, #tpu.memory_space<vmem>>, %arg9: memref<256x1xf32, #tpu.memory_space<vmem>>, %arg10: memref<256x1xf32, #tpu.memory_space<vmem>>, %arg11: memref<64x64xf32, #tpu.memory_space<vmem>>, %arg12: memref<1x64xf32, #tpu.memory_space<vmem>>, %arg13: memref<1x64xf32, #tpu.memory_space<vmem>>, %arg14: memref<64x128xf32, #tpu.memory_space<vmem>>, %arg15: memref<1x128xf32, #tpu.memory_space<vmem>>, %arg16: memref<8x256xf32, #tpu.memory_space<vmem>>, %arg17: memref<1x256xf32, #tpu.memory_space<vmem>>, %arg18: memref<128x128xf32, #tpu.memory_space<vmem>>, %arg19: memref<1x128xf32, #tpu.memory_space<vmem>>, %arg20: memref<128x128xf32, #tpu.memory_space<vmem>>, %arg21: memref<1x128xf32, #tpu.memory_space<vmem>>, %arg22: memref<1x256x128xf32, #tpu.memory_space<vmem>>, %arg23: memref<1x1x128xf32, #tpu.memory_space<vmem>>, %arg24: memref<1x1x128xf32, #tpu.memory_space<vmem>>) attributes {dimension_semantics = [#tpu.dimension_semantics<parallel>], iteration_bounds = array<i64: 2>, scalar_prefetch = 0 : i64, scratch_operands = 0 : i64, tpu.core_type = #tpu.core_type<tc>, window_params = [{transform_indices = @transform_0, window_bounds = array<i64: 1, 256, 8>}, {pipeline_mode = #tpu.pipeline_mode<synchronous>, transform_indices = @transform_1, window_bounds = array<i64: 8, 136>}, {pipeline_mode = #tpu.pipeline_mode<synchronous>, transform_indices = @transform_2, window_bounds = array<i64: 1, 136>}, {pipeline_mode = #tpu.pipeline_mode<synchronous>, transform_indices = @transform_3, window_bounds = array<i64: 32, 8>}, {pipeline_mode = #tpu.pipeline_mode<synchronous>, transform_indices = @transform_4, window_bounds = array<i64: 1, 8>}, {transform_indices = @transform_5, window_bounds = array<i64: 1>}, {pipeline_mode = #tpu.pipeline_mode<synchronous>, transform_indices = @transform_6, window_bounds = array<i64: 72, 64>}, {pipeline_mode = #tpu.pipeline_mode<synchronous>, transform_indices = @transform_7, window_bounds = array<i64: 1, 64>}, {pipeline_mode = #tpu.pipeline_mode<synchronous>, transform_indices = @transform_8, window_bounds = array<i64: 256, 1>}, {pipeline_mode = #tpu.pipeline_mode<synchronous>, transform_indices = @transform_9, window_bounds = array<i64: 256, 1>}, {pipeline_mode = #tpu.pipeline_mode<synchronous>, transform_indices = @transform_10, window_bounds = array<i64: 64, 64>}, {pipeline_mode = #tpu.pipeline_mode<synchronous>, transform_indices = @transform_11, window_bounds = array<i64: 1, 64>}, {pipeline_mode = #tpu.pipeline_mode<synchronous>, transform_indices = @transform_12, window_bounds = array<i64: 1, 64>}, {pipeline_mode = #tpu.pipeline_mode<synchronous>, transform_indices = @transform_13, window_bounds = array<i64: 64, 128>}, {pipeline_mode = #tpu.pipeline_mode<synchronous>, transform_indices = @transform_14, window_bounds = array<i64: 1, 128>}, {pipeline_mode = #tpu.pipeline_mode<synchronous>, transform_indices = @transform_15, window_bounds = array<i64: 8, 256>}, {pipeline_mode = #tpu.pipeline_mode<synchronous>, transform_indices = @transform_16, window_bounds = array<i64: 1, 256>}, {pipeline_mode = #tpu.pipeline_mode<synchronous>, transform_indices = @transform_17, window_bounds = array<i64: 128, 128>}, {pipeline_mode = #tpu.pipeline_mode<synchronous>, transform_indices = @transform_18, window_bounds = array<i64: 1, 128>}, {pipeline_mode = #tpu.pipeline_mode<synchronous>, transform_indices = @transform_19, window_bounds = array<i64: 128, 128>}, {pipeline_mode = #tpu.pipeline_mode<synchronous>, transform_indices = @transform_20, window_bounds = array<i64: 1, 128>}, {transform_indices = @transform_21, window_bounds = array<i64: 1, 256, 128>}, {transform_indices = @transform_22, window_bounds = array<i64: 1, 1, 128>}, {transform_indices = @transform_23, window_bounds = array<i64: 1, 1, 128>}]} {
    %c0 = arith.constant 0 : index
    %c0_0 = arith.constant 0 : index
    %c0_1 = arith.constant 0 : index
    %0 = vector.load %arg1[%c0, %c0_0, %c0_1] : memref<1x256x8xf32, #tpu.memory_space<vmem>>, vector<1x256x8xf32>
    %1 = vector.shape_cast %0 : vector<1x256x8xf32> to vector<256x8xf32>
    %c0_2 = arith.constant 0 : index
    %2 = memref.load %arg6[%c0_2] : memref<1xf32, #tpu.memory_space<smem>>
    %c0_3 = arith.constant 0 : index
    %c0_4 = arith.constant 0 : index
    %3 = vector.load %arg2[%c0_3, %c0_4] : memref<8x136xf32, #tpu.memory_space<vmem>>, vector<8x136xf32>
    %cst = arith.constant dense<0.000000e+00> : vector<256x136xf32>
    %4 = tpu.matmul %1, %3, %cst {dimension_numbers = #tpu.dot_dimension_numbers<[1], [0], [0], [1], [0, 0, 1, 1], [], []>} : vector<256x8xf32>, vector<8x136xf32>, vector<256x136xf32> -> vector<256x136xf32>
    %c0_5 = arith.constant 0 : index
    %c0_6 = arith.constant 0 : index
    %5 = vector.load %arg3[%c0_5, %c0_6] : memref<1x136xf32, #tpu.memory_space<vmem>>, vector<1x136xf32>
    %6 = vector.broadcast %5 : vector<1x136xf32> to vector<256x136xf32>
    %7 = arith.addf %4, %6 : vector<256x136xf32>
    %8 = vector.extract_strided_slice %7 {offsets = [0, 0], sizes = [256, 32], strides = [1, 1]} : vector<256x136xf32> to vector<256x32xf32>
    %cst_7 = arith.constant 5.000000e-01 : f32
    %9 = vector.broadcast %cst_7 : f32 to vector<256x32xf32>
    %10 = arith.mulf %9, %8 : vector<256x32xf32>
    %cst_8 = arith.constant 0.707106769 : f32
    %11 = vector.broadcast %cst_8 : f32 to vector<256x32xf32>
    %12 = arith.mulf %8, %11 : vector<256x32xf32>
    %cst_9 = arith.constant 0.000000e+00 : f32
    %13 = vector.broadcast %cst_9 : f32 to vector<256x32xf32>
    %14 = arith.cmpf oge, %12, %13 : vector<256x32xf32>
    %cst_10 = arith.constant 1.000000e+00 : f32
    %cst_11 = arith.constant -1.000000e+00 : f32
    %15 = vector.broadcast %cst_10 : f32 to vector<256x32xf32>
    %16 = vector.broadcast %cst_11 : f32 to vector<256x32xf32>
    %17 = arith.select %14, %15, %16 : vector<256x32xi1>, vector<256x32xf32>
    %18 = math.absf %12 : vector<256x32xf32>
    %cst_12 = arith.constant 0.327591091 : f32
    %19 = vector.broadcast %cst_12 : f32 to vector<256x32xf32>
    %20 = arith.mulf %19, %18 : vector<256x32xf32>
    %cst_13 = arith.constant 1.000000e+00 : f32
    %21 = vector.broadcast %cst_13 : f32 to vector<256x32xf32>
    %22 = arith.addf %21, %20 : vector<256x32xf32>
    %cst_14 = arith.constant 1.000000e+00 : f32
    %23 = vector.broadcast %cst_14 : f32 to vector<256x32xf32>
    %24 = arith.divf %23, %22 : vector<256x32xf32>
    %cst_15 = arith.constant 1.06140542 : f32
    %25 = vector.broadcast %cst_15 : f32 to vector<256x32xf32>
    %26 = arith.mulf %25, %24 : vector<256x32xf32>
    %cst_16 = arith.constant -1.45315206 : f32
    %27 = vector.broadcast %cst_16 : f32 to vector<256x32xf32>
    %28 = arith.addf %26, %27 : vector<256x32xf32>
    %29 = arith.mulf %28, %24 : vector<256x32xf32>
    %cst_17 = arith.constant 1.42141378 : f32
    %30 = vector.broadcast %cst_17 : f32 to vector<256x32xf32>
    %31 = arith.addf %29, %30 : vector<256x32xf32>
    %32 = arith.mulf %31, %24 : vector<256x32xf32>
    %cst_18 = arith.constant -0.284496725 : f32
    %33 = vector.broadcast %cst_18 : f32 to vector<256x32xf32>
    %34 = arith.addf %32, %33 : vector<256x32xf32>
    %35 = arith.mulf %34, %24 : vector<256x32xf32>
    %cst_19 = arith.constant 0.254829586 : f32
    %36 = vector.broadcast %cst_19 : f32 to vector<256x32xf32>
    %37 = arith.addf %35, %36 : vector<256x32xf32>
    %38 = arith.mulf %37, %24 : vector<256x32xf32>
    %cst_20 = arith.constant 0.000000e+00 : f32
    %39 = vector.broadcast %cst_20 : f32 to vector<256x32xf32>
    %40 = arith.subf %39, %18 : vector<256x32xf32>
    %41 = arith.mulf %40, %18 : vector<256x32xf32>
    %42 = math.exp %41 : vector<256x32xf32>
    %43 = arith.mulf %38, %42 : vector<256x32xf32>
    %cst_21 = arith.constant 1.000000e+00 : f32
    %44 = vector.broadcast %cst_21 : f32 to vector<256x32xf32>
    %45 = arith.subf %44, %43 : vector<256x32xf32>
    %46 = arith.mulf %17, %45 : vector<256x32xf32>
    %cst_22 = arith.constant 1.000000e+00 : f32
    %47 = vector.broadcast %cst_22 : f32 to vector<256x32xf32>
    %48 = arith.addf %47, %46 : vector<256x32xf32>
    %49 = arith.mulf %10, %48 : vector<256x32xf32>
    %50 = vector.extract_strided_slice %7 {offsets = [0, 128], sizes = [256, 8], strides = [1, 1]} : vector<256x136xf32> to vector<256x8xf32>
    %c0_23 = arith.constant 0 : index
    %c0_24 = arith.constant 0 : index
    %51 = vector.load %arg4[%c0_23, %c0_24] : memref<32x8xf32, #tpu.memory_space<vmem>>, vector<32x8xf32>
    %cst_25 = arith.constant dense<0.000000e+00> : vector<256x8xf32>
    %52 = tpu.matmul %49, %51, %cst_25 {dimension_numbers = #tpu.dot_dimension_numbers<[1], [0], [0], [1], [0, 0, 1, 1], [], []>} : vector<256x32xf32>, vector<32x8xf32>, vector<256x8xf32> -> vector<256x8xf32>
    %c0_26 = arith.constant 0 : index
    %c0_27 = arith.constant 0 : index
    %53 = vector.load %arg5[%c0_26, %c0_27] : memref<1x8xf32, #tpu.memory_space<vmem>>, vector<1x8xf32>
    %54 = vector.broadcast %53 : vector<1x8xf32> to vector<256x8xf32>
    %55 = arith.addf %52, %54 : vector<256x8xf32>
    %56 = vector.broadcast %2 : f32 to vector<256x8xf32>
    %57 = arith.mulf %56, %55 : vector<256x8xf32>
    %cst_28 = arith.constant 1.000000e+00 : f32
    %58 = arith.subf %cst_28, %2 : f32
    %59 = vector.broadcast %58 : f32 to vector<256x8xf32>
    %60 = arith.mulf %59, %50 : vector<256x8xf32>
    %61 = arith.addf %57, %60 : vector<256x8xf32>
    %cst_29 = arith.constant 0.000000e+00 : f32
    %62 = vector.broadcast %cst_29 : f32 to vector<17x8xf32>
    %63 = tpu.concatenate %62, %61, %62 in 0 : vector<17x8xf32>, vector<256x8xf32>, vector<17x8xf32> -> vector<290x8xf32>
    %c0_30 = arith.constant 0 : index
    %c0_31 = arith.constant 0 : index
    %64 = vector.load %arg9[%c0_30, %c0_31] : memref<256x1xf32, #tpu.memory_space<vmem>>, vector<256x1xf32>
    %c0_32 = arith.constant 0 : index
    %c0_33 = arith.constant 0 : index
    %65 = vector.load %arg10[%c0_32, %c0_33] : memref<256x1xf32, #tpu.memory_space<vmem>>, vector<256x1xf32>
    %cst_34 = arith.constant 0.000000e+00 : f32
    %66 = vector.broadcast %cst_34 : f32 to vector<256x64xf32>
    %67 = vector.extract_strided_slice %63 {offsets = [0, 0], sizes = [256, 8], strides = [1, 1]} : vector<290x8xf32> to vector<256x8xf32>
    %68 = vector.broadcast %64 : vector<256x1xf32> to vector<256x8xf32>
    %69 = arith.mulf %67, %68 : vector<256x8xf32>
    %c0_35 = arith.constant 0 : index
    %c0_36 = arith.constant 0 : index
    %70 = vector.load %arg7[%c0_35, %c0_36] : memref<72x64xf32, #tpu.memory_space<vmem>>, vector<8x64xf32>
    %cst_37 = arith.constant dense<0.000000e+00> : vector<256x64xf32>
    %71 = tpu.matmul %69, %70, %cst_37 {dimension_numbers = #tpu.dot_dimension_numbers<[1], [0], [0], [1], [0, 0, 1, 1], [], []>} : vector<256x8xf32>, vector<8x64xf32>, vector<256x64xf32> -> vector<256x64xf32>
    %72 = arith.addf %66, %71 : vector<256x64xf32>
    %73 = vector.extract_strided_slice %63 {offsets = [1, 0], sizes = [256, 8], strides = [1, 1]} : vector<290x8xf32> to vector<256x8xf32>
    %c8 = arith.constant 8 : index
    %c0_38 = arith.constant 0 : index
    %74 = vector.load %arg7[%c8, %c0_38] : memref<72x64xf32, #tpu.memory_space<vmem>>, vector<8x64xf32>
    %cst_39 = arith.constant dense<0.000000e+00> : vector<256x64xf32>
    %75 = tpu.matmul %73, %74, %cst_39 {dimension_numbers = #tpu.dot_dimension_numbers<[1], [0], [0], [1], [0, 0, 1, 1], [], []>} : vector<256x8xf32>, vector<8x64xf32>, vector<256x64xf32> -> vector<256x64xf32>
    %76 = arith.addf %72, %75 : vector<256x64xf32>
    %77 = vector.extract_strided_slice %63 {offsets = [2, 0], sizes = [256, 8], strides = [1, 1]} : vector<290x8xf32> to vector<256x8xf32>
    %78 = vector.broadcast %65 : vector<256x1xf32> to vector<256x8xf32>
    %79 = arith.mulf %77, %78 : vector<256x8xf32>
    %c16 = arith.constant 16 : index
    %c0_40 = arith.constant 0 : index
    %80 = vector.load %arg7[%c16, %c0_40] : memref<72x64xf32, #tpu.memory_space<vmem>>, vector<8x64xf32>
    %cst_41 = arith.constant dense<0.000000e+00> : vector<256x64xf32>
    %81 = tpu.matmul %79, %80, %cst_41 {dimension_numbers = #tpu.dot_dimension_numbers<[1], [0], [0], [1], [0, 0, 1, 1], [], []>} : vector<256x8xf32>, vector<8x64xf32>, vector<256x64xf32> -> vector<256x64xf32>
    %82 = arith.addf %76, %81 : vector<256x64xf32>
    %83 = vector.extract_strided_slice %63 {offsets = [16, 0], sizes = [256, 8], strides = [1, 1]} : vector<290x8xf32> to vector<256x8xf32>
    %84 = vector.broadcast %64 : vector<256x1xf32> to vector<256x8xf32>
    %85 = arith.mulf %83, %84 : vector<256x8xf32>
    %c24 = arith.constant 24 : index
    %c0_42 = arith.constant 0 : index
    %86 = vector.load %arg7[%c24, %c0_42] : memref<72x64xf32, #tpu.memory_space<vmem>>, vector<8x64xf32>
    %cst_43 = arith.constant dense<0.000000e+00> : vector<256x64xf32>
    %87 = tpu.matmul %85, %86, %cst_43 {dimension_numbers = #tpu.dot_dimension_numbers<[1], [0], [0], [1], [0, 0, 1, 1], [], []>} : vector<256x8xf32>, vector<8x64xf32>, vector<256x64xf32> -> vector<256x64xf32>
    %88 = arith.addf %82, %87 : vector<256x64xf32>
    %89 = vector.extract_strided_slice %63 {offsets = [17, 0], sizes = [256, 8], strides = [1, 1]} : vector<290x8xf32> to vector<256x8xf32>
    %c32 = arith.constant 32 : index
    %c0_44 = arith.constant 0 : index
    %90 = vector.load %arg7[%c32, %c0_44] : memref<72x64xf32, #tpu.memory_space<vmem>>, vector<8x64xf32>
    %cst_45 = arith.constant dense<0.000000e+00> : vector<256x64xf32>
    %91 = tpu.matmul %89, %90, %cst_45 {dimension_numbers = #tpu.dot_dimension_numbers<[1], [0], [0], [1], [0, 0, 1, 1], [], []>} : vector<256x8xf32>, vector<8x64xf32>, vector<256x64xf32> -> vector<256x64xf32>
    %92 = arith.addf %88, %91 : vector<256x64xf32>
    %93 = vector.extract_strided_slice %63 {offsets = [18, 0], sizes = [256, 8], strides = [1, 1]} : vector<290x8xf32> to vector<256x8xf32>
    %94 = vector.broadcast %65 : vector<256x1xf32> to vector<256x8xf32>
    %95 = arith.mulf %93, %94 : vector<256x8xf32>
    %c40 = arith.constant 40 : index
    %c0_46 = arith.constant 0 : index
    %96 = vector.load %arg7[%c40, %c0_46] : memref<72x64xf32, #tpu.memory_space<vmem>>, vector<8x64xf32>
    %cst_47 = arith.constant dense<0.000000e+00> : vector<256x64xf32>
    %97 = tpu.matmul %95, %96, %cst_47 {dimension_numbers = #tpu.dot_dimension_numbers<[1], [0], [0], [1], [0, 0, 1, 1], [], []>} : vector<256x8xf32>, vector<8x64xf32>, vector<256x64xf32> -> vector<256x64xf32>
    %98 = arith.addf %92, %97 : vector<256x64xf32>
    %99 = vector.extract_strided_slice %63 {offsets = [32, 0], sizes = [256, 8], strides = [1, 1]} : vector<290x8xf32> to vector<256x8xf32>
    %100 = vector.broadcast %64 : vector<256x1xf32> to vector<256x8xf32>
    %101 = arith.mulf %99, %100 : vector<256x8xf32>
    %c48 = arith.constant 48 : index
    %c0_48 = arith.constant 0 : index
    %102 = vector.load %arg7[%c48, %c0_48] : memref<72x64xf32, #tpu.memory_space<vmem>>, vector<8x64xf32>
    %cst_49 = arith.constant dense<0.000000e+00> : vector<256x64xf32>
    %103 = tpu.matmul %101, %102, %cst_49 {dimension_numbers = #tpu.dot_dimension_numbers<[1], [0], [0], [1], [0, 0, 1, 1], [], []>} : vector<256x8xf32>, vector<8x64xf32>, vector<256x64xf32> -> vector<256x64xf32>
    %104 = arith.addf %98, %103 : vector<256x64xf32>
    %105 = vector.extract_strided_slice %63 {offsets = [33, 0], sizes = [256, 8], strides = [1, 1]} : vector<290x8xf32> to vector<256x8xf32>
    %c56 = arith.constant 56 : index
    %c0_50 = arith.constant 0 : index
    %106 = vector.load %arg7[%c56, %c0_50] : memref<72x64xf32, #tpu.memory_space<vmem>>, vector<8x64xf32>
    %cst_51 = arith.constant dense<0.000000e+00> : vector<256x64xf32>
    %107 = tpu.matmul %105, %106, %cst_51 {dimension_numbers = #tpu.dot_dimension_numbers<[1], [0], [0], [1], [0, 0, 1, 1], [], []>} : vector<256x8xf32>, vector<8x64xf32>, vector<256x64xf32> -> vector<256x64xf32>
    %108 = arith.addf %104, %107 : vector<256x64xf32>
    %109 = vector.extract_strided_slice %63 {offsets = [34, 0], sizes = [256, 8], strides = [1, 1]} : vector<290x8xf32> to vector<256x8xf32>
    %110 = vector.broadcast %65 : vector<256x1xf32> to vector<256x8xf32>
    %111 = arith.mulf %109, %110 : vector<256x8xf32>
    %c64 = arith.constant 64 : index
    %c0_52 = arith.constant 0 : index
    %112 = vector.load %arg7[%c64, %c0_52] : memref<72x64xf32, #tpu.memory_space<vmem>>, vector<8x64xf32>
    %cst_53 = arith.constant dense<0.000000e+00> : vector<256x64xf32>
    %113 = tpu.matmul %111, %112, %cst_53 {dimension_numbers = #tpu.dot_dimension_numbers<[1], [0], [0], [1], [0, 0, 1, 1], [], []>} : vector<256x8xf32>, vector<8x64xf32>, vector<256x64xf32> -> vector<256x64xf32>
    %114 = arith.addf %108, %113 : vector<256x64xf32>
    %c0_54 = arith.constant 0 : index
    %c0_55 = arith.constant 0 : index
    %115 = vector.load %arg8[%c0_54, %c0_55] : memref<1x64xf32, #tpu.memory_space<vmem>>, vector<1x64xf32>
    %116 = vector.broadcast %115 : vector<1x64xf32> to vector<256x64xf32>
    %117 = arith.addf %114, %116 : vector<256x64xf32>
    %cst_56 = arith.constant 1.000000e+00 : f32
    %118 = vector.broadcast %cst_56 : f32 to vector<1x256xf32>
    %cst_57 = arith.constant dense<0.000000e+00> : vector<1x64xf32>
    %119 = tpu.matmul %118, %117, %cst_57 {dimension_numbers = #tpu.dot_dimension_numbers<[1], [0], [0], [1], [0, 0, 1, 1], [], []>} : vector<1x256xf32>, vector<256x64xf32>, vector<1x64xf32> -> vector<1x64xf32>
    %c0_58 = arith.constant 0 : index
    %c0_59 = arith.constant 0 : index
    %120 = vector.load %arg11[%c0_58, %c0_59] : memref<64x64xf32, #tpu.memory_space<vmem>>, vector<64x64xf32>
    %cst_60 = arith.constant dense<0.000000e+00> : vector<1x64xf32>
    %121 = tpu.matmul %119, %120, %cst_60 {dimension_numbers = #tpu.dot_dimension_numbers<[1], [0], [0], [1], [0, 0, 1, 1], [], []>} : vector<1x64xf32>, vector<64x64xf32>, vector<1x64xf32> -> vector<1x64xf32>
    %cst_61 = arith.constant 2.048000e+03 : f32
    %122 = vector.broadcast %cst_61 : f32 to vector<1x64xf32>
    %123 = arith.divf %121, %122 : vector<1x64xf32>
    %124 = vector.broadcast %123 : vector<1x64xf32> to vector<256x64xf32>
    %125 = arith.subf %117, %124 : vector<256x64xf32>
    %126 = arith.mulf %125, %125 : vector<256x64xf32>
    %cst_62 = arith.constant dense<0.000000e+00> : vector<1x64xf32>
    %127 = tpu.matmul %118, %126, %cst_62 {dimension_numbers = #tpu.dot_dimension_numbers<[1], [0], [0], [1], [0, 0, 1, 1], [], []>} : vector<1x256xf32>, vector<256x64xf32>, vector<1x64xf32> -> vector<1x64xf32>
    %c0_63 = arith.constant 0 : index
    %c0_64 = arith.constant 0 : index
    %128 = vector.load %arg11[%c0_63, %c0_64] : memref<64x64xf32, #tpu.memory_space<vmem>>, vector<64x64xf32>
    %cst_65 = arith.constant dense<0.000000e+00> : vector<1x64xf32>
    %129 = tpu.matmul %127, %128, %cst_65 {dimension_numbers = #tpu.dot_dimension_numbers<[1], [0], [0], [1], [0, 0, 1, 1], [], []>} : vector<1x64xf32>, vector<64x64xf32>, vector<1x64xf32> -> vector<1x64xf32>
    %cst_66 = arith.constant 2.048000e+03 : f32
    %130 = vector.broadcast %cst_66 : f32 to vector<1x64xf32>
    %131 = arith.divf %129, %130 : vector<1x64xf32>
    %cst_67 = arith.constant 9.99999974E-6 : f32
    %132 = vector.broadcast %cst_67 : f32 to vector<1x64xf32>
    %133 = arith.addf %131, %132 : vector<1x64xf32>
    %134 = math.rsqrt %133 : vector<1x64xf32>
    %135 = vector.broadcast %134 : vector<1x64xf32> to vector<256x64xf32>
    %136 = arith.mulf %125, %135 : vector<256x64xf32>
    %c0_68 = arith.constant 0 : index
    %c0_69 = arith.constant 0 : index
    %137 = vector.load %arg12[%c0_68, %c0_69] : memref<1x64xf32, #tpu.memory_space<vmem>>, vector<1x64xf32>
    %138 = vector.broadcast %137 : vector<1x64xf32> to vector<256x64xf32>
    %139 = arith.mulf %136, %138 : vector<256x64xf32>
    %c0_70 = arith.constant 0 : index
    %c0_71 = arith.constant 0 : index
    %140 = vector.load %arg13[%c0_70, %c0_71] : memref<1x64xf32, #tpu.memory_space<vmem>>, vector<1x64xf32>
    %141 = vector.broadcast %140 : vector<1x64xf32> to vector<256x64xf32>
    %142 = arith.addf %139, %141 : vector<256x64xf32>
    %cst_72 = arith.constant 5.000000e-01 : f32
    %143 = vector.broadcast %cst_72 : f32 to vector<256x64xf32>
    %144 = arith.mulf %143, %142 : vector<256x64xf32>
    %cst_73 = arith.constant 0.707106769 : f32
    %145 = vector.broadcast %cst_73 : f32 to vector<256x64xf32>
    %146 = arith.mulf %142, %145 : vector<256x64xf32>
    %cst_74 = arith.constant 0.000000e+00 : f32
    %147 = vector.broadcast %cst_74 : f32 to vector<256x64xf32>
    %148 = arith.cmpf oge, %146, %147 : vector<256x64xf32>
    %cst_75 = arith.constant 1.000000e+00 : f32
    %cst_76 = arith.constant -1.000000e+00 : f32
    %149 = vector.broadcast %cst_75 : f32 to vector<256x64xf32>
    %150 = vector.broadcast %cst_76 : f32 to vector<256x64xf32>
    %151 = arith.select %148, %149, %150 : vector<256x64xi1>, vector<256x64xf32>
    %152 = math.absf %146 : vector<256x64xf32>
    %cst_77 = arith.constant 0.327591091 : f32
    %153 = vector.broadcast %cst_77 : f32 to vector<256x64xf32>
    %154 = arith.mulf %153, %152 : vector<256x64xf32>
    %cst_78 = arith.constant 1.000000e+00 : f32
    %155 = vector.broadcast %cst_78 : f32 to vector<256x64xf32>
    %156 = arith.addf %155, %154 : vector<256x64xf32>
    %cst_79 = arith.constant 1.000000e+00 : f32
    %157 = vector.broadcast %cst_79 : f32 to vector<256x64xf32>
    %158 = arith.divf %157, %156 : vector<256x64xf32>
    %cst_80 = arith.constant 1.06140542 : f32
    %159 = vector.broadcast %cst_80 : f32 to vector<256x64xf32>
    %160 = arith.mulf %159, %158 : vector<256x64xf32>
    %cst_81 = arith.constant -1.45315206 : f32
    %161 = vector.broadcast %cst_81 : f32 to vector<256x64xf32>
    %162 = arith.addf %160, %161 : vector<256x64xf32>
    %163 = arith.mulf %162, %158 : vector<256x64xf32>
    %cst_82 = arith.constant 1.42141378 : f32
    %164 = vector.broadcast %cst_82 : f32 to vector<256x64xf32>
    %165 = arith.addf %163, %164 : vector<256x64xf32>
    %166 = arith.mulf %165, %158 : vector<256x64xf32>
    %cst_83 = arith.constant -0.284496725 : f32
    %167 = vector.broadcast %cst_83 : f32 to vector<256x64xf32>
    %168 = arith.addf %166, %167 : vector<256x64xf32>
    %169 = arith.mulf %168, %158 : vector<256x64xf32>
    %cst_84 = arith.constant 0.254829586 : f32
    %170 = vector.broadcast %cst_84 : f32 to vector<256x64xf32>
    %171 = arith.addf %169, %170 : vector<256x64xf32>
    %172 = arith.mulf %171, %158 : vector<256x64xf32>
    %cst_85 = arith.constant 0.000000e+00 : f32
    %173 = vector.broadcast %cst_85 : f32 to vector<256x64xf32>
    %174 = arith.subf %173, %152 : vector<256x64xf32>
    %175 = arith.mulf %174, %152 : vector<256x64xf32>
    %176 = math.exp %175 : vector<256x64xf32>
    %177 = arith.mulf %172, %176 : vector<256x64xf32>
    %cst_86 = arith.constant 1.000000e+00 : f32
    %178 = vector.broadcast %cst_86 : f32 to vector<256x64xf32>
    %179 = arith.subf %178, %177 : vector<256x64xf32>
    %180 = arith.mulf %151, %179 : vector<256x64xf32>
    %cst_87 = arith.constant 1.000000e+00 : f32
    %181 = vector.broadcast %cst_87 : f32 to vector<256x64xf32>
    %182 = arith.addf %181, %180 : vector<256x64xf32>
    %183 = arith.mulf %144, %182 : vector<256x64xf32>
    %c0_88 = arith.constant 0 : index
    %c0_89 = arith.constant 0 : index
    %184 = vector.load %arg14[%c0_88, %c0_89] : memref<64x128xf32, #tpu.memory_space<vmem>>, vector<64x128xf32>
    %cst_90 = arith.constant dense<0.000000e+00> : vector<256x128xf32>
    %185 = tpu.matmul %183, %184, %cst_90 {dimension_numbers = #tpu.dot_dimension_numbers<[1], [0], [0], [1], [0, 0, 1, 1], [], []>} : vector<256x64xf32>, vector<64x128xf32>, vector<256x128xf32> -> vector<256x128xf32>
    %c0_91 = arith.constant 0 : index
    %c0_92 = arith.constant 0 : index
    %186 = vector.load %arg15[%c0_91, %c0_92] : memref<1x128xf32, #tpu.memory_space<vmem>>, vector<1x128xf32>
    %187 = vector.broadcast %186 : vector<1x128xf32> to vector<256x128xf32>
    %188 = arith.addf %185, %187 : vector<256x128xf32>
    %c0_93 = arith.constant 0 : index
    %c0_94 = arith.constant 0 : index
    %c0_95 = arith.constant 0 : index
    %189 = vector.load %arg22[%c0_93, %c0_94, %c0_95] : memref<1x256x128xf32, #tpu.memory_space<vmem>>, vector<1x256x128xf32>
    %190 = vector.shape_cast %189 : vector<1x256x128xf32> to vector<256x128xf32>
    %191 = vector.shape_cast %188 : vector<256x128xf32> to vector<1x256x128xf32>
    tpu.vector_store %arg22[%c0_93, %c0_94, %c0_95], %191 {strides = array<i32>} : memref<1x256x128xf32, #tpu.memory_space<vmem>>, vector<1x256x128xf32>,
    %cst_96 = arith.constant dense<0.000000e+00> : vector<1x8xf32>
    %192 = tpu.matmul %118, %1, %cst_96 {dimension_numbers = #tpu.dot_dimension_numbers<[1], [0], [0], [1], [0, 0, 1, 1], [], []>} : vector<1x256xf32>, vector<256x8xf32>, vector<1x8xf32> -> vector<1x8xf32>
    %cst_97 = arith.constant 2.560000e+02 : f32
    %193 = vector.broadcast %cst_97 : f32 to vector<1x8xf32>
    %194 = arith.divf %192, %193 : vector<1x8xf32>
    %c0_98 = arith.constant 0 : index
    %c0_99 = arith.constant 0 : index
    %195 = vector.load %arg16[%c0_98, %c0_99] : memref<8x256xf32, #tpu.memory_space<vmem>>, vector<8x256xf32>
    %cst_100 = arith.constant dense<0.000000e+00> : vector<1x256xf32>
    %196 = tpu.matmul %194, %195, %cst_100 {dimension_numbers = #tpu.dot_dimension_numbers<[1], [0], [0], [1], [0, 0, 1, 1], [], []>} : vector<1x8xf32>, vector<8x256xf32>, vector<1x256xf32> -> vector<1x256xf32>
    %c0_101 = arith.constant 0 : index
    %c0_102 = arith.constant 0 : index
    %197 = vector.load %arg17[%c0_101, %c0_102] : memref<1x256xf32, #tpu.memory_space<vmem>>, vector<1x256xf32>
    %198 = arith.addf %196, %197 : vector<1x256xf32>
    %cst_103 = arith.constant 5.000000e-01 : f32
    %199 = vector.broadcast %cst_103 : f32 to vector<1x256xf32>
    %200 = arith.mulf %199, %198 : vector<1x256xf32>
    %cst_104 = arith.constant 0.707106769 : f32
    %201 = vector.broadcast %cst_104 : f32 to vector<1x256xf32>
    %202 = arith.mulf %198, %201 : vector<1x256xf32>
    %cst_105 = arith.constant 0.000000e+00 : f32
    %203 = vector.broadcast %cst_105 : f32 to vector<1x256xf32>
    %204 = arith.cmpf oge, %202, %203 : vector<1x256xf32>
    %cst_106 = arith.constant 1.000000e+00 : f32
    %cst_107 = arith.constant -1.000000e+00 : f32
    %205 = vector.broadcast %cst_106 : f32 to vector<1x256xf32>
    %206 = vector.broadcast %cst_107 : f32 to vector<1x256xf32>
    %207 = arith.select %204, %205, %206 : vector<1x256xi1>, vector<1x256xf32>
    %208 = math.absf %202 : vector<1x256xf32>
    %cst_108 = arith.constant 0.327591091 : f32
    %209 = vector.broadcast %cst_108 : f32 to vector<1x256xf32>
    %210 = arith.mulf %209, %208 : vector<1x256xf32>
    %cst_109 = arith.constant 1.000000e+00 : f32
    %211 = vector.broadcast %cst_109 : f32 to vector<1x256xf32>
    %212 = arith.addf %211, %210 : vector<1x256xf32>
    %cst_110 = arith.constant 1.000000e+00 : f32
    %213 = vector.broadcast %cst_110 : f32 to vector<1x256xf32>
    %214 = arith.divf %213, %212 : vector<1x256xf32>
    %cst_111 = arith.constant 1.06140542 : f32
    %215 = vector.broadcast %cst_111 : f32 to vector<1x256xf32>
    %216 = arith.mulf %215, %214 : vector<1x256xf32>
    %cst_112 = arith.constant -1.45315206 : f32
    %217 = vector.broadcast %cst_112 : f32 to vector<1x256xf32>
    %218 = arith.addf %216, %217 : vector<1x256xf32>
    %219 = arith.mulf %218, %214 : vector<1x256xf32>
    %cst_113 = arith.constant 1.42141378 : f32
    %220 = vector.broadcast %cst_113 : f32 to vector<1x256xf32>
    %221 = arith.addf %219, %220 : vector<1x256xf32>
    %222 = arith.mulf %221, %214 : vector<1x256xf32>
    %cst_114 = arith.constant -0.284496725 : f32
    %223 = vector.broadcast %cst_114 : f32 to vector<1x256xf32>
    %224 = arith.addf %222, %223 : vector<1x256xf32>
    %225 = arith.mulf %224, %214 : vector<1x256xf32>
    %cst_115 = arith.constant 0.254829586 : f32
    %226 = vector.broadcast %cst_115 : f32 to vector<1x256xf32>
    %227 = arith.addf %225, %226 : vector<1x256xf32>
    %228 = arith.mulf %227, %214 : vector<1x256xf32>
    %cst_116 = arith.constant 0.000000e+00 : f32
    %229 = vector.broadcast %cst_116 : f32 to vector<1x256xf32>
    %230 = arith.subf %229, %208 : vector<1x256xf32>
    %231 = arith.mulf %230, %208 : vector<1x256xf32>
    %232 = math.exp %231 : vector<1x256xf32>
    %233 = arith.mulf %228, %232 : vector<1x256xf32>
    %cst_117 = arith.constant 1.000000e+00 : f32
    %234 = vector.broadcast %cst_117 : f32 to vector<1x256xf32>
    %235 = arith.subf %234, %233 : vector<1x256xf32>
    %236 = arith.mulf %207, %235 : vector<1x256xf32>
    %cst_118 = arith.constant 1.000000e+00 : f32
    %237 = vector.broadcast %cst_118 : f32 to vector<1x256xf32>
    %238 = arith.addf %237, %236 : vector<1x256xf32>
    %239 = arith.mulf %200, %238 : vector<1x256xf32>
    %240 = vector.extract_strided_slice %239 {offsets = [0, 0], sizes = [1, 128], strides = [1, 1]} : vector<1x256xf32> to vector<1x128xf32>
    %241 = vector.extract_strided_slice %239 {offsets = [0, 128], sizes = [1, 128], strides = [1, 1]} : vector<1x256xf32> to vector<1x128xf32>
    %c0_119 = arith.constant 0 : index
    %c0_120 = arith.constant 0 : index
    %242 = vector.load %arg18[%c0_119, %c0_120] : memref<128x128xf32, #tpu.memory_space<vmem>>, vector<128x128xf32>
    %cst_121 = arith.constant dense<0.000000e+00> : vector<1x128xf32>
    %243 = tpu.matmul %240, %242, %cst_121 {dimension_numbers = #tpu.dot_dimension_numbers<[1], [0], [0], [1], [0, 0, 1, 1], [], []>} : vector<1x128xf32>, vector<128x128xf32>, vector<1x128xf32> -> vector<1x128xf32>
    %c0_122 = arith.constant 0 : index
    %c0_123 = arith.constant 0 : index
    %244 = vector.load %arg19[%c0_122, %c0_123] : memref<1x128xf32, #tpu.memory_space<vmem>>, vector<1x128xf32>
    %245 = arith.addf %243, %244 : vector<1x128xf32>
    %c0_124 = arith.constant 0 : index
    %c0_125 = arith.constant 0 : index
    %c0_126 = arith.constant 0 : index
    %246 = vector.load %arg23[%c0_124, %c0_125, %c0_126] : memref<1x1x128xf32, #tpu.memory_space<vmem>>, vector<1x1x128xf32>
    %247 = vector.shape_cast %246 : vector<1x1x128xf32> to vector<1x128xf32>
    %248 = vector.shape_cast %245 : vector<1x128xf32> to vector<1x1x128xf32>
    tpu.vector_store %arg23[%c0_124, %c0_125, %c0_126], %248 {strides = array<i32>} : memref<1x1x128xf32, #tpu.memory_space<vmem>>, vector<1x1x128xf32>,
    %c0_127 = arith.constant 0 : index
    %c0_128 = arith.constant 0 : index
    %249 = vector.load %arg20[%c0_127, %c0_128] : memref<128x128xf32, #tpu.memory_space<vmem>>, vector<128x128xf32>
    %cst_129 = arith.constant dense<0.000000e+00> : vector<1x128xf32>
    %250 = tpu.matmul %241, %249, %cst_129 {dimension_numbers = #tpu.dot_dimension_numbers<[1], [0], [0], [1], [0, 0, 1, 1], [], []>} : vector<1x128xf32>, vector<128x128xf32>, vector<1x128xf32> -> vector<1x128xf32>
    %c0_130 = arith.constant 0 : index
    %c0_131 = arith.constant 0 : index
    %251 = vector.load %arg21[%c0_130, %c0_131] : memref<1x128xf32, #tpu.memory_space<vmem>>, vector<1x128xf32>
    %252 = arith.addf %250, %251 : vector<1x128xf32>
    %c0_132 = arith.constant 0 : index
    %c0_133 = arith.constant 0 : index
    %c0_134 = arith.constant 0 : index
    %253 = vector.load %arg24[%c0_132, %c0_133, %c0_134] : memref<1x1x128xf32, #tpu.memory_space<vmem>>, vector<1x1x128xf32>
    %254 = vector.shape_cast %253 : vector<1x1x128xf32> to vector<1x128xf32>
    %255 = vector.shape_cast %252 : vector<1x128xf32> to vector<1x1x128xf32>
    tpu.vector_store %arg24[%c0_132, %c0_133, %c0_134], %255 {strides = array<i32>} : memref<1x1x128xf32, #tpu.memory_space<vmem>>, vector<1x1x128xf32>,
    return
  }
  func.func @transform_0(%arg0: i32) -> (i32, i32, i32) {
    %c0_i32 = arith.constant 0 : i32
    %c0_i32_0 = arith.constant 0 : i32
    %c0_i32_1 = arith.constant 0 : i32
    return %arg0, %c0_i32, %c0_i32_0 : i32, i32, i32
  }
  func.func @transform_1(%arg0: i32) -> (i32, i32) {
    %c0_i32 = arith.constant 0 : i32
    %c0_i32_0 = arith.constant 0 : i32
    %c0_i32_1 = arith.constant 0 : i32
    return %c0_i32, %c0_i32_0 : i32, i32
  }
  func.func @transform_2(%arg0: i32) -> (i32, i32) {
    %c0_i32 = arith.constant 0 : i32
    %c0_i32_0 = arith.constant 0 : i32
    %c0_i32_1 = arith.constant 0 : i32
    return %c0_i32, %c0_i32_0 : i32, i32
  }
  func.func @transform_3(%arg0: i32) -> (i32, i32) {
    %c0_i32 = arith.constant 0 : i32
    %c0_i32_0 = arith.constant 0 : i32
    %c0_i32_1 = arith.constant 0 : i32
    return %c0_i32, %c0_i32_0 : i32, i32
  }
  func.func @transform_4(%arg0: i32) -> (i32, i32) {
    %c0_i32 = arith.constant 0 : i32
    %c0_i32_0 = arith.constant 0 : i32
    %c0_i32_1 = arith.constant 0 : i32
    return %c0_i32, %c0_i32_0 : i32, i32
  }
  func.func @transform_5(%arg0: i32) -> i32 {
    %c0_i32 = arith.constant 0 : i32
    %c0_i32_0 = arith.constant 0 : i32
    return %c0_i32 : i32
  }
  func.func @transform_6(%arg0: i32) -> (i32, i32) {
    %c0_i32 = arith.constant 0 : i32
    %c0_i32_0 = arith.constant 0 : i32
    %c0_i32_1 = arith.constant 0 : i32
    return %c0_i32, %c0_i32_0 : i32, i32
  }
  func.func @transform_7(%arg0: i32) -> (i32, i32) {
    %c0_i32 = arith.constant 0 : i32
    %c0_i32_0 = arith.constant 0 : i32
    %c0_i32_1 = arith.constant 0 : i32
    return %c0_i32, %c0_i32_0 : i32, i32
  }
  func.func @transform_8(%arg0: i32) -> (i32, i32) {
    %c0_i32 = arith.constant 0 : i32
    %c0_i32_0 = arith.constant 0 : i32
    %c0_i32_1 = arith.constant 0 : i32
    return %c0_i32, %c0_i32_0 : i32, i32
  }
  func.func @transform_9(%arg0: i32) -> (i32, i32) {
    %c0_i32 = arith.constant 0 : i32
    %c0_i32_0 = arith.constant 0 : i32
    %c0_i32_1 = arith.constant 0 : i32
    return %c0_i32, %c0_i32_0 : i32, i32
  }
  func.func @transform_10(%arg0: i32) -> (i32, i32) {
    %c0_i32 = arith.constant 0 : i32
    %c0_i32_0 = arith.constant 0 : i32
    %c0_i32_1 = arith.constant 0 : i32
    return %c0_i32, %c0_i32_0 : i32, i32
  }
  func.func @transform_11(%arg0: i32) -> (i32, i32) {
    %c0_i32 = arith.constant 0 : i32
    %c0_i32_0 = arith.constant 0 : i32
    %c0_i32_1 = arith.constant 0 : i32
    return %c0_i32, %c0_i32_0 : i32, i32
  }
  func.func @transform_12(%arg0: i32) -> (i32, i32) {
    %c0_i32 = arith.constant 0 : i32
    %c0_i32_0 = arith.constant 0 : i32
    %c0_i32_1 = arith.constant 0 : i32
    return %c0_i32, %c0_i32_0 : i32, i32
  }
  func.func @transform_13(%arg0: i32) -> (i32, i32) {
    %c0_i32 = arith.constant 0 : i32
    %c0_i32_0 = arith.constant 0 : i32
    %c0_i32_1 = arith.constant 0 : i32
    return %c0_i32, %c0_i32_0 : i32, i32
  }
  func.func @transform_14(%arg0: i32) -> (i32, i32) {
    %c0_i32 = arith.constant 0 : i32
    %c0_i32_0 = arith.constant 0 : i32
    %c0_i32_1 = arith.constant 0 : i32
    return %c0_i32, %c0_i32_0 : i32, i32
  }
  func.func @transform_15(%arg0: i32) -> (i32, i32) {
    %c0_i32 = arith.constant 0 : i32
    %c0_i32_0 = arith.constant 0 : i32
    %c0_i32_1 = arith.constant 0 : i32
    return %c0_i32, %c0_i32_0 : i32, i32
  }
  func.func @transform_16(%arg0: i32) -> (i32, i32) {
    %c0_i32 = arith.constant 0 : i32
    %c0_i32_0 = arith.constant 0 : i32
    %c0_i32_1 = arith.constant 0 : i32
    return %c0_i32, %c0_i32_0 : i32, i32
  }
  func.func @transform_17(%arg0: i32) -> (i32, i32) {
    %c0_i32 = arith.constant 0 : i32
    %c0_i32_0 = arith.constant 0 : i32
    %c0_i32_1 = arith.constant 0 : i32
    return %c0_i32, %c0_i32_0 : i32, i32
  }
  func.func @transform_18(%arg0: i32) -> (i32, i32) {
    %c0_i32 = arith.constant 0 : i32
    %c0_i32_0 = arith.constant 0 : i32
    %c0_i32_1 = arith.constant 0 : i32
    return %c0_i32, %c0_i32_0 : i32, i32
  }
  func.func @transform_19(%arg0: i32) -> (i32, i32) {
    %c0_i32 = arith.constant 0 : i32
    %c0_i32_0 = arith.constant 0 : i32
    %c0_i32_1 = arith.constant 0 : i32
    return %c0_i32, %c0_i32_0 : i32, i32
  }
  func.func @transform_20(%arg0: i32) -> (i32, i32) {
    %c0_i32 = arith.constant 0 : i32
    %c0_i32_0 = arith.constant 0 : i32
    %c0_i32_1 = arith.constant 0 : i32
    return %c0_i32, %c0_i32_0 : i32, i32
  }
  func.func @transform_21(%arg0: i32) -> (i32, i32, i32) {
    %c0_i32 = arith.constant 0 : i32
    %c0_i32_0 = arith.constant 0 : i32
    %c0_i32_1 = arith.constant 0 : i32
    return %arg0, %c0_i32, %c0_i32_0 : i32, i32, i32
  }
  func.func @transform_22(%arg0: i32) -> (i32, i32, i32) {
    %c0_i32 = arith.constant 0 : i32
    %c0_i32_0 = arith.constant 0 : i32
    %c0_i32_1 = arith.constant 0 : i32
    return %arg0, %c0_i32, %c0_i32_0 : i32, i32, i32
  }
  func.func @transform_23(%arg0: i32) -> (i32, i32, i32) {
    %c0_i32 = arith.constant 0 : i32
    %c0_i32_0 = arith.constant 0 : i32
    %c0_i32_1 = arith.constant 0 : i32
    return %arg0, %c0_i32, %c0_i32_0 : i32, i32, i32
  }
}

</mosaic_0001>

<bundles_post_ra>
// kernel: multi_task_decoder_forward.1
= control target key start
LH: loop header
LB: loop body
LE: loop exit
PB: predicated region body
PF: predicated region fallthrough
CT: control target
= control target key end

     0   :  { %s16537_s0 = inlined_call_operand.vmem [shape: f32[2,256,8], index: 0, kind: input, shape index: {}]   ;;  %s16538_s1 = inlined_call_operand.vmem [shape: f32[8,136], index: 1, kind: input, shape index: {}]   ;;  %s16539_s2 = inlined_call_operand.vmem [shape: f32[1,136], index: 2, kind: input, shape index: {}]   ;;  %s16540_s3 = inlined_call_operand.vmem [shape: f32[32,8], index: 3, kind: input, shape index: {}]   ;;  %s16541_s4 = inlined_call_operand.vmem [shape: f32[1,8], index: 4, kind: input, shape index: {}]   ;;  %s16542_s5 = inlined_call_operand.<no memory space> [shape: f32[1], index: 5, kind: input, shape index: {}]   ;;  %s16543_s6 = inlined_call_operand.vmem [shape: f32[72,64], index: 6, kind: input, shape index: {}]   ;;  %s16544_s7 = inlined_call_operand.vmem [shape: f32[1,64], index: 7, kind: input, shape index: {}]   ;;  %s16545_s8 = inlined_call_operand.vmem [shape: f32[256,1], index: 8, kind: input, shape index: {}]   ;;  %s16546_s9 = inlined_call_operand.vmem [shape: f32[256,1], index: 9, kind: input, shape index: {}]   ;;  %s16547_s10 = inlined_call_operand.vmem [shape: f32[64,64], index: 10, kind: input, shape index: {}]   ;;  %s16548_s11 = inlined_call_operand.vmem [shape: f32[1,64], index: 11, kind: input, shape index: {}]   ;;  %s16549_s12 = inlined_call_operand.vmem [shape: f32[1,64], index: 12, kind: input, shape index: {}]   ;;  %s16550_s13 = inlined_call_operand.vmem [shape: f32[64,128], index: 13, kind: input, shape index: {}]   ;;  %s16551_s14 = inlined_call_operand.vmem [shape: f32[1,128], index: 14, kind: input, shape index: {}]   ;;  %s16552_s15 = inlined_call_operand.vmem [shape: f32[8,256], index: 15, kind: input, shape index: {}]   ;;  %s16553_s16 = inlined_call_operand.vmem [shape: f32[1,256], index: 16, kind: input, shape index: {}]   ;;  %s16554_s17 = inlined_call_operand.vmem [shape: f32[128,128], index: 17, kind: input, shape index: {}]   ;;  %s16555_s18 = inlined_call_operand.vmem [shape: f32[1,128], index: 18, kind: input, shape index: {}]   ;;  %s16556_s19 = inlined_call_operand.vmem [shape: f32[128,128], index: 19, kind: input, shape index: {}]   ;;  %s16557_s20 = inlined_call_operand.vmem [shape: f32[1,128], index: 20, kind: input, shape index: {}]   ;;  %s16558_s21 = inlined_call_operand.vmem [shape: f32[2,256,128], index: 21, kind: output, shape index: {0}]   ;;  %s16559_s22 = inlined_call_operand.vmem [shape: f32[2,1,128], index: 22, kind: output, shape index: {1}]   ;;  %s16560_s23 = inlined_call_operand.hbm [shape: f32[2,1,128], index: 23, kind: output, shape index: {2}]  }
   0x1   :  { %16927 = sst [smem:[#allocation190_spill]] %s16537_s0 }
   0x2   :  { %16928 = sst [smem:[#allocation191_spill]] %s16538_s1 }
   0x3   :  { %16929 = sst [smem:[#allocation192_spill]] %s16539_s2 }
   0x4   :  { %16930 = sst [smem:[#allocation193_spill]] %s16540_s3 }
   0x5   :  { %16931 = sst [smem:[#allocation194_spill]] %s16541_s4 }
   0x6   :  { %16932 = sst [smem:[#allocation195_spill]] %s16542_s5 }
   0x7   :  { %16933 = sst [smem:[#allocation196_spill]] %s16543_s6  ;;  %s16935_s24 = sld [smem:[#allocation195_spill]] }
   0x8   :  { %16934 = sst [smem:[#allocation197_spill]] %s16544_s7 }
   0xd   :  { %29 = sst [smem:[#allocation2]] %s16935_s24 }
   0xe   :  { %30 = vsyncpa [#allocation4], 0 }
   0xf   :  { %32 = vsyncpa [#allocation4 + $0x1], 0  ;;  %s11233_s25 = smov 0   ;;  %s11235_s5 = smov 0  }
  0x10   :  { %s11237_s1 = smov 0   ;;  %s11239_s26 = smov 0  }
  0x11 LB: > { %16936 = sst [smem:[#allocation6_spill]] %s11089_s25  ;;  %s11254_s2 = sadd.s32 4294967295, %s11101_s26   ;;  %s11101_s26 = sphi %s11239_s26, %s17740_s26   ;;  %s11097_s1 = sphi %s11237_s1, %s17742_s1   ;;  %s11093_s5 = sphi %s11235_s5, %s17744_s5   ;;  %s11089_s25 = sphi %s11233_s25, %s17743_s25  }
  0x12   : > { %16937 = sst [smem:[#allocation7_spill]] %s11097_s1  ;;  %s8647_s6 = sadd.s32 4294967294, %s11101_s26  }
  0x13   : > { %16938 = sst [smem:[#allocation8_spill]] %s11101_s26  ;;  %s11258_s27 = sadd.s32 1, %s11101_s26  }
  0x14   : > { %16939 = sst [smem:[#allocation9_spill]] %s11258_s27  ;;  %s543_s7 = sadd.s32 1, %s11097_s1 }
  0x15   : > { %s540_s28 = ssub.s32 %s11101_s26, %s11258_s27  ;;  %p553_p0 = scmp.ne.s32.totalorder %s11097_s1, %s11093_s5 }
  0x16   : > { %p541_p1 = scmp.eq.s32.totalorder %s540_s28, 0  ;;  %p554_p2 = scmp.eq.s32.totalorder %s11254_s2, 1 }
  0x17   : > { %p559_p3 = scmp.ne.s32.totalorder %s11093_s5, %s11089_s25  ;;  %p560_p4 = scmp.eq.s32.totalorder %s8647_s6, 1 }
  0x18   : > { %s11269_s29 = scalar_select %p541_p1, %s11097_s1, %s543_s7  }
  0x19   : > { %p11271_p5 = por %p554_p2, %p553_p0  ;;  %p11275_p6 = por %p560_p4, %p559_p3 }
  0x1a   : > { %16940 = sst [smem:[#allocation10_spill]] %s11269_s29  ;;  %p8650_p7 = scmp.ge.s32.totalorder %s11101_s26, 1 }
  0x1b   : > { %s16942_s0 = scalar_select %p11275_p6, 1, 0 }
  0x1c   : > { %p646_p8 = scmp.lt.s32.totalorder %s11101_s26, 3 }
  0x1d   : > { %16943 = sst [smem:[#allocation11_spill]] %s16942_s0 }
  0x1e   : > { %p647_p9 = pnand %p8650_p7, %p646_p8 }
  0x20   : > { %650 = sbr.rel (%p647_p9) target bundleno = 3324 (0xcfc), region = 104 }
  0x27   : > { %s16944_s24 = sld [smem:[#allocation191_spill]]  ;;  %p717_p10 = scmp.lt.s32.totalorder %s11254_s2, 1  ;;  %v16575_v2 = vmov 0.0   ;;  %vm777_vm0 = vcmask 64512   ;;  %v11104_v49 = vmov 0   ;;  %v2560_v50 = vld [vmem:[%s16545_s8 + $0x10] sm:$0xff]  ;;  %v767_v52 = vlaneseq }
  0x28   : > { %938 = vmatprep.mubr.f32.mxu0 %v16575_v2  ;;  %s16945_s1 = sld [smem:[#allocation190_spill]]  ;;  %s16962_s7 = sld [smem:[#allocation193_spill]]  ;;  %10754 = vset.pattern.permute.xlu1 %v11104_v49  ;;  %v2558_v51 = vld [vmem:[%s16545_s8] sm:$0xff]  ;;  %v2561_v54 = vld [vmem:[%s16545_s8 + $0x18] sm:$0xff]  ;;  %v2559_v55 = vld [vmem:[%s16545_s8 + $0x8] sm:$0xff]  ;;  %vm2006_vm4 = vcmask 261120  }
  0x29   : > { %s11290_s28 = scalar_select %p717_p10, %s11254_s2, 1  ;;  %10753 = vset.pattern.permute.xlu0 %v11104_v49  ;;  %2634 = vperm.xlu1 %10754, %v2560_v50   ;;  %v11477_v53 = vshrl.u32 %v767_v52, 7  ;;  %v2563_v58 = vld [vmem:[%s16545_s8 + $0x28] sm:$0xff]  ;;  %v2562_v59 = vld [vmem:[%s16545_s8 + $0x20] sm:$0xff] }
  0x2a   : > { %2624 = vperm.xlu0 %10753, %v2558_v51   ;;  %s16965_s4 = sld [smem:[#allocation192_spill]]  ;;  %s16987_s0 = sld [smem:[#allocation196_spill]] }
  0x2b   : > { %s16569_s29 = sshll.u32 %s11290_s28, 8  ;;  %16963 = vst [vmem:[#allocation28_spill] sm:$0xff] %v11477_v53  ;;  %v11486_v56 = vsub.s32 0, %v11477_v53  ;;  %s762_s26 = sld [smem:[#allocation2]] }
  0x2c   : > { %s17732_s6 = sshll.u32 %s11290_s28, 8 }
  0x2d   : > { %v764_v0 = vld [vmem:[%s16944_s24 + $0x8] sm:$0xff]  ;;  %v763_v1 = vld [vmem:[%s16944_s24] sm:$0xff]  ;;  %2639 = vperm.xlu1 %10754, %v2561_v54   ;;  %16964 = vst [vmem:[#allocation29_spill] sm:$0xff] %v11486_v56 }
  0x2e   : > { %874 = vmatprep.subr.mxu0 %v764_v0  ;;  %s11298_s27 = scalar_lea.vmem %s16945_s1, %s16569_s29  ;;  %v1995_v43 = vld [vmem:[%s16962_s7] sm:$0xff]  ;;  %v1996_v44 = vld [vmem:[%s16962_s7 + $0x8] sm:$0xff]  ;;  %v1997_v46 = vld [vmem:[%s16962_s7 + $0x10] sm:$0xff]  ;;  %2629 = vperm.xlu0 %10753, %v2559_v55  }
  0x2f   : > { %875 = vmatpush1.msra.mxu0 %v763_v1  ;;  %v11301_v3 = vld [vmem:[%s11298_s27] sm:$0xff]  ;;  %v11304_v4 = vld [vmem:[%s11298_s27 + $0x8] sm:$0xff]  ;;  %v11307_v5 = vld [vmem:[%s11298_s27 + $0x10] sm:$0xff]  ;;  %v10260_v45 = vpack.c.bf16 %v1996_v44, %v1995_v43 }
  0x30   : > { %16946 = vst [vmem:[#allocation12_spill] sm:$0xff] %v11301_v3  ;;  %16947 = vst [vmem:[#allocation13_spill] sm:$0xff] %v11304_v4  ;;  %8655 = vmatmul.mubr.msk.f32.vlgmr.msra.gmra.mrb[0].mxu0 %vm777_vm0, %v11301_v3  ;;  %v11314_v7 = vld [vmem:[%s11298_s27 + $0x18] sm:$0xff]  ;;  %v11317_v8 = vld [vmem:[%s11298_s27 + $0x20] sm:$0xff] }
  0x31   : > { %16948 = vst [vmem:[#allocation14_spill] sm:$0xff] %v11307_v5  ;;  %16949 = vst [vmem:[#allocation15_spill] sm:$0xff] %v11314_v7  ;;  %v11320_v9 = vld [vmem:[%s11298_s27 + $0x28] sm:$0xff]  ;;  %944 = vmatprep.mubr.f32.mxu0 %v16575_v2  ;;  %v11328_v12 = vld [vmem:[%s11298_s27 + $0x30] sm:$0xff]  ;;  %10261 = vmatprep.subr.bf16.mxu0 %v10260_v45  ;;  %s2361_s30 = ssub.f32 1.0, %s762_s26 }
  0x32   : > { %16950 = vst [vmem:[#allocation16_spill] sm:$0xff] %v11317_v8  ;;  %16951 = vst [vmem:[#allocation17_spill] sm:$0xff] %v11320_v9  ;;  %v11331_v13 = vld [vmem:[%s11298_s27 + $0x38] sm:$0xff]  ;;  %v11334_v14 = vld [vmem:[%s11298_s27 + $0x40] sm:$0xff]  ;;  %10263 = vmatpush3.bf16.msra.mxu0 %v10260_v45  ;;  %2649 = vperm.xlu1 %10754, %v2563_v58  }
  0x33   : > { %16952 = vst [vmem:[#allocation18_spill] sm:$0xff] %v11328_v12  ;;  %16953 = vst [vmem:[#allocation19_spill] sm:$0xff] %v11331_v13  ;;  %v11339_v16 = vld [vmem:[%s11298_s27 + $0x48] sm:$0xff]  ;;  %v11342_v17 = vld [vmem:[%s11298_s27 + $0x50] sm:$0xff]  ;;  %2644 = vperm.xlu0 %10753, %v2562_v59  }
  0x34   : > { %16954 = vst [vmem:[#allocation20_spill] sm:$0xff] %v11334_v14  ;;  %16955 = vst [vmem:[#allocation21_spill] sm:$0xff] %v11339_v16  ;;  %v11345_v18 = vld [vmem:[%s11298_s27 + $0x58] sm:$0xff]  ;;  %v11352_v21 = vld [vmem:[%s11298_s27 + $0x60] sm:$0xff]  ;;  %8656 = vmatmul.mubr.msk.f32.gmra.mrb[2].mxu0 %vm777_vm0, %v11304_v4 }
  0x35   : > { %16956 = vst [vmem:[#allocation22_spill] sm:$0xff] %v11342_v17  ;;  %16957 = vst [vmem:[#allocation23_spill] sm:$0xff] %v11345_v18  ;;  %v11355_v22 = vld [vmem:[%s11298_s27 + $0x68] sm:$0xff]  ;;  %v11362_v24 = vld [vmem:[%s11298_s27 + $0x70] sm:$0xff]  ;;  %950 = vmatprep.mubr.f32.mxu0 %v16575_v2 }
  0x36   : > { %16958 = vst [vmem:[#allocation24_spill] sm:$0xff] %v11352_v21  ;;  %16959 = vst [vmem:[#allocation25_spill] sm:$0xff] %v11355_v22  ;;  %v11365_v25 = vld [vmem:[%s11298_s27 + $0x78] sm:$0xff]  ;;  %v746_v27 = vld [vmem:[%s11298_s27 + $0x80] sm:$0xff] }
  0x37   : > { %16960 = vst [vmem:[#allocation26_spill] sm:$0xff] %v11362_v24  ;;  %16961 = vst [vmem:[#allocation27_spill] sm:$0xff] %v11365_v25  ;;  %v747_v28 = vld [vmem:[%s11298_s27 + $0x88] sm:$0xff]  ;;  %v748_v29 = vld [vmem:[%s11298_s27 + $0x90] sm:$0xff] }
  0x38   : > { %8657 = vmatmul.mubr.msk.f32.gmra.mrb[4].mxu0 %vm777_vm0, %v11307_v5  ;;  %v749_v30 = vld [vmem:[%s11298_s27 + $0x98] sm:$0xff]  ;;  %v750_v31 = vld [vmem:[%s11298_s27 + $0xa0] sm:$0xff]  ;;  %v751_v32 = vld [vmem:[%s11298_s27 + $0xa8] sm:$0xff] }
  0x39   : > { %956 = vmatprep.mubr.f32.mxu0 %v16575_v2  ;;  %v752_v33 = vld [vmem:[%s11298_s27 + $0xb0] sm:$0xff]  ;;  %v753_v34 = vld [vmem:[%s11298_s27 + $0xb8] sm:$0xff]  ;;  %v754_v35 = vld [vmem:[%s11298_s27 + $0xc0] sm:$0xff] }
  0x3a   : > { %v755_v36 = vld [vmem:[%s11298_s27 + $0xc8] sm:$0xff]  ;;  %v756_v37 = vld [vmem:[%s11298_s27 + $0xd0] sm:$0xff]  ;;  %v757_v38 = vld [vmem:[%s11298_s27 + $0xd8] sm:$0xff] }
  0x3b   : > { %v758_v39 = vld [vmem:[%s11298_s27 + $0xe0] sm:$0xff]  ;;  %v759_v40 = vld [vmem:[%s11298_s27 + $0xe8] sm:$0xff]  ;;  %v760_v41 = vld [vmem:[%s11298_s27 + $0xf0] sm:$0xff] }
  0x3c   : > { %8658 = vmatmul.mubr.msk.f32.gmra.mrb[6].mxu0 %vm777_vm0, %v11314_v7  ;;  %v761_v42 = vld [vmem:[%s11298_s27 + $0xf8] sm:$0xff]  ;;  %v765_v57 = vld [vmem:[%s16965_s4] sm:$0x3]  ;;  %v2564_v1 = vld [vmem:[%s16545_s8 + $0x30] sm:$0xff] }
  0x3d   : > { %962 = vmatprep.mubr.f32.mxu0 %v16575_v2  ;;  %v1998_v47 = vld [vmem:[%s16962_s7 + $0x18] sm:$0xff]  ;;  %v11498_v60 = vrot.slane %v765_v57, %v11486_v56  ;;  %2654 = vperm.xlu0 %10753, %v2564_v1   ;;  %v2567_v45 = vld [vmem:[%s16545_s8 + $0x48] sm:$0xff]  ;;  %s17020_s7 = sld [smem:[#allocation194_spill]] }
  0x3e   : > { %v10264_v48 = vpack.c.bf16 %v1998_v47, %v1997_v46  ;;  %v2565_v0 = vld [vmem:[%s16545_s8 + $0x38] sm:$0xff]  ;;  %v2566_v46 = vld [vmem:[%s16545_s8 + $0x40] sm:$0xff] }
  0x3f   : > { %2659 = vperm.xlu1 %10754, %v2565_v0   ;;  %v2569_v59 = vld [vmem:[%s16545_s8 + $0x58] sm:$0xff] }
  0x40   : > { %8659 = vmatmul.mubr.msk.f32.gmra.mrb[8].mxu0 %vm777_vm0, %v11317_v8  ;;  %10265 = vmatprep.subr.bf16.mxu0 %v10264_v48 }
  0x41   : > { %968 = vmatprep.mubr.f32.mxu0 %v16575_v2  ;;  %10267 = vmatpush3.bf16.msra.mxu0 %v10264_v48 }
  0x42   : > { %2664 = vperm.xlu0 %10753, %v2566_v46  }
  0x43   : > { %2669 = vperm.xlu1 %10754, %v2567_v45  }
  0x44   : > { %8660 = vmatmul.mubr.msk.f32.gmra.mrb[10].mxu0 %vm777_vm0, %v11320_v9 }
  0x45   : > { %974 = vmatprep.mubr.f32.mxu0 %v16575_v2 }
  0x47   : > { %2679 = vperm.xlu1 %10754, %v2569_v59  }
  0x48   : > { %8661 = vmatmul.mubr.msk.f32.gmra.mrb[12].mxu0 %vm777_vm0, %v11328_v12 }
  0x49   : > { %980 = vmatprep.mubr.f32.mxu0 %v16575_v2 }
  0x4c   : > { %8662 = vmatmul.mubr.msk.f32.gmra.mrb[14].mxu0 %vm777_vm0, %v11331_v13 }
  0x4d   : > { %986 = vmatprep.mubr.f32.mxu0 %v16575_v2 }
  0x50   : > { %8663 = vmatmul.mubr.msk.f32.gmra.mrb[16].mxu0 %vm777_vm0, %v11334_v14 }
  0x51   : > { %992 = vmatprep.mubr.f32.mxu0 %v16575_v2 }
  0x54   : > { %8664 = vmatmul.mubr.msk.f32.gmra.mrb[18].mxu0 %vm777_vm0, %v11339_v16 }
  0x55   : > { %998 = vmatprep.mubr.f32.mxu0 %v16575_v2 }
  0x58   : > { %8665 = vmatmul.mubr.msk.f32.gmra.mrb[20].mxu0 %vm777_vm0, %v11342_v17 }
  0x59   : > { %1004 = vmatprep.mubr.f32.mxu0 %v16575_v2 }
  0x5c   : > { %8666 = vmatmul.mubr.msk.f32.gmra.mrb[22].mxu0 %vm777_vm0, %v11345_v18 }
  0x5d   : > { %1010 = vmatprep.mubr.f32.mxu0 %v16575_v2 }
  0x60   : > { %8667 = vmatmul.mubr.msk.f32.gmra.mrb[24].mxu0 %vm777_vm0, %v11352_v21 }
  0x61   : > { %1016 = vmatprep.mubr.f32.mxu0 %v16575_v2 }
  0x64   : > { %8668 = vmatmul.mubr.msk.f32.gmra.mrb[26].mxu0 %vm777_vm0, %v11355_v22 }
  0x65   : > { %1022 = vmatprep.mubr.f32.mxu0 %v16575_v2 }
  0x68   : > { %8669 = vmatmul.mubr.msk.f32.gmra.mrb[28].mxu0 %vm777_vm0, %v11362_v24 }
  0x69   : > { %1028 = vmatprep.mubr.f32.mxu0 %v16575_v2 }
  0x6c   : > { %8670 = vmatmul.mubr.msk.f32.gmra.mrb[30].mxu0 %vm777_vm0, %v11365_v25 }
  0x6d   : > { %1034 = vmatprep.mubr.f32.mxu0 %v16575_v2 }
  0x70   : > { %8671 = vmatmul.mubr.msk.f32.gmra.mrb[32].mxu0 %vm777_vm0, %v746_v27 }
  0x71   : > { %1040 = vmatprep.mubr.f32.mxu0 %v16575_v2 }
  0x74   : > { %8672 = vmatmul.mubr.msk.f32.gmra.mrb[34].mxu0 %vm777_vm0, %v747_v28 }
  0x75   : > { %1046 = vmatprep.mubr.f32.mxu0 %v16575_v2 }
  0x78   : > { %8673 = vmatmul.mubr.msk.f32.gmra.mrb[36].mxu0 %vm777_vm0, %v748_v29 }
  0x79   : > { %1052 = vmatprep.mubr.f32.mxu0 %v16575_v2 }
  0x7c   : > { %8674 = vmatmul.mubr.msk.f32.gmra.mrb[38].mxu0 %vm777_vm0, %v749_v30 }
  0x7d   : > { %1058 = vmatprep.mubr.f32.mxu0 %v16575_v2 }
  0x80   : > { %8675 = vmatmul.mubr.msk.f32.gmra.mrb[40].mxu0 %vm777_vm0, %v750_v31 }
  0x81   : > { %1064 = vmatprep.mubr.f32.mxu0 %v16575_v2 }
  0x84   : > { %8676 = vmatmul.mubr.msk.f32.gmra.mrb[42].mxu0 %vm777_vm0, %v751_v32 }
  0x85   : > { %1070 = vmatprep.mubr.f32.mxu0 %v16575_v2 }
  0x88   : > { %8677 = vmatmul.mubr.msk.f32.gmra.mrb[44].mxu0 %vm777_vm0, %v752_v33 }
  0x89   : > { %1076 = vmatprep.mubr.f32.mxu0 %v16575_v2 }
  0x8c   : > { %8678 = vmatmul.mubr.msk.f32.gmra.mrb[46].mxu0 %vm777_vm0, %v753_v34 }
  0x8d   : > { %1082 = vmatprep.mubr.f32.mxu0 %v16575_v2 }
  0x90   : > { %8679 = vmatmul.mubr.msk.f32.gmra.mrb[48].mxu0 %vm777_vm0, %v754_v35 }
  0x91   : > { %1088 = vmatprep.mubr.f32.mxu0 %v16575_v2 }
  0x94   : > { %8680 = vmatmul.mubr.msk.f32.gmra.mrb[50].mxu0 %vm777_vm0, %v755_v36 }
  0x95   : > { %1094 = vmatprep.mubr.f32.mxu0 %v16575_v2 }
  0x98   : > { %8681 = vmatmul.mubr.msk.f32.gmra.mrb[52].mxu0 %vm777_vm0, %v756_v37 }
  0x99   : > { %1100 = vmatprep.mubr.f32.mxu0 %v16575_v2 }
  0x9c   : > { %8682 = vmatmul.mubr.msk.f32.gmra.mrb[54].mxu0 %vm777_vm0, %v757_v38 }
  0x9d   : > { %1106 = vmatprep.mubr.f32.mxu0 %v16575_v2 }
  0xa0   : > { %8683 = vmatmul.mubr.msk.f32.gmra.mrb[56].mxu0 %vm777_vm0, %v758_v39 }
  0xa1   : > { %1112 = vmatprep.mubr.f32.mxu0 %v16575_v2 }
  0xa4   : > { %8684 = vmatmul.mubr.msk.f32.gmra.mrb[58].mxu0 %vm777_vm0, %v759_v40 }
  0xa5   : > { %1118 = vmatprep.mubr.f32.mxu0 %v16575_v2 }
  0xa8   : > { %8685 = vmatmul.mubr.msk.f32.gmra.mrb[60].mxu0 %vm777_vm0, %v760_v41 }
  0xa9   : > { %1124 = vmatprep.mubr.f32.mxu0 %v16575_v2 }
  0xac   : > { %8686 = vmatmul.mubr.msk.f32.gmra.mrb[62].mxu0 %vm777_vm0, %v761_v42 }
 0x103   : > { %v940_v61 = vpop.f32.mrb[0].mxu0 }
 0x104   : > { %v941_v62 = vadd.f32 %v940_v61, %v11498_v60  ;;  %v11501_v63 = vpop.f32.mrb[1].mxu0  ;;  %v2568_v61 = vld [vmem:[%s16545_s8 + $0x50] sm:$0xff] }
 0x105   : > { %2674 = vperm.xlu0 %10753, %v2568_v61  }
 0x106   : > { %v11509_v27 = vmul.f32 0.70710677, %v941_v62 }
 0x107   : > { %v946_v28 = vpop.f32.mrb[2].mxu0 }
 0x108   : > { %v1259_v29 = vand.u32 2147483647, %v11509_v27  ;;  %v11513_v30 = vadd.f32 %v946_v28, %v11498_v60  ;;  %v11515_v31 = vpop.f32.mrb[3].mxu0  ;;  %vm1195_vm1 = vcmp.ge.f32.partialorder %v11509_v27, 0.0 }
 0x10a   : > { %v1291_v32 = vmul.f32 0.3275911, %v1259_v29  ;;  %v11518_v33 = vmul.f32 0.70710677, %v11513_v30  ;;  %v1707_v51 = vsub.f32 0.0, %v1259_v29 }
 0x10b   : > { %v952_v34 = vpop.f32.mrb[4].mxu0 }
 0x10c   : > { %v1323_v35 = vadd.f32 1.0, %v1291_v32  ;;  %v1260_v36 = vand.u32 2147483647, %v11518_v33  ;;  %v11521_v37 = vpop.f32.mrb[5].mxu0  ;;  %v11524_v38 = vadd.f32 %v952_v34, %v11498_v60  ;;  %v1739_v34 = vmul.f32 %v1707_v51, %v1259_v29 }
 0x10d   : > { %v11574_v29 = vmul.f32 0.5, %v941_v62  ;;  %vm1196_vm2 = vcmp.ge.f32.partialorder %v11518_v33, 0.0 }
 0x10e   : > { %10755 = vrcp.f32 %v1323_v35  ;;  %v1292_v39 = vmul.f32 0.3275911, %v1260_v36  ;;  %v11527_v40 = vmul.f32 0.70710677, %v11524_v38  ;;  %v1708_v55 = vsub.f32 0.0, %v1260_v36 }
 0x10f   : > { %v958_v41 = vpop.f32.mrb[6].mxu0  ;;  %v11619_v2 = vmul.f32 0.5, %v11524_v38 }
 0x110   : > { %v1324_v42 = vadd.f32 1.0, %v1292_v39  ;;  %v11530_v43 = vadd.f32 %v958_v41, %v11498_v60  ;;  %v11532_v44 = vpop.f32.mrb[7].mxu0  ;;  %v1261_v47 = vand.u32 2147483647, %v11527_v40  ;;  %v1740_v45 = vmul.f32 %v1708_v55, %v1260_v36 }
 0x111   : > { %v1771_v36 = vmul.f32 1.442695, %v1739_v34  ;;  %vm1197_vm3 = vcmp.ge.f32.partialorder %v11527_v40, 0.0 }
 0x112   : > { %10757 = vrcp.f32 %v1324_v42  ;;  %v1293_v48 = vmul.f32 0.3275911, %v1261_v47  ;;  %v11542_v49 = vmul.f32 0.70710677, %v11530_v43 }
 0x113   : > { %v964_v50 = vpop.f32.mrb[8].mxu0 }
 0x114   : > { %v11545_v52 = vadd.f32 %v964_v50, %v11498_v60  ;;  %v11547_v54 = vpop.f32.mrb[9].mxu0  ;;  %v1325_v57 = vadd.f32 1.0, %v1293_v48  ;;  %v1262_v58 = vand.u32 2147483647, %v11542_v49  ;;  %v1709_v48 = vsub.f32 0.0, %v1261_v47 }
 0x115   : > { %vm1198_vm5 = vcmp.ge.f32.partialorder %v11542_v49, 0.0 }
 0x116   : > { %v11557_v0 = vmul.f32 0.70710677, %v11545_v52  ;;  %10759 = vrcp.f32 %v1325_v57  ;;  %v1294_v1 = vmul.f32 0.3275911, %v1262_v58  ;;  %v2571_v57 = vld [vmem:[%s16545_s8 + $0x68] sm:$0xff]  ;;  %v1710_v23 = vsub.f32 0.0, %v1262_v58 }
 0x117   : > { %v970_v28 = vpop.f32.mrb[10].mxu0  ;;  %2689 = vperm.xlu1 %10754, %v2571_v57   ;;  %v1741_v57 = vmul.f32 %v1709_v48, %v1261_v47 }
 0x118   : > { %v11559_v32 = vpop.eup %10755  ;;  %v11562_v35 = vand.u32 2147483647, %v11557_v0  ;;  %v11565_v39 = vadd.f32 %v970_v28, %v11498_v60  ;;  %v11567_v41 = vpop.f32.mrb[11].mxu0  ;;  %v1326_v46 = vadd.f32 1.0, %v1294_v1  ;;  %v2570_v28 = vld [vmem:[%s16545_s8 + $0x60] sm:$0xff]  ;;  %v1742_v33 = vmul.f32 %v1710_v23, %v1262_v58 }
 0x119   : > { %v1419_v42 = vmul.f32 1.0614054, %v11559_v32  ;;  %2684 = vperm.xlu0 %10753, %v2570_v28   ;;  %v11600_v28 = vmul.f32 0.5, %v11513_v30  ;;  %vm1199_vm6 = vcmp.ge.f32.partialorder %v11557_v0, 0.0 }
 0x11a   : > { %v1295_v50 = vmul.f32 0.3275911, %v11562_v35  ;;  %10761 = vrcp.f32 %v1326_v46  ;;  %v11577_v59 = vmul.f32 0.70710677, %v11565_v39  ;;  %v1773_v46 = vmul.f32 1.442695, %v1740_v45 }
 0x11b   : > { %v1451_v51 = vadd.f32 -1.4531521, %v1419_v42  ;;  %v976_v1 = vpop.f32.mrb[12].mxu0 }
 0x11c   : > { %v11579_v61 = vpop.eup %10757  ;;  %v1327_v55 = vadd.f32 1.0, %v1295_v50  ;;  %v11588_v26 = vpop.f32.mrb[13].mxu0  ;;  %v1264_v34 = vand.u32 2147483647, %v11577_v59  ;;  %v16577_v50 = vmov -1.0   ;;  %v11597_v15 = vadd.f32 %v976_v1, %v11498_v60 }
 0x11d   : > { %v1483_v62 = vmul.f32 %v11559_v32, %v1451_v51  ;;  %v1420_v42 = vmul.f32 1.0614054, %v11579_v61  ;;  %v11594_v20 = vsel %vm1195_vm1, 1.0, %v16577_v50  ;;  %v11605_v47 = vsel %vm1196_vm2, 1.0, %v16577_v50 }
 0x11e   : > { %10763 = vrcp.f32 %v1327_v55  ;;  %v1296_v48 = vmul.f32 0.3275911, %v1264_v34  ;;  %vm1200_vm7 = vcmp.ge.f32.partialorder %v11577_v59, 0.0 }
 0x11f   : > { %v1515_v51 = vadd.f32 1.4214138, %v1483_v62  ;;  %v1452_v19 = vadd.f32 -1.4531521, %v1420_v42  ;;  %v982_v45 = vpop.f32.mrb[14].mxu0  ;;  %10765 = vpow2.f32 %v1771_v36 }
 0x120   : > { %v11607_v55 = vpop.f32.mrb[15].mxu0  ;;  %v11609_v27 = vpop.eup %10759  ;;  %v11615_v36 = vmul.f32 0.70710677, %v11597_v15  ;;  %v1775_v42 = vmul.f32 1.442695, %v1741_v57  ;;  %v1328_v11 = vadd.f32 1.0, %v1296_v48  ;;  %10767 = vpow2.f32 %v1773_v46 }
 0x121   : > { %v1547_v62 = vmul.f32 %v11559_v32, %v1515_v51  ;;  %v1484_v1 = vmul.f32 %v11579_v61, %v1452_v19  ;;  %v1421_v30 = vmul.f32 1.0614054, %v11609_v27  ;;  %v1711_v19 = vsub.f32 0.0, %v11562_v35 }
 0x122   : > { %10769 = vrcp.f32 %v1328_v11  ;;  %v11625_v24 = vadd.f32 %v982_v45, %v11498_v60  ;;  %v16966_v46 = vmov -1.0   ;;  %v11639_v48 = vand.u32 2147483647, %v11615_v36  ;;  %v2573_v11 = vld [vmem:[%s16545_s8 + $0x78] sm:$0xff]  ;;  %v2572_v45 = vld [vmem:[%s16545_s8 + $0x70] sm:$0xff] }
 0x123   : > { %v1579_v10 = vadd.f32 -0.28449672, %v1547_v62  ;;  %v1516_v6 = vadd.f32 1.4214138, %v1484_v1  ;;  %v11621_v50 = vpop.f32.mrb[16].mxu0  ;;  %v11636_v38 = vsel %vm1197_vm3, 1.0, %v16966_v46  ;;  %2699 = vperm.xlu1 %10754, %v2573_v11   ;;  %2694 = vperm.xlu0 %10753, %v2572_v45   ;;  %10771 = vpow2.f32 %v1775_v42 }
 0x124   : > { %v1453_v51 = vadd.f32 -1.4531521, %v1421_v30  ;;  %v11627_v25 = vpop.f32.mrb[17].mxu0  ;;  %v11629_v57 = vpop.eup %10761  ;;  %v1777_v62 = vmul.f32 1.442695, %v1742_v33  ;;  %v1712_v1 = vsub.f32 0.0, %v1264_v34  ;;  %v1743_v14 = vmul.f32 %v1711_v19, %v11562_v35 }
 0x125   : > { %v1611_v23 = vmul.f32 %v11559_v32, %v1579_v10  ;;  %v1548_v58 = vmul.f32 %v11579_v61, %v1516_v6  ;;  %v1422_v6 = vmul.f32 1.0614054, %v11629_v57  ;;  %v1297_v21 = vmul.f32 0.3275911, %v11639_v48 }
 0x126   : > { %v1485_v10 = vmul.f32 %v11609_v27, %v1453_v51  ;;  %v11654_v16 = vmul.f32 0.70710677, %v11625_v24  ;;  %v1744_v19 = vmul.f32 %v1712_v1, %v1264_v34  ;;  %v1779_v8 = vmul.f32 1.442695, %v1743_v14 }
 0x127   : > { %v1643_v40 = vadd.f32 0.2548296, %v1611_v23  ;;  %v1580_v30 = vadd.f32 -0.28449672, %v1548_v58  ;;  %v1454_v18 = vadd.f32 -1.4531521, %v1422_v6 }
 0x128   : > { %v11650_v22 = vpop.eup %10763  ;;  %v1517_v17 = vadd.f32 1.4214138, %v1485_v10  ;;  %v1329_v23 = vadd.f32 1.0, %v1297_v21  ;;  %v11659_v58 = vpop.f32.mrb[18].mxu0  ;;  %v11663_v10 = vmul.f32 0.5, %v11530_v43  ;;  %vm1201_vm8 = vcmp.ge.f32.partialorder %v11615_v36, 0.0 }
 0x129   : > { %v1675_v51 = vmul.f32 %v11559_v32, %v1643_v40  ;;  %v1612_v33 = vmul.f32 %v11579_v61, %v1580_v30  ;;  %v1423_v11 = vmul.f32 1.0614054, %v11650_v22  ;;  %v10766_v42 = vpop.eup %10765  ;;  %v1486_v35 = vmul.f32 %v11629_v57, %v1454_v18  ;;  %v11666_v6 = vpop.f32.mrb[19].mxu0 }
 0x12a   : > { %v1549_v45 = vmul.f32 %v11609_v27, %v1517_v17  ;;  %10773 = vrcp.f32 %v1329_v23  ;;  %v10768_v17 = vpop.eup %10767  ;;  %v11673_v34 = vand.u32 2147483647, %v11654_v16  ;;  %v1713_v23 = vsub.f32 0.0, %v11639_v48 }
 0x12b   : > { %v1835_v32 = vmul.f32 %v10766_v42, %v1675_v51  ;;  %v1644_v40 = vadd.f32 0.2548296, %v1612_v33  ;;  %v1455_v30 = vadd.f32 -1.4531521, %v1423_v11  ;;  %v11668_v12 = vpop.f32.mrb[20].mxu0  ;;  %10775 = vpow2.f32 %v1777_v62  ;;  %v2575_v51 = vld [vmem:[%s16545_s8 + $0x88] sm:$0xff] }
 0x12c   : > { %v1581_v21 = vadd.f32 -0.28449672, %v1549_v45  ;;  %v1518_v13 = vadd.f32 1.4214138, %v1486_v35  ;;  %v11675_v1 = vpop.f32.mrb[21].mxu0  ;;  %v2574_v62 = vld [vmem:[%s16545_s8 + $0x80] sm:$0xff]  ;;  %v11683_v14 = vpop.eup %10769  ;;  %2709 = vperm.xlu1 %10754, %v2575_v51   ;;  %10777 = vpow2.f32 %v1779_v8 }
 0x12d   : > { %v1867_v9 = vsub.f32 1.0, %v1835_v32  ;;  %v1676_v43 = vmul.f32 %v11579_v61, %v1644_v40  ;;  %v1487_v18 = vmul.f32 %v11650_v22, %v1455_v30  ;;  %v1781_v11 = vmul.f32 1.442695, %v1744_v19  ;;  %2704 = vperm.xlu0 %10753, %v2574_v62   ;;  %v10772_v7 = vpop.eup %10771  ;;  %v2577_v8 = vld [vmem:[%s16545_s8 + $0x98] sm:$0xff] }
 0x12e   : > { %v1613_v33 = vmul.f32 %v11609_v27, %v1581_v21  ;;  %v1550_v61 = vmul.f32 %v11629_v57, %v1518_v13  ;;  %v1424_v32 = vmul.f32 1.0614054, %v11683_v14  ;;  %v1298_v21 = vmul.f32 0.3275911, %v11673_v34 }
 0x12f   : > { %v1899_v42 = vmul.f32 %v1867_v9, %v11594_v20  ;;  %v1836_v45 = vmul.f32 %v10768_v17, %v1676_v43  ;;  %v1519_v35 = vadd.f32 1.4214138, %v1487_v18  ;;  %v11690_v40 = vpop.f32.mrb[22].mxu0  ;;  %v11700_v43 = vadd.f32 %v11621_v50, %v11498_v60  ;;  %v2576_v18 = vld [vmem:[%s16545_s8 + $0x90] sm:$0xff] }
 0x130   : > { %v1645_v30 = vadd.f32 0.2548296, %v1613_v33  ;;  %v1582_v5 = vadd.f32 -0.28449672, %v1550_v61  ;;  %v1456_v51 = vadd.f32 -1.4531521, %v1424_v32  ;;  %2719 = vperm.xlu1 %10754, %v2577_v8  }
 0x131   : > { %v1931_v13 = vadd.f32 1.0, %v1899_v42  ;;  %v1868_v19 = vsub.f32 1.0, %v1836_v45  ;;  %v1551_v3 = vmul.f32 %v11650_v22, %v1519_v35  ;;  %v11694_v62 = vpop.f32.mrb[23].mxu0  ;;  %v1330_v17 = vadd.f32 1.0, %v1298_v21  ;;  %2714 = vperm.xlu0 %10753, %v2576_v18  }
 0x132   : > { %v1677_v9 = vmul.f32 %v11609_v27, %v1645_v30  ;;  %v1614_v20 = vmul.f32 %v11629_v57, %v1582_v5  ;;  %v1488_v5 = vmul.f32 %v11683_v14, %v1456_v51  ;;  %v1233_v36 = vsel %vm1201_vm8, 1.0, %v16966_v46 }
 0x133   : > { %v1963_v33 = vmul.f32 %v1931_v13, %v11574_v29  ;;  %v1900_v61 = vmul.f32 %v1868_v19, %v11605_v47  ;;  %v1583_v27 = vadd.f32 -0.28449672, %v1551_v3  ;;  %v11711_v42 = vpop.f32.mrb[24].mxu0  ;;  %10779 = vrcp.f32 %v1330_v17 }
 0x134   : > { %v1837_v50 = vmul.f32 %v10772_v7, %v1677_v9  ;;  %v1646_v45 = vadd.f32 0.2548296, %v1614_v20  ;;  %v11714_v35 = vpop.f32.mrb[25].mxu0  ;;  %v11716_v32 = vpop.eup %10773  ;;  %v1520_v47 = vadd.f32 1.4214138, %v1488_v5  ;;  %v1745_v3 = vmul.f32 %v1713_v23, %v11639_v48 }
 0x135   : > { %16967 = vst [vmem:[#allocation30_spill] sm:$0xff] %v11714_v35  ;;  %v1932_v30 = vadd.f32 1.0, %v1900_v61  ;;  %v1615_v29 = vmul.f32 %v11650_v22, %v1583_v27  ;;  %9590 = vmatprep.mubr.msk.f32.mxu0 %vm2006_vm4, %v1963_v33  ;;  %v10776_v21 = vpop.eup %10775  ;;  %10781 = vpow2.f32 %v1781_v11  ;;  %v1425_v19 = vmul.f32 1.0614054, %v11716_v32  ;;  %v2578_v11 = vld [vmem:[%s16545_s8 + $0xa0] sm:$0xff] }
 0x136   : > { %v1869_v13 = vsub.f32 1.0, %v1837_v50  ;;  %v1678_v7 = vmul.f32 %v11629_v57, %v1646_v45  ;;  %v1552_v20 = vmul.f32 %v11683_v14, %v1520_v47  ;;  %v11726_v17 = vmul.f32 0.70710677, %v11700_v43  ;;  %v10778_v5 = vpop.eup %10777  ;;  %2724 = vperm.xlu0 %10753, %v2578_v11  }
 0x137   : > { %v1964_v51 = vmul.f32 %v1932_v30, %v11600_v28  ;;  %v1647_v9 = vadd.f32 0.2548296, %v1615_v29  ;;  %v11728_v8 = vpop.f32.mrb[26].mxu0  ;;  %v1457_v18 = vadd.f32 -1.4531521, %v1425_v19  ;;  %v2579_v28 = vld [vmem:[%s16545_s8 + $0xa8] sm:$0xff] }
 0x138   : > { %v1901_v48 = vmul.f32 %v1869_v13, %v11636_v38  ;;  %v1838_v23 = vmul.f32 %v10776_v21, %v1678_v7  ;;  %v11732_v57 = vpop.f32.mrb[27].mxu0  ;;  %v1584_v61 = vadd.f32 -0.28449672, %v1552_v20  ;;  %v1783_v27 = vmul.f32 1.442695, %v1745_v3  ;;  %2729 = vperm.xlu1 %10754, %v2579_v28  }
 0x139   : > { %16968 = vst [vmem:[#allocation31_spill] sm:$0xff] %v11732_v57  ;;  %v1679_v33 = vmul.f32 %v11650_v22, %v1647_v9  ;;  %v11742_v38 = vand.u32 2147483647, %v11726_v17  ;;  %9591 = vmatmul.mubr.msk.f32.vlgmr.msra.gmra.mrb[64].mxu0 %vm2006_vm4, %v1964_v51  ;;  %v1489_v30 = vmul.f32 %v11716_v32, %v1457_v18  ;;  %v1714_v29 = vsub.f32 0.0, %v11673_v34 }
 0x13a   : > { %v1933_v50 = vadd.f32 1.0, %v1901_v48  ;;  %v1870_v45 = vsub.f32 1.0, %v1838_v23  ;;  %v1230_v22 = vsel %vm1198_vm5, 1.0, %v16966_v46  ;;  %v1616_v3 = vmul.f32 %v11683_v14, %v1584_v61 }
 0x13b   : > { %v1839_v47 = vmul.f32 %v10778_v5, %v1679_v33  ;;  %v1299_v21 = vmul.f32 0.3275911, %v11742_v38  ;;  %v11752_v13 = vpop.f32.mrb[28].mxu0  ;;  %v1231_v51 = vsel %vm1199_vm6, 1.0, %v16966_v46  ;;  %v1521_v9 = vadd.f32 1.4214138, %v1489_v30 }
 0x13c   : > { %v1965_v7 = vmul.f32 %v1933_v50, %v11619_v2  ;;  %v1902_v19 = vmul.f32 %v1870_v45, %v1230_v22  ;;  %v11758_v20 = vpop.f32.mrb[29].mxu0  ;;  %v1648_v49 = vadd.f32 0.2548296, %v1616_v3  ;;  %10783 = vpow2.f32 %v1783_v27 }
 0x13d   : > { %16969 = vst [vmem:[#allocation32_spill] sm:$0xff] %v11758_v20  ;;  %v1871_v48 = vsub.f32 1.0, %v1839_v47  ;;  %v1331_v23 = vadd.f32 1.0, %v1299_v21  ;;  %v11760_v18 = vpop.eup %10779  ;;  %v1553_v11 = vmul.f32 %v11716_v32, %v1521_v9  ;;  %v1746_v33 = vmul.f32 %v1714_v29, %v11673_v34 }
 0x13e   : > { %v1934_v28 = vadd.f32 1.0, %v1902_v19  ;;  %v11766_v2 = vadd.f32 %v11659_v58, %v11498_v60  ;;  %9593 = vmatprep.mubr.msk.f32.mxu0 %vm2006_vm4, %v1965_v7  ;;  %v1680_v61 = vmul.f32 %v11683_v14, %v1648_v49  ;;  %v1426_v5 = vmul.f32 1.0614054, %v11760_v18 }
 0x13f   : > { %v1903_v0 = vmul.f32 %v1871_v48, %v1231_v51  ;;  %10785 = vrcp.f32 %v1331_v23  ;;  %v11771_v27 = vpop.f32.mrb[30].mxu0  ;;  %v10782_v50 = vpop.eup %10781  ;;  %v1135_v30 = vmul.f32 0.5, %v11545_v52  ;;  %v1585_v34 = vadd.f32 -0.28449672, %v1553_v11  ;;  %v2581_v52 = vld [vmem:[%s16545_s8 + $0xb8] sm:$0xff] }
 0x140   : > { %v1966_v45 = vmul.f32 %v1934_v28, %v11663_v10  ;;  %v11776_v58 = vpop.f32.mrb[31].mxu0  ;;  %v1840_v22 = vmul.f32 %v10782_v50, %v1680_v61  ;;  %v1458_v47 = vadd.f32 -1.4531521, %v1426_v5  ;;  %v11779_v14 = vmul.f32 0.70710677, %v11766_v2  ;;  %v2580_v10 = vld [vmem:[%s16545_s8 + $0xb0] sm:$0xff]  ;;  %2739 = vperm.xlu1 %10754, %v2581_v52  }
 0x141   : > { %16970 = vst [vmem:[#allocation33_spill] sm:$0xff] %v11776_v58  ;;  %v1935_v29 = vadd.f32 1.0, %v1903_v0  ;;  %v1617_v3 = vmul.f32 %v11716_v32, %v1585_v34  ;;  %v1785_v21 = vmul.f32 1.442695, %v1746_v33  ;;  %v11784_v7 = vadd.f32 %v11668_v12, %v11498_v60  ;;  %2734 = vperm.xlu0 %10753, %v2580_v10   ;;  %v2583_v50 = vld [vmem:[%s16545_s8 + $0xc8] sm:$0xff] }
 0x142   : > { %9594 = vmatmul.mubr.msk.f32.gmra.mrb[66].mxu0 %vm2006_vm4, %v1966_v45  ;;  %v1872_v51 = vsub.f32 1.0, %v1840_v22  ;;  %v1490_v9 = vmul.f32 %v11760_v18, %v1458_v47  ;;  %v1232_v12 = vsel %vm1200_vm7, 1.0, %v16966_v46  ;;  %v1715_v23 = vsub.f32 0.0, %v11742_v38  ;;  %v2582_v45 = vld [vmem:[%s16545_s8 + $0xc0] sm:$0xff] }
 0x143   : > { %v1967_v19 = vmul.f32 %v1935_v29, %v1135_v30  ;;  %v11794_v48 = vpop.f32.mrb[32].mxu0  ;;  %v1649_v49 = vadd.f32 0.2548296, %v1617_v3  ;;  %v11801_v28 = vand.u32 2147483647, %v11779_v14  ;;  %10787 = vpow2.f32 %v1785_v21 }
 0x144   : > { %v1904_v11 = vmul.f32 %v1872_v51, %v1232_v12  ;;  %v1522_v33 = vadd.f32 1.4214138, %v1490_v9  ;;  %v11804_v0 = vmul.f32 0.70710677, %v11784_v7  ;;  %v11806_v61 = vpop.f32.mrb[33].mxu0  ;;  %v1136_v34 = vmul.f32 0.5, %v11565_v39  ;;  %2749 = vperm.xlu1 %10754, %v2583_v50  }
 0x145   : > { %16971 = vst [vmem:[#allocation34_spill] sm:$0xff] %v11806_v61  ;;  %9596 = vmatprep.mubr.msk.f32.mxu0 %vm2006_vm4, %v1967_v19  ;;  %v1681_v5 = vmul.f32 %v11716_v32, %v1649_v49  ;;  %v1300_v59 = vmul.f32 0.3275911, %v11801_v28  ;;  %2744 = vperm.xlu0 %10753, %v2582_v45   ;;  %v1747_v21 = vmul.f32 %v1715_v23, %v11742_v38  ;;  %vm1202_vm9 = vcmp.ge.f32.partialorder %v11654_v16, 0.0 }
 0x146   : > { %v10784_v30 = vpop.eup %10783  ;;  %v1936_v29 = vadd.f32 1.0, %v1904_v11  ;;  %v1554_v22 = vmul.f32 %v11760_v18, %v1522_v33  ;;  %v11820_v47 = vand.u32 2147483647, %v11804_v0  ;;  %v11833_v12 = vadd.f32 %v11690_v40, %v11498_v60 }
 0x147   : > { %v11822_v32 = vpop.f32.mrb[34].mxu0  ;;  %v1841_v3 = vmul.f32 %v10784_v30, %v1681_v5  ;;  %v1332_v52 = vadd.f32 1.0, %v1300_v59  ;;  %v1787_v40 = vmul.f32 1.442695, %v1747_v21  ;;  %v2584_v21 = vld [vmem:[%s16545_s8 + $0xd0] sm:$0xff]  ;;  %vm1203_vm10 = vcmp.ge.f32.partialorder %v11726_v17, 0.0 }
 0x148   : > { %v11826_v10 = vpop.f32.mrb[35].mxu0  ;;  %v1968_v39 = vmul.f32 %v1936_v29, %v1136_v34  ;;  %v1586_v51 = vadd.f32 -0.28449672, %v1554_v22  ;;  %v1301_v9 = vmul.f32 0.3275911, %v11820_v47  ;;  %v1137_v34 = vmul.f32 0.5, %v11597_v15 }
 0x149   : > { %16972 = vst [vmem:[#allocation35_spill] sm:$0xff] %v11826_v10  ;;  %v11828_v19 = vpop.eup %10785  ;;  %v1873_v49 = vsub.f32 1.0, %v1841_v3  ;;  %10789 = vrcp.f32 %v1332_v52  ;;  %v11844_v30 = vmul.f32 0.70710677, %v11833_v12  ;;  %v11850_v3 = vadd.f32 %v11711_v42, %v11498_v60  ;;  %v2585_v52 = vld [vmem:[%s16545_s8 + $0xd8] sm:$0xff]  ;;  %2754 = vperm.xlu0 %10753, %v2584_v21  }
 0x14a   : > { %v1427_v11 = vmul.f32 1.0614054, %v11828_v19  ;;  %v1618_v38 = vmul.f32 %v11760_v18, %v1586_v51  ;;  %v1333_v23 = vadd.f32 1.0, %v1301_v9  ;;  %9597 = vmatmul.mubr.msk.f32.gmra.mrb[68].mxu0 %vm2006_vm4, %v1968_v39  ;;  %v1716_v51 = vsub.f32 0.0, %v11801_v28  ;;  %2759 = vperm.xlu1 %10754, %v2585_v52  }
 0x14b   : > { %v11839_v33 = vpop.f32.mrb[36].mxu0  ;;  %v1905_v5 = vmul.f32 %v1873_v49, %v1233_v36  ;;  %v11861_v15 = vand.u32 2147483647, %v11844_v30  ;;  %vm1204_vm11 = vcmp.ge.f32.partialorder %v11779_v14, 0.0  ;;  %vm1205_vm12 = vcmp.ge.f32.partialorder %v11804_v0, 0.0  ;;  %v2596_v0 = vld [vmem:[%s16546_s9 + $0x30] sm:$0xff] }
 0x14c   : > { %v1459_v59 = vadd.f32 -1.4531521, %v1427_v11  ;;  %v11841_v50 = vpop.f32.mrb[37].mxu0  ;;  %v1650_v45 = vadd.f32 0.2548296, %v1618_v38  ;;  %10791 = vrcp.f32 %v1333_v23  ;;  %v1237_v14 = vsel %vm1205_vm12, 1.0, %v16966_v46 }
 0x14d   : > { %16973 = vst [vmem:[#allocation36_spill] sm:$0xff] %v11841_v50  ;;  %v1937_v29 = vadd.f32 1.0, %v1905_v5  ;;  %v10788_v42 = vpop.eup %10787  ;;  %10793 = vpow2.f32 %v1787_v40  ;;  %v1717_v5 = vsub.f32 0.0, %v11820_v47  ;;  %v1138_v40 = vmul.f32 0.5, %v11625_v24 }
 0x14e   : > { %v1491_v22 = vmul.f32 %v11828_v19, %v1459_v59  ;;  %v1682_v39 = vmul.f32 %v11760_v18, %v1650_v45  ;;  %v1302_v18 = vmul.f32 0.3275911, %v11861_v15  ;;  %v11872_v59 = vmul.f32 0.70710677, %v11850_v3  ;;  %v2587_v45 = vld [vmem:[%s16545_s8 + $0xe8] sm:$0xff] }
 0x14f   : > { %v11863_v9 = vpop.f32.mrb[38].mxu0  ;;  %v1969_v49 = vmul.f32 %v1937_v29, %v1137_v34  ;;  %v2586_v34 = vld [vmem:[%s16545_s8 + $0xe0] sm:$0xff]  ;;  %2769 = vperm.xlu1 %10754, %v2587_v45   ;;  %v1749_v16 = vmul.f32 %v1717_v5, %v11820_v47  ;;  %v1718_v47 = vsub.f32 0.0, %v11861_v15  ;;  %vm1206_vm13 = vcmp.ge.f32.partialorder %v11844_v30, 0.0 }
 0x150   : > { %v1523_v11 = vadd.f32 1.4214138, %v1491_v22  ;;  %v11865_v36 = vpop.f32.mrb[39].mxu0  ;;  %v1842_v38 = vmul.f32 %v10788_v42, %v1682_v39  ;;  %v1748_v22 = vmul.f32 %v1716_v51, %v11801_v28  ;;  %v1334_v52 = vadd.f32 1.0, %v1302_v18  ;;  %2764 = vperm.xlu0 %10753, %v2586_v34  }
 0x151   : > { %16974 = vst [vmem:[#allocation37_spill] sm:$0xff] %v11865_v36  ;;  %9599 = vmatprep.mubr.msk.f32.mxu0 %vm2006_vm4, %v1969_v49  ;;  %v1234_v42 = vsel %vm1202_vm9, 1.0, %v16966_v46  ;;  %v11898_v51 = vadd.f32 %v11728_v8, %v11498_v60  ;;  %vm1207_vm14 = vcmp.ge.f32.partialorder %v11872_v59, 0.0 }
 0x152   : > { %v1555_v23 = vmul.f32 %v11828_v19, %v1523_v11  ;;  %v1874_v29 = vsub.f32 1.0, %v1842_v38  ;;  %v11891_v11 = vand.u32 2147483647, %v11872_v59  ;;  %10795 = vrcp.f32 %v1334_v52 }
 0x153   : > { %v11883_v21 = vpop.f32.mrb[40].mxu0  ;;  %v11885_v39 = vpop.eup %10789  ;;  %v11914_v5 = vmul.f32 0.70710677, %v11898_v51 }
 0x154   : > { %v1587_v49 = vadd.f32 -0.28449672, %v1555_v23  ;;  %v11893_v4 = vpop.f32.mrb[41].mxu0  ;;  %v1906_v24 = vmul.f32 %v1874_v29, %v1234_v42  ;;  %v1428_v28 = vmul.f32 1.0614054, %v11885_v39 }
 0x155   : > { %16975 = vst [vmem:[#allocation38_spill] sm:$0xff] %v11893_v4  ;;  %v1303_v18 = vmul.f32 0.3275911, %v11891_v11  ;;  %v1789_v29 = vmul.f32 1.442695, %v1748_v22  ;;  %vm1208_vm15 = vcmp.ge.f32.partialorder %v11914_v5, 0.0 }
 0x156   : > { %v1619_v38 = vmul.f32 %v11828_v19, %v1587_v49  ;;  %v11904_v23 = vpop.eup %10791  ;;  %v1938_v45 = vadd.f32 1.0, %v1906_v24  ;;  %v1460_v34 = vadd.f32 -1.4531521, %v1428_v28  ;;  %v1791_v22 = vmul.f32 1.442695, %v1749_v16 }
 0x157   : > { %v11906_v42 = vpop.f32.mrb[42].mxu0  ;;  %v1429_v56 = vmul.f32 1.0614054, %v11904_v23  ;;  %v1335_v8 = vadd.f32 1.0, %v1303_v18  ;;  %v10794_v18 = vpop.eup %10793  ;;  %v1235_v16 = vsel %vm1203_vm10, 1.0, %v16966_v46 }
 0x158   : > { %v1651_v52 = vadd.f32 0.2548296, %v1619_v38  ;;  %v11909_v4 = vpop.f32.mrb[43].mxu0  ;;  %v1970_v50 = vmul.f32 %v1938_v45, %v1138_v40  ;;  %v1492_v49 = vmul.f32 %v11885_v39, %v1460_v34  ;;  %v2591_v38 = vld [vmem:[%s16546_s9 + $0x8] sm:$0xff]  ;;  %v2590_v40 = vld [vmem:[%s16546_s9] sm:$0xff]  ;;  %v1139_v45 = vmul.f32 0.5, %v11700_v43 }
 0x159   : > { %16976 = vst [vmem:[#allocation39_spill] sm:$0xff] %v11909_v4  ;;  %v1461_v28 = vadd.f32 -1.4531521, %v1429_v56  ;;  %10797 = vrcp.f32 %v1335_v8  ;;  %v11925_v4 = vand.u32 2147483647, %v11914_v5  ;;  %v11929_v56 = vadd.f32 %v11752_v13, %v11498_v60  ;;  %3499 = vperm.xlu1 %10754, %v2591_v38   ;;  %3495 = vperm.xlu0 %10753, %v2590_v40   ;;  %v2608_v5 = vld [vmem:[%s16546_s9 + $0x90] sm:$0xff] }
 0x15a   : > { %v1683_v24 = vmul.f32 %v11828_v19, %v1651_v52  ;;  %v1524_v34 = vadd.f32 1.4214138, %v1492_v49  ;;  %9600 = vmatmul.mubr.msk.f32.gmra.mrb[70].mxu0 %vm2006_vm4, %v1970_v50  ;;  %10799 = vpow2.f32 %v1789_v29  ;;  %v1750_v13 = vmul.f32 %v1718_v47, %v11861_v15  ;;  %v2588_v29 = vld [vmem:[%s16545_s8 + $0xf0] sm:$0xff] }
 0x15b   : > { %v11932_v19 = vpop.f32.mrb[44].mxu0  ;;  %v1493_v43 = vmul.f32 %v11904_v23, %v1461_v28  ;;  %v1719_v50 = vsub.f32 0.0, %v11891_v11  ;;  %v1304_v36 = vmul.f32 0.3275911, %v11925_v4  ;;  %v11945_v17 = vmul.f32 0.70710677, %v11929_v56 }
 0x15c   : > { %v1843_v52 = vmul.f32 %v10794_v18, %v1683_v24  ;;  %v11938_v8 = vpop.f32.mrb[45].mxu0  ;;  %v1556_v49 = vmul.f32 %v11885_v39, %v1524_v34  ;;  %v11950_v24 = vpop.eup %10795  ;;  %v11953_v28 = vmul.f32 0.5, %v11766_v2  ;;  %10801 = vpow2.f32 %v1791_v22  ;;  %v2592_v18 = vld [vmem:[%s16546_s9 + $0x10] sm:$0xff] }
 0x15d   : > { %16977 = vst [vmem:[#allocation40_spill] sm:$0xff] %v11938_v8  ;;  %v1525_v61 = vadd.f32 1.4214138, %v1493_v43  ;;  %v1336_v15 = vadd.f32 1.0, %v1304_v36  ;;  %2774 = vperm.xlu1 %10754, %v2588_v29   ;;  %v1430_v43 = vmul.f32 1.0614054, %v11950_v24  ;;  %v11964_v8 = vadd.f32 %v11771_v27, %v11498_v60  ;;  %3503 = vperm.xlu0 %10753, %v2592_v18  }
 0x15e   : > { %v1875_v38 = vsub.f32 1.0, %v1843_v52  ;;  %v1588_v40 = vadd.f32 -0.28449672, %v1556_v49  ;;  %v1793_v22 = vmul.f32 1.442695, %v1750_v13  ;;  %v1751_v49 = vmul.f32 %v1719_v50, %v11891_v11 }
 0x15f   : > { %v11955_v47 = vpop.f32.mrb[46].mxu0  ;;  %v1557_v52 = vmul.f32 %v11904_v23, %v1525_v61  ;;  %10803 = vrcp.f32 %v1336_v15  ;;  %v2593_v61 = vld [vmem:[%s16546_s9 + $0x18] sm:$0xff]  ;;  %v11984_v15 = vmul.f32 0.70710677, %v11964_v8  ;;  %vm1209_vm1 = vcmp.ge.f32.partialorder %v11945_v17, 0.0 }
 0x160   : > { %v1907_v34 = vmul.f32 %v1875_v38, %v1235_v16  ;;  %v11966_v2 = vpop.f32.mrb[47].mxu0  ;;  %v1620_v36 = vmul.f32 %v11885_v39, %v1588_v40  ;;  %v1462_v16 = vadd.f32 -1.4531521, %v1430_v43  ;;  %v11975_v38 = vand.u32 2147483647, %v11945_v17 }
 0x161   : > { %16978 = vst [vmem:[#allocation41_spill] sm:$0xff] %v11966_v2  ;;  %v1589_v10 = vadd.f32 -0.28449672, %v1557_v52  ;;  %3507 = vperm.xlu1 %10754, %v2593_v61   ;;  %v2589_v52 = vld [vmem:[%s16545_s8 + $0xf8] sm:$0xff]  ;;  %v1795_v61 = vmul.f32 1.442695, %v1751_v49  ;;  %10805 = vpow2.f32 %v1793_v22 }
 0x162   : > { %v1939_v29 = vadd.f32 1.0, %v1907_v34  ;;  %v1652_v27 = vadd.f32 0.2548296, %v1620_v36  ;;  %v1494_v40 = vmul.f32 %v11950_v24, %v1462_v16  ;;  %2779 = vperm.xlu0 %10753, %v2589_v52   ;;  %v1236_v22 = vsel %vm1204_vm11, 1.0, %v16966_v46 }
 0x163   : > { %v11977_v18 = vpop.f32.mrb[48].mxu0  ;;  %v11979_v13 = vpop.eup %10797  ;;  %v1621_v50 = vmul.f32 %v11904_v23, %v1589_v10  ;;  %v12011_v52 = vand.u32 2147483647, %v11984_v15  ;;  %vm1210_vm2 = vcmp.ge.f32.partialorder %v11984_v15, 0.0  ;;  %v2613_v15 = vld [vmem:[%s16546_s9 + $0xb8] sm:$0xff] }
 0x164   : > { %v1971_v11 = vmul.f32 %v1939_v29, %v1139_v45  ;;  %v11986_v34 = vpop.f32.mrb[49].mxu0  ;;  %v1684_v43 = vmul.f32 %v11885_v39, %v1652_v27  ;;  %v1431_v36 = vmul.f32 1.0614054, %v11979_v13  ;;  %v1305_v45 = vmul.f32 0.3275911, %v11975_v38  ;;  %v10800_v10 = vpop.eup %10799 }
 0x165   : > { %16979 = vst [vmem:[#allocation42_spill] sm:$0xff] %v11986_v34  ;;  %v1653_v29 = vadd.f32 0.2548296, %v1621_v50  ;;  %v1526_v16 = vadd.f32 1.4214138, %v1494_v40  ;;  %v2595_v34 = vld [vmem:[%s16546_s9 + $0x28] sm:$0xff] }
 0x166   : > { %9602 = vmatprep.mubr.msk.f32.mxu0 %vm2006_vm4, %v1971_v11  ;;  %v1844_v2 = vmul.f32 %v10800_v10, %v1684_v43  ;;  %v1463_v39 = vadd.f32 -1.4531521, %v1431_v36  ;;  %v1720_v27 = vsub.f32 0.0, %v11925_v4  ;;  %v1337_v49 = vadd.f32 1.0, %v1305_v45  ;;  %3515 = vperm.xlu1 %10754, %v2595_v34   ;;  %v2594_v50 = vld [vmem:[%s16546_s9 + $0x20] sm:$0xff]  ;;  %v10802_v36 = vpop.eup %10801 }
 0x167   : > { %v12000_v58 = vpop.f32.mrb[50].mxu0  ;;  %v1685_v11 = vmul.f32 %v11904_v23, %v1653_v29  ;;  %v1558_v40 = vmul.f32 %v11950_v24, %v1526_v16  ;;  %v1141_v34 = vmul.f32 0.5, %v11784_v7  ;;  %3511 = vperm.xlu0 %10753, %v2594_v50   ;;  %v1306_v16 = vmul.f32 0.3275911, %v12011_v52 }
 0x168   : > { %v12013_v43 = vpop.f32.mrb[51].mxu0  ;;  %v1876_v45 = vsub.f32 1.0, %v1844_v2  ;;  %v1495_v10 = vmul.f32 %v11979_v13, %v1463_v39  ;;  %10807 = vrcp.f32 %v1337_v49  ;;  %v1752_v39 = vmul.f32 %v1720_v27, %v11925_v4 }
 0x169   : > { %16980 = vst [vmem:[#allocation43_spill] sm:$0xff] %v12013_v43  ;;  %v1845_v23 = vmul.f32 %v10802_v36, %v1685_v11  ;;  %v1590_v29 = vadd.f32 -0.28449672, %v1558_v40  ;;  %v2597_v43 = vld [vmem:[%s16546_s9 + $0x38] sm:$0xff]  ;;  %v12024_v20 = vpop.eup %10803  ;;  %10809 = vpow2.f32 %v1795_v61  ;;  %v1338_v36 = vadd.f32 1.0, %v1306_v16 }
 0x16a   : > { %v1908_v2 = vmul.f32 %v1876_v45, %v1236_v22  ;;  %v1527_v7 = vadd.f32 1.4214138, %v1495_v10  ;;  %3523 = vperm.xlu1 %10754, %v2597_v43   ;;  %v1432_v40 = vmul.f32 1.0614054, %v12024_v20  ;;  %v12040_v61 = vadd.f32 %v11794_v48, %v11498_v60  ;;  %v2599_v10 = vld [vmem:[%s16546_s9 + $0x48] sm:$0xff] }
 0x16b   : > { %v12027_v49 = vpop.f32.mrb[52].mxu0  ;;  %v1877_v50 = vsub.f32 1.0, %v1845_v23  ;;  %v1622_v11 = vmul.f32 %v11950_v24, %v1590_v29  ;;  %3519 = vperm.xlu0 %10753, %v2596_v0   ;;  %10811 = vrcp.f32 %v1338_v36  ;;  %v2598_v23 = vld [vmem:[%s16546_s9 + $0x40] sm:$0xff]  ;;  %v1721_v48 = vsub.f32 0.0, %v11975_v38 }
 0x16c   : > { %v12034_v57 = vpop.f32.mrb[53].mxu0  ;;  %v1940_v22 = vadd.f32 1.0, %v1908_v2  ;;  %v1559_v4 = vmul.f32 %v11979_v13, %v1527_v7  ;;  %v1464_v45 = vadd.f32 -1.4531521, %v1432_v40  ;;  %v1797_v2 = vmul.f32 1.442695, %v1752_v39 }
 0x16d   : > { %16981 = vst [vmem:[#allocation44_spill] sm:$0xff] %v12034_v57  ;;  %v1909_v27 = vmul.f32 %v1877_v50, %v1237_v14  ;;  %v1654_v43 = vadd.f32 0.2548296, %v1622_v11  ;;  %v10806_v14 = vpop.eup %10805  ;;  %v12055_v40 = vmul.f32 0.70710677, %v12040_v61  ;;  %v1722_v39 = vsub.f32 0.0, %v12011_v52 }
 0x16e   : > { %v1972_v29 = vmul.f32 %v1940_v22, %v11953_v28  ;;  %v1591_v16 = vadd.f32 -0.28449672, %v1559_v4  ;;  %3531 = vperm.xlu1 %10754, %v2599_v10   ;;  %v1496_v11 = vmul.f32 %v12024_v20, %v1464_v45  ;;  %v12063_v22 = vadd.f32 %v11822_v32, %v11498_v60  ;;  %v2601_v45 = vld [vmem:[%s16546_s9 + $0x58] sm:$0xff]  ;;  %v2600_v10 = vld [vmem:[%s16546_s9 + $0x50] sm:$0xff] }
 0x16f   : > { %v12050_v7 = vpop.f32.mrb[54].mxu0  ;;  %v1941_v0 = vadd.f32 1.0, %v1909_v27  ;;  %v1686_v50 = vmul.f32 %v11950_v24, %v1654_v43  ;;  %3527 = vperm.xlu0 %10753, %v2598_v23   ;;  %v1238_v24 = vsel %vm1206_vm13, 1.0, %v16966_v46  ;;  %10813 = vpow2.f32 %v1797_v2 }
 0x170   : > { %v12057_v36 = vpop.f32.mrb[55].mxu0  ;;  %v1623_v28 = vmul.f32 %v11979_v13, %v1591_v16  ;;  %9603 = vmatmul.mubr.msk.f32.gmra.mrb[72].mxu0 %vm2006_vm4, %v1972_v29  ;;  %v1528_v43 = vadd.f32 1.4214138, %v1496_v11  ;;  %v12079_v23 = vand.u32 2147483647, %v12055_v40  ;;  %vm1211_vm3 = vcmp.ge.f32.partialorder %v12055_v40, 0.0 }
 0x171   : > { %16982 = vst [vmem:[#allocation45_spill] sm:$0xff] %v12057_v36  ;;  %v1973_v4 = vmul.f32 %v1941_v0, %v1141_v34  ;;  %v1846_v27 = vmul.f32 %v10806_v14, %v1686_v50  ;;  %v1753_v34 = vmul.f32 %v1721_v48, %v11975_v38  ;;  %v1754_v48 = vmul.f32 %v1722_v39, %v12011_v52  ;;  %v2619_v40 = vld [vmem:[%s16546_s9 + $0xe8] sm:$0xff] }
 0x172   : > { %v12075_v32 = vpop.eup %10807  ;;  %v1655_v16 = vadd.f32 0.2548296, %v1623_v28  ;;  %3539 = vperm.xlu1 %10754, %v2601_v45   ;;  %v1560_v14 = vmul.f32 %v12024_v20, %v1528_v43  ;;  %v1307_v11 = vmul.f32 0.3275911, %v12079_v23  ;;  %v12093_v28 = vmul.f32 0.70710677, %v12063_v22 }
 0x173   : > { %v12081_v30 = vpop.f32.mrb[56].mxu0  ;;  %v1878_v29 = vsub.f32 1.0, %v1846_v27  ;;  %v1433_v0 = vmul.f32 1.0614054, %v12075_v32  ;;  %9605 = vmatprep.mubr.msk.f32.mxu0 %vm2006_vm4, %v1973_v4  ;;  %v10810_v2 = vpop.eup %10809  ;;  %3535 = vperm.xlu0 %10753, %v2600_v10   ;;  %v2603_v4 = vld [vmem:[%s16546_s9 + $0x68] sm:$0xff] }
 0x174   : > { %v12087_v50 = vpop.f32.mrb[57].mxu0  ;;  %v1687_v38 = vmul.f32 %v11979_v13, %v1655_v16  ;;  %v1592_v45 = vadd.f32 -0.28449672, %v1560_v14  ;;  %v1142_v13 = vmul.f32 0.5, %v11833_v12  ;;  %v1799_v39 = vmul.f32 1.442695, %v1753_v34 }
 0x175   : > { %16983 = vst [vmem:[#allocation46_spill] sm:$0xff] %v12087_v50  ;;  %v1910_v27 = vmul.f32 %v1878_v29, %v1238_v24  ;;  %v1465_v43 = vadd.f32 -1.4531521, %v1433_v0  ;;  %v2602_v50 = vld [vmem:[%s16546_s9 + $0x60] sm:$0xff]  ;;  %v1339_v16 = vadd.f32 1.0, %v1307_v11  ;;  %v12104_v10 = vpop.eup %10811  ;;  %v1239_v29 = vsel %vm1207_vm14, 1.0, %v16966_v46 }
 0x176   : > { %v1847_v52 = vmul.f32 %v10810_v2, %v1687_v38  ;;  %3547 = vperm.xlu1 %10754, %v2603_v4   ;;  %v1624_v14 = vmul.f32 %v12024_v20, %v1592_v45  ;;  %v1434_v34 = vmul.f32 1.0614054, %v12104_v10  ;;  %v1801_v2 = vmul.f32 1.442695, %v1754_v48  ;;  %v2604_v48 = vld [vmem:[%s16546_s9 + $0x70] sm:$0xff] }
 0x177   : > { %v12102_v36 = vpop.f32.mrb[58].mxu0  ;;  %v1942_v24 = vadd.f32 1.0, %v1910_v27  ;;  %v1497_v0 = vmul.f32 %v12075_v32, %v1465_v43  ;;  %10815 = vrcp.f32 %v1339_v16  ;;  %3543 = vperm.xlu0 %10753, %v2602_v50   ;;  %v12115_v27 = vand.u32 2147483647, %v12093_v28  ;;  %v2605_v43 = vld [vmem:[%s16546_s9 + $0x78] sm:$0xff] }
 0x178   : > { %v12111_v57 = vpop.f32.mrb[59].mxu0  ;;  %v1879_v12 = vsub.f32 1.0, %v1847_v52  ;;  %v1656_v11 = vadd.f32 0.2548296, %v1624_v14  ;;  %10817 = vpow2.f32 %v1799_v39  ;;  %v1466_v35 = vadd.f32 -1.4531521, %v1434_v34 }
 0x179   : > { %16984 = vst [vmem:[#allocation47_spill] sm:$0xff] %v12111_v57  ;;  %v1974_v38 = vmul.f32 %v1942_v24, %v1142_v13  ;;  %v1529_v4 = vadd.f32 1.4214138, %v1497_v0  ;;  %v1143_v50 = vmul.f32 0.5, %v11850_v3  ;;  %v1308_v16 = vmul.f32 0.3275911, %v12115_v27  ;;  %v10814_v24 = vpop.eup %10813 }
 0x17a   : > { %v1911_v59 = vmul.f32 %v1879_v12, %v1239_v29  ;;  %v1688_v13 = vmul.f32 %v12024_v20, %v1656_v11  ;;  %3555 = vperm.xlu1 %10754, %v2605_v43   ;;  %v1498_v14 = vmul.f32 %v12104_v10, %v1466_v35  ;;  %v12136_v3 = vadd.f32 %v11839_v33, %v11498_v60  ;;  %v2607_v34 = vld [vmem:[%s16546_s9 + $0x88] sm:$0xff] }
 0x17b   : > { %v12117_v45 = vpop.f32.mrb[60].mxu0  ;;  %v1561_v52 = vmul.f32 %v12075_v32, %v1529_v4  ;;  %9606 = vmatmul.mubr.msk.f32.gmra.mrb[74].mxu0 %vm2006_vm4, %v1974_v38  ;;  %3551 = vperm.xlu0 %10753, %v2604_v48   ;;  %10819 = vpow2.f32 %v1801_v2  ;;  %v1340_v12 = vadd.f32 1.0, %v1308_v16  ;;  %v2606_v38 = vld [vmem:[%s16546_s9 + $0x80] sm:$0xff]  ;;  %v1723_v35 = vsub.f32 0.0, %v12079_v23 }
 0x17c   : > { %v12130_v39 = vpop.f32.mrb[61].mxu0  ;;  %v1943_v29 = vadd.f32 1.0, %v1911_v59  ;;  %v1848_v20 = vmul.f32 %v10814_v24, %v1688_v13  ;;  %v1530_v4 = vadd.f32 1.4214138, %v1498_v14  ;;  %v12146_v33 = vmul.f32 0.70710677, %v12136_v3 }
 0x17d   : > { %16985 = vst [vmem:[#allocation48_spill] sm:$0xff] %v12130_v39  ;;  %v1593_v0 = vadd.f32 -0.28449672, %v1561_v52  ;;  %10821 = vrcp.f32 %v1340_v12  ;;  %v1240_v48 = vsel %vm1208_vm15, 1.0, %v16966_v46  ;;  %v1144_v52 = vmul.f32 0.5, %v11898_v51 }
 0x17e   : > { %v1975_v11 = vmul.f32 %v1943_v29, %v1143_v50  ;;  %v1880_v43 = vsub.f32 1.0, %v1848_v20  ;;  %3563 = vperm.xlu1 %10754, %v2607_v34   ;;  %v1562_v13 = vmul.f32 %v12104_v10, %v1530_v4  ;;  %v12156_v50 = vand.u32 2147483647, %v12146_v33  ;;  %v2609_v29 = vld [vmem:[%s16546_s9 + $0x98] sm:$0xff] }
 0x17f   : > { %v12148_v59 = vpop.f32.mrb[62].mxu0  ;;  %v1625_v2 = vmul.f32 %v12075_v32, %v1593_v0  ;;  %3559 = vperm.xlu0 %10753, %v2606_v38   ;;  %v1755_v0 = vmul.f32 %v1723_v35, %v12079_v23  ;;  %v12172_v51 = vadd.f32 %v11863_v9, %v11498_v60  ;;  %v1724_v23 = vsub.f32 0.0, %v12115_v27 }
 0x180   : > { %9608 = vmatprep.mubr.msk.f32.mxu0 %vm2006_vm4, %v1975_v11  ;;  %v1912_v16 = vmul.f32 %v1880_v43, %v1240_v48  ;;  %v1594_v20 = vadd.f32 -0.28449672, %v1562_v13  ;;  %v1309_v12 = vmul.f32 0.3275911, %v12156_v50  ;;  %vm1212_vm5 = vcmp.ge.f32.partialorder %v12093_v28, 0.0 }
 0x181   : > { %v1657_v24 = vadd.f32 0.2548296, %v1625_v2  ;;  %v12166_v14 = vpop.eup %10815  ;;  %v12181_v13 = vmul.f32 0.70710677, %v12172_v51  ;;  %vm1213_vm6 = vcmp.ge.f32.partialorder %v12146_v33, 0.0 }
 0x182   : > { %v1944_v34 = vadd.f32 1.0, %v1912_v16  ;;  %v1435_v11 = vmul.f32 1.0614054, %v12166_v14  ;;  %3571 = vperm.xlu1 %10754, %v2609_v29   ;;  %v10818_v4 = vpop.eup %10817  ;;  %v1626_v43 = vmul.f32 %v12104_v10, %v1594_v20  ;;  %v1341_v35 = vadd.f32 1.0, %v1309_v12  ;;  %v2610_v16 = vld [vmem:[%s16546_s9 + $0xa0] sm:$0xff] }
 0x183   : > { %v1689_v38 = vmul.f32 %v12075_v32, %v1657_v24  ;;  %3567 = vperm.xlu0 %10753, %v2608_v5   ;;  %v2611_v32 = vld [vmem:[%s16546_s9 + $0xa8] sm:$0xff]  ;;  %v1803_v29 = vmul.f32 1.442695, %v1755_v0  ;;  %v1145_v5 = vmul.f32 0.5, %v11929_v56  ;;  %v1242_v0 = vsel %vm1210_vm2, 1.0, %v16966_v46 }
 0x184   : > { %v1976_v2 = vmul.f32 %v1944_v34, %v1144_v52  ;;  %v1467_v48 = vadd.f32 -1.4531521, %v1435_v11  ;;  %v1658_v24 = vadd.f32 0.2548296, %v1626_v43  ;;  %10823 = vrcp.f32 %v1341_v35 }
 0x185   : > { %v1849_v9 = vmul.f32 %v10818_v4, %v1689_v38  ;;  %v10820_v20 = vpop.eup %10819  ;;  %v12192_v34 = vand.u32 2147483647, %v12181_v13  ;;  %v1241_v38 = vsel %vm1209_vm1, 1.0, %v16966_v46  ;;  %v12204_v56 = vadd.f32 %v11883_v21, %v11498_v60 }
 0x186   : > { %v1499_v12 = vmul.f32 %v12166_v14, %v1467_v48  ;;  %9609 = vmatmul.mubr.msk.f32.gmra.mrb[76].mxu0 %vm2006_vm4, %v1976_v2  ;;  %3579 = vperm.xlu1 %10754, %v2611_v32   ;;  %v1690_v11 = vmul.f32 %v12104_v10, %v1658_v24  ;;  %v1756_v2 = vmul.f32 %v1724_v23, %v12115_v27  ;;  %10825 = vpow2.f32 %v1803_v29  ;;  %v2612_v48 = vld [vmem:[%s16546_s9 + $0xb0] sm:$0xff]  ;;  %v12222_v24 = vpop.f32.mrb[63].mxu0 }
 0x187   : > { %v1881_v52 = vsub.f32 1.0, %v1849_v9  ;;  %3575 = vperm.xlu0 %10753, %v2610_v16   ;;  %v12206_v4 = vpop.eup %10821  ;;  %v1310_v17 = vmul.f32 0.3275911, %v12192_v34  ;;  %v12215_v21 = vmul.f32 0.70710677, %v12204_v56  ;;  %v1725_v23 = vsub.f32 0.0, %v12156_v50 }
 0x188   : > { %v1531_v35 = vadd.f32 1.4214138, %v1499_v12  ;;  %v1850_v9 = vmul.f32 %v10820_v20, %v1690_v11  ;;  %v1436_v10 = vmul.f32 1.0614054, %v12206_v4  ;;  %16986 = vst [vmem:[#allocation49_spill] sm:$0xff] %v12222_v24  ;;  %v2615_v12 = vld [vmem:[%s16546_s9 + $0xc8] sm:$0xff] }
 0x189   : > { %v1913_v43 = vmul.f32 %v1881_v52, %v1241_v38  ;;  %v1342_v16 = vadd.f32 1.0, %v1310_v17  ;;  %v12225_v52 = vand.u32 2147483647, %v12215_v21  ;;  %v1757_v24 = vmul.f32 %v1725_v23, %v12156_v50  ;;  %v2616_v23 = vld [vmem:[%s16546_s9 + $0xd0] sm:$0xff] }
 0x18a   : > { %v1563_v27 = vmul.f32 %v12166_v14, %v1531_v35  ;;  %3587 = vperm.xlu1 %10754, %v2613_v15   ;;  %v1882_v20 = vsub.f32 1.0, %v1850_v9  ;;  %v1468_v29 = vadd.f32 -1.4531521, %v1436_v10  ;;  %v2614_v35 = vld [vmem:[%s16546_s9 + $0xc0] sm:$0xff]  ;;  %v1146_v10 = vmul.f32 0.5, %v11964_v8  ;;  %v2617_v8 = vld [vmem:[%s16546_s9 + $0xd8] sm:$0xff] }
 0x18b   : > { %v1945_v32 = vadd.f32 1.0, %v1913_v43  ;;  %3583 = vperm.xlu0 %10753, %v2612_v48   ;;  %v1805_v43 = vmul.f32 1.442695, %v1756_v2  ;;  %10827 = vrcp.f32 %v1342_v16  ;;  %v1311_v9 = vmul.f32 0.3275911, %v12225_v52 }
 0x18c   : > { %v1595_v11 = vadd.f32 -0.28449672, %v1563_v27  ;;  %v1914_v17 = vmul.f32 %v1882_v20, %v1242_v0  ;;  %v1500_v15 = vmul.f32 %v12206_v4, %v1468_v29  ;;  %v12243_v0 = vadd.f32 %v11906_v42, %v11498_v60 }
 0x18d   : > { %v1977_v38 = vmul.f32 %v1945_v32, %v1145_v5  ;;  %v1343_v27 = vadd.f32 1.0, %v1311_v9  ;;  %10829 = vpow2.f32 %v1805_v43  ;;  %v1245_v33 = vsel %vm1213_vm6, 1.0, %v16966_v46 }
 0x18e   : > { %v1627_v48 = vmul.f32 %v12166_v14, %v1595_v11  ;;  %3595 = vperm.xlu1 %10754, %v2615_v12   ;;  %v12239_v5 = vpop.eup %10823  ;;  %v1946_v2 = vadd.f32 1.0, %v1914_v17  ;;  %v1532_v32 = vadd.f32 1.4214138, %v1500_v15  ;;  %v1726_v12 = vsub.f32 0.0, %v12192_v34 }
 0x18f   : > { %9611 = vmatprep.mubr.msk.f32.mxu0 %vm2006_vm4, %v1977_v38  ;;  %3591 = vperm.xlu0 %10753, %v2614_v35   ;;  %v1437_v50 = vmul.f32 1.0614054, %v12239_v5  ;;  %10831 = vrcp.f32 %v1343_v27  ;;  %v12257_v11 = vmul.f32 0.70710677, %v12243_v0  ;;  %v1807_v17 = vmul.f32 1.442695, %v1757_v24 }
 0x190   : > { %v1659_v16 = vadd.f32 0.2548296, %v1627_v48  ;;  %v1978_v20 = vmul.f32 %v1946_v2, %v1146_v10  ;;  %v1564_v29 = vmul.f32 %v12206_v4, %v1532_v32  ;;  %v10826_v43 = vpop.eup %10825  ;;  %v12261_v15 = vadd.f32 %v11932_v19, %v11498_v60  ;;  %v2618_v10 = vld [vmem:[%s16546_s9 + $0xe0] sm:$0xff]  ;;  %v2621_v32 = vld [vmem:[%s16546_s9 + $0xf8] sm:$0xff] }
 0x191   : > { %v1469_v38 = vadd.f32 -1.4531521, %v1437_v50  ;;  %v1243_v24 = vsel %vm1211_vm3, 1.0, %v16966_v46  ;;  %v1758_v19 = vmul.f32 %v1726_v12, %v12192_v34  ;;  %v12275_v2 = vand.u32 2147483647, %v12257_v11 }
 0x192   : > { %v1691_v42 = vmul.f32 %v12166_v14, %v1659_v16  ;;  %3603 = vperm.xlu1 %10754, %v2617_v8   ;;  %v1596_v35 = vadd.f32 -0.28449672, %v1564_v29  ;;  %9612 = vmatmul.mubr.msk.f32.gmra.mrb[78].mxu0 %vm2006_vm4, %v1978_v20  ;;  %v1727_v50 = vsub.f32 0.0, %v12225_v52  ;;  %10833 = vpow2.f32 %v1807_v17 }
 0x193   : > { %3599 = vperm.xlu0 %10753, %v2616_v23   ;;  %v1501_v9 = vmul.f32 %v12239_v5, %v1469_v38  ;;  %v12284_v23 = vmul.f32 0.70710677, %v12261_v15  ;;  %v1312_v29 = vmul.f32 0.3275911, %v12275_v2  ;;  %v1147_v12 = vmul.f32 0.5, %v12040_v61  ;;  %v2814_v61 = vld [vmem:[%s16987_s0] sm:$0xff] }
 0x194   : > { %v1851_v14 = vmul.f32 %v10826_v43, %v1691_v42  ;;  %v1628_v48 = vmul.f32 %v12206_v4, %v1596_v35  ;;  %v2620_v43 = vld [vmem:[%s16546_s9 + $0xf0] sm:$0xff]  ;;  %v1809_v17 = vmul.f32 1.442695, %v1758_v19  ;;  %9688 = vmatprep.subr.mxu1 %v2814_v61  ;;  %vm1214_vm7 = vcmp.ge.f32.partialorder %v12181_v13, 0.0 }
 0x195   : > { %v12280_v27 = vpop.eup %10827  ;;  %v1533_v16 = vadd.f32 1.4214138, %v1501_v9  ;;  %9689 = vmatpush3.msra.mxu1 %v2814_v61  ;;  %vm1215_vm8 = vcmp.ge.f32.partialorder %v12215_v21, 0.0  ;;  %v12371_v13 = vadd.f32 %v12000_v58, %v11498_v60  ;;  %vm1216_vm9 = vcmp.ge.f32.partialorder %v12257_v11, 0.0 }
 0x196   : > { %v1883_v8 = vsub.f32 1.0, %v1851_v14  ;;  %3611 = vperm.xlu1 %10754, %v2619_v40   ;;  %v1660_v20 = vadd.f32 0.2548296, %v1628_v48  ;;  %v1438_v34 = vmul.f32 1.0614054, %v12280_v27  ;;  %v1344_v14 = vadd.f32 1.0, %v1312_v29 }
 0x197   : > { %3607 = vperm.xlu0 %10753, %v2618_v10   ;;  %v1565_v38 = vmul.f32 %v12239_v5, %v1533_v16  ;;  %v10830_v9 = vpop.eup %10829  ;;  %v12296_v10 = vand.u32 2147483647, %v12284_v23  ;;  %v12380_v58 = vmul.f32 0.70710677, %v12371_v13  ;;  %vm1217_vm10 = vcmp.ge.f32.partialorder %v12284_v23, 0.0 }
 0x198   : > { %v1915_v42 = vmul.f32 %v1883_v8, %v1243_v24  ;;  %v1692_v35 = vmul.f32 %v12206_v4, %v1660_v20  ;;  %v1470_v40 = vadd.f32 -1.4531521, %v1438_v34  ;;  %v1759_v4 = vmul.f32 %v1727_v50, %v12225_v52 }
 0x199   : > { %v1597_v39 = vadd.f32 -0.28449672, %v1565_v38  ;;  %v12301_v24 = vpop.eup %10831  ;;  %10835 = vrcp.f32 %v1344_v14  ;;  %v1313_v38 = vmul.f32 0.3275911, %v12296_v10  ;;  %v1244_v52 = vsel %vm1212_vm5, 1.0, %v16966_v46 }
 0x19a   : > { %v1947_v48 = vadd.f32 1.0, %v1915_v42  ;;  %3619 = vperm.xlu1 %10754, %v2621_v32   ;;  %v1852_v8 = vmul.f32 %v10830_v9, %v1692_v35  ;;  %v1502_v16 = vmul.f32 %v12280_v27, %v1470_v40  ;;  %v1439_v34 = vmul.f32 1.0614054, %v12301_v24 }
 0x19b   : > { %3615 = vperm.xlu0 %10753, %v2620_v43   ;;  %v1629_v20 = vmul.f32 %v12239_v5, %v1597_v39  ;;  %v12309_v32 = vadd.f32 %v11955_v47, %v11498_v60  ;;  %10837 = vpow2.f32 %v1809_v17  ;;  %v2815_v39 = vld [vmem:[%s16987_s0 + $0x8] sm:$0xff]  ;;  %v1811_v35 = vmul.f32 1.442695, %v1759_v4 }
 0x19c   : > { %v1979_v19 = vmul.f32 %v1947_v48, %v1147_v12  ;;  %v1884_v29 = vsub.f32 1.0, %v1852_v8  ;;  %v1534_v42 = vadd.f32 1.4214138, %v1502_v16  ;;  %v1471_v12 = vadd.f32 -1.4531521, %v1439_v34  ;;  %9638 = vmatprep.subr.mxu0 %v2815_v39  ;;  %v10834_v48 = vpop.eup %10833 }
 0x19d   : > { %v1661_v50 = vadd.f32 0.2548296, %v1629_v20  ;;  %v1345_v40 = vadd.f32 1.0, %v1313_v38  ;;  %v1148_v14 = vmul.f32 0.5, %v12063_v22  ;;  %v12324_v17 = vmul.f32 0.70710677, %v12309_v32  ;;  %9639 = vmatpush3.msra.mxu0 %v2815_v39 }
 0x19e   : > { %9614 = vmatprep.mubr.msk.f32.mxu0 %vm2006_vm4, %v1979_v19  ;;  %v1916_v47 = vmul.f32 %v1884_v29, %v1244_v52  ;;  %v1566_v43 = vmul.f32 %v12280_v27, %v1534_v42  ;;  %v1503_v9 = vmul.f32 %v12301_v24, %v1471_v12  ;;  %v1728_v16 = vsub.f32 0.0, %v12275_v2 }
 0x19f   : > { %v1693_v28 = vmul.f32 %v12239_v5, %v1661_v50  ;;  %10839 = vrcp.f32 %v1345_v40  ;;  %v12329_v22 = vand.u32 2147483647, %v12324_v17  ;;  %v1149_v34 = vmul.f32 0.5, %v12136_v3 }
 0x1a0   : > { %v1948_v61 = vadd.f32 1.0, %v1916_v47  ;;  %v1598_v8 = vadd.f32 -0.28449672, %v1566_v43  ;;  %v1535_v19 = vadd.f32 1.4214138, %v1503_v9  ;;  %10841 = vpow2.f32 %v1811_v35 }
 0x1a1   : > { %v1853_v4 = vmul.f32 %v10834_v48, %v1693_v28  ;;  %v1314_v38 = vmul.f32 0.3275911, %v12329_v22  ;;  %v1760_v12 = vmul.f32 %v1728_v16, %v12275_v2  ;;  %v12341_v39 = vadd.f32 %v11977_v18, %v11498_v60 }
 0x1a2   : > { %v1980_v5 = vmul.f32 %v1948_v61, %v1148_v14  ;;  %v1630_v20 = vmul.f32 %v12280_v27, %v1598_v8  ;;  %v1567_v42 = vmul.f32 %v12301_v24, %v1535_v19  ;;  %v1729_v14 = vsub.f32 0.0, %v12296_v10 }
 0x1a3   : > { %v1885_v29 = vsub.f32 1.0, %v1853_v4  ;;  %v12335_v52 = vpop.eup %10835  ;;  %v1346_v35 = vadd.f32 1.0, %v1314_v38  ;;  %v12349_v28 = vmul.f32 0.70710677, %v12341_v39  ;;  %v1813_v8 = vmul.f32 1.442695, %v1760_v12 }
 0x1a4   : > { %v1662_v50 = vadd.f32 0.2548296, %v1630_v20  ;;  %9615 = vmatmul.mubr.msk.f32.gmra.mrb[80].mxu0 %vm2006_vm4, %v1980_v5  ;;  %v1599_v3 = vadd.f32 -0.28449672, %v1567_v42  ;;  %v1440_v43 = vmul.f32 1.0614054, %v12335_v52  ;;  %v12356_v5 = vpop.permute.xlu1 %2634  ;;  %v1761_v38 = vmul.f32 %v1729_v14, %v12296_v10 }
 0x1a5   : > { %v1917_v47 = vmul.f32 %v1885_v29, %v1245_v33  ;;  %v10838_v2 = vpop.eup %10837  ;;  %10843 = vrcp.f32 %v1346_v35  ;;  %v12353_v16 = vand.u32 2147483647, %v12349_v28  ;;  %16988 = vst [vmem:[#allocation50_spill] sm:$0xff] %v12356_v5  ;;  %v1246_v29 = vsel %vm1214_vm7, 1.0, %v16966_v46 }
 0x1a6   : > { %v1694_v40 = vmul.f32 %v12280_v27, %v1662_v50  ;;  %v1631_v18 = vmul.f32 %v12301_v24, %v1599_v3  ;;  %v1472_v48 = vadd.f32 -1.4531521, %v1440_v43  ;;  %10845 = vpow2.f32 %v1813_v8 }
 0x1a7   : > { %v1949_v9 = vadd.f32 1.0, %v1917_v47  ;;  %v1315_v33 = vmul.f32 0.3275911, %v12353_v16  ;;  %v1730_v14 = vsub.f32 0.0, %v12329_v22  ;;  %v12399_v21 = vand.u32 2147483647, %v12380_v58 }
 0x1a8   : > { %v1854_v61 = vmul.f32 %v10838_v2, %v1694_v40  ;;  %v1663_v19 = vadd.f32 0.2548296, %v1631_v18  ;;  %v1504_v27 = vmul.f32 %v12335_v52, %v1472_v48  ;;  %v1150_v2 = vmul.f32 0.5, %v12172_v51 }
 0x1a9   : > { %v1981_v4 = vmul.f32 %v1949_v9, %v1149_v34  ;;  %v12358_v20 = vpop.eup %10839  ;;  %v1347_v43 = vadd.f32 1.0, %v1315_v33  ;;  %v1815_v18 = vmul.f32 1.442695, %v1761_v38  ;;  %v12390_v51 = vadd.f32 %v12027_v49, %v11498_v60 }
 0x1aa   : > { %v1886_v42 = vsub.f32 1.0, %v1854_v61  ;;  %v1695_v34 = vmul.f32 %v12301_v24, %v1663_v19  ;;  %v1536_v50 = vadd.f32 1.4214138, %v1504_v27  ;;  %v1441_v12 = vmul.f32 1.0614054, %v12358_v20  ;;  %v10842_v47 = vpop.eup %10841  ;;  %v12375_v24 = vpop.permute.xlu0 %2624 }
 0x1ab   : > { %9617 = vmatprep.mubr.msk.f32.mxu0 %vm2006_vm4, %v1981_v4  ;;  %16989 = vst [vmem:[#allocation51_spill] sm:$0xff] %v12375_v24  ;;  %10847 = vrcp.f32 %v1347_v43  ;;  %v12382_v4 = vpop.permute.xlu1 %2639  ;;  %v1151_v27 = vmul.f32 0.5, %v12204_v56  ;;  %v1731_v56 = vsub.f32 0.0, %v12353_v16  ;;  %v12404_v43 = vmul.f32 0.70710677, %v12390_v51 }
 0x1ac   : > { %v1918_v3 = vmul.f32 %v1886_v42, %v1246_v29  ;;  %v1855_v10 = vmul.f32 %v10842_v47, %v1695_v34  ;;  %v1568_v35 = vmul.f32 %v12335_v52, %v1536_v50  ;;  %v1473_v40 = vadd.f32 -1.4531521, %v1441_v12  ;;  %16990 = vst [vmem:[#allocation52_spill] sm:$0xff] %v12382_v4 }
 0x1ad   : > { %v1247_v29 = vsel %vm1215_vm8, 1.0, %v16966_v46  ;;  %v1762_v50 = vmul.f32 %v1730_v14, %v12329_v22  ;;  %10849 = vpow2.f32 %v1815_v18  ;;  %vm1218_vm11 = vcmp.ge.f32.partialorder %v12324_v17, 0.0 }
 0x1ae   : > { %v1950_v9 = vadd.f32 1.0, %v1918_v3  ;;  %v1887_v48 = vsub.f32 1.0, %v1855_v10  ;;  %v1600_v61 = vadd.f32 -0.28449672, %v1568_v35  ;;  %v1505_v8 = vmul.f32 %v12358_v20, %v1473_v40  ;;  %v12406_v10 = vpop.permute.xlu0 %2629 }
 0x1af   : > { %v12392_v42 = vpop.eup %10843  ;;  %16991 = vst [vmem:[#allocation53_spill] sm:$0xff] %v12406_v10  ;;  %v1316_v35 = vmul.f32 0.3275911, %v12399_v21  ;;  %v12410_v18 = vpop.permute.xlu1 %2649  ;;  %vm1219_vm12 = vcmp.ge.f32.partialorder %v12349_v28, 0.0  ;;  %vm1220_vm13 = vcmp.ge.f32.partialorder %v12380_v58, 0.0  ;;  %vm1221_vm14 = vcmp.ge.f32.partialorder %v12404_v43, 0.0 }
 0x1b0   : > { %v1982_v19 = vmul.f32 %v1950_v9, %v1150_v2  ;;  %v1919_v38 = vmul.f32 %v1887_v48, %v1247_v29  ;;  %v1632_v33 = vmul.f32 %v12335_v52, %v1600_v61  ;;  %v1537_v34 = vadd.f32 1.4214138, %v1505_v8  ;;  %16992 = vst [vmem:[#allocation54_spill] sm:$0xff] %v12410_v18  ;;  %v10846_v48 = vpop.eup %10845 }
 0x1b1   : > { %v1442_v12 = vmul.f32 1.0614054, %v12392_v42  ;;  %v1817_v9 = vmul.f32 1.442695, %v1762_v50  ;;  %v1348_v8 = vadd.f32 1.0, %v1316_v35  ;;  %vm2459_vm6 = vcmask 1040384  }
 0x1b2   : > { %9618 = vmatmul.mubr.msk.f32.gmra.mrb[82].mxu0 %vm2006_vm4, %v1982_v19  ;;  %v1951_v49 = vadd.f32 1.0, %v1919_v38  ;;  %v1664_v47 = vadd.f32 0.2548296, %v1632_v33  ;;  %v1569_v3 = vmul.f32 %v12358_v20, %v1537_v34  ;;  %v1763_v38 = vmul.f32 %v1731_v56, %v12353_v16 }
 0x1b3   : > { %v1474_v22 = vadd.f32 -1.4531521, %v1442_v12  ;;  %v12417_v33 = vand.u32 2147483647, %v12404_v43  ;;  %10851 = vrcp.f32 %v1348_v8  ;;  %v12424_v34 = vadd.f32 %v12050_v7, %v11498_v60 }
 0x1b4   : > { %v1983_v40 = vmul.f32 %v1951_v49, %v1151_v27  ;;  %v1696_v14 = vmul.f32 %v12335_v52, %v1664_v47  ;;  %v1601_v2 = vadd.f32 -0.28449672, %v1569_v3  ;;  %10853 = vpow2.f32 %v1817_v9  ;;  %v12427_v47 = vpop.permute.xlu0 %2644 }
 0x1b5   : > { %v1506_v61 = vmul.f32 %v12392_v42, %v1474_v22  ;;  %v12420_v52 = vpop.eup %10847  ;;  %16993 = vst [vmem:[#allocation55_spill] sm:$0xff] %v12427_v47  ;;  %v1152_v16 = vmul.f32 0.5, %v12243_v0  ;;  %v1248_v56 = vsel %vm1216_vm9, 1.0, %v16966_v46  ;;  %v1317_v22 = vmul.f32 0.3275911, %v12417_v33 }
 0x1b6   : > { %v1856_v19 = vmul.f32 %v10846_v48, %v1696_v14  ;;  %v1633_v29 = vmul.f32 %v12358_v20, %v1601_v2  ;;  %9620 = vmatprep.mubr.msk.f32.mxu0 %vm2006_vm4, %v1983_v40  ;;  %v1443_v49 = vmul.f32 1.0614054, %v12420_v52  ;;  %v1819_v14 = vmul.f32 1.442695, %v1763_v38  ;;  %v12436_v2 = vpop.permute.xlu1 %2659 }
 0x1b7   : > { %v1538_v27 = vadd.f32 1.4214138, %v1506_v61  ;;  %16994 = vst [vmem:[#allocation56_spill] sm:$0xff] %v12436_v2  ;;  %v10850_v9 = vpop.eup %10849  ;;  %v1349_v0 = vadd.f32 1.0, %v1317_v22  ;;  %v12440_v61 = vmul.f32 0.70710677, %v12424_v34 }
 0x1b8   : > { %v1888_v50 = vsub.f32 1.0, %v1856_v19  ;;  %v1665_v12 = vadd.f32 0.2548296, %v1633_v29  ;;  %v1475_v40 = vadd.f32 -1.4531521, %v1443_v49  ;;  %v1732_v29 = vsub.f32 0.0, %v12399_v21 }
 0x1b9   : > { %v1570_v3 = vmul.f32 %v12392_v42, %v1538_v27  ;;  %10855 = vrcp.f32 %v1349_v0  ;;  %v12446_v38 = vand.u32 2147483647, %v12440_v61  ;;  %v1249_v49 = vsel %vm1217_vm10, 1.0, %v16966_v46 }
 0x1ba   : > { %v1920_v35 = vmul.f32 %v1888_v50, %v1248_v56  ;;  %v1697_v7 = vmul.f32 %v12358_v20, %v1665_v12  ;;  %v1507_v19 = vmul.f32 %v12420_v52, %v1475_v40  ;;  %v12448_v12 = vpop.permute.xlu0 %2654  ;;  %10857 = vpow2.f32 %v1819_v14 }
 0x1bb   : > { %v1602_v48 = vadd.f32 -0.28449672, %v1570_v3  ;;  %16995 = vst [vmem:[#allocation57_spill] sm:$0xff] %v12448_v12  ;;  %v1318_v3 = vmul.f32 0.3275911, %v12446_v38  ;;  %v12456_v40 = vadd.f32 %v12081_v30, %v11498_v60  ;;  %vm1222_vm15 = vcmp.ge.f32.partialorder %v12440_v61, 0.0 }
 0x1bc   : > { %v1952_v11 = vadd.f32 1.0, %v1920_v35  ;;  %v1857_v8 = vmul.f32 %v10850_v9, %v1697_v7  ;;  %v1539_v23 = vadd.f32 1.4214138, %v1507_v19  ;;  %v1764_v7 = vmul.f32 %v1732_v29, %v12399_v21 }
 0x1bd   : > { %v1634_v20 = vmul.f32 %v12392_v42, %v1602_v48  ;;  %v12461_v9 = vpop.eup %10851  ;;  %v1153_v48 = vmul.f32 0.5, %v12261_v15  ;;  %v1350_v0 = vadd.f32 1.0, %v1318_v3  ;;  %v1733_v29 = vsub.f32 0.0, %v12417_v33 }
 0x1be   : > { %v1984_v27 = vmul.f32 %v1952_v11, %v1152_v16  ;;  %v1889_v50 = vsub.f32 1.0, %v1857_v8  ;;  %v1571_v35 = vmul.f32 %v12420_v52, %v1539_v23  ;;  %v12459_v16 = vpop.permute.xlu1 %2669  ;;  %v10854_v11 = vpop.eup %10853  ;;  %v1444_v19 = vmul.f32 1.0614054, %v12461_v9 }
 0x1bf   : > { %v1666_v56 = vadd.f32 0.2548296, %v1634_v20  ;;  %16996 = vst [vmem:[#allocation58_spill] sm:$0xff] %v12459_v16  ;;  %10859 = vrcp.f32 %v1350_v0  ;;  %v12469_v20 = vmul.f32 0.70710677, %v12456_v40  ;;  %v12472_v23 = vpop.permute.xlu0 %2664  ;;  %vm2818_vm7 = vcmask 1046528  }
 0x1c0   : > { %v1921_v22 = vmul.f32 %v1889_v50, %v1249_v49  ;;  %9621 = vmatmul.mubr.msk.f32.gmra.mrb[84].mxu0 %vm2006_vm4, %v1984_v27  ;;  %v1603_v21 = vadd.f32 -0.28449672, %v1571_v35  ;;  %v1476_v50 = vadd.f32 -1.4531521, %v1444_v19  ;;  %16997 = vst [vmem:[#allocation59_spill] sm:$0xff] %v12472_v23  ;;  %v12481_v35 = vadd.f32 %v12102_v36, %v11498_v60 }
 0x1c1   : > { %v1698_v14 = vmul.f32 %v12392_v42, %v1666_v56  ;;  %v1821_v42 = vmul.f32 1.442695, %v1764_v7  ;;  %v12475_v17 = vand.u32 2147483647, %v12469_v20  ;;  %v1250_v56 = vsel %vm1218_vm11, 1.0, %v16966_v46 }
 0x1c2   : > { %v1953_v8 = vadd.f32 1.0, %v1921_v22  ;;  %v1635_v15 = vmul.f32 %v12420_v52, %v1603_v21  ;;  %v1508_v22 = vmul.f32 %v12461_v9, %v1476_v50  ;;  %v12495_v57 = vmul.f32 0.70710677, %v12481_v35 }
 0x1c3   : > { %v1858_v30 = vmul.f32 %v10854_v11, %v1698_v14  ;;  %v12486_v7 = vpop.eup %10855  ;;  %v1154_v14 = vmul.f32 0.5, %v12309_v32  ;;  %v1765_v11 = vmul.f32 %v1733_v29, %v12417_v33  ;;  %10861 = vpow2.f32 %v1821_v42 }
 0x1c4   : > { %v1985_v27 = vmul.f32 %v1953_v8, %v1153_v48  ;;  %v1667_v3 = vadd.f32 0.2548296, %v1635_v15  ;;  %v12484_v48 = vpop.permute.xlu1 %2679  ;;  %v1319_v8 = vmul.f32 0.3275911, %v12475_v17  ;;  %v1540_v19 = vadd.f32 1.4214138, %v1508_v22 }
 0x1c5   : > { %v1890_v49 = vsub.f32 1.0, %v1858_v30  ;;  %16998 = vst [vmem:[#allocation60_spill] sm:$0xff] %v12484_v48  ;;  %v1445_v36 = vmul.f32 1.0614054, %v12486_v7  ;;  %v10858_v30 = vpop.eup %10857  ;;  %v1823_v42 = vmul.f32 1.442695, %v1765_v11 }
 0x1c6   : > { %9623 = vmatprep.mubr.msk.f32.mxu0 %vm2006_vm4, %v1985_v27  ;;  %v1699_v21 = vmul.f32 %v12420_v52, %v1667_v3  ;;  %v1734_v27 = vsub.f32 0.0, %v12446_v38  ;;  %v1351_v50 = vadd.f32 1.0, %v1319_v8  ;;  %v1572_v33 = vmul.f32 %v12461_v9, %v1540_v19 }
 0x1c7   : > { %v1922_v0 = vmul.f32 %v1890_v49, %v1250_v56  ;;  %v1477_v29 = vadd.f32 -1.4531521, %v1445_v36  ;;  %v12499_v49 = vpop.permute.xlu0 %2674  ;;  %v1251_v48 = vsel %vm1219_vm12, 1.0, %v16966_v46  ;;  %vm1223_vm1 = vcmp.ge.f32.partialorder %v12469_v20, 0.0 }
 0x1c8   : > { %v1859_v32 = vmul.f32 %v10858_v30, %v1699_v21  ;;  %16999 = vst [vmem:[#allocation61_spill] sm:$0xff] %v12499_v49  ;;  %10863 = vrcp.f32 %v1351_v50  ;;  %v1604_v3 = vadd.f32 -0.28449672, %v1572_v33  ;;  %v1766_v28 = vmul.f32 %v1734_v27, %v12446_v38 }
 0x1c9   : > { %v1954_v15 = vadd.f32 1.0, %v1922_v0  ;;  %v1509_v22 = vmul.f32 %v12486_v7, %v1477_v29  ;;  %v12502_v0 = vpop.permute.xlu1 %2689  ;;  %v12504_v8 = vpop.eup %10859  ;;  %v12509_v21 = vand.u32 2147483647, %v12495_v57  ;;  %10865 = vpow2.f32 %v1823_v42 }
 0x1ca   : > { %v1891_v56 = vsub.f32 1.0, %v1859_v32  ;;  %17000 = vst [vmem:[#allocation62_spill] sm:$0xff] %v12502_v0  ;;  %v1636_v19 = vmul.f32 %v12461_v9, %v1604_v3  ;;  %v1446_v30 = vmul.f32 1.0614054, %v12504_v8  ;;  %vm1224_vm2 = vcmp.ge.f32.partialorder %v12495_v57, 0.0 }
 0x1cb   : > { %v1986_v52 = vmul.f32 %v1954_v15, %v1154_v14  ;;  %v12513_v14 = vadd.f32 %v12117_v45, %v11498_v60  ;;  %v1541_v36 = vadd.f32 1.4214138, %v1509_v22  ;;  %v1155_v15 = vmul.f32 0.5, %v12341_v39  ;;  %v12524_v29 = vpop.permute.xlu0 %2684 }
 0x1cc   : > { %v1923_v11 = vmul.f32 %v1891_v56, %v1251_v48  ;;  %v1320_v38 = vmul.f32 0.3275911, %v12509_v21  ;;  %v1668_v32 = vadd.f32 0.2548296, %v1636_v19  ;;  %v1478_v33 = vadd.f32 -1.4531521, %v1446_v30 }
 0x1cd   : > { %9624 = vmatmul.mubr.msk.f32.gmra.mrb[86].mxu0 %vm2006_vm4, %v1986_v52  ;;  %v12521_v27 = vmul.f32 0.70710677, %v12513_v14  ;;  %v1573_v45 = vmul.f32 %v12486_v7, %v1541_v36  ;;  %17001 = vst [vmem:[#allocation63_spill] sm:$0xff] %v12524_v29  ;;  %v1825_v48 = vmul.f32 1.442695, %v1766_v28  ;;  %v1735_v52 = vsub.f32 0.0, %v12475_v17  ;;  %v10862_v39 = vpop.eup %10861  ;;  %v12532_v19 = vpop.permute.xlu1 %2699 }
 0x1ce   : > { %v1955_v50 = vadd.f32 1.0, %v1923_v11  ;;  %v1352_v56 = vadd.f32 1.0, %v1320_v38  ;;  %v1700_v22 = vmul.f32 %v12461_v9, %v1668_v32  ;;  %v1510_v11 = vmul.f32 %v12504_v8, %v1478_v33  ;;  %17002 = vst [vmem:[#allocation64_spill] sm:$0xff] %v12532_v19 }
 0x1cf   : > { %v12528_v3 = vand.u32 2147483647, %v12521_v27  ;;  %v1605_v0 = vadd.f32 -0.28449672, %v1573_v45  ;;  %v1767_v9 = vmul.f32 %v1735_v52, %v12475_v17  ;;  %vm1225_vm3 = vcmp.ge.f32.partialorder %v12521_v27, 0.0 }
 0x1d0   : > { %v1987_v42 = vmul.f32 %v1955_v50, %v1155_v15  ;;  %10867 = vrcp.f32 %v1352_v56  ;;  %v1860_v28 = vmul.f32 %v10862_v39, %v1700_v22  ;;  %v1542_v38 = vadd.f32 1.4214138, %v1510_v11 }
 0x1d1   : > { %v1321_v36 = vmul.f32 0.3275911, %v12528_v3  ;;  %v1637_v30 = vmul.f32 %v12486_v7, %v1605_v0  ;;  %10869 = vpow2.f32 %v1825_v48  ;;  %v12543_v50 = vadd.f32 %v12148_v59, %v11498_v60  ;;  %v12547_v0 = vpop.permute.xlu0 %2694  ;;  %v12557_v22 = vpop.permute.xlu1 %2709 }
 0x1d2   : > { %9626 = vmatprep.mubr.msk.f32.mxu0 %vm2006_vm4, %v1987_v42  ;;  %v12538_v29 = vpop.eup %10863  ;;  %v1892_v32 = vsub.f32 1.0, %v1860_v28  ;;  %v1574_v33 = vmul.f32 %v12504_v8, %v1542_v38  ;;  %17003 = vst [vmem:[#allocation65_spill] sm:$0xff] %v12547_v0  ;;  %v1156_v39 = vmul.f32 0.5, %v12371_v13  ;;  %v1252_v48 = vsel %vm1220_vm13, 1.0, %v16966_v46  ;;  %17004 = vst [vmem:[#allocation66_spill] sm:$0xff] %v12557_v22 }
 0x1d3   : > { %v1353_v15 = vadd.f32 1.0, %v1321_v36  ;;  %v1669_v45 = vadd.f32 0.2548296, %v1637_v30  ;;  %v1447_v56 = vmul.f32 1.0614054, %v12538_v29  ;;  %v10866_v11 = vpop.eup %10865  ;;  %v1736_v13 = vsub.f32 0.0, %v12509_v21 }
 0x1d4   : > { %v12554_v17 = vmul.f32 0.70710677, %v12543_v50  ;;  %v1924_v60 = vmul.f32 %v1892_v32, %v1252_v48  ;;  %v1606_v52 = vadd.f32 -0.28449672, %v1574_v33  ;;  %v1827_v36 = vmul.f32 1.442695, %v1767_v9 }
 0x1d5   : > { %10871 = vrcp.f32 %v1353_v15  ;;  %v1701_v59 = vmul.f32 %v12486_v7, %v1669_v45  ;;  %v1479_v42 = vadd.f32 -1.4531521, %v1447_v56  ;;  %v1737_v7 = vsub.f32 0.0, %v12528_v3  ;;  %v12565_v22 = vpop.permute.xlu0 %2704 }
 0x1d6   : > { %v1290_v58 = vand.u32 2147483647, %v12554_v17  ;;  %v1956_v28 = vadd.f32 1.0, %v1924_v60  ;;  %v1638_v38 = vmul.f32 %v12504_v8, %v1606_v52  ;;  %17005 = vst [vmem:[#allocation67_spill] sm:$0xff] %v12565_v22  ;;  %v1253_v60 = vsel %vm1221_vm14, 1.0, %v16966_v46 }
 0x1d7   : > { %v1861_v30 = vmul.f32 %v10866_v11, %v1701_v59  ;;  %v1511_v15 = vmul.f32 %v12538_v29, %v1479_v42  ;;  %10873 = vpow2.f32 %v1827_v36  ;;  %v1768_v59 = vmul.f32 %v1736_v13, %v12509_v21 }
 0x1d8   : > { %v1322_v32 = vmul.f32 0.3275911, %v1290_v58  ;;  %v1988_v45 = vmul.f32 %v1956_v28, %v1156_v39  ;;  %v1670_v56 = vadd.f32 0.2548296, %v1638_v38  ;;  %v1769_v43 = vmul.f32 %v1737_v7, %v12528_v3 }
 0x1d9   : > { %v1893_v33 = vsub.f32 1.0, %v1861_v30  ;;  %v1543_v48 = vadd.f32 1.4214138, %v1511_v15  ;;  %v12577_v30 = vpop.permute.xlu1 %2719  ;;  %v1157_v15 = vmul.f32 0.5, %v12390_v51  ;;  %v1254_v51 = vsel %vm1222_vm15, 1.0, %v16966_v46 }
 0x1da   : > { %v12567_v9 = vpop.eup %10867  ;;  %v1354_v52 = vadd.f32 1.0, %v1322_v32  ;;  %v1702_v11 = vmul.f32 %v12504_v8, %v1670_v56  ;;  %9627 = vmatmul.mubr.msk.f32.gmra.mrb[88].mxu0 %vm2006_vm4, %v1988_v45  ;;  %17006 = vst [vmem:[#allocation68_spill] sm:$0xff] %v12577_v30  ;;  %v12586_v30 = vpop.permute.xlu0 %2714  ;;  %v1831_v3 = vmul.f32 1.442695, %v1769_v43  ;;  %v1738_v7 = vsub.f32 0.0, %v1290_v58 }
 0x1db   : > { %v1925_v42 = vmul.f32 %v1893_v33, %v1253_v60  ;;  %v1575_v39 = vmul.f32 %v12538_v29, %v1543_v48  ;;  %v1448_v28 = vmul.f32 1.0614054, %v12567_v9  ;;  %v10870_v38 = vpop.eup %10869  ;;  %v1829_v33 = vmul.f32 1.442695, %v1768_v59  ;;  %17007 = vst [vmem:[#allocation69_spill] sm:$0xff] %v12586_v30 }
 0x1dc   : > { %10875 = vrcp.f32 %v1354_v52  ;;  %v1862_v36 = vmul.f32 %v10870_v38, %v1702_v11  ;;  %v1161_v27 = vmul.f32 0.5, %v12513_v14  ;;  %vm1226_vm5 = vcmp.ge.f32.partialorder %v12554_v17, 0.0 }
 0x1dd   : > { %v1957_v21 = vadd.f32 1.0, %v1925_v42  ;;  %v1607_v13 = vadd.f32 -0.28449672, %v1575_v39  ;;  %v1480_v8 = vadd.f32 -1.4531521, %v1448_v28  ;;  %v12591_v59 = vpop.permute.xlu1 %2729  ;;  %v1158_v39 = vmul.f32 0.5, %v12424_v34 }
 0x1de   : > { %v1894_v48 = vsub.f32 1.0, %v1862_v36  ;;  %17008 = vst [vmem:[#allocation70_spill] sm:$0xff] %v12591_v59  ;;  %10877 = vpow2.f32 %v1829_v33  ;;  %v12599_v34 = vpop.permute.xlu0 %2724  ;;  %v2782_v33 = vmul.f32 0.0, %v12375_v24  ;;  %v16602_v14 = vsub.s32 1, %v11477_v53 }
 0x1df   : > { %v12582_v32 = vpop.eup %10871  ;;  %v1989_v56 = vmul.f32 %v1957_v21, %v1157_v15  ;;  %v1639_v45 = vmul.f32 %v12538_v29, %v1607_v13  ;;  %v1512_v60 = vmul.f32 %v12567_v9, %v1480_v8  ;;  %10879 = vpow2.f32 %v1831_v3  ;;  %17009 = vst [vmem:[#allocation71_spill] sm:$0xff] %v12599_v34 }
 0x1e0   : > { %v1449_v61 = vmul.f32 1.0614054, %v12582_v32  ;;  %v1926_v52 = vmul.f32 %v1894_v48, %v1254_v51  ;;  %v1770_v13 = vmul.f32 %v1738_v7, %v1290_v58  ;;  %v2783_v8 = vmul.f32 0.0, %v12406_v10  ;;  %9690 = vmatprep.mubr.msk.f32.mxu1 %vm777_vm0, %v2782_v33 }
 0x1e1   : > { %v1671_v42 = vadd.f32 0.2548296, %v1639_v45  ;;  %v1544_v11 = vadd.f32 1.4214138, %v1512_v60  ;;  %9629 = vmatprep.mubr.msk.f32.mxu0 %vm2006_vm4, %v1989_v56  ;;  %v10874_v43 = vpop.eup %10873  ;;  %v1255_v58 = vsel %vm1223_vm1, 1.0, %v16966_v46  ;;  %v1162_v17 = vmul.f32 0.5, %v12543_v50 }
 0x1e2   : > { %v1481_v28 = vadd.f32 -1.4531521, %v1449_v61  ;;  %v1958_v38 = vadd.f32 1.0, %v1926_v52  ;;  %v1833_v7 = vmul.f32 1.442695, %v1770_v13  ;;  %9691 = vmatmul.mubr.msk.f32.vlgmr.msra.gmra.mrb[0].mxu1 %vm777_vm0, %v2783_v8  ;;  %vm3785_vm8 = vcmask 1045504  }
 0x1e3   : > { %v1703_v15 = vmul.f32 %v12538_v29, %v1671_v42  ;;  %v1576_v21 = vmul.f32 %v12567_v9, %v1544_v11  ;;  %v12604_v42 = vpop.permute.xlu1 %2739  ;;  %vm11108_vm9 = vmmov 0   ;;  %vm6495_vm10 = vcmask 523264  }
 0x1e4   : > { %v1513_v36 = vmul.f32 %v12582_v32, %v1481_v28  ;;  %v1990_v56 = vmul.f32 %v1958_v38, %v1158_v39  ;;  %17010 = vst [vmem:[#allocation72_spill] sm:$0xff] %v12604_v42  ;;  %10881 = vpow2.f32 %v1833_v7 }
 0x1e5   : > { %v1863_v48 = vmul.f32 %v10874_v43, %v1703_v15  ;;  %v1608_v45 = vadd.f32 -0.28449672, %v1576_v21  ;;  %v1159_v15 = vmul.f32 0.5, %v12456_v40 }
 0x1e6   : > { %v10876_v60 = vpop.eup %10875  ;;  %v1545_v51 = vadd.f32 1.4214138, %v1513_v36  ;;  %9630 = vmatmul.mubr.msk.f32.gmra.mrb[90].mxu0 %vm2006_vm4, %v1990_v56  ;;  %v12614_v56 = vpop.permute.xlu0 %2734 }
 0x1e7   : > { %v1895_v61 = vsub.f32 1.0, %v1863_v48  ;;  %v1640_v29 = vmul.f32 %v12567_v9, %v1608_v45  ;;  %v1450_v52 = vmul.f32 1.0614054, %v10876_v60  ;;  %17011 = vst [vmem:[#allocation73_spill] sm:$0xff] %v12614_v56  ;;  %v12618_v33 = vpop.permute.xlu1 %2749 }
 0x1e8   : > { %v1577_v3 = vmul.f32 %v12582_v32, %v1545_v51  ;;  %v10878_v48 = vpop.eup %10877  ;;  %17012 = vst [vmem:[#allocation74_spill] sm:$0xff] %v12618_v33 }
 0x1e9   : > { %v1927_v11 = vmul.f32 %v1895_v61, %v1255_v58  ;;  %v1672_v39 = vadd.f32 0.2548296, %v1640_v29  ;;  %v1482_v28 = vadd.f32 -1.4531521, %v1450_v52  ;;  %v10880_v51 = vpop.eup %10879 }
 0x1ea   : > { %v1609_v38 = vadd.f32 -0.28449672, %v1577_v3  ;;  %v12624_v7 = vpop.permute.xlu0 %2744 }
 0x1eb   : > { %v1959_v21 = vadd.f32 1.0, %v1927_v11  ;;  %v1704_v43 = vmul.f32 %v12567_v9, %v1672_v39  ;;  %v1514_v36 = vmul.f32 %v10876_v60, %v1482_v28  ;;  %v1256_v9 = vsel %vm1224_vm2, 1.0, %v16966_v46  ;;  %17013 = vst [vmem:[#allocation75_spill] sm:$0xff] %v12624_v7 }
 0x1ec   : > { %v1641_v20 = vmul.f32 %v12582_v32, %v1609_v38  ;;  %v1160_v11 = vmul.f32 0.5, %v12481_v35  ;;  %v1257_v28 = vsel %vm1225_vm3, 1.0, %v16966_v46 }
 0x1ed   : > { %v1991_v45 = vmul.f32 %v1959_v21, %v1159_v15  ;;  %v1864_v13 = vmul.f32 %v10878_v48, %v1704_v43  ;;  %v1546_v8 = vadd.f32 1.4214138, %v1514_v36  ;;  %v12628_v15 = vpop.permute.xlu1 %2759 }
 0x1ee   : > { %v1673_v61 = vadd.f32 0.2548296, %v1641_v20  ;;  %17014 = vst [vmem:[#allocation76_spill] sm:$0xff] %v12628_v15  ;;  %v10882_v48 = vpop.eup %10881 }
 0x1ef   : > { %v1896_v40 = vsub.f32 1.0, %v1864_v13  ;;  %v1578_v29 = vmul.f32 %v10876_v60, %v1546_v8  ;;  %9632 = vmatprep.mubr.msk.f32.mxu0 %vm2006_vm4, %v1991_v45  ;;  %v12633_v45 = vpop.permute.xlu0 %2754 }
 0x1f0   : > { %v1705_v52 = vmul.f32 %v12582_v32, %v1673_v61  ;;  %17015 = vst [vmem:[#allocation77_spill] sm:$0xff] %v12633_v45  ;;  %v1258_v61 = vsel %vm1226_vm5, 1.0, %v16966_v46 }
 0x1f1   : > { %v1928_v58 = vmul.f32 %v1896_v40, %v1256_v9  ;;  %v1610_v3 = vadd.f32 -0.28449672, %v1578_v29  ;;  %v12635_v8 = vpop.permute.xlu1 %2769 }
 0x1f2   : > { %v1865_v57 = vmul.f32 %v10880_v51, %v1705_v52  ;;  %17016 = vst [vmem:[#allocation78_spill] sm:$0xff] %v12635_v8 }
 0x1f3   : > { %v1960_v39 = vadd.f32 1.0, %v1928_v58  ;;  %v1642_v38 = vmul.f32 %v10876_v60, %v1610_v3  ;;  %v12641_v29 = vpop.permute.xlu0 %2764  ;;  %v17018_v58 = vmov 0.0  }
 0x1f4   : > { %v1897_v21 = vsub.f32 1.0, %v1865_v57  ;;  %17017 = vst [vmem:[#allocation79_spill] sm:$0xff] %v12641_v29  ;;  %v12646_v3 = vrot.slane %v17018_v58, 1  ;;  %v11021_v57 = vld [vmem:[%s16965_s4] sm:$0x3] }
 0x1f5   : > { %v1992_v43 = vmul.f32 %v1960_v39, %v1160_v11  ;;  %v1674_v36 = vadd.f32 0.2548296, %v1642_v38  ;;  %v12643_v52 = vpop.permute.xlu1 %3499  ;;  %v12653_v11 = vrot.slane %v11021_v57, %v16602_v14 }
 0x1f6   : > { %v1929_v32 = vmul.f32 %v1897_v21, %v1257_v28  ;;  %17019 = vst [vmem:[#allocation80_spill] sm:$0xff] %v12646_v3  ;;  %v12659_v28 = vld [vmem:[%s17020_s7] ss:$0 sm:$0xff] }
 0x1f7   : > { %v1706_v20 = vmul.f32 %v10876_v60, %v1674_v36  ;;  %9633 = vmatmul.mubr.msk.f32.gmra.mrb[92].mxu0 %vm2006_vm4, %v1992_v43  ;;  %v3496_v50 = vpop.permute.xlu0 %3495  ;;  %v949_v38 = vadd.f32 %v11515_v31, %v12653_v11  ;;  %v943_v21 = vadd.f32 %v11501_v63, %v12653_v11 }
 0x1f8   : > { %v1961_v35 = vadd.f32 1.0, %v1929_v32 }
 0x1f9   : > { %v1866_v13 = vmul.f32 %v10882_v48, %v1706_v20  ;;  %v12667_v43 = vpop.permute.xlu1 %2774  ;;  %v12669_v48 = vstv %s762_s26  ;;  %s729_s26 = scalar_lea.vmem %s16559_s22, %s11290_s28 }
 0x1fa   : > { %v1993_v51 = vmul.f32 %v1961_v35, %v1161_v27  ;;  %17021 = vst [vmem:[#allocation81_spill] sm:$0xff] %v12667_v43  ;;  %v12671_v27 = vstv %s2361_s30  ;;  %s17445_s30 = sld [smem:[#allocation197_spill]] }
 0x1fb   : > { %v1898_v40 = vsub.f32 1.0, %v1866_v13  ;;  %v2364_v31 = vmul.f32 %v12671_v27, %v949_v38 }
 0x1fc   : > { %9635 = vmatprep.mubr.msk.f32.mxu0 %vm2006_vm4, %v1993_v51  ;;  %v2363_v51 = vmul.f32 %v12671_v27, %v943_v21  ;;  %v955_v21 = vadd.f32 %v11521_v37, %v12653_v11 }
 0x1fd   : > { %v1930_v60 = vmul.f32 %v1898_v40, %v1258_v61  ;;  %v3504_v61 = vpop.permute.xlu0 %3503  ;;  %v961_v40 = vadd.f32 %v11532_v44, %v12653_v11  ;;  %v12682_v57 = vpop.permute.xlu1 %3507  ;;  %v967_v44 = vadd.f32 %v11547_v54, %v12653_v11 }
 0x1fe   : > { %v3627_v38 = vrot.slane %v12682_v57, 6 }
 0x1ff   : > { %v1962_v9 = vadd.f32 1.0, %v1930_v60  ;;  %v3623_v60 = vrot.slane %v12643_v52, 6 }
 0x201   : > { %v1994_v39 = vmul.f32 %v1962_v9, %v1162_v17  ;;  %v3625_v9 = vrot.slane %v3504_v61, 6 }
 0x203   : > { %9636 = vmatmul.mubr.msk.f32.gmra.mrb[94].mxu0 %vm2006_vm4, %v1994_v39  ;;  %vm3621_vm4 = vcmask 1041408  }
 0x204   : > { %9640 = vmatprep.mubr.msk.f32.mxu0 %vm777_vm0, %v12646_v3 }
 0x20c   : > { %v9592_v36 = vpop.f32.mrb[64].mxu0 }
 0x20d   : > { %v2175_v32 = vadd.f32 %v9592_v36, %v12659_v28  ;;  %v2169_v20 = vpop.f32.mrb[65].mxu0 }
 0x20e   : > { %v2170_v35 = vadd.f32 %v12659_v28, %v2169_v20  ;;  %v2366_v20 = vmul.f32 %v12671_v27, %v961_v40  ;;  %v12705_v40 = vsel %vm3621_vm4, %v3625_v9, %v3627_v38 }
 0x20f   : > { %v2330_v13 = vmul.f32 %v12669_v48, %v2175_v32 }
 0x210   : > { %v2329_v63 = vmul.f32 %v12669_v48, %v2170_v35  ;;  %v12690_v35 = vrot.slane %v3496_v50, 6 }
 0x211   : > { %v2396_v17 = vadd.f32 %v2364_v31, %v2330_v13  ;;  %v12693_v31 = vsel %vm3621_vm4, %v3623_v60, %v3625_v9  ;;  %v12695_v13 = vpop.permute.xlu0 %2779  ;;  %v973_v9 = vadd.f32 %v11567_v41, %v12653_v11 }
 0x212   : > { %v2395_v39 = vadd.f32 %v2363_v51, %v2329_v63  ;;  %v12734_v41 = vsel %vm3621_vm4, %v12690_v35, %v3623_v60 }
 0x213   : > { %v2461_v36 = vrot.slane %v2396_v17, 7 }
 0x214   : > { %v2460_v32 = vrot.slane %v2395_v39, 7 }
 0x215   : > { %v9595_v52 = vpop.f32.mrb[66].mxu0  ;;  %v3512_v46 = vpop.permute.xlu0 %3511 }
 0x216   : > { %v12698_v51 = vsel %vm2459_vm6, %v2460_v32, %v2461_v36  ;;  %v12701_v61 = vsel %vm2459_vm6, 0.0, %v2460_v32  ;;  %v2185_v37 = vadd.f32 %v9595_v52, %v12659_v28  ;;  %v2179_v63 = vpop.f32.mrb[67].mxu0  ;;  %v2365_v52 = vmul.f32 %v12671_v27, %v955_v21 }
 0x217   : > { %17022 = vst [vmem:[#allocation82_spill] sm:$0xff] %v12698_v51  ;;  %17023 = vst [vmem:[#allocation83_spill] sm:$0xff] %v12701_v61  ;;  %v2180_v54 = vadd.f32 %v12659_v28, %v2179_v63  ;;  %v2784_v50 = vmul.f32 %v12356_v5, %v12701_v61  ;;  %v2821_v57 = vrot.slane %v12701_v61, 1  ;;  %v2785_v39 = vmul.f32 %v12382_v4, %v12698_v51 }
 0x218   : > { %v2332_v17 = vmul.f32 %v12669_v48, %v2185_v37  ;;  %v2823_v32 = vrot.slane %v12698_v51, 1  ;;  %v12722_v14 = vmul.f32 %v12693_v31, %v12701_v61  ;;  %v3629_v60 = vrot.slane %v3512_v46, 6 }
 0x219   : > { %v2331_v63 = vmul.f32 %v12669_v48, %v2180_v54  ;;  %9693 = vmatprep.mubr.msk.f32.mxu1 %vm777_vm0, %v2784_v50  ;;  %v2822_v53 = vsel %vm2818_vm7, %v12646_v3, %v2821_v57  ;;  %v3516_v54 = vpop.permute.xlu1 %3515  ;;  %v4825_v46 = vmul.f32 %v12690_v35, %v12701_v61 }
 0x21a   : > { %v12724_v37 = vadd.f32 %v2366_v20, %v2332_v17  ;;  %9694 = vmatmul.mubr.msk.f32.gmra.mrb[2].mxu1 %vm777_vm0, %v2785_v39  ;;  %v12730_v21 = vsel %vm2818_vm7, %v2821_v57, %v2823_v32  ;;  %9641 = vmatmul.mubr.msk.f32.vlgmr.msra.gmra.mrb[96].mxu0 %vm777_vm0, %v2822_v53  ;;  %v3721_v20 = vmul.f32 %v12705_v40, %v12698_v51  ;;  %v3631_v39 = vrot.slane %v3516_v54, 6 }
 0x21b   : > { %17024 = vst [vmem:[#allocation84_spill] sm:$0xff] %v12730_v21  ;;  %v2397_v50 = vadd.f32 %v2365_v52, %v2331_v63  ;;  %v2367_v17 = vmul.f32 %v12671_v27, %v967_v44  ;;  %9643 = vmatprep.mubr.msk.f32.mxu0 %vm777_vm0, %v12730_v21  ;;  %v2368_v57 = vmul.f32 %v12671_v27, %v973_v9 }
 0x21c   : > { %v2465_v58 = vrot.slane %v12724_v37, 7  ;;  %v3791_v52 = vrot.slane %v3721_v20, 2  ;;  %v12747_v63 = vmul.f32 %v12734_v41, %v12698_v51  ;;  %v12765_v21 = vsel %vm3621_vm4, %v3627_v38, %v3629_v60 }
 0x21d   : > { %v2463_v3 = vrot.slane %v2397_v50, 7  ;;  %v9598_v4 = vpop.f32.mrb[68].mxu0  ;;  %v17028_v38 = vrot.slane %v12722_v14, 2 }
 0x21e   : > { %v2195_v9 = vadd.f32 %v9598_v4, %v12659_v28  ;;  %v2189_v54 = vpop.f32.mrb[69].mxu0  ;;  %v12770_v4 = vpop.permute.xlu1 %3523 }
 0x21f   : > { %v12750_v44 = vsel %vm2459_vm6, %v2461_v36, %v2463_v3  ;;  %v12753_v37 = vsel %vm2459_vm6, %v2463_v3, %v2465_v58  ;;  %v2190_v50 = vadd.f32 %v12659_v28, %v2189_v54  ;;  %v12768_v3 = vsel %vm3621_vm4, %v3629_v60, %v3631_v39 }
 0x220   : > { %17025 = vst [vmem:[#allocation85_spill] sm:$0xff] %v12750_v44  ;;  %17026 = vst [vmem:[#allocation86_spill] sm:$0xff] %v12753_v37  ;;  %v2786_v20 = vmul.f32 %v12427_v47, %v12750_v44  ;;  %v2825_v53 = vrot.slane %v12750_v44, 1  ;;  %v2787_v36 = vmul.f32 %v12410_v18, %v12753_v37  ;;  %v2334_v5 = vmul.f32 %v12669_v48, %v2195_v9  ;;  %v3520_v47 = vpop.permute.xlu0 %3519 }
 0x221   : > { %v2827_v54 = vrot.slane %v12753_v37, 1  ;;  %v16624_v10 = vrot.slane %v12770_v4, 6  ;;  %v2333_v51 = vmul.f32 %v12669_v48, %v2190_v50  ;;  %v12783_v60 = vsel %vm3785_vm8, %v17028_v38, %v3791_v52 }
 0x222   : > { %9696 = vmatprep.mubr.msk.f32.mxu1 %vm777_vm0, %v2786_v20  ;;  %v12778_v18 = vsel %vm2818_vm7, %v2823_v32, %v2825_v53  ;;  %v3633_v24 = vrot.slane %v3520_v47, 6  ;;  %v12785_v61 = vadd.f32 %v2368_v57, %v2334_v5  ;;  %v4892_v50 = vrot.slane %v4825_v46, 2 }
 0x223   : > { %17027 = vst [vmem:[#allocation87_spill] sm:$0xff] %v12778_v18  ;;  %9644 = vmatmul.mubr.msk.f32.gmra.mrb[98].mxu0 %vm777_vm0, %v12778_v18  ;;  %9697 = vmatmul.mubr.msk.f32.gmra.mrb[4].mxu1 %vm777_vm0, %v2787_v36  ;;  %v12791_v9 = vsel %vm2818_vm7, %v2825_v53, %v2827_v54  ;;  %v2399_v20 = vadd.f32 %v2367_v17, %v2333_v51  ;;  %v4893_v36 = vrot.slane %v12747_v63, 2 }
 0x224   : > { %17029 = vst [vmem:[#allocation88_spill] sm:$0xff] %v12791_v9  ;;  %9646 = vmatprep.mubr.msk.f32.mxu0 %vm777_vm0, %v12791_v9  ;;  %v3722_v32 = vmul.f32 %v12765_v21, %v12750_v44  ;;  %v3723_v5 = vmul.f32 %v12768_v3, %v12753_v37  ;;  %v985_v47 = vadd.f32 %v11607_v55, %v12653_v11  ;;  %v16625_v57 = vrot.slane %v12785_v61, 7 }
 0x225   : > { %v2467_v53 = vrot.slane %v2399_v20, 7  ;;  %v4827_v51 = vmul.f32 %v12693_v31, %v12750_v44  ;;  %v12806_v17 = vsel %vm3621_vm4, %v3631_v39, %v3633_v24  ;;  %v12811_v9 = vsel %vm3621_vm4, %v3633_v24, %v16624_v10 }
 0x226   : > { %v3793_v38 = vrot.slane %v3722_v32, 2  ;;  %v3795_v46 = vrot.slane %v3723_v5, 2  ;;  %v12814_v55 = vsel %vm3785_vm8, %v4892_v50, %v4893_v36  ;;  %v4828_v63 = vmul.f32 %v12705_v40, %v12753_v37 }
 0x227   : > { %17030 = vst [vmem:[#allocation89_spill] sm:$0xff] %v12814_v55  ;;  %v12819_v20 = vsel %vm2459_vm6, %v2465_v58, %v2467_v53  ;;  %v12824_v32 = vsel %vm2459_vm6, %v2467_v53, %v16625_v57  ;;  %v4895_v55 = vrot.slane %v4827_v51, 2  ;;  %v2370_v51 = vmul.f32 %v12671_v27, %v985_v47 }
 0x228   : > { %17031 = vst [vmem:[#allocation90_spill] sm:$0xff] %v12819_v20  ;;  %17032 = vst [vmem:[#allocation91_spill] sm:$0xff] %v12824_v32  ;;  %v12827_v39 = vsel %vm3785_vm8, %v3791_v52, %v3793_v38  ;;  %v12830_v24 = vsel %vm3785_vm8, %v3793_v38, %v3795_v46  ;;  %v2788_v50 = vmul.f32 %v12448_v12, %v12819_v20  ;;  %v2829_v5 = vrot.slane %v12819_v20, 1 }
 0x229   : > { %17033 = vst [vmem:[#allocation92_spill] sm:$0xff] %v12830_v24  ;;  %v2789_v58 = vmul.f32 %v12436_v2, %v12824_v32  ;;  %v16631_v10 = vrot.slane %v12824_v32, 1  ;;  %v3724_v53 = vmul.f32 %v12806_v17, %v12819_v20  ;;  %v12842_v52 = vmul.f32 %v12811_v9, %v12824_v32 }
 0x22a   : > { %9699 = vmatprep.mubr.msk.f32.mxu1 %vm777_vm0, %v2788_v50  ;;  %v12846_v38 = vsel %vm2818_vm7, %v2827_v54, %v2829_v5  ;;  %v4897_v18 = vrot.slane %v4828_v63, 2  ;;  %v4829_v50 = vmul.f32 %v12765_v21, %v12819_v20  ;;  %v12861_v54 = vmul.f32 %v12768_v3, %v12824_v32 }
 0x22b   : > { %17034 = vst [vmem:[#allocation93_spill] sm:$0xff] %v12846_v38  ;;  %v12851_v57 = vsel %vm2818_vm7, %v2829_v5, %v16631_v10  ;;  %9647 = vmatmul.mubr.msk.f32.gmra.mrb[100].mxu0 %vm777_vm0, %v12846_v38  ;;  %9700 = vmatmul.mubr.msk.f32.gmra.mrb[6].mxu1 %vm777_vm0, %v2789_v58  ;;  %v3797_v2 = vrot.slane %v3724_v53, 2  ;;  %v16636_v12 = vrot.slane %v12842_v52, 2  ;;  %v979_v5 = vadd.f32 %v11588_v26, %v12653_v11 }
 0x22c   : > { %17035 = vst [vmem:[#allocation94_spill] sm:$0xff] %v12851_v57  ;;  %9649 = vmatprep.mubr.msk.f32.mxu0 %vm777_vm0, %v12851_v57  ;;  %v12869_v63 = vsel %vm3785_vm8, %v4893_v36, %v4895_v55  ;;  %v12872_v58 = vsel %vm3785_vm8, %v4895_v55, %v4897_v18  ;;  %v4899_v26 = vrot.slane %v4829_v50, 2  ;;  %v4901_v47 = vrot.slane %v12861_v54, 2 }
 0x22d   : > { %17036 = vst [vmem:[#allocation95_spill] sm:$0xff] %v12869_v63  ;;  %17037 = vst [vmem:[#allocation96_spill] sm:$0xff] %v12872_v58  ;;  %v9601_v53 = vpop.f32.mrb[70].mxu0  ;;  %v12875_v10 = vsel %vm3785_vm8, %v3795_v46, %v3797_v2  ;;  %v12880_v38 = vsel %vm3785_vm8, %v3797_v2, %v16636_v12  ;;  %v5925_v36 = vmul.f32 %v12690_v35, %v12750_v44 }
 0x22e   : > { %17038 = vst [vmem:[#allocation97_spill] sm:$0xff] %v12880_v38  ;;  %v2205_v57 = vadd.f32 %v9601_v53, %v12659_v28  ;;  %v2199_v24 = vpop.f32.mrb[71].mxu0  ;;  %v5926_v55 = vmul.f32 %v12734_v41, %v12753_v37  ;;  %v5927_v46 = vmul.f32 %v12693_v31, %v12819_v20  ;;  %v12892_v2 = vsel %vm3785_vm8, %v4897_v18, %v4899_v26  ;;  %v12899_v53 = vpop.permute.xlu1 %3531 }
 0x22f   : > { %v2200_v58 = vadd.f32 %v12659_v28, %v2199_v24  ;;  %17039 = vst [vmem:[#allocation98_spill] sm:$0xff] %v12892_v2  ;;  %v12895_v50 = vsel %vm3785_vm8, %v4899_v26, %v4901_v47  ;;  %v5928_v54 = vmul.f32 %v12705_v40, %v12824_v32  ;;  %v5992_v63 = vrot.slane %v5925_v36, 2  ;;  %v3528_v20 = vpop.permute.xlu0 %3527 }
 0x230   : > { %17040 = vst [vmem:[#allocation99_spill] sm:$0xff] %v12895_v50  ;;  %v2336_v12 = vmul.f32 %v12669_v48, %v2205_v57  ;;  %v5993_v37 = vrot.slane %v5926_v55, 2  ;;  %v5995_v44 = vrot.slane %v5927_v46, 2  ;;  %v2369_v31 = vmul.f32 %v12671_v27, %v979_v5 }
 0x231   : > { %v16644_v24 = vrot.slane %v12899_v53, 6  ;;  %v2335_v18 = vmul.f32 %v12669_v48, %v2200_v58  ;;  %v5997_v2 = vrot.slane %v5928_v54, 2  ;;  %v3637_v26 = vrot.slane %v3528_v20, 6 }
 0x232   : > { %v12905_v50 = vadd.f32 %v2370_v51, %v2336_v12  ;;  %v12908_v40 = vsel %vm3785_vm8, %v5992_v63, %v5993_v37  ;;  %v12911_v38 = vsel %vm3785_vm8, %v5993_v37, %v5995_v44  ;;  %v17044_v46 = vrot.slane %v12770_v4, 6 }
 0x233   : > { %17041 = vst [vmem:[#allocation100_spill] sm:$0xff] %v12908_v40  ;;  %17042 = vst [vmem:[#allocation101_spill] sm:$0xff] %v12911_v38  ;;  %v2401_v57 = vadd.f32 %v2369_v31, %v2335_v18  ;;  %v12914_v36 = vsel %vm3785_vm8, %v5995_v44, %v5997_v2  ;;  %v12925_v12 = vsel %vm3621_vm4, %v3637_v26, %v16644_v24  ;;  %v17045_v37 = vrot.slane %v12785_v61, 7 }
 0x234   : > { %17043 = vst [vmem:[#allocation102_spill] sm:$0xff] %v12914_v36  ;;  %v2473_v5 = vrot.slane %v12905_v50, 7  ;;  %v12920_v58 = vsel %vm3621_vm4, %v17044_v46, %v3637_v26  ;;  %v17048_v31 = vrot.slane %v12824_v32, 1  ;;  %v17051_v24 = vrot.slane %v12842_v52, 2 }
 0x235   : > { %v2471_v55 = vrot.slane %v2401_v57, 7 }
 0x237   : > { %v12930_v20 = vsel %vm2459_vm6, %v17045_v37, %v2471_v55  ;;  %v12933_v44 = vsel %vm2459_vm6, %v2471_v55, %v2473_v5 }
 0x238   : > { %17046 = vst [vmem:[#allocation103_spill] sm:$0xff] %v12930_v20  ;;  %17047 = vst [vmem:[#allocation104_spill] sm:$0xff] %v12933_v44  ;;  %v2790_v51 = vmul.f32 %v12472_v23, %v12930_v20  ;;  %v2833_v4 = vrot.slane %v12930_v20, 1  ;;  %v2791_v63 = vmul.f32 %v12459_v16, %v12933_v44  ;;  %v16643_v50 = vrot.slane %v12933_v44, 1 }
 0x239   : > { %v3726_v54 = vmul.f32 %v12920_v58, %v12930_v20  ;;  %v12945_v61 = vmul.f32 %v12925_v12, %v12933_v44  ;;  %v4831_v57 = vmul.f32 %v12806_v17, %v12930_v20  ;;  %v12962_v55 = vmul.f32 %v12811_v9, %v12933_v44 }
 0x23a   : > { %9702 = vmatprep.mubr.msk.f32.mxu1 %vm777_vm0, %v2790_v51  ;;  %v12951_v18 = vsel %vm2818_vm7, %v17048_v31, %v2833_v4  ;;  %v12956_v26 = vsel %vm2818_vm7, %v2833_v4, %v16643_v50  ;;  %v5929_v31 = vmul.f32 %v12765_v21, %v12930_v20  ;;  %v12975_v50 = vmul.f32 %v12768_v3, %v12933_v44 }
 0x23b   : > { %17049 = vst [vmem:[#allocation105_spill] sm:$0xff] %v12951_v18  ;;  %17050 = vst [vmem:[#allocation106_spill] sm:$0xff] %v12956_v26  ;;  %9650 = vmatmul.mubr.msk.f32.gmra.mrb[102].mxu0 %vm777_vm0, %v12951_v18  ;;  %9703 = vmatmul.mubr.msk.f32.gmra.mrb[8].mxu1 %vm777_vm0, %v2791_v63  ;;  %v3801_v46 = vrot.slane %v3726_v54, 2  ;;  %v16645_v37 = vrot.slane %v12945_v61, 2  ;;  %v4903_v51 = vrot.slane %v4831_v57, 2  ;;  %v16646_v4 = vrot.slane %v12962_v55, 2 }
 0x23c   : > { %9652 = vmatprep.mubr.msk.f32.mxu0 %vm777_vm0, %v12956_v26  ;;  %v3751_v57 = vld [vmem:[%s16987_s0 + $0x10] sm:$0xff]  ;;  %v5999_v52 = vrot.slane %v5929_v31, 2 }
 0x23d   : > { %v12980_v63 = vsel %vm3785_vm8, %v17051_v24, %v3801_v46  ;;  %v12985_v54 = vsel %vm3785_vm8, %v3801_v46, %v16645_v37  ;;  %v12991_v21 = vsel %vm3785_vm8, %v4901_v47, %v4903_v51  ;;  %v12996_v3 = vsel %vm3785_vm8, %v4903_v51, %v16646_v4  ;;  %9738 = vmatprep.subr.mxu1 %v3751_v57 }
 0x23e   : > { %17052 = vst [vmem:[#allocation107_spill] sm:$0xff] %v12991_v21  ;;  %17053 = vst [vmem:[#allocation108_spill] sm:$0xff] %v12996_v3  ;;  %v16647_v24 = vrot.slane %v12975_v50, 2  ;;  %9739 = vmatpush3.msra.mxu1 %v3751_v57  ;;  %v13000_v46 = vsel %vm3785_vm8, %v5997_v2, %v5999_v52  ;;  %v997_v47 = vadd.f32 %v11666_v6, %v12653_v11 }
 0x23f   : > { %17054 = vst [vmem:[#allocation109_spill] sm:$0xff] %v13000_v46  ;;  %v991_v51 = vadd.f32 %v11627_v25, %v12653_v11 }
 0x240   : > { %v13005_v37 = vsel %vm3785_vm8, %v5999_v52, %v16647_v24  ;;  %v2372_v2 = vmul.f32 %v12671_v27, %v997_v47  ;;  %v3540_v52 = vpop.permute.xlu1 %3539  ;;  %v3536_v24 = vpop.permute.xlu0 %3535  ;;  %v17056_v47 = vrot.slane %v12899_v53, 6  ;;  %v17059_v53 = vld [vmem:[#allocation60_spill] sm:$0xff] }
 0x241   : > { %17055 = vst [vmem:[#allocation110_spill] sm:$0xff] %v13005_v37  ;;  %v2371_v38 = vmul.f32 %v12671_v27, %v991_v51  ;;  %v3643_v6 = vrot.slane %v3540_v52, 6  ;;  %v3641_v40 = vrot.slane %v3536_v24, 6 }
 0x243   : > { %v9604_v4 = vpop.f32.mrb[72].mxu0  ;;  %v13024_v51 = vsel %vm3621_vm4, %v17056_v47, %v3641_v40  ;;  %v17060_v47 = vrot.slane %v12933_v44, 1 }
 0x244   : > { %v2215_v31 = vadd.f32 %v9604_v4, %v12659_v28  ;;  %v2209_v36 = vpop.f32.mrb[73].mxu0  ;;  %v1003_v4 = vadd.f32 %v11675_v1, %v12653_v11  ;;  %v13060_v18 = vpop.permute.xlu1 %3547 }
 0x245   : > { %v2210_v57 = vadd.f32 %v12659_v28, %v2209_v36  ;;  %v1009_v36 = vadd.f32 %v11694_v62, %v12653_v11 }
 0x246   : > { %v2338_v46 = vmul.f32 %v12669_v48, %v2215_v31  ;;  %v13027_v31 = vsel %vm3621_vm4, %v3641_v40, %v3643_v6  ;;  %v2373_v40 = vmul.f32 %v12671_v27, %v1003_v4 }
 0x247   : > { %v2337_v37 = vmul.f32 %v12669_v48, %v2210_v57  ;;  %v2374_v52 = vmul.f32 %v12671_v27, %v1009_v36 }
 0x248   : > { %v2404_v3 = vadd.f32 %v2372_v2, %v2338_v46  ;;  %v13170_v44 = vpop.permute.xlu1 %3555 }
 0x249   : > { %v2403_v25 = vadd.f32 %v2371_v38, %v2337_v37 }
 0x24a   : > { %v2477_v21 = vrot.slane %v2404_v3, 7 }
 0x24b   : > { %v2475_v26 = vrot.slane %v2403_v25, 7 }
 0x24d   : > { %v13030_v24 = vsel %vm2459_vm6, %v2473_v5, %v2475_v26  ;;  %v13033_v38 = vsel %vm2459_vm6, %v2475_v26, %v2477_v21 }
 0x24e   : > { %17057 = vst [vmem:[#allocation111_spill] sm:$0xff] %v13030_v24  ;;  %17058 = vst [vmem:[#allocation112_spill] sm:$0xff] %v13033_v38  ;;  %v9607_v37 = vpop.f32.mrb[74].mxu0  ;;  %v2792_v1 = vmul.f32 %v12499_v49, %v13030_v24  ;;  %v2837_v62 = vrot.slane %v13030_v24, 1  ;;  %v2793_v3 = vmul.f32 %v17059_v53, %v13033_v38  ;;  %v2839_v46 = vrot.slane %v13033_v38, 1  ;;  %v3544_v53 = vpop.permute.xlu0 %3543 }
 0x24f   : > { %v2225_v57 = vadd.f32 %v9607_v37, %v12659_v28  ;;  %v2219_v5 = vpop.f32.mrb[75].mxu0  ;;  %v3728_v26 = vmul.f32 %v13024_v51, %v13030_v24  ;;  %v13047_v2 = vmul.f32 %v13027_v31, %v13033_v38 }
 0x250   : > { %v2220_v25 = vadd.f32 %v12659_v28, %v2219_v5  ;;  %9705 = vmatprep.mubr.msk.f32.mxu1 %vm777_vm0, %v2792_v1  ;;  %v13055_v4 = vsel %vm2818_vm7, %v17060_v47, %v2837_v62  ;;  %v13058_v37 = vsel %vm2818_vm7, %v2837_v62, %v2839_v46  ;;  %v4833_v5 = vmul.f32 %v12920_v58, %v13030_v24 }
 0x251   : > { %17061 = vst [vmem:[#allocation113_spill] sm:$0xff] %v13055_v4  ;;  %17062 = vst [vmem:[#allocation114_spill] sm:$0xff] %v13058_v37  ;;  %v2340_v49 = vmul.f32 %v12669_v48, %v2225_v57  ;;  %9653 = vmatmul.mubr.msk.f32.gmra.mrb[104].mxu0 %vm777_vm0, %v13055_v4  ;;  %9706 = vmatmul.mubr.msk.f32.gmra.mrb[10].mxu1 %vm777_vm0, %v2793_v3  ;;  %v3805_v36 = vrot.slane %v3728_v26, 2  ;;  %v3807_v1 = vrot.slane %v13047_v2, 2  ;;  %v3645_v62 = vrot.slane %v3544_v53, 6 }
 0x252   : > { %v2339_v16 = vmul.f32 %v12669_v48, %v2220_v25  ;;  %9655 = vmatprep.mubr.msk.f32.mxu0 %vm777_vm0, %v13058_v37  ;;  %v4834_v57 = vmul.f32 %v12925_v12, %v13033_v38  ;;  %v17063_v3 = vrot.slane %v12945_v61, 2  ;;  %v4907_v47 = vrot.slane %v4833_v5, 2 }
 0x253   : > { %v13075_v4 = vadd.f32 %v2374_v52, %v2340_v49  ;;  %v13083_v2 = vsel %vm3785_vm8, %v3805_v36, %v3807_v1  ;;  %v5931_v25 = vmul.f32 %v12806_v17, %v13030_v24  ;;  %v5932_v37 = vmul.f32 %v12811_v9, %v13033_v38  ;;  %v17068_v17 = vld [vmem:[#allocation31_spill] sm:$0xff] }
 0x254   : > { %v13080_v26 = vsel %vm3785_vm8, %v17063_v3, %v3805_v36  ;;  %v2405_v53 = vadd.f32 %v2373_v40, %v2339_v16  ;;  %v4909_v23 = vrot.slane %v4834_v57, 2  ;;  %v17064_v52 = vrot.slane %v12962_v55, 2  ;;  %v17067_v40 = vld [vmem:[#allocation30_spill] sm:$0xff] }
 0x255   : > { %v16664_v49 = vrot.slane %v13075_v4, 7  ;;  %v6003_v5 = vrot.slane %v5931_v25, 2  ;;  %v6005_v16 = vrot.slane %v5932_v37, 2  ;;  %v1015_v57 = vadd.f32 %v17067_v40, %v12653_v11  ;;  %v17075_v40 = vld [vmem:[#allocation63_spill] sm:$0xff] }
 0x256   : > { %v13093_v61 = vsel %vm3785_vm8, %v17064_v52, %v4907_v47  ;;  %v2479_v3 = vrot.slane %v2405_v53, 7  ;;  %v13096_v36 = vsel %vm3785_vm8, %v4907_v47, %v4909_v23  ;;  %v1021_v24 = vadd.f32 %v17068_v17, %v12653_v11 }
 0x257   : > { %17065 = vst [vmem:[#allocation115_spill] sm:$0xff] %v13093_v61  ;;  %17066 = vst [vmem:[#allocation116_spill] sm:$0xff] %v13096_v36  ;;  %v13103_v9 = vsel %vm3621_vm4, %v3643_v6, %v3645_v62  ;;  %v17069_v55 = vrot.slane %v13060_v18, 6  ;;  %v17072_v47 = vrot.slane %v12975_v50, 2  ;;  %v13124_v6 = vsel %vm3785_vm8, %v6003_v5, %v6005_v16 }
 0x258   : > { %v13111_v53 = vsel %vm2459_vm6, %v2477_v21, %v2479_v3  ;;  %v13116_v37 = vsel %vm2459_vm6, %v2479_v3, %v16664_v49  ;;  %17074 = vst [vmem:[#allocation118_spill] sm:$0xff] %v13124_v6  ;;  %v17076_v21 = vld [vmem:[#allocation62_spill] sm:$0xff] }
 0x259   : > { %v13108_v52 = vsel %vm3621_vm4, %v3645_v62, %v17069_v55  ;;  %17070 = vst [vmem:[#allocation30_spill] sm:$0xff] %v13111_v53  ;;  %17071 = vst [vmem:[#allocation31_spill] sm:$0xff] %v13116_v37  ;;  %v13121_v25 = vsel %vm3785_vm8, %v17072_v47, %v6003_v5  ;;  %v2794_v62 = vmul.f32 %v17075_v40, %v13111_v53  ;;  %v2841_v17 = vrot.slane %v13111_v53, 1  ;;  %v9610_v3 = vpop.f32.mrb[76].mxu0 }
 0x25a   : > { %17073 = vst [vmem:[#allocation117_spill] sm:$0xff] %v13121_v25  ;;  %v2795_v55 = vmul.f32 %v17076_v21, %v13116_v37  ;;  %v2843_v36 = vrot.slane %v13116_v37, 1  ;;  %v3730_v50 = vmul.f32 %v13103_v9, %v13111_v53  ;;  %v13136_v47 = vmul.f32 %v13108_v52, %v13116_v37  ;;  %v2229_v49 = vpop.f32.mrb[77].mxu0 }
 0x25b   : > { %v2235_v5 = vadd.f32 %v9610_v3, %v12659_v28  ;;  %9708 = vmatprep.mubr.msk.f32.mxu1 %vm777_vm0, %v2794_v62  ;;  %v13141_v6 = vsel %vm2818_vm7, %v2839_v46, %v2841_v17  ;;  %v4835_v61 = vmul.f32 %v13024_v51, %v13111_v53  ;;  %v2230_v21 = vadd.f32 %v12659_v28, %v2229_v49 }
 0x25c   : > { %17077 = vst [vmem:[#allocation119_spill] sm:$0xff] %v13141_v6  ;;  %v13144_v25 = vsel %vm2818_vm7, %v2841_v17, %v2843_v36  ;;  %9656 = vmatmul.mubr.msk.f32.gmra.mrb[106].mxu0 %vm777_vm0, %v13141_v6  ;;  %9709 = vmatmul.mubr.msk.f32.gmra.mrb[12].mxu1 %vm777_vm0, %v2795_v55  ;;  %v3809_v3 = vrot.slane %v3730_v50, 2  ;;  %v3811_v40 = vrot.slane %v13136_v47, 2  ;;  %v13155_v46 = vmul.f32 %v13027_v31, %v13116_v37 }
 0x25d   : > { %17078 = vst [vmem:[#allocation120_spill] sm:$0xff] %v13144_v25  ;;  %v2375_v62 = vmul.f32 %v12671_v27, %v1015_v57  ;;  %v2376_v17 = vmul.f32 %v12671_v27, %v1021_v24  ;;  %v2342_v38 = vmul.f32 %v12669_v48, %v2235_v5  ;;  %9658 = vmatprep.mubr.msk.f32.mxu0 %vm777_vm0, %v13144_v25  ;;  %v4911_v49 = vrot.slane %v4835_v61, 2  ;;  %v3552_v57 = vpop.permute.xlu0 %3551 }
 0x25e   : > { %v2341_v6 = vmul.f32 %v12669_v48, %v2230_v21  ;;  %v13164_v55 = vsel %vm3785_vm8, %v3807_v1, %v3809_v3  ;;  %v13167_v50 = vsel %vm3785_vm8, %v3809_v3, %v3811_v40  ;;  %v4913_v47 = vrot.slane %v13155_v46, 2 }
 0x25f   : > { %v13172_v24 = vadd.f32 %v2376_v17, %v2342_v38  ;;  %v13175_v5 = vsel %vm3785_vm8, %v4909_v23, %v4911_v49  ;;  %v5933_v61 = vmul.f32 %v12920_v58, %v13111_v53  ;;  %v5934_v1 = vmul.f32 %v12925_v12, %v13116_v37  ;;  %v17081_v23 = vld [vmem:[#allocation32_spill] sm:$0xff]  ;;  %v17082_v58 = vld [vmem:[#allocation33_spill] sm:$0xff] }
 0x260   : > { %17079 = vst [vmem:[#allocation121_spill] sm:$0xff] %v13175_v5  ;;  %v3651_v21 = vrot.slane %v13170_v44, 6  ;;  %v3649_v3 = vrot.slane %v3552_v57, 6  ;;  %v2407_v25 = vadd.f32 %v2375_v62, %v2341_v6  ;;  %v13183_v46 = vsel %vm3785_vm8, %v4911_v49, %v4913_v47 }
 0x261   : > { %17080 = vst [vmem:[#allocation122_spill] sm:$0xff] %v13183_v46  ;;  %v2485_v20 = vrot.slane %v13172_v24, 7  ;;  %v6007_v38 = vrot.slane %v5933_v61, 2  ;;  %v6009_v17 = vrot.slane %v5934_v1, 2  ;;  %v1027_v5 = vadd.f32 %v17081_v23, %v12653_v11 }
 0x262   : > { %v2483_v32 = vrot.slane %v2407_v25, 7  ;;  %v1033_v53 = vadd.f32 %v17082_v58, %v12653_v11  ;;  %v17085_v6 = vrot.slane %v13060_v18, 6  ;;  %v13202_v49 = vsel %vm3621_vm4, %v3649_v3, %v3651_v21 }
 0x263   : > { %v13191_v12 = vsel %vm3785_vm8, %v6005_v16, %v6007_v38  ;;  %v13194_v44 = vsel %vm3785_vm8, %v6007_v38, %v6009_v17  ;;  %v17086_v25 = vrot.slane %v13075_v4, 7 }
 0x264   : > { %17083 = vst [vmem:[#allocation32_spill] sm:$0xff] %v13191_v12  ;;  %17084 = vst [vmem:[#allocation33_spill] sm:$0xff] %v13194_v44  ;;  %v13199_v62 = vsel %vm3621_vm4, %v17085_v6, %v3649_v3  ;;  %v13210_v24 = vsel %vm2459_vm6, %v2483_v32, %v2485_v20 }
 0x265   : > { %v13207_v57 = vsel %vm2459_vm6, %v17086_v25, %v2483_v32  ;;  %17088 = vst [vmem:[#allocation124_spill] sm:$0xff] %v13210_v24  ;;  %v2797_v18 = vmul.f32 %v12532_v19, %v13210_v24  ;;  %v2847_v1 = vrot.slane %v13210_v24, 1  ;;  %v13222_v4 = vmul.f32 %v13202_v49, %v13210_v24  ;;  %v9613_v38 = vpop.f32.mrb[78].mxu0 }
 0x266   : > { %17087 = vst [vmem:[#allocation123_spill] sm:$0xff] %v13207_v57  ;;  %v2796_v16 = vmul.f32 %v12547_v0, %v13207_v57  ;;  %v2845_v61 = vrot.slane %v13207_v57, 1  ;;  %v3732_v3 = vmul.f32 %v13199_v62, %v13207_v57  ;;  %v4837_v58 = vmul.f32 %v13103_v9, %v13207_v57  ;;  %v2239_v12 = vpop.f32.mrb[79].mxu0 }
 0x267   : > { %v4838_v6 = vmul.f32 %v13108_v52, %v13210_v24  ;;  %v2377_v25 = vmul.f32 %v12671_v27, %v1027_v5  ;;  %v2245_v44 = vadd.f32 %v9613_v38, %v12659_v28  ;;  %v2240_v46 = vadd.f32 %v12659_v28, %v2239_v12 }
 0x268   : > { %9711 = vmatprep.mubr.msk.f32.mxu1 %vm777_vm0, %v2796_v16  ;;  %v13226_v32 = vsel %vm2818_vm7, %v2843_v36, %v2845_v61  ;;  %v13229_v23 = vsel %vm2818_vm7, %v2845_v61, %v2847_v1  ;;  %v3813_v36 = vrot.slane %v3732_v3, 2  ;;  %v3815_v16 = vrot.slane %v13222_v4, 2  ;;  %v13263_v4 = vpop.permute.xlu1 %3563 }
 0x269   : > { %17089 = vst [vmem:[#allocation125_spill] sm:$0xff] %v13226_v32  ;;  %17090 = vst [vmem:[#allocation126_spill] sm:$0xff] %v13229_v23  ;;  %9659 = vmatmul.mubr.msk.f32.gmra.mrb[108].mxu0 %vm777_vm0, %v13226_v32  ;;  %9712 = vmatmul.mubr.msk.f32.gmra.mrb[14].mxu1 %vm777_vm0, %v2797_v18  ;;  %v2378_v61 = vmul.f32 %v12671_v27, %v1033_v53  ;;  %v4915_v19 = vrot.slane %v4837_v58, 2  ;;  %v4917_v5 = vrot.slane %v4838_v6, 2 }
 0x26a   : > { %9661 = vmatprep.mubr.msk.f32.mxu0 %vm777_vm0, %v13229_v23  ;;  %v2344_v38 = vmul.f32 %v12669_v48, %v2245_v44  ;;  %v13247_v0 = vsel %vm3785_vm8, %v3811_v40, %v3813_v36  ;;  %v13250_v32 = vsel %vm3785_vm8, %v3813_v36, %v3815_v16  ;;  %v5935_v18 = vmul.f32 %v13024_v51, %v13207_v57  ;;  %v3560_v40 = vpop.permute.xlu0 %3559 }
 0x26b   : > { %v2343_v53 = vmul.f32 %v12669_v48, %v2240_v46  ;;  %v13256_v12 = vsel %vm3785_vm8, %v4913_v47, %v4915_v19  ;;  %v13259_v3 = vsel %vm3785_vm8, %v4915_v19, %v4917_v5  ;;  %v5936_v44 = vmul.f32 %v13027_v31, %v13210_v24 }
 0x26c   : > { %17091 = vst [vmem:[#allocation127_spill] sm:$0xff] %v13256_v12  ;;  %17092 = vst [vmem:[#allocation128_spill] sm:$0xff] %v13259_v3  ;;  %v13265_v58 = vadd.f32 %v2378_v61, %v2344_v38  ;;  %v6011_v6 = vrot.slane %v5935_v18, 2  ;;  %v3655_v36 = vrot.slane %v13263_v4, 6  ;;  %v3653_v51 = vrot.slane %v3560_v40, 6  ;;  %v17097_v18 = vld [vmem:[#allocation66_spill] sm:$0xff] }
 0x26d   : > { %v2409_v23 = vadd.f32 %v2377_v25, %v2343_v53  ;;  %v6013_v46 = vrot.slane %v5936_v44, 2 }
 0x26e   : > { %v2489_v47 = vrot.slane %v13265_v58, 7  ;;  %v13270_v12 = vsel %vm3785_vm8, %v6009_v17, %v6011_v6  ;;  %v13276_v31 = vsel %vm3621_vm4, %v3651_v21, %v3653_v51  ;;  %v13279_v61 = vsel %vm3621_vm4, %v3653_v51, %v3655_v36 }
 0x26f   : > { %17093 = vst [vmem:[#allocation129_spill] sm:$0xff] %v13270_v12  ;;  %v2487_v19 = vrot.slane %v2409_v23, 7  ;;  %v13273_v3 = vsel %vm3785_vm8, %v6011_v6, %v6013_v46  ;;  %v17100_v12 = vld [vmem:[#allocation35_spill] sm:$0xff] }
 0x270   : > { %17094 = vst [vmem:[#allocation130_spill] sm:$0xff] %v13273_v3 }
 0x271   : > { %v13282_v38 = vsel %vm2459_vm6, %v2485_v20, %v2487_v19  ;;  %v13285_v25 = vsel %vm2459_vm6, %v2487_v19, %v2489_v47 }
 0x272   : > { %17095 = vst [vmem:[#allocation131_spill] sm:$0xff] %v13282_v38  ;;  %17096 = vst [vmem:[#allocation132_spill] sm:$0xff] %v13285_v25  ;;  %v2798_v17 = vmul.f32 %v12565_v22, %v13282_v38  ;;  %v2849_v23 = vrot.slane %v13282_v38, 1  ;;  %v2799_v53 = vmul.f32 %v17097_v18, %v13285_v25  ;;  %v2851_v21 = vrot.slane %v13285_v25, 1 }
 0x273   : > { %v3734_v44 = vmul.f32 %v13276_v31, %v13282_v38  ;;  %v13297_v20 = vmul.f32 %v13279_v61, %v13285_v25  ;;  %v4839_v58 = vmul.f32 %v13199_v62, %v13282_v38  ;;  %v13310_v6 = vmul.f32 %v13202_v49, %v13285_v25 }
 0x274   : > { %9714 = vmatprep.mubr.msk.f32.mxu1 %vm777_vm0, %v2798_v17  ;;  %v13301_v4 = vsel %vm2818_vm7, %v2847_v1, %v2849_v23  ;;  %v13304_v40 = vsel %vm2818_vm7, %v2849_v23, %v2851_v21  ;;  %v5937_v23 = vmul.f32 %v13103_v9, %v13282_v38  ;;  %v13323_v3 = vmul.f32 %v13108_v52, %v13285_v25 }
 0x275   : > { %17098 = vst [vmem:[#allocation133_spill] sm:$0xff] %v13301_v4  ;;  %17099 = vst [vmem:[#allocation134_spill] sm:$0xff] %v13304_v40  ;;  %9662 = vmatmul.mubr.msk.f32.gmra.mrb[110].mxu0 %vm777_vm0, %v13301_v4  ;;  %9715 = vmatmul.mubr.msk.f32.gmra.mrb[16].mxu1 %vm777_vm0, %v2799_v53  ;;  %v3817_v51 = vrot.slane %v3734_v44, 2  ;;  %v16696_v19 = vrot.slane %v13297_v20, 2  ;;  %v4919_v1 = vrot.slane %v4839_v58, 2  ;;  %v16695_v17 = vrot.slane %v13310_v6, 2 }
 0x276   : > { %9664 = vmatprep.mubr.msk.f32.mxu0 %vm777_vm0, %v13304_v40  ;;  %v1045_v4 = vadd.f32 %v17100_v12, %v12653_v11  ;;  %v6015_v52 = vrot.slane %v5937_v23, 2  ;;  %v16703_v40 = vrot.slane %v13323_v3, 2  ;;  %v17104_v12 = vld [vmem:[#allocation34_spill] sm:$0xff] }
 0x277   : > { %v13328_v53 = vsel %vm3785_vm8, %v3815_v16, %v3817_v51  ;;  %v13333_v44 = vsel %vm3785_vm8, %v3817_v51, %v16696_v19  ;;  %v13336_v58 = vsel %vm3785_vm8, %v4917_v5, %v4919_v1  ;;  %v13341_v9 = vsel %vm3785_vm8, %v4919_v1, %v16695_v17  ;;  %v9616_v18 = vpop.f32.mrb[80].mxu0 }
 0x278   : > { %17101 = vst [vmem:[#allocation35_spill] sm:$0xff] %v13333_v44  ;;  %17102 = vst [vmem:[#allocation135_spill] sm:$0xff] %v13336_v58  ;;  %v1039_v16 = vadd.f32 %v17104_v12, %v12653_v11  ;;  %v2255_v22 = vadd.f32 %v9616_v18, %v12659_v28  ;;  %v2249_v25 = vpop.f32.mrb[81].mxu0  ;;  %v13348_v51 = vsel %vm3785_vm8, %v6013_v46, %v6015_v52  ;;  %v3572_v18 = vpop.permute.xlu1 %3571 }
 0x279   : > { %17103 = vst [vmem:[#allocation136_spill] sm:$0xff] %v13341_v9  ;;  %17105 = vst [vmem:[#allocation34_spill] sm:$0xff] %v13348_v51  ;;  %v13353_v5 = vsel %vm3785_vm8, %v6015_v52, %v16703_v40  ;;  %v2250_v1 = vadd.f32 %v12659_v28, %v2249_v25  ;;  %v2380_v23 = vmul.f32 %v12671_v27, %v1045_v4  ;;  %v3568_v9 = vpop.permute.xlu0 %3567  ;;  %v3659_v46 = vrot.slane %v3572_v18, 6  ;;  %v17107_v52 = vld [vmem:[#allocation37_spill] sm:$0xff]  ;;  %v13365_v25 = vld [vmem:[%s16987_s0 + $0x18] sm:$0xff] }
 0x27a   : > { %17106 = vst [vmem:[#allocation137_spill] sm:$0xff] %v13353_v5  ;;  %v2346_v17 = vmul.f32 %v12669_v48, %v2255_v22  ;;  %v2379_v12 = vmul.f32 %v12671_v27, %v1039_v16  ;;  %v3657_v51 = vrot.slane %v3568_v9, 6  ;;  %v1057_v40 = vadd.f32 %v17107_v52, %v12653_v11  ;;  %9788 = vmatprep.subr.mxu1 %v13365_v25  ;;  %v17110_v9 = vld [vmem:[#allocation68_spill] sm:$0xff] }
 0x27b   : > { %v2345_v19 = vmul.f32 %v12669_v48, %v2250_v1  ;;  %v17113_v18 = vld [vmem:[#allocation36_spill] sm:$0xff] }
 0x27c   : > { %v2412_v58 = vadd.f32 %v2380_v23, %v2346_v17  ;;  %v13368_v22 = vsel %vm3621_vm4, %v3655_v36, %v3657_v51  ;;  %v13371_v4 = vsel %vm3621_vm4, %v3657_v51, %v3659_v46  ;;  %v1051_v52 = vadd.f32 %v17113_v18, %v12653_v11 }
 0x27d   : > { %v2411_v38 = vadd.f32 %v2379_v12, %v2345_v19  ;;  %v2382_v5 = vmul.f32 %v12671_v27, %v1057_v40 }
 0x27e   : > { %v2493_v24 = vrot.slane %v2412_v58, 7 }
 0x27f   : > { %v2491_v57 = vrot.slane %v2411_v38, 7 }
 0x281   : > { %v13374_v17 = vsel %vm2459_vm6, %v2489_v47, %v2491_v57  ;;  %v13377_v19 = vsel %vm2459_vm6, %v2491_v57, %v2493_v24 }
 0x282   : > { %17108 = vst [vmem:[#allocation37_spill] sm:$0xff] %v13374_v17  ;;  %17109 = vst [vmem:[#allocation138_spill] sm:$0xff] %v13377_v19  ;;  %v2800_v38 = vmul.f32 %v12586_v30, %v13374_v17  ;;  %v2853_v58 = vrot.slane %v13374_v17, 1  ;;  %v2801_v36 = vmul.f32 %v17110_v9, %v13377_v19  ;;  %v2855_v16 = vrot.slane %v13377_v19, 1 }
 0x283   : > { %v3736_v51 = vmul.f32 %v13368_v22, %v13374_v17  ;;  %v13390_v47 = vmul.f32 %v13371_v4, %v13377_v19  ;;  %v4841_v23 = vmul.f32 %v13276_v31, %v13374_v17  ;;  %v13403_v12 = vmul.f32 %v13279_v61, %v13377_v19 }
 0x284   : > { %9717 = vmatprep.mubr.msk.f32.mxu1 %vm777_vm0, %v2800_v38  ;;  %v13394_v57 = vsel %vm2818_vm7, %v2851_v21, %v2853_v58  ;;  %v13397_v1 = vsel %vm2818_vm7, %v2853_v58, %v2855_v16  ;;  %v5939_v40 = vmul.f32 %v13199_v62, %v13374_v17  ;;  %v3576_v17 = vpop.permute.xlu0 %3575 }
 0x285   : > { %17111 = vst [vmem:[#allocation139_spill] sm:$0xff] %v13394_v57  ;;  %17112 = vst [vmem:[#allocation140_spill] sm:$0xff] %v13397_v1  ;;  %v9619_v9 = vpop.f32.mrb[82].mxu0  ;;  %9665 = vmatmul.mubr.msk.f32.gmra.mrb[112].mxu0 %vm777_vm0, %v13394_v57  ;;  %9718 = vmatmul.mubr.msk.f32.gmra.mrb[18].mxu1 %vm777_vm0, %v2801_v36  ;;  %v3821_v21 = vrot.slane %v3736_v51, 2  ;;  %v3823_v38 = vrot.slane %v13390_v47, 2  ;;  %v4923_v37 = vrot.slane %v4841_v23, 2 }
 0x286   : > { %v2265_v58 = vadd.f32 %v9619_v9, %v12659_v28  ;;  %v2259_v30 = vpop.f32.mrb[83].mxu0  ;;  %9667 = vmatprep.mubr.msk.f32.mxu0 %vm777_vm0, %v13397_v1  ;;  %v4925_v18 = vrot.slane %v13403_v12, 2  ;;  %v17114_v57 = vrot.slane %v13297_v20, 2  ;;  %v5940_v9 = vmul.f32 %v13202_v49, %v13377_v19  ;;  %v13440_v1 = vpop.permute.xlu1 %3579 }
 0x287   : > { %v2260_v44 = vadd.f32 %v12659_v28, %v2259_v30  ;;  %v13425_v51 = vsel %vm3785_vm8, %v3821_v21, %v3823_v38  ;;  %v17115_v23 = vrot.slane %v13310_v6, 2  ;;  %v6019_v62 = vrot.slane %v5939_v40, 2 }
 0x288   : > { %v13422_v36 = vsel %vm3785_vm8, %v17114_v57, %v3821_v21  ;;  %v2348_v47 = vmul.f32 %v12669_v48, %v2265_v58  ;;  %v13436_v30 = vsel %vm3785_vm8, %v4923_v37, %v4925_v18  ;;  %v2381_v20 = vmul.f32 %v12671_v27, %v1051_v52 }
 0x289   : > { %v13433_v12 = vsel %vm3785_vm8, %v17115_v23, %v4923_v37  ;;  %17117 = vst [vmem:[#allocation141_spill] sm:$0xff] %v13436_v30  ;;  %v2347_v57 = vmul.f32 %v12669_v48, %v2260_v44  ;;  %v6021_v21 = vrot.slane %v5940_v9, 2  ;;  %v17118_v58 = vrot.slane %v13323_v3, 2 }
 0x28a   : > { %17116 = vst [vmem:[#allocation36_spill] sm:$0xff] %v13433_v12  ;;  %v13442_v49 = vadd.f32 %v2382_v5, %v2348_v47  ;;  %v3663_v23 = vrot.slane %v13440_v1, 6  ;;  %v3661_v37 = vrot.slane %v3576_v17, 6 }
 0x28b   : > { %v13447_v6 = vsel %vm3785_vm8, %v17118_v58, %v6019_v62  ;;  %v2413_v30 = vadd.f32 %v2381_v20, %v2347_v57  ;;  %v13451_v40 = vsel %vm3785_vm8, %v6019_v62, %v6021_v21 }
 0x28c   : > { %17119 = vst [vmem:[#allocation142_spill] sm:$0xff] %v13447_v6  ;;  %17120 = vst [vmem:[#allocation143_spill] sm:$0xff] %v13451_v40  ;;  %v2497_v44 = vrot.slane %v13442_v49, 7  ;;  %v13455_v9 = vsel %vm3621_vm4, %v3659_v46, %v3661_v37  ;;  %v13458_v5 = vsel %vm3621_vm4, %v3661_v37, %v3663_v23  ;;  %v17125_v37 = vld [vmem:[#allocation38_spill] sm:$0xff]  ;;  %v17126_v40 = vld [vmem:[#allocation39_spill] sm:$0xff] }
 0x28d   : > { %v2495_v52 = vrot.slane %v2413_v30, 7  ;;  %v1069_v6 = vadd.f32 %v17126_v40, %v12653_v11 }
 0x28f   : > { %v13461_v3 = vsel %vm2459_vm6, %v2493_v24, %v2495_v52  ;;  %v13464_v47 = vsel %vm2459_vm6, %v2495_v52, %v2497_v44  ;;  %v1063_v52 = vadd.f32 %v17125_v37, %v12653_v11 }
 0x290   : > { %17121 = vst [vmem:[#allocation144_spill] sm:$0xff] %v13461_v3  ;;  %17122 = vst [vmem:[#allocation145_spill] sm:$0xff] %v13464_v47  ;;  %v2802_v17 = vmul.f32 %v12599_v34, %v13461_v3  ;;  %v2857_v1 = vrot.slane %v13461_v3, 1  ;;  %v2803_v30 = vmul.f32 %v12591_v59, %v13464_v47  ;;  %v2859_v46 = vrot.slane %v13464_v47, 1 }
 0x291   : > { %v3738_v62 = vmul.f32 %v13455_v9, %v13461_v3  ;;  %v13476_v24 = vmul.f32 %v13458_v5, %v13464_v47  ;;  %v4843_v49 = vmul.f32 %v13368_v22, %v13461_v3  ;;  %v13489_v58 = vmul.f32 %v13371_v4, %v13464_v47 }
 0x292   : > { %9720 = vmatprep.mubr.msk.f32.mxu1 %vm777_vm0, %v2802_v17  ;;  %v13480_v20 = vsel %vm2818_vm7, %v2855_v16, %v2857_v1  ;;  %v13483_v57 = vsel %vm2818_vm7, %v2857_v1, %v2859_v46  ;;  %v5941_v37 = vmul.f32 %v13276_v31, %v13461_v3  ;;  %v13506_v40 = vmul.f32 %v13279_v61, %v13464_v47 }
 0x293   : > { %17123 = vst [vmem:[#allocation146_spill] sm:$0xff] %v13480_v20  ;;  %17124 = vst [vmem:[#allocation147_spill] sm:$0xff] %v13483_v57  ;;  %9668 = vmatmul.mubr.msk.f32.gmra.mrb[114].mxu0 %vm777_vm0, %v13480_v20  ;;  %9721 = vmatmul.mubr.msk.f32.gmra.mrb[20].mxu1 %vm777_vm0, %v2803_v30  ;;  %v3825_v16 = vrot.slane %v3738_v62, 2  ;;  %v16724_v17 = vrot.slane %v13476_v24, 2  ;;  %v9622_v1 = vpop.f32.mrb[84].mxu0  ;;  %v4927_v12 = vrot.slane %v4843_v49, 2  ;;  %v2384_v34 = vmul.f32 %v12671_v27, %v1069_v6 }
 0x294   : > { %9670 = vmatprep.mubr.msk.f32.mxu0 %vm777_vm0, %v13483_v57  ;;  %v2275_v20 = vadd.f32 %v9622_v1, %v12659_v28  ;;  %v2269_v30 = vpop.f32.mrb[85].mxu0  ;;  %v17129_v31 = vrot.slane %v13489_v58, 2  ;;  %v6023_v1 = vrot.slane %v5941_v37, 2  ;;  %v6025_v47 = vrot.slane %v13506_v40, 2  ;;  %v17133_v40 = vld [vmem:[#allocation40_spill] sm:$0xff] }
 0x295   : > { %v13510_v62 = vsel %vm3785_vm8, %v3823_v38, %v3825_v16  ;;  %v13515_v57 = vsel %vm3785_vm8, %v3825_v16, %v16724_v17  ;;  %v2270_v49 = vadd.f32 %v12659_v28, %v2269_v30  ;;  %v13519_v59 = vsel %vm3785_vm8, %v4925_v18, %v4927_v12  ;;  %v3588_v18 = vpop.permute.xlu1 %3587  ;;  %v3584_v30 = vpop.permute.xlu0 %3583 }
 0x296   : > { %17127 = vst [vmem:[#allocation38_spill] sm:$0xff] %v13515_v57  ;;  %17128 = vst [vmem:[#allocation39_spill] sm:$0xff] %v13519_v59  ;;  %v13524_v61 = vsel %vm3785_vm8, %v4927_v12, %v17129_v31  ;;  %v2350_v38 = vmul.f32 %v12669_v48, %v2275_v20  ;;  %v2383_v16 = vmul.f32 %v12671_v27, %v1063_v52  ;;  %v3667_v37 = vrot.slane %v3588_v18, 6  ;;  %v17134_v52 = vld [vmem:[#allocation41_spill] sm:$0xff] }
 0x297   : > { %17130 = vst [vmem:[#allocation148_spill] sm:$0xff] %v13524_v61  ;;  %v2349_v17 = vmul.f32 %v12669_v48, %v2270_v49  ;;  %v13532_v28 = vsel %vm3785_vm8, %v6021_v21, %v6023_v1  ;;  %v13535_v12 = vsel %vm3785_vm8, %v6023_v1, %v6025_v47  ;;  %v3665_v31 = vrot.slane %v3584_v30, 6 }
 0x298   : > { %17131 = vst [vmem:[#allocation149_spill] sm:$0xff] %v13532_v28  ;;  %v2416_v59 = vadd.f32 %v2384_v34, %v2350_v38  ;;  %17132 = vst [vmem:[#allocation150_spill] sm:$0xff] %v13535_v12  ;;  %v1075_v3 = vadd.f32 %v17133_v40, %v12653_v11  ;;  %v1081_v49 = vadd.f32 %v17134_v52, %v12653_v11  ;;  %v13582_v52 = vld [vmem:[%s17020_s7] ss:$0 sm:$0xff]  ;;  %v17139_v57 = vrot.slane %v13476_v24, 2 }
 0x299   : > { %v2415_v6 = vadd.f32 %v2383_v16, %v2349_v17  ;;  %v13542_v21 = vsel %vm3621_vm4, %v3663_v23, %v3665_v31  ;;  %v13545_v28 = vsel %vm3621_vm4, %v3665_v31, %v3667_v37 }
 0x29a   : > { %v2501_v61 = vrot.slane %v2416_v59, 7  ;;  %v2385_v40 = vmul.f32 %v12671_v27, %v1075_v3 }
 0x29b   : > { %v2499_v20 = vrot.slane %v2415_v6, 7 }
 0x29d   : > { %v13548_v34 = vsel %vm2459_vm6, %v2497_v44, %v2499_v20  ;;  %v13551_v1 = vsel %vm2459_vm6, %v2499_v20, %v2501_v61 }
 0x29e   : > { %17135 = vst [vmem:[#allocation40_spill] sm:$0xff] %v13548_v34  ;;  %17136 = vst [vmem:[#allocation41_spill] sm:$0xff] %v13551_v1  ;;  %v2804_v59 = vmul.f32 %v12614_v56, %v13548_v34  ;;  %v2861_v17 = vrot.slane %v13548_v34, 1  ;;  %v2805_v38 = vmul.f32 %v12604_v42, %v13551_v1  ;;  %v2863_v23 = vrot.slane %v13551_v1, 1 }
 0x29f   : > { %v3740_v16 = vmul.f32 %v13542_v21, %v13548_v34  ;;  %v13563_v44 = vmul.f32 %v13545_v28, %v13551_v1  ;;  %v4845_v6 = vmul.f32 %v13455_v9, %v13548_v34  ;;  %v13576_v20 = vmul.f32 %v13458_v5, %v13551_v1 }
 0x2a0   : > { %v9625_v18 = vpop.f32.mrb[86].mxu0  ;;  %9723 = vmatprep.mubr.msk.f32.mxu1 %vm777_vm0, %v2804_v59  ;;  %v13567_v30 = vsel %vm2818_vm7, %v2859_v46, %v2861_v17  ;;  %v13570_v31 = vsel %vm2818_vm7, %v2861_v17, %v2863_v23  ;;  %v2386_v42 = vmul.f32 %v12671_v27, %v1081_v49  ;;  %v5943_v49 = vmul.f32 %v13368_v22, %v13548_v34 }
 0x2a1   : > { %17137 = vst [vmem:[#allocation151_spill] sm:$0xff] %v13567_v30  ;;  %17138 = vst [vmem:[#allocation152_spill] sm:$0xff] %v13570_v31  ;;  %v2285_v46 = vadd.f32 %v13582_v52, %v9625_v18  ;;  %v2279_v59 = vpop.f32.mrb[87].mxu0  ;;  %9671 = vmatmul.mubr.msk.f32.gmra.mrb[116].mxu0 %vm777_vm0, %v13567_v30  ;;  %9724 = vmatmul.mubr.msk.f32.gmra.mrb[22].mxu1 %vm777_vm0, %v2805_v38  ;;  %v3829_v17 = vrot.slane %v3740_v16, 2  ;;  %v3831_v12 = vrot.slane %v13563_v44, 2  ;;  %v4931_v56 = vrot.slane %v4845_v6, 2 }
 0x2a2   : > { %v2280_v3 = vadd.f32 %v13582_v52, %v2279_v59  ;;  %9673 = vmatprep.mubr.msk.f32.mxu0 %vm777_vm0, %v13570_v31  ;;  %v4933_v19 = vrot.slane %v13576_v20, 2  ;;  %v17140_v44 = vrot.slane %v13489_v58, 2  ;;  %v5944_v24 = vmul.f32 %v13371_v4, %v13551_v1  ;;  %v17157_v1 = vld [vmem:[#allocation44_spill] sm:$0xff] }
 0x2a3   : > { %v2352_v18 = vmul.f32 %v12669_v48, %v2285_v46  ;;  %v13598_v30 = vsel %vm3785_vm8, %v17139_v57, %v3829_v17  ;;  %v13601_v38 = vsel %vm3785_vm8, %v3829_v17, %v3831_v12  ;;  %v13616_v57 = vpop.permute.xlu1 %3595  ;;  %v3592_v46 = vpop.permute.xlu0 %3591  ;;  %v6027_v17 = vrot.slane %v5943_v49, 2 }
 0x2a4   : > { %v2351_v16 = vmul.f32 %v12669_v48, %v2280_v3  ;;  %v13609_v6 = vsel %vm3785_vm8, %v17140_v44, %v4931_v56  ;;  %v13612_v20 = vsel %vm3785_vm8, %v4931_v56, %v4933_v19  ;;  %v3671_v22 = vrot.slane %v13616_v57, 6 }
 0x2a5   : > { %17141 = vst [vmem:[#allocation153_spill] sm:$0xff] %v13609_v6  ;;  %17142 = vst [vmem:[#allocation154_spill] sm:$0xff] %v13612_v20  ;;  %v13618_v59 = vadd.f32 %v2386_v42, %v2352_v18  ;;  %v3669_v3 = vrot.slane %v3592_v46, 6  ;;  %v6029_v58 = vrot.slane %v5944_v24, 2  ;;  %v13623_v6 = vsel %vm3785_vm8, %v6025_v47, %v6027_v17 }
 0x2a6   : > { %v2417_v31 = vadd.f32 %v2385_v40, %v2351_v16  ;;  %17143 = vst [vmem:[#allocation155_spill] sm:$0xff] %v13623_v6 }
 0x2a7   : > { %v2505_v44 = vrot.slane %v13618_v59, 7  ;;  %v13626_v20 = vsel %vm3785_vm8, %v6027_v17, %v6029_v58  ;;  %v13629_v4 = vsel %vm3621_vm4, %v3667_v37, %v3669_v3  ;;  %v13632_v42 = vsel %vm3621_vm4, %v3669_v3, %v3671_v22 }
 0x2a8   : > { %v2503_v56 = vrot.slane %v2417_v31, 7  ;;  %17144 = vst [vmem:[#allocation156_spill] sm:$0xff] %v13626_v20  ;;  %v17149_v20 = vld [vmem:[#allocation42_spill] sm:$0xff] }
 0x2a9   : > { %v1087_v6 = vadd.f32 %v17149_v20, %v12653_v11 }
 0x2aa   : > { %v13635_v18 = vsel %vm2459_vm6, %v2501_v61, %v2503_v56  ;;  %v13638_v40 = vsel %vm2459_vm6, %v2503_v56, %v2505_v44 }
 0x2ab   : > { %17145 = vst [vmem:[#allocation157_spill] sm:$0xff] %v13635_v18  ;;  %17146 = vst [vmem:[#allocation158_spill] sm:$0xff] %v13638_v40  ;;  %v2806_v47 = vmul.f32 %v12624_v7, %v13635_v18  ;;  %v2865_v31 = vrot.slane %v13635_v18, 1  ;;  %v2807_v49 = vmul.f32 %v12618_v33, %v13638_v40  ;;  %v2867_v37 = vrot.slane %v13638_v40, 1 }
 0x2ac   : > { %v3742_v16 = vmul.f32 %v13629_v4, %v13635_v18  ;;  %v13650_v61 = vmul.f32 %v13632_v42, %v13638_v40  ;;  %v4847_v46 = vmul.f32 %v13542_v21, %v13635_v18  ;;  %v13663_v59 = vmul.f32 %v13545_v28, %v13638_v40 }
 0x2ad   : > { %9726 = vmatprep.mubr.msk.f32.mxu1 %vm777_vm0, %v2806_v47  ;;  %v13654_v24 = vsel %vm2818_vm7, %v2863_v23, %v2865_v31  ;;  %v13657_v57 = vsel %vm2818_vm7, %v2865_v31, %v2867_v37  ;;  %v5945_v47 = vmul.f32 %v13455_v9, %v13635_v18  ;;  %v13676_v31 = vmul.f32 %v13458_v5, %v13638_v40 }
 0x2ae   : > { %17147 = vst [vmem:[#allocation159_spill] sm:$0xff] %v13654_v24  ;;  %17148 = vst [vmem:[#allocation160_spill] sm:$0xff] %v13657_v57  ;;  %9674 = vmatmul.mubr.msk.f32.gmra.mrb[118].mxu0 %vm777_vm0, %v13654_v24  ;;  %9727 = vmatmul.mubr.msk.f32.gmra.mrb[24].mxu1 %vm777_vm0, %v2807_v49  ;;  %v3833_v17 = vrot.slane %v3742_v16, 2  ;;  %v4935_v23 = vrot.slane %v4847_v46, 2  ;;  %v17150_v49 = vld [vmem:[#allocation43_spill] sm:$0xff]  ;;  %v17151_v46 = vrot.slane %v13650_v61, 2 }
 0x2af   : > { %9676 = vmatprep.mubr.msk.f32.mxu0 %vm777_vm0, %v13657_v57  ;;  %v1093_v16 = vadd.f32 %v17150_v49, %v12653_v11  ;;  %v9628_v57 = vpop.f32.mrb[88].mxu0  ;;  %v17153_v5 = vrot.slane %v13663_v59, 2  ;;  %v6031_v20 = vrot.slane %v5945_v47, 2  ;;  %v16751_v49 = vrot.slane %v13676_v31, 2 }
 0x2b0   : > { %v13683_v3 = vsel %vm3785_vm8, %v3831_v12, %v3833_v17  ;;  %v13688_v56 = vsel %vm3785_vm8, %v3833_v17, %v17151_v46  ;;  %v13691_v9 = vsel %vm3785_vm8, %v4933_v19, %v4935_v23  ;;  %v2295_v12 = vadd.f32 %v13582_v52, %v9628_v57  ;;  %v2289_v33 = vpop.f32.mrb[89].mxu0  ;;  %v3604_v57 = vpop.permute.xlu1 %3603 }
 0x2b1   : > { %17152 = vst [vmem:[#allocation42_spill] sm:$0xff] %v13691_v9  ;;  %v13696_v24 = vsel %vm3785_vm8, %v4935_v23, %v17153_v5  ;;  %v2290_v7 = vadd.f32 %v13582_v52, %v2289_v33  ;;  %v13702_v17 = vsel %vm3785_vm8, %v6029_v58, %v6031_v20  ;;  %v13707_v19 = vsel %vm3785_vm8, %v6031_v20, %v16751_v49  ;;  %v17158_v49 = vld [vmem:[#allocation45_spill] sm:$0xff] }
 0x2b2   : > { %17154 = vst [vmem:[#allocation43_spill] sm:$0xff] %v13696_v24  ;;  %17155 = vst [vmem:[#allocation161_spill] sm:$0xff] %v13702_v17  ;;  %v2388_v46 = vmul.f32 %v12671_v27, %v1093_v16  ;;  %v2354_v23 = vmul.f32 %v12669_v48, %v2295_v12  ;;  %v2387_v47 = vmul.f32 %v12671_v27, %v1087_v6  ;;  %v3600_v24 = vpop.permute.xlu0 %3599  ;;  %v3675_v33 = vrot.slane %v3604_v57, 6 }
 0x2b3   : > { %17156 = vst [vmem:[#allocation162_spill] sm:$0xff] %v13707_v19  ;;  %v2353_v5 = vmul.f32 %v12669_v48, %v2290_v7  ;;  %v3673_v40 = vrot.slane %v3600_v24, 6  ;;  %v1099_v20 = vadd.f32 %v17157_v1, %v12653_v11  ;;  %v1105_v16 = vadd.f32 %v17158_v49, %v12653_v11 }
 0x2b4   : > { %v2420_v9 = vadd.f32 %v2388_v46, %v2354_v23 }
 0x2b5   : > { %v2419_v58 = vadd.f32 %v2387_v47, %v2353_v5  ;;  %v13718_v12 = vsel %vm3621_vm4, %v3671_v22, %v3673_v40  ;;  %v13721_v6 = vsel %vm3621_vm4, %v3673_v40, %v3675_v33 }
 0x2b6   : > { %v2509_v17 = vrot.slane %v2420_v9, 7 }
 0x2b7   : > { %v2507_v18 = vrot.slane %v2419_v58, 7 }
 0x2b9   : > { %v13724_v7 = vsel %vm2459_vm6, %v2505_v44, %v2507_v18  ;;  %v13727_v24 = vsel %vm2459_vm6, %v2507_v18, %v2509_v17  ;;  %v9631_v46 = vpop.f32.mrb[90].mxu0 }
 0x2ba   : > { %17159 = vst [vmem:[#allocation44_spill] sm:$0xff] %v13727_v24  ;;  %v2808_v9 = vmul.f32 %v12633_v45, %v13724_v7  ;;  %v2869_v1 = vrot.slane %v13724_v7, 1  ;;  %v2809_v49 = vmul.f32 %v12628_v15, %v13727_v24  ;;  %v2871_v22 = vrot.slane %v13727_v24, 1  ;;  %v2299_v23 = vpop.f32.mrb[91].mxu0 }
 0x2bb   : > { %v3744_v40 = vmul.f32 %v13718_v12, %v13724_v7  ;;  %v13739_v44 = vmul.f32 %v13721_v6, %v13727_v24  ;;  %v2305_v18 = vadd.f32 %v13582_v52, %v9631_v46  ;;  %v4849_v57 = vmul.f32 %v13629_v4, %v13724_v7 }
 0x2bc   : > { %9729 = vmatprep.mubr.msk.f32.mxu1 %vm777_vm0, %v2808_v9  ;;  %v13744_v47 = vsel %vm2818_vm7, %v2867_v37, %v2869_v1  ;;  %v13747_v5 = vsel %vm2818_vm7, %v2869_v1, %v2871_v22  ;;  %v2300_v58 = vadd.f32 %v13582_v52, %v2299_v23  ;;  %v4850_v37 = vmul.f32 %v13632_v42, %v13727_v24 }
 0x2bd   : > { %17160 = vst [vmem:[#allocation45_spill] sm:$0xff] %v13744_v47  ;;  %17161 = vst [vmem:[#allocation163_spill] sm:$0xff] %v13747_v5  ;;  %9677 = vmatmul.mubr.msk.f32.gmra.mrb[120].mxu0 %vm777_vm0, %v13744_v47  ;;  %9730 = vmatmul.mubr.msk.f32.gmra.mrb[26].mxu1 %vm777_vm0, %v2809_v49  ;;  %v3837_v46 = vrot.slane %v3744_v40, 2  ;;  %v3839_v19 = vrot.slane %v13739_v44, 2  ;;  %v2389_v9 = vmul.f32 %v12671_v27, %v1099_v20  ;;  %v4939_v23 = vrot.slane %v4849_v57, 2  ;;  %v13772_v20 = vpop.permute.xlu1 %3611 }
 0x2be   : > { %v2390_v1 = vmul.f32 %v12671_v27, %v1105_v16  ;;  %v2356_v15 = vmul.f32 %v12669_v48, %v2305_v18  ;;  %9679 = vmatprep.mubr.msk.f32.mxu0 %vm777_vm0, %v13747_v5  ;;  %v2355_v47 = vmul.f32 %v12669_v48, %v2300_v58  ;;  %v17162_v49 = vrot.slane %v13650_v61, 2  ;;  %v3608_v16 = vpop.permute.xlu0 %3607 }
 0x2bf   : > { %v13770_v44 = vsel %vm3785_vm8, %v3837_v46, %v3839_v19  ;;  %v4941_v45 = vrot.slane %v4850_v37, 2  ;;  %v17164_v18 = vrot.slane %v13663_v59, 2  ;;  %v5947_v61 = vmul.f32 %v13542_v21, %v13724_v7 }
 0x2c0   : > { %v13767_v40 = vsel %vm3785_vm8, %v17162_v49, %v3837_v46  ;;  %17163 = vst [vmem:[#allocation164_spill] sm:$0xff] %v13770_v44  ;;  %v13774_v34 = vadd.f32 %v2390_v1, %v2356_v15  ;;  %v5948_v58 = vmul.f32 %v13545_v28, %v13727_v24  ;;  %v16764_v46 = vrot.slane %v13772_v20, 6 }
 0x2c1   : > { %v13779_v57 = vsel %vm3785_vm8, %v17164_v18, %v4939_v23  ;;  %v3677_v49 = vrot.slane %v3608_v16, 6  ;;  %v2421_v37 = vadd.f32 %v2389_v9, %v2355_v47  ;;  %v13787_v5 = vsel %vm3785_vm8, %v4939_v23, %v4941_v45 }
 0x2c2   : > { %17165 = vst [vmem:[#allocation165_spill] sm:$0xff] %v13779_v57  ;;  %17166 = vst [vmem:[#allocation166_spill] sm:$0xff] %v13787_v5  ;;  %v16762_v15 = vrot.slane %v13774_v34, 7  ;;  %v6035_v1 = vrot.slane %v5947_v61, 2  ;;  %v6037_v59 = vrot.slane %v5948_v58, 2  ;;  %v17167_v18 = vrot.slane %v13676_v31, 2 }
 0x2c3   : > { %v2511_v44 = vrot.slane %v2421_v37, 7  ;;  %v13799_v28 = vsel %vm3621_vm4, %v3675_v33, %v3677_v49  ;;  %v13804_v47 = vsel %vm3621_vm4, %v3677_v49, %v16764_v46 }
 0x2c4   : > { %v13793_v57 = vsel %vm3785_vm8, %v17167_v18, %v6035_v1  ;;  %v13796_v21 = vsel %vm3785_vm8, %v6035_v1, %v6037_v59  ;;  %v17173_v18 = vld [vmem:[#allocation47_spill] sm:$0xff] }
 0x2c5   : > { %17168 = vst [vmem:[#allocation167_spill] sm:$0xff] %v13793_v57  ;;  %17169 = vst [vmem:[#allocation168_spill] sm:$0xff] %v13796_v21  ;;  %v13807_v9 = vsel %vm2459_vm6, %v2509_v17, %v2511_v44  ;;  %v13812_v31 = vsel %vm2459_vm6, %v2511_v44, %v16762_v15  ;;  %v1117_v15 = vadd.f32 %v17173_v18, %v12653_v11  ;;  %v17174_v21 = vld [vmem:[#allocation46_spill] sm:$0xff] }
 0x2c6   : > { %17170 = vst [vmem:[#allocation169_spill] sm:$0xff] %v13807_v9  ;;  %v2810_v23 = vmul.f32 %v12641_v29, %v13807_v9  ;;  %v2873_v16 = vrot.slane %v13807_v9, 1  ;;  %v2811_v33 = vmul.f32 %v12635_v8, %v13812_v31  ;;  %v16763_v61 = vrot.slane %v13812_v31, 1 }
 0x2c7   : > { %v3746_v58 = vmul.f32 %v13799_v28, %v13807_v9  ;;  %v13824_v17 = vmul.f32 %v13804_v47, %v13812_v31  ;;  %v4851_v37 = vmul.f32 %v13718_v12, %v13807_v9  ;;  %v13839_v1 = vmul.f32 %v13721_v6, %v13812_v31 }
 0x2c8   : > { %9732 = vmatprep.mubr.msk.f32.mxu1 %vm777_vm0, %v2810_v23  ;;  %v13828_v44 = vsel %vm2818_vm7, %v2871_v22, %v2873_v16  ;;  %v13833_v49 = vsel %vm2818_vm7, %v2873_v16, %v16763_v61  ;;  %v5949_v46 = vmul.f32 %v13629_v4, %v13807_v9  ;;  %v13854_v18 = vmul.f32 %v13632_v42, %v13812_v31  ;;  %v17182_v9 = vld [vmem:[#allocation49_spill] sm:$0xff] }
 0x2c9   : > { %17171 = vst [vmem:[#allocation170_spill] sm:$0xff] %v13828_v44  ;;  %17172 = vst [vmem:[#allocation171_spill] sm:$0xff] %v13833_v49  ;;  %9680 = vmatmul.mubr.msk.f32.gmra.mrb[122].mxu0 %vm777_vm0, %v13828_v44  ;;  %9733 = vmatmul.mubr.msk.f32.gmra.mrb[28].mxu1 %vm777_vm0, %v2811_v33  ;;  %v3841_v22 = vrot.slane %v3746_v58, 2  ;;  %v16771_v23 = vrot.slane %v13824_v17, 2  ;;  %v4943_v16 = vrot.slane %v4851_v37, 2  ;;  %v1111_v57 = vadd.f32 %v17174_v21, %v12653_v11 }
 0x2ca   : > { %9682 = vmatprep.mubr.msk.f32.mxu0 %vm777_vm0, %v13833_v49  ;;  %v9634_v33 = vpop.f32.mrb[92].mxu0  ;;  %v17176_v42 = vrot.slane %v13839_v1, 2  ;;  %v6039_v21 = vrot.slane %v5949_v46, 2  ;;  %v16778_v44 = vrot.slane %v13854_v18, 2  ;;  %v2392_v8 = vmul.f32 %v12671_v27, %v1117_v15 }
 0x2cb   : > { %v13859_v58 = vsel %vm3785_vm8, %v3839_v19, %v3841_v22  ;;  %v13864_v37 = vsel %vm3785_vm8, %v3841_v22, %v16771_v23  ;;  %v2315_v61 = vadd.f32 %v13582_v52, %v9634_v33  ;;  %v2309_v5 = vpop.f32.mrb[93].mxu0  ;;  %v13868_v4 = vsel %vm3785_vm8, %v4941_v45, %v4943_v16  ;;  %v3620_v22 = vpop.permute.xlu1 %3619 }
 0x2cc   : > { %17175 = vst [vmem:[#allocation47_spill] sm:$0xff] %v13868_v4  ;;  %v13873_v49 = vsel %vm3785_vm8, %v4943_v16, %v17176_v42  ;;  %v2310_v19 = vadd.f32 %v13582_v52, %v2309_v5  ;;  %v3616_v23 = vpop.permute.xlu0 %3615  ;;  %v13880_v29 = vsel %vm3785_vm8, %v6037_v59, %v6039_v21  ;;  %v2391_v45 = vmul.f32 %v12671_v27, %v1111_v57  ;;  %v17181_v57 = vld [vmem:[#allocation48_spill] sm:$0xff] }
 0x2cd   : > { %17177 = vst [vmem:[#allocation46_spill] sm:$0xff] %v13873_v49  ;;  %v2358_v33 = vmul.f32 %v12669_v48, %v2315_v61  ;;  %17178 = vst [vmem:[#allocation172_spill] sm:$0xff] %v13880_v29  ;;  %v3718_v16 = vmul.f32 0.0, %v12690_v35  ;;  %v13888_v5 = vsel %vm3785_vm8, %v6039_v21, %v16778_v44  ;;  %v3719_v15 = vmul.f32 0.0, %v12734_v41 }
 0x2ce   : > { %v2357_v4 = vmul.f32 %v12669_v48, %v2310_v19  ;;  %17179 = vst [vmem:[#allocation173_spill] sm:$0xff] %v13888_v5  ;;  %v13893_v42 = vrot.slane %v3620_v22, 6  ;;  %v3681_v61 = vrot.slane %v3616_v23, 6  ;;  %v1123_v19 = vadd.f32 %v17181_v57, %v12653_v11 }
 0x2cf   : > { %v13890_v46 = vadd.f32 %v2392_v8, %v2358_v33  ;;  %v3786_v35 = vrot.slane %v3718_v16, 2  ;;  %v1129_v24 = vadd.f32 %v17182_v9, %v12653_v11  ;;  %v3787_v21 = vrot.slane %v3719_v15, 2 }
 0x2d0   : > { %17180 = vst [vmem:[#allocation174_spill] sm:$0xff] %v13893_v42  ;;  %v2423_v59 = vadd.f32 %v2391_v45, %v2357_v4  ;;  %v17183_v8 = vrot.slane %v13772_v20, 6  ;;  %v13907_v41 = vsel %vm3621_vm4, %v3681_v61, %v13893_v42  ;;  %v17185_v23 = vrot.slane %v13774_v34, 7 }
 0x2d1   : > { %v2517_v29 = vrot.slane %v13890_v46, 7  ;;  %17184 = vst [vmem:[#allocation48_spill] sm:$0xff] %v13907_v41  ;;  %v2393_v16 = vmul.f32 %v12671_v27, %v1123_v19  ;;  %v3788_v34 = vsel %vm3785_vm8, %v3786_v35, %v3787_v21  ;;  %v17186_v57 = vrot.slane %v13812_v31, 1 }
 0x2d2   : > { %v2515_v49 = vrot.slane %v2423_v59, 7  ;;  %v13903_v33 = vsel %vm3621_vm4, %v17183_v8, %v3681_v61  ;;  %v2394_v44 = vmul.f32 %v12671_v27, %v1129_v24 }
 0x2d4   : > { %v13912_v4 = vsel %vm2459_vm6, %v17185_v23, %v2515_v49  ;;  %v13915_v22 = vsel %vm2459_vm6, %v2515_v49, %v2517_v29 }
 0x2d5   : > { %v2812_v11 = vmul.f32 %v12667_v43, %v13912_v4  ;;  %v2877_v20 = vrot.slane %v13912_v4, 1  ;;  %v2813_v9 = vmul.f32 %v12695_v13, %v13915_v22  ;;  %v2879_v45 = vrot.slane %v13915_v22, 1 }
 0x2d6   : > { %v9637_v46 = vpop.f32.mrb[94].mxu0  ;;  %v3748_v15 = vmul.f32 %v13903_v33, %v13912_v4  ;;  %v13929_v49 = vmul.f32 %v13907_v41, %v13915_v22  ;;  %v4853_v35 = vmul.f32 %v13799_v28, %v13912_v4 }
 0x2d7   : > { %v2325_v61 = vadd.f32 %v13582_v52, %v9637_v46  ;;  %v2319_v59 = vpop.f32.mrb[95].mxu0  ;;  %9735 = vmatprep.mubr.msk.f32.mxu1 %vm777_vm0, %v2812_v11  ;;  %v13936_v8 = vsel %vm2818_vm7, %v17186_v57, %v2877_v20  ;;  %v13939_v19 = vsel %vm2818_vm7, %v2877_v20, %v2879_v45  ;;  %v4854_v57 = vmul.f32 %v13804_v47, %v13915_v22 }
 0x2d8   : > { %17187 = vst [vmem:[#allocation49_spill] sm:$0xff] %v13936_v8  ;;  %17188 = vst [vmem:[#allocation175_spill] sm:$0xff] %v13939_v19  ;;  %v2320_v23 = vadd.f32 %v13582_v52, %v2319_v59  ;;  %9683 = vmatmul.mubr.msk.f32.gmra.mrb[124].mxu0 %vm777_vm0, %v13936_v8  ;;  %9736 = vmatmul.mubr.msk.f32.gmra.mrb[30].mxu1 %vm777_vm0, %v2813_v9  ;;  %v3845_v46 = vrot.slane %v3748_v15, 2  ;;  %v3847_v11 = vrot.slane %v13929_v49, 2  ;;  %v17189_v52 = vrot.slane %v12722_v14, 2 }
 0x2d9   : > { %v2360_v20 = vmul.f32 %v12669_v48, %v2325_v61  ;;  %9685 = vmatprep.mubr.msk.f32.mxu0 %vm777_vm0, %v13939_v19  ;;  %9740 = vmatprep.mubr.msk.f32.mxu1 %vm777_vm0, %v3788_v34  ;;  %v4947_v9 = vrot.slane %v4853_v35, 2  ;;  %v17190_v49 = vrot.slane %v13824_v17, 2  ;;  %v4949_v24 = vrot.slane %v4854_v57, 2  ;;  %v13970_v34 = vld [vmem:[%s16987_s0 + $0x20] sm:$0xff] }
 0x2da   : > { %v3790_v59 = vsel %vm3785_vm8, %v3787_v21, %v17189_v52  ;;  %v2359_v15 = vmul.f32 %v12669_v48, %v2320_v23  ;;  %v13965_v27 = vsel %vm3785_vm8, %v3845_v46, %v3847_v11  ;;  %v17191_v14 = vrot.slane %v13839_v1, 2 }
 0x2db   : > { %v13962_v5 = vsel %vm3785_vm8, %v17190_v49, %v3845_v46  ;;  %v2426_v61 = vadd.f32 %v2394_v44, %v2360_v20  ;;  %v5951_v48 = vmul.f32 %v13718_v12, %v13912_v4  ;;  %v5952_v17 = vmul.f32 %v13721_v6, %v13915_v22 }
 0x2dc   : > { %v13975_v21 = vsel %vm3785_vm8, %v17191_v14, %v4947_v9  ;;  %v2425_v35 = vadd.f32 %v2393_v16, %v2359_v15  ;;  %9741 = vmatmul.mubr.msk.f32.vlgmr.msra.gmra.mrb[0].mxu1 %vm777_vm0, %v3790_v59  ;;  %v13983_v44 = vsel %vm3785_vm8, %v4947_v9, %v4949_v24  ;;  %v17193_v6 = vrot.slane %v13854_v18, 2  ;;  %v17196_v9 = vld [vmem:[#allocation92_spill] sm:$0xff] }
 0x2dd   : > { %v2521_v23 = vrot.slane %v2426_v61, 7  ;;  %9743 = vmatprep.mubr.msk.f32.mxu1 %vm777_vm0, %v12783_v60  ;;  %9789 = vmatpush3.msra.mxu1 %v13365_v25  ;;  %v6043_v1 = vrot.slane %v5951_v48, 2  ;;  %v6045_v46 = vrot.slane %v5952_v17, 2 }
 0x2de   : > { %v2519_v57 = vrot.slane %v2425_v35, 7  ;;  %9838 = vmatprep.subr.mxu1 %v13970_v34 }
 0x2df   : > { %v13990_v12 = vsel %vm2459_vm6, %v2521_v23, 0.0  ;;  %v13995_v16 = vsel %vm3785_vm8, %v17193_v6, %v6043_v1  ;;  %v13998_v20 = vsel %vm3785_vm8, %v6043_v1, %v6045_v46 }
 0x2e0   : > { %17192 = vst [vmem:[#allocation176_spill] sm:$0xff] %v13990_v12  ;;  %17194 = vst [vmem:[#allocation177_spill] sm:$0xff] %v13995_v16  ;;  %v14001_v60 = vsel %vm2459_vm6, %v2517_v29, %v2519_v57  ;;  %v14004_v25 = vsel %vm2459_vm6, %v2519_v57, %v2521_v23  ;;  %9744 = vmatmul.mubr.msk.f32.gmra.mrb[2].mxu1 %vm777_vm0, %v12827_v39  ;;  %v16780_v52 = vrot.slane %v13990_v12, 1  ;;  %v17200_v57 = vld [vmem:[#allocation97_spill] sm:$0xff]  ;;  %v17262_v16 = vld [vmem:[#allocation40_spill] sm:$0xff] }
 0x2e1   : > { %17195 = vst [vmem:[#allocation178_spill] sm:$0xff] %v13998_v20  ;;  %v4857_v18 = vmul.f32 %v13893_v42, %v13990_v12  ;;  %v2881_v59 = vrot.slane %v14001_v60, 1  ;;  %9746 = vmatprep.mubr.msk.f32.mxu1 %vm777_vm0, %v17196_v9  ;;  %v3750_v29 = vmul.f32 %v13893_v42, %v14001_v60  ;;  %v4560_v15 = vrot.slane %v14004_v25, 1  ;;  %v17261_v20 = vld [vmem:[#allocation68_spill] sm:$0xff] }
 0x2e2   : > { %v4855_v49 = vmul.f32 %v13903_v33, %v14001_v60  ;;  %v4856_v39 = vmul.f32 %v13907_v41, %v14004_v25  ;;  %v5953_v6 = vmul.f32 %v13799_v28, %v14001_v60  ;;  %v5954_v9 = vmul.f32 %v13804_v47, %v14004_v25  ;;  %v17259_v41 = vld [vmem:[#allocation69_spill] sm:$0xff] }
 0x2e3   : > { %v4955_v61 = vrot.slane %v4857_v18, 2  ;;  %v14022_v14 = vsel %vm2818_vm7, %v2879_v45, %v2881_v59  ;;  %v3849_v48 = vrot.slane %v3750_v29, 2  ;;  %v14029_v17 = vsel %vm2818_vm7, %v2881_v59, %v4560_v15 }
 0x2e4   : > { %17197 = vst [vmem:[#allocation92_spill] sm:$0xff] %v14022_v14  ;;  %9686 = vmatmul.mubr.msk.f32.gmra.mrb[126].mxu0 %vm777_vm0, %v14022_v14  ;;  %9747 = vmatmul.mubr.msk.f32.gmra.mrb[4].mxu1 %vm777_vm0, %v12875_v10  ;;  %17198 = vst [vmem:[#allocation179_spill] sm:$0xff] %v14029_v17  ;;  %v14034_v35 = vsel %vm2818_vm7, %v4560_v15, %v16780_v52  ;;  %v4951_v23 = vrot.slane %v4855_v49, 2  ;;  %v4953_v1 = vrot.slane %v4856_v39, 2  ;;  %v6047_v15 = vrot.slane %v5953_v6, 2  ;;  %v17229_v6 = vld [vmem:[#allocation54_spill] sm:$0xff] }
 0x2e5   : > { %17199 = vst [vmem:[#allocation180_spill] sm:$0xff] %v14034_v35  ;;  %9749 = vmatprep.mubr.msk.f32.mxu1 %vm777_vm0, %v17200_v57  ;;  %v3850_v45 = vsel %vm3785_vm8, %v3847_v11, %v3849_v48  ;;  %v14056_v11 = vmul.f32 %v13903_v33, %v13990_v12  ;;  %v17225_v48 = vld [vmem:[#allocation90_spill] sm:$0xff]  ;;  %v17241_v52 = vld [vmem:[#allocation61_spill] sm:$0xff]  ;;  %v17263_v12 = vld [vmem:[#allocation71_spill] sm:$0xff] }
 0x2e6   : > { %v14042_v10 = vsel %vm3785_vm8, %v4949_v24, %v4951_v23  ;;  %v14045_v18 = vsel %vm3785_vm8, %v4951_v23, %v4953_v1  ;;  %v14048_v59 = vsel %vm3785_vm8, %v4953_v1, %v4955_v61  ;;  %v6049_v24 = vrot.slane %v5954_v9, 2  ;;  %v17226_v23 = vld [vmem:[#allocation55_spill] sm:$0xff] }
 0x2e7   : > { %17202 = vst [vmem:[#allocation181_spill] sm:$0xff] %v14056_v11  ;;  %v14065_v49 = vsel %vm3785_vm8, %v6045_v46, %v6047_v15  ;;  %v16779_v47 = vrot.slane %v14056_v11, 2  ;;  %v4176_v1 = vmul.f32 %v17226_v23, %v17225_v48 }
 0x2e8   : > { %9750 = vmatmul.mubr.msk.f32.gmra.mrb[6].mxu1 %vm777_vm0, %v12980_v63  ;;  %17204 = vst [vmem:[#allocation183_spill] sm:$0xff] %v14065_v49  ;;  %v14069_v39 = vsel %vm3785_vm8, %v6047_v15, %v6049_v24  ;;  %v17231_v15 = vld [vmem:[#allocation57_spill] sm:$0xff]  ;;  %v17257_v49 = vld [vmem:[#allocation66_spill] sm:$0xff] }
 0x2e9   : > { %9752 = vmatprep.mubr.msk.f32.mxu1 %vm777_vm0, %v12985_v54  ;;  %17205 = vst [vmem:[#allocation184_spill] sm:$0xff] %v14069_v39  ;;  %v14074_v33 = vsel %vm3785_vm8, %v6049_v24, %v16779_v47  ;;  %v17256_v39 = vld [vmem:[#allocation138_spill] sm:$0xff] }
 0x2ea   : > { %17206 = vst [vmem:[#allocation185_spill] sm:$0xff] %v14074_v33  ;;  %v17255_v33 = vld [vmem:[#allocation67_spill] sm:$0xff]  ;;  %v4189_v42 = vmul.f32 %v17257_v49, %v17256_v39 }
 0x2ec   : > { %9753 = vmatmul.mubr.msk.f32.gmra.mrb[8].mxu1 %vm777_vm0, %v13080_v26 }
 0x2ed   : > { %v14052_v29 = vpop.f32.mrb[96].mxu0  ;;  %9755 = vmatprep.mubr.msk.f32.mxu1 %vm777_vm0, %v13083_v2  ;;  %v17210_v2 = vld [vmem:[#allocation35_spill] sm:$0xff] }
 0x2ee   : > { %17201 = vst [vmem:[#allocation97_spill] sm:$0xff] %v14052_v29  ;;  %v14060_v28 = vpop.f32.mrb[97].mxu0 }
 0x2ef   : > { %17203 = vst [vmem:[#allocation182_spill] sm:$0xff] %v14060_v28  ;;  %v17252_v28 = vld [vmem:[#allocation64_spill] sm:$0xff] }
 0x2f0   : > { %9756 = vmatmul.mubr.msk.f32.gmra.mrb[10].mxu1 %vm777_vm0, %v13164_v55 }
 0x2f1   : > { %9758 = vmatprep.mubr.msk.f32.mxu1 %vm777_vm0, %v13167_v50 }
 0x2f4   : > { %9759 = vmatmul.mubr.msk.f32.gmra.mrb[12].mxu1 %vm777_vm0, %v13247_v0  ;;  %v17212_v0 = vld [vmem:[#allocation38_spill] sm:$0xff] }
 0x2f5   : > { %9761 = vmatprep.mubr.msk.f32.mxu1 %vm777_vm0, %v13250_v32 }
 0x2f6   : > { %v14080_v63 = vpop.f32.mrb[98].mxu0 }
 0x2f7   : > { %17207 = vst [vmem:[#allocation186_spill] sm:$0xff] %v14080_v63  ;;  %v14084_v54 = vpop.f32.mrb[99].mxu0 }
 0x2f8   : > { %17208 = vst [vmem:[#allocation187_spill] sm:$0xff] %v14084_v54  ;;  %9762 = vmatmul.mubr.msk.f32.gmra.mrb[14].mxu1 %vm777_vm0, %v13328_v53  ;;  %v17215_v53 = vld [vmem:[#allocation164_spill] sm:$0xff]  ;;  %v17249_v54 = vld [vmem:[#allocation65_spill] sm:$0xff] }
 0x2f9   : > { %9764 = vmatprep.mubr.msk.f32.mxu1 %vm777_vm0, %v17210_v2  ;;  %v17232_v2 = vld [vmem:[#allocation104_spill] sm:$0xff] }
 0x2fc   : > { %9765 = vmatmul.mubr.msk.f32.gmra.mrb[16].mxu1 %vm777_vm0, %v13422_v36  ;;  %v17216_v36 = vld [vmem:[#allocation83_spill] sm:$0xff] }
 0x2fd   : > { %9767 = vmatprep.mubr.msk.f32.mxu1 %vm777_vm0, %v13425_v51  ;;  %v17217_v51 = vld [vmem:[#allocation51_spill] sm:$0xff] }
 0x2fe   : > { %v14094_v26 = vpop.f32.mrb[100].mxu0 }
 0x2ff   : > { %17209 = vst [vmem:[#allocation188_spill] sm:$0xff] %v14094_v26  ;;  %v14098_v55 = vpop.f32.mrb[101].mxu0  ;;  %v17248_v26 = vld [vmem:[#allocation131_spill] sm:$0xff] }
 0x300   : > { %17211 = vst [vmem:[#allocation35_spill] sm:$0xff] %v14098_v55  ;;  %9768 = vmatmul.mubr.msk.f32.gmra.mrb[18].mxu1 %vm777_vm0, %v13510_v62  ;;  %v4172_v62 = vmul.f32 %v17217_v51, %v17216_v36  ;;  %v17234_v36 = vld [vmem:[#allocation111_spill] sm:$0xff]  ;;  %v17247_v55 = vld [vmem:[#allocation62_spill] sm:$0xff]  ;;  %v4186_v63 = vmul.f32 %v17249_v54, %v17248_v26 }
 0x301   : > { %9770 = vmatprep.mubr.msk.f32.mxu1 %vm777_vm0, %v17212_v0  ;;  %v17233_v0 = vld [vmem:[#allocation56_spill] sm:$0xff] }
 0x304   : > { %9771 = vmatmul.mubr.msk.f32.gmra.mrb[20].mxu1 %vm777_vm0, %v13598_v30  ;;  %v17218_v30 = vld [vmem:[#allocation82_spill] sm:$0xff] }
 0x305   : > { %9773 = vmatprep.mubr.msk.f32.mxu1 %vm777_vm0, %v13601_v38  ;;  %v17219_v38 = vld [vmem:[#allocation53_spill] sm:$0xff] }
 0x308   : > { %9774 = vmatmul.mubr.msk.f32.gmra.mrb[22].mxu1 %vm777_vm0, %v13683_v3  ;;  %v4173_v3 = vmul.f32 %v17219_v38, %v17218_v30 }
 0x309   : > { %9776 = vmatprep.mubr.msk.f32.mxu1 %vm777_vm0, %v13688_v56  ;;  %v17220_v56 = vld [vmem:[#allocation85_spill] sm:$0xff] }
 0x30c   : > { %9777 = vmatmul.mubr.msk.f32.gmra.mrb[24].mxu1 %vm777_vm0, %v13767_v40  ;;  %v17221_v40 = vld [vmem:[#allocation50_spill] sm:$0xff] }
 0x30d   : > { %9779 = vmatprep.mubr.msk.f32.mxu1 %vm777_vm0, %v17215_v53  ;;  %v4179_v53 = vmul.f32 %v17233_v0, %v17232_v2 }
 0x30e   : > { %v14114_v50 = vpop.f32.mrb[102].mxu0 }
 0x30f   : > { %17213 = vst [vmem:[#allocation38_spill] sm:$0xff] %v14114_v50  ;;  %v14118_v32 = vpop.f32.mrb[103].mxu0  ;;  %v17245_v50 = vld [vmem:[#allocation63_spill] sm:$0xff] }
 0x310   : > { %17214 = vst [vmem:[#allocation189_spill] sm:$0xff] %v14118_v32  ;;  %9780 = vmatmul.mubr.msk.f32.gmra.mrb[26].mxu1 %vm777_vm0, %v13859_v58  ;;  %v4174_v58 = vmul.f32 %v17221_v40, %v17220_v56 }
 0x311   : > { %9782 = vmatprep.mubr.msk.f32.mxu1 %vm777_vm0, %v13864_v37  ;;  %v14143_v37 = vld [vmem:[%s16987_s0 + $0x28] sm:$0xff] }
 0x314   : > { %9783 = vmatmul.mubr.msk.f32.gmra.mrb[28].mxu1 %vm777_vm0, %v13962_v5  ;;  %v17222_v5 = vld [vmem:[#allocation86_spill] sm:$0xff] }
 0x315   : > { %9785 = vmatprep.mubr.msk.f32.mxu1 %vm777_vm0, %v13965_v27  ;;  %v17223_v27 = vld [vmem:[#allocation52_spill] sm:$0xff] }
 0x316   : > { %v4175_v46 = vmul.f32 %v17223_v27, %v17222_v5 }
 0x318   : > { %9786 = vmatmul.mubr.msk.f32.gmra.mrb[30].mxu1 %vm777_vm0, %v3850_v45  ;;  %v17228_v45 = vld [vmem:[#allocation91_spill] sm:$0xff] }
 0x319   : > { %9790 = vmatprep.mubr.msk.f32.mxu1 %vm777_vm0, %v4172_v62  ;;  %v4177_v9 = vmul.f32 %v17229_v6, %v17228_v45  ;;  %v17235_v62 = vld [vmem:[#allocation59_spill] sm:$0xff] }
 0x31a   : > { %v4180_v30 = vmul.f32 %v17235_v62, %v17234_v36 }
 0x31c   : > { %9791 = vmatmul.mubr.msk.f32.vlgmr.msra.gmra.mrb[0].mxu1 %vm777_vm0, %v4173_v3 }
 0x31d   : > { %9793 = vmatprep.mubr.msk.f32.mxu1 %vm777_vm0, %v4174_v58  ;;  %9839 = vmatpush3.msra.mxu1 %v13970_v34  ;;  %v17230_v34 = vld [vmem:[#allocation103_spill] sm:$0xff]  ;;  %v17237_v58 = vld [vmem:[#allocation112_spill] sm:$0xff] }
 0x31e   : > { %9888 = vmatprep.subr.mxu1 %v14143_v37  ;;  %v4178_v24 = vmul.f32 %v17231_v15, %v17230_v34 }
 0x320   : > { %9794 = vmatmul.mubr.msk.f32.gmra.mrb[2].mxu1 %vm777_vm0, %v4175_v46  ;;  %v17238_v46 = vld [vmem:[#allocation58_spill] sm:$0xff] }
 0x321   : > { %9796 = vmatprep.mubr.msk.f32.mxu1 %vm777_vm0, %v4176_v1  ;;  %v4181_v1 = vmul.f32 %v17238_v46, %v17237_v58 }
 0x324   : > { %v14150_v61 = vpop.f32.mrb[104].mxu0  ;;  %9797 = vmatmul.mubr.msk.f32.gmra.mrb[4].mxu1 %vm777_vm0, %v4177_v9  ;;  %v17240_v9 = vld [vmem:[#allocation30_spill] sm:$0xff] }
 0x325   : > { %17224 = vst [vmem:[#allocation164_spill] sm:$0xff] %v14150_v61  ;;  %v14155_v57 = vpop.f32.mrb[105].mxu0  ;;  %9799 = vmatprep.mubr.msk.f32.mxu1 %vm777_vm0, %v4178_v24  ;;  %v4182_v24 = vmul.f32 %v17241_v52, %v17240_v9  ;;  %v17243_v61 = vld [vmem:[#allocation60_spill] sm:$0xff] }
 0x326   : > { %17227 = vst [vmem:[#allocation83_spill] sm:$0xff] %v14155_v57  ;;  %v17242_v57 = vld [vmem:[#allocation31_spill] sm:$0xff] }
 0x327   : > { %v4183_v32 = vmul.f32 %v17243_v61, %v17242_v57 }
 0x328   : > { %9800 = vmatmul.mubr.msk.f32.gmra.mrb[6].mxu1 %vm777_vm0, %v4179_v53  ;;  %v17244_v53 = vld [vmem:[#allocation123_spill] sm:$0xff] }
 0x329   : > { %9802 = vmatprep.mubr.msk.f32.mxu1 %vm777_vm0, %v4180_v30  ;;  %v4184_v30 = vmul.f32 %v17245_v50, %v17244_v53 }
 0x32c   : > { %9803 = vmatmul.mubr.msk.f32.gmra.mrb[8].mxu1 %vm777_vm0, %v4181_v1 }
 0x32d   : > { %9805 = vmatprep.mubr.msk.f32.mxu1 %vm777_vm0, %v4182_v24  ;;  %v17251_v24 = vld [vmem:[#allocation132_spill] sm:$0xff] }
 0x32e   : > { %v4187_v29 = vmul.f32 %v17252_v28, %v17251_v24 }
 0x32f   : > { %v14171_v3 = vpop.f32.mrb[106].mxu0 }
 0x330   : > { %17236 = vst [vmem:[#allocation51_spill] sm:$0xff] %v14171_v3  ;;  %v14175_v47 = vpop.f32.mrb[107].mxu0  ;;  %9806 = vmatmul.mubr.msk.f32.gmra.mrb[10].mxu1 %vm777_vm0, %v4183_v32  ;;  %v17246_v3 = vld [vmem:[#allocation124_spill] sm:$0xff]  ;;  %v17254_v32 = vld [vmem:[#allocation37_spill] sm:$0xff] }
 0x331   : > { %17239 = vst [vmem:[#allocation82_spill] sm:$0xff] %v14175_v47  ;;  %9808 = vmatprep.mubr.msk.f32.mxu1 %vm777_vm0, %v4184_v30  ;;  %v4185_v47 = vmul.f32 %v17247_v55, %v17246_v3  ;;  %v4188_v30 = vmul.f32 %v17255_v33, %v17254_v32  ;;  %v4192_v33 = vmul.f32 %v17263_v12, %v17262_v16  ;;  %v17271_v12 = vld [vmem:[#allocation72_spill] sm:$0xff] }
 0x334   : > { %9809 = vmatmul.mubr.msk.f32.gmra.mrb[12].mxu1 %vm777_vm0, %v4185_v47  ;;  %v17258_v47 = vld [vmem:[#allocation144_spill] sm:$0xff] }
 0x335   : > { %9811 = vmatprep.mubr.msk.f32.mxu1 %vm777_vm0, %v4186_v63  ;;  %v4190_v63 = vmul.f32 %v17259_v41, %v17258_v47  ;;  %v17267_v41 = vld [vmem:[#allocation157_spill] sm:$0xff] }
 0x336   : > { %v17268_v47 = vld [vmem:[#allocation73_spill] sm:$0xff] }
 0x338   : > { %9812 = vmatmul.mubr.msk.f32.gmra.mrb[14].mxu1 %vm777_vm0, %v4187_v29  ;;  %v17264_v29 = vld [vmem:[#allocation41_spill] sm:$0xff] }
 0x339   : > { %9814 = vmatprep.mubr.msk.f32.mxu1 %vm777_vm0, %v4188_v30  ;;  %v17265_v30 = vld [vmem:[#allocation70_spill] sm:$0xff] }
 0x33a   : > { %v4193_v49 = vmul.f32 %v17265_v30, %v17264_v29  ;;  %v17274_v30 = vld [vmem:[#allocation74_spill] sm:$0xff] }
 0x33c   : > { %v14193_v1 = vpop.f32.mrb[108].mxu0  ;;  %9815 = vmatmul.mubr.msk.f32.gmra.mrb[16].mxu1 %vm777_vm0, %v4189_v42  ;;  %v4194_v42 = vmul.f32 %v17268_v47, %v17267_v41  ;;  %v17275_v47 = vld [vmem:[#allocation169_spill] sm:$0xff] }
 0x33d   : > { %17250 = vst [vmem:[#allocation53_spill] sm:$0xff] %v14193_v1  ;;  %v14197_v11 = vpop.f32.mrb[109].mxu0  ;;  %9817 = vmatprep.mubr.msk.f32.mxu1 %vm777_vm0, %v4190_v63  ;;  %v17260_v1 = vld [vmem:[#allocation145_spill] sm:$0xff]  ;;  %v17270_v63 = vld [vmem:[#allocation158_spill] sm:$0xff] }
 0x33e   : > { %17253 = vst [vmem:[#allocation85_spill] sm:$0xff] %v14197_v11  ;;  %v4191_v11 = vmul.f32 %v17261_v20, %v17260_v1  ;;  %v4195_v20 = vmul.f32 %v17271_v12, %v17270_v63  ;;  %v17276_v41 = vld [vmem:[#allocation77_spill] sm:$0xff]  ;;  %v17278_v12 = vld [vmem:[#allocation79_spill] sm:$0xff] }
 0x340   : > { %9818 = vmatmul.mubr.msk.f32.gmra.mrb[18].mxu1 %vm777_vm0, %v4191_v11  ;;  %v17272_v11 = vld [vmem:[#allocation75_spill] sm:$0xff] }
 0x341   : > { %9820 = vmatprep.mubr.msk.f32.mxu1 %vm777_vm0, %v4192_v33  ;;  %v4196_v33 = vmul.f32 %v17272_v11, %v13724_v7  ;;  %v4200_v11 = vmul.f32 %v17278_v12, %v13912_v4  ;;  %v4203_v12 = vmul.f32 %v12695_v13, %v14004_v25 }
 0x344   : > { %9821 = vmatmul.mubr.msk.f32.gmra.mrb[20].mxu1 %vm777_vm0, %v4193_v49  ;;  %v17277_v49 = vld [vmem:[#allocation76_spill] sm:$0xff] }
 0x345   : > { %9823 = vmatprep.mubr.msk.f32.mxu1 %vm777_vm0, %v4194_v42  ;;  %v4199_v42 = vmul.f32 %v17277_v49, %v13812_v31 }
 0x348   : > { %v14217_v28 = vpop.f32.mrb[110].mxu0  ;;  %9824 = vmatmul.mubr.msk.f32.gmra.mrb[22].mxu1 %vm777_vm0, %v4195_v20  ;;  %v17279_v20 = vld [vmem:[#allocation78_spill] sm:$0xff] }
 0x349   : > { %17266 = vst [vmem:[#allocation50_spill] sm:$0xff] %v14217_v28  ;;  %v14221_v39 = vpop.f32.mrb[111].mxu0  ;;  %9826 = vmatprep.mubr.msk.f32.mxu1 %vm777_vm0, %v4196_v33  ;;  %v17273_v28 = vld [vmem:[#allocation44_spill] sm:$0xff]  ;;  %v4201_v33 = vmul.f32 %v17279_v20, %v13915_v22 }
 0x34a   : > { %17269 = vst [vmem:[#allocation86_spill] sm:$0xff] %v14221_v39  ;;  %v4197_v29 = vmul.f32 %v17274_v30, %v17273_v28  ;;  %v4198_v39 = vmul.f32 %v17276_v41, %v17275_v47  ;;  %v4202_v41 = vmul.f32 %v12667_v43, %v14001_v60  ;;  %v17283_v43 = vld [vmem:[#allocation87_spill] sm:$0xff] }
 0x34c   : > { %9827 = vmatmul.mubr.msk.f32.gmra.mrb[24].mxu1 %vm777_vm0, %v4197_v29 }
 0x34d   : > { %9829 = vmatprep.mubr.msk.f32.mxu1 %vm777_vm0, %v4198_v39 }
 0x350   : > { %9830 = vmatmul.mubr.msk.f32.gmra.mrb[26].mxu1 %vm777_vm0, %v4199_v42  ;;  %v5310_v42 = vld [vmem:[%s16987_s0 + $0x30] sm:$0xff] }
 0x351   : > { %9832 = vmatprep.mubr.msk.f32.mxu1 %vm777_vm0, %v4200_v11  ;;  %v17282_v11 = vld [vmem:[#allocation84_spill] sm:$0xff] }
 0x354   : > { %9833 = vmatmul.mubr.msk.f32.gmra.mrb[28].mxu1 %vm777_vm0, %v4201_v33  ;;  %v17284_v33 = vld [vmem:[#allocation88_spill] sm:$0xff] }
 0x355   : > { %9835 = vmatprep.mubr.msk.f32.mxu1 %vm777_vm0, %v4202_v41  ;;  %v17285_v41 = vld [vmem:[#allocation93_spill] sm:$0xff] }
 0x358   : > { %v14248_v29 = vpop.f32.mrb[112].mxu0  ;;  %9836 = vmatmul.mubr.msk.f32.gmra.mrb[30].mxu1 %vm777_vm0, %v4203_v12  ;;  %v17286_v12 = vld [vmem:[#allocation94_spill] sm:$0xff] }
 0x359   : > { %17280 = vst [vmem:[#allocation52_spill] sm:$0xff] %v14248_v29  ;;  %v14251_v39 = vpop.f32.mrb[113].mxu0  ;;  %9840 = vmatprep.mubr.msk.f32.mxu1 %vm777_vm0, %v17282_v11  ;;  %v17289_v29 = vld [vmem:[#allocation105_spill] sm:$0xff] }
 0x35a   : > { %17281 = vst [vmem:[#allocation90_spill] sm:$0xff] %v14251_v39 }
 0x35c   : > { %9841 = vmatmul.mubr.msk.f32.vlgmr.msra.gmra.mrb[0].mxu1 %vm777_vm0, %v17283_v43  ;;  %v17290_v43 = vld [vmem:[#allocation106_spill] sm:$0xff] }
 0x35d   : > { %9843 = vmatprep.mubr.msk.f32.mxu1 %vm777_vm0, %v17284_v33  ;;  %9889 = vmatpush3.msra.mxu1 %v14143_v37  ;;  %v17291_v33 = vld [vmem:[#allocation113_spill] sm:$0xff]  ;;  %v17292_v37 = vld [vmem:[#allocation114_spill] sm:$0xff] }
 0x35e   : > { %9938 = vmatprep.subr.mxu1 %v5310_v42 }
 0x360   : > { %9844 = vmatmul.mubr.msk.f32.gmra.mrb[2].mxu1 %vm777_vm0, %v17285_v41  ;;  %v17293_v41 = vld [vmem:[#allocation119_spill] sm:$0xff] }
 0x361   : > { %9846 = vmatprep.mubr.msk.f32.mxu1 %vm777_vm0, %v17286_v12  ;;  %v17294_v12 = vld [vmem:[#allocation120_spill] sm:$0xff] }
 0x364   : > { %9847 = vmatmul.mubr.msk.f32.gmra.mrb[4].mxu1 %vm777_vm0, %v17289_v29 }
 0x365   : > { %9849 = vmatprep.mubr.msk.f32.mxu1 %vm777_vm0, %v17290_v43 }
 0x366   : > { %v14270_v11 = vpop.f32.mrb[114].mxu0 }
 0x367   : > { %17287 = vst [vmem:[#allocation55_spill] sm:$0xff] %v14270_v11  ;;  %v14272_v39 = vpop.f32.mrb[115].mxu0  ;;  %v17295_v11 = vld [vmem:[#allocation125_spill] sm:$0xff] }
 0x368   : > { %17288 = vst [vmem:[#allocation91_spill] sm:$0xff] %v14272_v39  ;;  %9850 = vmatmul.mubr.msk.f32.gmra.mrb[6].mxu1 %vm777_vm0, %v17291_v33  ;;  %v17296_v39 = vld [vmem:[#allocation126_spill] sm:$0xff]  ;;  %v17299_v33 = vld [vmem:[#allocation133_spill] sm:$0xff] }
 0x369   : > { %9852 = vmatprep.mubr.msk.f32.mxu1 %vm777_vm0, %v17292_v37  ;;  %v17300_v37 = vld [vmem:[#allocation134_spill] sm:$0xff] }
 0x36c   : > { %9853 = vmatmul.mubr.msk.f32.gmra.mrb[8].mxu1 %vm777_vm0, %v17293_v41  ;;  %v17301_v41 = vld [vmem:[#allocation139_spill] sm:$0xff] }
 0x36d   : > { %9855 = vmatprep.mubr.msk.f32.mxu1 %vm777_vm0, %v17294_v12  ;;  %v17302_v12 = vld [vmem:[#allocation140_spill] sm:$0xff] }
 0x370   : > { %9856 = vmatmul.mubr.msk.f32.gmra.mrb[10].mxu1 %vm777_vm0, %v17295_v11  ;;  %v17303_v11 = vld [vmem:[#allocation146_spill] sm:$0xff] }
 0x371   : > { %9858 = vmatprep.mubr.msk.f32.mxu1 %vm777_vm0, %v17296_v39  ;;  %v17304_v39 = vld [vmem:[#allocation147_spill] sm:$0xff] }
 0x374   : > { %v14290_v29 = vpop.f32.mrb[116].mxu0  ;;  %9859 = vmatmul.mubr.msk.f32.gmra.mrb[12].mxu1 %vm777_vm0, %v17299_v33  ;;  %v17307_v33 = vld [vmem:[#allocation151_spill] sm:$0xff] }
 0x375   : > { %17297 = vst [vmem:[#allocation54_spill] sm:$0xff] %v14290_v29  ;;  %v14292_v43 = vpop.f32.mrb[117].mxu0  ;;  %9861 = vmatprep.mubr.msk.f32.mxu1 %vm777_vm0, %v17300_v37  ;;  %v17308_v37 = vld [vmem:[#allocation152_spill] sm:$0xff] }
 0x376   : > { %17298 = vst [vmem:[#allocation103_spill] sm:$0xff] %v14292_v43 }
 0x378   : > { %9862 = vmatmul.mubr.msk.f32.gmra.mrb[14].mxu1 %vm777_vm0, %v17301_v41  ;;  %v17309_v41 = vld [vmem:[#allocation159_spill] sm:$0xff] }
 0x379   : > { %9864 = vmatprep.mubr.msk.f32.mxu1 %vm777_vm0, %v17302_v12  ;;  %v17310_v12 = vld [vmem:[#allocation160_spill] sm:$0xff] }
 0x37c   : > { %9865 = vmatmul.mubr.msk.f32.gmra.mrb[16].mxu1 %vm777_vm0, %v17303_v11  ;;  %v17311_v11 = vld [vmem:[#allocation45_spill] sm:$0xff] }
 0x37d   : > { %9867 = vmatprep.mubr.msk.f32.mxu1 %vm777_vm0, %v17304_v39  ;;  %v17312_v39 = vld [vmem:[#allocation163_spill] sm:$0xff] }
 0x380   : > { %9868 = vmatmul.mubr.msk.f32.gmra.mrb[18].mxu1 %vm777_vm0, %v17307_v33 }
 0x381   : > { %v14306_v29 = vpop.f32.mrb[118].mxu0  ;;  %9870 = vmatprep.mubr.msk.f32.mxu1 %vm777_vm0, %v17308_v37 }
 0x382   : > { %17305 = vst [vmem:[#allocation57_spill] sm:$0xff] %v14306_v29  ;;  %v14308_v43 = vpop.f32.mrb[119].mxu0  ;;  %v17313_v29 = vld [vmem:[#allocation170_spill] sm:$0xff] }
 0x383   : > { %17306 = vst [vmem:[#allocation104_spill] sm:$0xff] %v14308_v43  ;;  %v17314_v43 = vld [vmem:[#allocation171_spill] sm:$0xff] }
 0x384   : > { %9871 = vmatmul.mubr.msk.f32.gmra.mrb[20].mxu1 %vm777_vm0, %v17309_v41 }
 0x385   : > { %9873 = vmatprep.mubr.msk.f32.mxu1 %vm777_vm0, %v17310_v12 }
 0x388   : > { %9874 = vmatmul.mubr.msk.f32.gmra.mrb[22].mxu1 %vm777_vm0, %v17311_v11 }
 0x389   : > { %9876 = vmatprep.mubr.msk.f32.mxu1 %vm777_vm0, %v17312_v39 }
 0x38c   : > { %9877 = vmatmul.mubr.msk.f32.gmra.mrb[24].mxu1 %vm777_vm0, %v17313_v29 }
 0x38d   : > { %9879 = vmatprep.mubr.msk.f32.mxu1 %vm777_vm0, %v17314_v43  ;;  %v17317_v43 = vld [vmem:[#allocation89_spill] sm:$0xff] }
 0x390   : > { %v14326_v33 = vpop.f32.mrb[120].mxu0  ;;  %9880 = vmatmul.mubr.msk.f32.gmra.mrb[26].mxu1 %vm777_vm0, %v13936_v8  ;;  %v17319_v8 = vld [vmem:[#allocation95_spill] sm:$0xff] }
 0x391   : > { %17315 = vst [vmem:[#allocation56_spill] sm:$0xff] %v14326_v33  ;;  %v14330_v41 = vpop.f32.mrb[121].mxu0  ;;  %9882 = vmatprep.mubr.msk.f32.mxu1 %vm777_vm0, %v13939_v19 }
 0x392   : > { %17316 = vst [vmem:[#allocation111_spill] sm:$0xff] %v14330_v41  ;;  %v5664_v41 = vld [vmem:[%s16987_s0 + $0x38] sm:$0xff] }
 0x394   : > { %9883 = vmatmul.mubr.msk.f32.gmra.mrb[28].mxu1 %vm777_vm0, %v14022_v14  ;;  %v17321_v14 = vld [vmem:[#allocation96_spill] sm:$0xff] }
 0x395   : > { %9885 = vmatprep.mubr.msk.f32.mxu1 %vm777_vm0, %v14029_v17  ;;  %v17325_v17 = vld [vmem:[#allocation108_spill] sm:$0xff] }
 0x398   : > { %9886 = vmatmul.mubr.msk.f32.gmra.mrb[30].mxu1 %vm777_vm0, %v14034_v35  ;;  %v17322_v35 = vld [vmem:[#allocation98_spill] sm:$0xff] }
 0x399   : > { %9890 = vmatprep.mubr.msk.f32.mxu1 %vm777_vm0, %v17317_v43  ;;  %v17323_v43 = vld [vmem:[#allocation99_spill] sm:$0xff] }
 0x39c   : > { %v14342_v33 = vpop.f32.mrb[122].mxu0  ;;  %9891 = vmatmul.mubr.msk.f32.vlgmr.msra.gmra.mrb[0].mxu1 %vm777_vm0, %v17319_v8  ;;  %v17326_v8 = vld [vmem:[#allocation115_spill] sm:$0xff] }
 0x39d   : > { %17318 = vst [vmem:[#allocation59_spill] sm:$0xff] %v14342_v33  ;;  %v14349_v19 = vpop.f32.mrb[123].mxu0  ;;  %9893 = vmatprep.mubr.msk.f32.mxu1 %vm777_vm0, %v17321_v14  ;;  %9939 = vmatpush3.msra.mxu1 %v5310_v42  ;;  %v17324_v33 = vld [vmem:[#allocation107_spill] sm:$0xff] }
 0x39e   : > { %17320 = vst [vmem:[#allocation112_spill] sm:$0xff] %v14349_v19  ;;  %9988 = vmatprep.subr.mxu1 %v5664_v41  ;;  %v17327_v19 = vld [vmem:[#allocation116_spill] sm:$0xff] }
 0x3a0   : > { %9894 = vmatmul.mubr.msk.f32.gmra.mrb[2].mxu1 %vm777_vm0, %v17322_v35  ;;  %v17330_v35 = vld [vmem:[#allocation121_spill] sm:$0xff] }
 0x3a1   : > { %9896 = vmatprep.mubr.msk.f32.mxu1 %vm777_vm0, %v17323_v43  ;;  %v17331_v43 = vld [vmem:[#allocation122_spill] sm:$0xff] }
 0x3a4   : > { %9897 = vmatmul.mubr.msk.f32.gmra.mrb[4].mxu1 %vm777_vm0, %v17324_v33  ;;  %v17332_v33 = vld [vmem:[#allocation127_spill] sm:$0xff] }
 0x3a5   : > { %9899 = vmatprep.mubr.msk.f32.mxu1 %vm777_vm0, %v17325_v17  ;;  %v17333_v17 = vld [vmem:[#allocation128_spill] sm:$0xff] }
 0x3a8   : > { %9900 = vmatmul.mubr.msk.f32.gmra.mrb[6].mxu1 %vm777_vm0, %v17326_v8  ;;  %v17334_v8 = vld [vmem:[#allocation135_spill] sm:$0xff] }
 0x3a9   : > { %9902 = vmatprep.mubr.msk.f32.mxu1 %vm777_vm0, %v17327_v19  ;;  %v17335_v19 = vld [vmem:[#allocation136_spill] sm:$0xff] }
 0x3ab   : > { %v14365_v14 = vpop.f32.mrb[124].mxu0 }
 0x3ac   : > { %17328 = vst [vmem:[#allocation58_spill] sm:$0xff] %v14365_v14  ;;  %v14367_v42 = vpop.f32.mrb[125].mxu0  ;;  %9903 = vmatmul.mubr.msk.f32.gmra.mrb[8].mxu1 %vm777_vm0, %v17330_v35  ;;  %v17338_v35 = vld [vmem:[#allocation36_spill] sm:$0xff] }
 0x3ad   : > { %17329 = vst [vmem:[#allocation30_spill] sm:$0xff] %v14367_v42  ;;  %9905 = vmatprep.mubr.msk.f32.mxu1 %vm777_vm0, %v17331_v43  ;;  %v17339_v43 = vld [vmem:[#allocation141_spill] sm:$0xff] }
 0x3b0   : > { %9906 = vmatmul.mubr.msk.f32.gmra.mrb[10].mxu1 %vm777_vm0, %v17332_v33  ;;  %v17340_v33 = vld [vmem:[#allocation39_spill] sm:$0xff] }
 0x3b1   : > { %9908 = vmatprep.mubr.msk.f32.mxu1 %vm777_vm0, %v17333_v17  ;;  %v17341_v17 = vld [vmem:[#allocation148_spill] sm:$0xff] }
 0x3b4   : > { %9909 = vmatmul.mubr.msk.f32.gmra.mrb[12].mxu1 %vm777_vm0, %v17334_v8  ;;  %v17342_v8 = vld [vmem:[#allocation153_spill] sm:$0xff] }
 0x3b5   : > { %9911 = vmatprep.mubr.msk.f32.mxu1 %vm777_vm0, %v17335_v19  ;;  %v17343_v19 = vld [vmem:[#allocation154_spill] sm:$0xff] }
 0x3b7   : > { %v14381_v14 = vpop.f32.mrb[126].mxu0 }
 0x3b8   : > { %17336 = vst [vmem:[#allocation61_spill] sm:$0xff] %v14381_v14  ;;  %v14383_v42 = vpop.f32.mrb[127].mxu0  ;;  %9912 = vmatmul.mubr.msk.f32.gmra.mrb[14].mxu1 %vm777_vm0, %v17338_v35  ;;  %v17344_v14 = vld [vmem:[#allocation42_spill] sm:$0xff]  ;;  %v17346_v35 = vld [vmem:[#allocation165_spill] sm:$0xff] }
 0x3b9   : > { %17337 = vst [vmem:[#allocation31_spill] sm:$0xff] %v14383_v42  ;;  %9914 = vmatprep.mubr.msk.f32.mxu1 %vm777_vm0, %v17339_v43  ;;  %v17345_v42 = vld [vmem:[#allocation43_spill] sm:$0xff]  ;;  %v17347_v43 = vld [vmem:[#allocation166_spill] sm:$0xff] }
 0x3bc   : > { %9915 = vmatmul.mubr.msk.f32.gmra.mrb[16].mxu1 %vm777_vm0, %v17340_v33  ;;  %v17348_v33 = vld [vmem:[#allocation47_spill] sm:$0xff] }
 0x3bd   : > { %9917 = vmatprep.mubr.msk.f32.mxu1 %vm777_vm0, %v17341_v17  ;;  %v17349_v17 = vld [vmem:[#allocation46_spill] sm:$0xff] }
 0x3c0   : > { %9918 = vmatmul.mubr.msk.f32.gmra.mrb[18].mxu1 %vm777_vm0, %v17342_v8  ;;  %v17364_v8 = vld [vmem:[#allocation77_spill] sm:$0xff] }
 0x3c1   : > { %9920 = vmatprep.mubr.msk.f32.mxu1 %vm777_vm0, %v17343_v19  ;;  %v17365_v19 = vld [vmem:[#allocation79_spill] sm:$0xff] }
 0x3c4   : > { %9921 = vmatmul.mubr.msk.f32.gmra.mrb[20].mxu1 %vm777_vm0, %v17344_v14  ;;  %v5278_v14 = vmul.f32 %v17217_v51, %v17220_v56  ;;  %v5283_v51 = vmul.f32 %v17229_v6, %v17232_v2  ;;  %v5285_v56 = vmul.f32 %v17233_v0, %v17237_v58  ;;  %v17351_v6 = vld [vmem:[#allocation64_spill] sm:$0xff]  ;;  %v17355_v2 = vld [vmem:[#allocation69_spill] sm:$0xff]  ;;  %v17359_v58 = vld [vmem:[#allocation71_spill] sm:$0xff] }
 0x3c5   : > { %9923 = vmatprep.mubr.msk.f32.mxu1 %vm777_vm0, %v17345_v42  ;;  %v17356_v0 = vld [vmem:[#allocation41_spill] sm:$0xff] }
 0x3c8   : > { %9924 = vmatmul.mubr.msk.f32.gmra.mrb[22].mxu1 %vm777_vm0, %v17346_v35  ;;  %v17367_v35 = vld [vmem:[#allocation81_spill] sm:$0xff] }
 0x3c9   : > { %9926 = vmatprep.mubr.msk.f32.mxu1 %vm777_vm0, %v17347_v43  ;;  %v5309_v43 = vmul.f32 0.0, %v12695_v13  ;;  %v17373_v13 = vld [vmem:[#allocation113_spill] sm:$0xff] }
 0x3cc   : > { %9927 = vmatmul.mubr.msk.f32.gmra.mrb[24].mxu1 %vm777_vm0, %v17348_v33  ;;  %v17374_v33 = vld [vmem:[#allocation114_spill] sm:$0xff] }
 0x3cd   : > { %9929 = vmatprep.mubr.msk.f32.mxu1 %vm777_vm0, %v17349_v17  ;;  %v17375_v17 = vld [vmem:[#allocation119_spill] sm:$0xff] }
 0x3d0   : > { %9930 = vmatmul.mubr.msk.f32.gmra.mrb[26].mxu1 %vm777_vm0, %v13975_v21  ;;  %v5279_v21 = vmul.f32 %v17219_v38, %v17222_v5  ;;  %v5284_v38 = vmul.f32 %v17231_v15, %v17234_v36  ;;  %v5287_v5 = vmul.f32 %v17238_v46, %v17242_v57  ;;  %v5291_v57 = vmul.f32 %v17247_v55, %v17251_v24  ;;  %v17353_v15 = vld [vmem:[#allocation67_spill] sm:$0xff]  ;;  %v17357_v36 = vld [vmem:[#allocation68_spill] sm:$0xff] }
 0x3d1   : > { %9932 = vmatprep.mubr.msk.f32.mxu1 %vm777_vm0, %v13983_v44  ;;  %v5280_v44 = vmul.f32 %v17221_v40, %v17225_v48  ;;  %v5286_v40 = vmul.f32 %v17235_v62, %v17240_v9  ;;  %v5289_v48 = vmul.f32 %v17243_v61, %v17246_v3  ;;  %v5297_v62 = vmul.f32 %v17357_v36, %v17356_v0  ;;  %v17358_v3 = vld [vmem:[#allocation157_spill] sm:$0xff]  ;;  %v17360_v9 = vld [vmem:[#allocation70_spill] sm:$0xff]  ;;  %v17362_v24 = vld [vmem:[#allocation72_spill] sm:$0xff] }
 0x3d2   : > { %v5298_v46 = vmul.f32 %v17359_v58, %v17358_v3  ;;  %v17406_v0 = vld [vmem:[#allocation34_spill] sm:$0xff]  ;;  %v17407_v36 = vld [vmem:[#allocation137_spill] sm:$0xff]  ;;  %v17409_v3 = vld [vmem:[#allocation143_spill] sm:$0xff] }
 0x3d3   : > { %v17410_v58 = vld [vmem:[#allocation149_spill] sm:$0xff] }
 0x3d4   : > { %9933 = vmatmul.mubr.msk.f32.gmra.mrb[28].mxu1 %vm777_vm0, %v14042_v10  ;;  %v14429_v10 = vld [vmem:[%s16987_s0 + $0x40] sm:$0xff]  ;;  %s16275_s0 = scalar_lea.vmem %s16558_s21, %s17732_s6 }
 0x3d5   : > { %9935 = vmatprep.mubr.msk.f32.mxu1 %vm777_vm0, %v14045_v18  ;;  %v5281_v18 = vmul.f32 %v17223_v27, %v17228_v45  ;;  %v5288_v27 = vmul.f32 %v17241_v52, %v17244_v53  ;;  %v5292_v52 = vmul.f32 %v17249_v54, %v17254_v32  ;;  %v17350_v45 = vld [vmem:[#allocation138_spill] sm:$0xff]  ;;  %v5296_v54 = vmul.f32 %v17355_v2, %v17262_v16  ;;  %v17404_v2 = vld [vmem:[#allocation129_spill] sm:$0xff] }
 0x3d6   : > { %v5293_v61 = vmul.f32 %v17351_v6, %v17350_v45  ;;  %v5299_v53 = vmul.f32 %v17360_v9, %v17270_v63  ;;  %v5301_v32 = vmul.f32 %v17362_v24, %v17273_v28  ;;  %v5303_v63 = vmul.f32 %v17274_v30, %v13812_v31  ;;  %v17366_v30 = vld [vmem:[#allocation176_spill] sm:$0xff]  ;;  %v17396_v45 = vld [vmem:[#allocation101_spill] sm:$0xff]  ;;  %v17397_v6 = vld [vmem:[#allocation102_spill] sm:$0xff] }
 0x3d7   : > { %v5305_v28 = vmul.f32 %v17277_v49, %v13915_v22  ;;  %v5307_v31 = vmul.f32 %v17279_v20, %v14004_v25  ;;  %v17368_v22 = vld [vmem:[#allocation88_spill] sm:$0xff]  ;;  %v17370_v49 = vld [vmem:[#allocation94_spill] sm:$0xff]  ;;  %v17371_v25 = vld [vmem:[#allocation105_spill] sm:$0xff] }
 0x3d8   : > { %9936 = vmatmul.mubr.msk.f32.gmra.mrb[30].mxu1 %vm777_vm0, %v14048_v59  ;;  %v5282_v59 = vmul.f32 %v17226_v23, %v17230_v34  ;;  %v5290_v23 = vmul.f32 %v17245_v50, %v17248_v26  ;;  %v17352_v34 = vld [vmem:[#allocation144_spill] sm:$0xff]  ;;  %v17354_v50 = vld [vmem:[#allocation66_spill] sm:$0xff]  ;;  %v17412_v9 = vld [vmem:[#allocation155_spill] sm:$0xff] }
 0x3d9   : > { %9940 = vmatprep.mubr.msk.f32.mxu1 %vm777_vm0, %v5278_v14  ;;  %v5294_v26 = vmul.f32 %v17353_v15, %v17352_v34  ;;  %v5295_v55 = vmul.f32 %v17354_v50, %v17260_v1  ;;  %v17361_v1 = vld [vmem:[#allocation73_spill] sm:$0xff]  ;;  %v17372_v20 = vld [vmem:[#allocation106_spill] sm:$0xff]  ;;  %v17376_v14 = vld [vmem:[#allocation120_spill] sm:$0xff] }
 0x3da   : > { %v5300_v16 = vmul.f32 %v17361_v1, %v13724_v7  ;;  %v5304_v7 = vmul.f32 %v17364_v8, %v13912_v4  ;;  %v5308_v4 = vmul.f32 %v17367_v35, %v17366_v30  ;;  %v17399_v34 = vld [vmem:[#allocation110_spill] sm:$0xff]  ;;  %v17400_v15 = vld [vmem:[#allocation117_spill] sm:$0xff]  ;;  %v17402_v50 = vld [vmem:[#allocation32_spill] sm:$0xff] }
 0x3db   : > { %v17414_v1 = vld [vmem:[#allocation161_spill] sm:$0xff]  ;;  %v17416_v24 = vld [vmem:[#allocation167_spill] sm:$0xff]  ;;  %v17421_v8 = vld [vmem:[#allocation178_spill] sm:$0xff] }
 0x3dc   : > { %9941 = vmatmul.mubr.msk.f32.vlgmr.msra.gmra.mrb[0].mxu1 %vm777_vm0, %v5279_v21  ;;  %v17377_v21 = vld [vmem:[#allocation125_spill] sm:$0xff] }
 0x3dd   : > { %9943 = vmatprep.mubr.msk.f32.mxu1 %vm777_vm0, %v5280_v44  ;;  %9989 = vmatpush3.msra.mxu1 %v5664_v41  ;;  %v17363_v41 = vld [vmem:[#allocation75_spill] sm:$0xff]  ;;  %v17378_v44 = vld [vmem:[#allocation126_spill] sm:$0xff] }
 0x3de   : > { %10038 = vmatprep.subr.mxu1 %v14429_v10  ;;  %v5302_v42 = vmul.f32 %v17363_v41, %v17275_v47  ;;  %v5306_v47 = vmul.f32 %v17365_v19, %v14001_v60  ;;  %v17369_v60 = vld [vmem:[#allocation93_spill] sm:$0xff]  ;;  %v17418_v41 = vld [vmem:[#allocation172_spill] sm:$0xff]  ;;  %v17423_v19 = vld [vmem:[#allocation174_spill] sm:$0xff] }
 0x3e0   : > { %9944 = vmatmul.mubr.msk.f32.gmra.mrb[2].mxu1 %vm777_vm0, %v5281_v18  ;;  %v17380_v18 = vld [vmem:[#allocation134_spill] sm:$0xff] }
 0x3e1   : > { %9946 = vmatprep.mubr.msk.f32.mxu1 %vm777_vm0, %v5282_v59  ;;  %v17381_v59 = vld [vmem:[#allocation139_spill] sm:$0xff] }
 0x3e4   : > { %9947 = vmatmul.mubr.msk.f32.gmra.mrb[4].mxu1 %vm777_vm0, %v5283_v51  ;;  %v17382_v51 = vld [vmem:[#allocation140_spill] sm:$0xff] }
 0x3e5   : > { %9949 = vmatprep.mubr.msk.f32.mxu1 %vm777_vm0, %v5284_v38  ;;  %v17383_v38 = vld [vmem:[#allocation146_spill] sm:$0xff] }
 0x3e8   : > { %9950 = vmatmul.mubr.msk.f32.gmra.mrb[6].mxu1 %vm777_vm0, %v5285_v56  ;;  %v17384_v56 = vld [vmem:[#allocation147_spill] sm:$0xff] }
 0x3e9   : > { %9952 = vmatprep.mubr.msk.f32.mxu1 %vm777_vm0, %v5286_v40  ;;  %v17385_v40 = vld [vmem:[#allocation151_spill] sm:$0xff] }
 0x3ec   : > { %9953 = vmatmul.mubr.msk.f32.gmra.mrb[8].mxu1 %vm777_vm0, %v5287_v5  ;;  %v17386_v5 = vld [vmem:[#allocation159_spill] sm:$0xff] }
 0x3ed   : > { %9955 = vmatprep.mubr.msk.f32.mxu1 %vm777_vm0, %v5288_v27  ;;  %v17387_v27 = vld [vmem:[#allocation171_spill] sm:$0xff] }
 0x3f0   : > { %9956 = vmatmul.mubr.msk.f32.gmra.mrb[10].mxu1 %vm777_vm0, %v5289_v48  ;;  %v17388_v48 = vld [vmem:[#allocation49_spill] sm:$0xff] }
 0x3f1   : > { %9958 = vmatprep.mubr.msk.f32.mxu1 %vm777_vm0, %v5290_v23  ;;  %v17390_v23 = vld [vmem:[#allocation92_spill] sm:$0xff] }
 0x3f4   : > { %9959 = vmatmul.mubr.msk.f32.gmra.mrb[12].mxu1 %vm777_vm0, %v5291_v57 }
 0x3f5   : > { %9961 = vmatprep.mubr.msk.f32.mxu1 %vm777_vm0, %v5292_v52  ;;  %v17395_v52 = vld [vmem:[#allocation100_spill] sm:$0xff] }
 0x3f8   : > { %9962 = vmatmul.mubr.msk.f32.gmra.mrb[14].mxu1 %vm777_vm0, %v5293_v61  ;;  %v17398_v61 = vld [vmem:[#allocation109_spill] sm:$0xff] }
 0x3f9   : > { %9964 = vmatprep.mubr.msk.f32.mxu1 %vm777_vm0, %v5294_v26  ;;  %v17401_v26 = vld [vmem:[#allocation118_spill] sm:$0xff] }
 0x3fc   : > { %9965 = vmatmul.mubr.msk.f32.gmra.mrb[16].mxu1 %vm777_vm0, %v5295_v55  ;;  %v17403_v55 = vld [vmem:[#allocation33_spill] sm:$0xff] }
 0x3fd   : > { %9967 = vmatprep.mubr.msk.f32.mxu1 %vm777_vm0, %v5296_v54  ;;  %v17405_v54 = vld [vmem:[#allocation130_spill] sm:$0xff] }
 0x400   : > { %9968 = vmatmul.mubr.msk.f32.gmra.mrb[18].mxu1 %vm777_vm0, %v5297_v62  ;;  %v17408_v62 = vld [vmem:[#allocation142_spill] sm:$0xff] }
 0x401   : > { %9970 = vmatprep.mubr.msk.f32.mxu1 %vm777_vm0, %v5298_v46  ;;  %v17411_v46 = vld [vmem:[#allocation150_spill] sm:$0xff] }
 0x404   : > { %9971 = vmatmul.mubr.msk.f32.gmra.mrb[20].mxu1 %vm777_vm0, %v5299_v53  ;;  %v17413_v53 = vld [vmem:[#allocation156_spill] sm:$0xff] }
 0x405   : > { %9973 = vmatprep.mubr.msk.f32.mxu1 %vm777_vm0, %v5300_v16  ;;  %v17415_v16 = vld [vmem:[#allocation162_spill] sm:$0xff] }
 0x408   : > { %9974 = vmatmul.mubr.msk.f32.gmra.mrb[22].mxu1 %vm777_vm0, %v5301_v32  ;;  %v17417_v32 = vld [vmem:[#allocation168_spill] sm:$0xff] }
 0x409   : > { %9976 = vmatprep.mubr.msk.f32.mxu1 %vm777_vm0, %v5302_v42  ;;  %v17419_v42 = vld [vmem:[#allocation173_spill] sm:$0xff] }
 0x40c   : > { %9977 = vmatmul.mubr.msk.f32.gmra.mrb[24].mxu1 %vm777_vm0, %v5303_v63  ;;  %v17420_v63 = vld [vmem:[#allocation177_spill] sm:$0xff] }
 0x40d   : > { %9979 = vmatprep.mubr.msk.f32.mxu1 %vm777_vm0, %v5304_v7  ;;  %v17422_v7 = vld [vmem:[#allocation48_spill] sm:$0xff] }
 0x410   : > { %9980 = vmatmul.mubr.msk.f32.gmra.mrb[26].mxu1 %vm777_vm0, %v5305_v28  ;;  %v5956_v28 = vmul.f32 0.0, %v17422_v7  ;;  %v17446_v7 = vld [vmem:[#allocation52_spill] sm:$0xff] }
 0x411   : > { %9982 = vmatprep.mubr.msk.f32.mxu1 %vm777_vm0, %v5306_v47  ;;  %v5957_v47 = vmul.f32 0.0, %v17423_v19 }
 0x412   : > { %v6053_v35 = vrot.slane %v5956_v28, 2 }
 0x414   : > { %9983 = vmatmul.mubr.msk.f32.gmra.mrb[28].mxu1 %vm777_vm0, %v5307_v31  ;;  %v17424_v31 = vld [vmem:[#allocation183_spill] sm:$0xff] }
 0x415   : > { %9985 = vmatprep.mubr.msk.f32.mxu1 %vm777_vm0, %v5308_v4  ;;  %v6055_v4 = vrot.slane %v5957_v47, 2  ;;  %v17447_v47 = vld [vmem:[#allocation90_spill] sm:$0xff] }
 0x418   : > { %9986 = vmatmul.mubr.msk.f32.gmra.mrb[30].mxu1 %vm777_vm0, %v5309_v43  ;;  %v17426_v43 = vld [vmem:[#allocation185_spill] sm:$0xff] }
 0x419   : > { %9990 = vmatprep.mubr.msk.f32.mxu1 %vm777_vm0, %v17368_v22  ;;  %v17427_v22 = vld [vmem:[#allocation181_spill] sm:$0xff] }
 0x41c   : > { %9991 = vmatmul.mubr.msk.f32.vlgmr.msra.gmra.mrb[0].mxu1 %vm777_vm0, %v17369_v60  ;;  %v17428_v60 = vrot.slane %v17427_v22, 2 }
 0x41d   : > { %9993 = vmatprep.mubr.msk.f32.mxu1 %vm777_vm0, %v17370_v49  ;;  %10039 = vmatpush3.msra.mxu1 %v14429_v10  ;;  %v17379_v10 = vld [vmem:[#allocation133_spill] sm:$0xff] }
 0x41e   : > { %v6054_v49 = vsel %vm3785_vm8, %v17428_v60, %v6053_v35  ;;  %v17448_v60 = vld [vmem:[#allocation55_spill] sm:$0xff] }
 0x420   : > { %9994 = vmatmul.mubr.msk.f32.gmra.mrb[2].mxu1 %vm777_vm0, %v17371_v25  ;;  %v6056_v25 = vsel %vm3785_vm8, %v6053_v35, %v6055_v4 }
 0x421   : > { %9996 = vmatprep.mubr.msk.f32.mxu1 %vm777_vm0, %v17372_v20  ;;  %v16795_v20 = vmov 1.0  }
 0x422   : > { %6481 = vmatprep.mubr.f32.mxu0 %v16795_v20 }
 0x424   : > { %9997 = vmatmul.mubr.msk.f32.gmra.mrb[4].mxu1 %vm777_vm0, %v17373_v13 }
 0x425   : > { %9999 = vmatprep.mubr.msk.f32.mxu1 %vm777_vm0, %v17374_v33  ;;  %v17429_v33 = vld [vmem:[#allocation97_spill] sm:$0xff] }
 0x428   : > { %10000 = vmatmul.mubr.msk.f32.gmra.mrb[6].mxu1 %vm777_vm0, %v17375_v17 }
 0x429   : > { %10002 = vmatprep.mubr.msk.f32.mxu1 %vm777_vm0, %v17376_v14 }
 0x42c   : > { %10003 = vmatmul.mubr.msk.f32.gmra.mrb[8].mxu1 %vm777_vm0, %v17377_v21  ;;  %v17430_v21 = vld [vmem:[#allocation182_spill] sm:$0xff] }
 0x42d   : > { %10005 = vmatprep.mubr.msk.f32.mxu1 %vm777_vm0, %v17378_v44 }
 0x430   : > { %10006 = vmatmul.mubr.msk.f32.gmra.mrb[10].mxu1 %vm777_vm0, %v17379_v10 }
 0x431   : > { %10008 = vmatprep.mubr.msk.f32.mxu1 %vm777_vm0, %v17380_v18  ;;  %v17431_v18 = vld [vmem:[#allocation186_spill] sm:$0xff] }
 0x434   : > { %10009 = vmatmul.mubr.msk.f32.gmra.mrb[12].mxu1 %vm777_vm0, %v17381_v59 }
 0x435   : > { %10011 = vmatprep.mubr.msk.f32.mxu1 %vm777_vm0, %v17382_v51 }
 0x438   : > { %10012 = vmatmul.mubr.msk.f32.gmra.mrb[14].mxu1 %vm777_vm0, %v17383_v38  ;;  %v17432_v38 = vld [vmem:[#allocation187_spill] sm:$0xff] }
 0x439   : > { %10014 = vmatprep.mubr.msk.f32.mxu1 %vm777_vm0, %v17384_v56 }
 0x43c   : > { %10015 = vmatmul.mubr.msk.f32.gmra.mrb[16].mxu1 %vm777_vm0, %v17385_v40 }
 0x43d   : > { %10017 = vmatprep.mubr.msk.f32.mxu1 %vm777_vm0, %v17308_v37  ;;  %v17389_v37 = vld [vmem:[#allocation175_spill] sm:$0xff] }
 0x440   : > { %10018 = vmatmul.mubr.msk.f32.gmra.mrb[18].mxu1 %vm777_vm0, %v17386_v5  ;;  %v17433_v5 = vld [vmem:[#allocation188_spill] sm:$0xff] }
 0x441   : > { %10020 = vmatprep.mubr.msk.f32.mxu1 %vm777_vm0, %v17310_v12  ;;  %v17391_v12 = vld [vmem:[#allocation179_spill] sm:$0xff] }
 0x444   : > { %10021 = vmatmul.mubr.msk.f32.gmra.mrb[20].mxu1 %vm777_vm0, %v17311_v11  ;;  %v17392_v11 = vld [vmem:[#allocation180_spill] sm:$0xff] }
 0x445   : > { %10023 = vmatprep.mubr.msk.f32.mxu1 %vm777_vm0, %v17312_v39  ;;  %v17393_v39 = vld [vmem:[#allocation80_spill] sm:$0xff] }
 0x448   : > { %10024 = vmatmul.mubr.msk.f32.gmra.mrb[22].mxu1 %vm777_vm0, %v17313_v29  ;;  %v17394_v29 = vrot.slane %v17366_v30, 1  ;;  %v17425_v30 = vld [vmem:[#allocation184_spill] sm:$0xff] }
 0x449   : > { %10026 = vmatprep.mubr.msk.f32.mxu1 %vm777_vm0, %v17387_v27 }
 0x44a   : > { %v5665_v57 = vsel %vm2818_vm7, %v17394_v29, %v17393_v39 }
 0x44c   : > { %10027 = vmatmul.mubr.msk.f32.gmra.mrb[24].mxu1 %vm777_vm0, %v17388_v48 }
 0x44d   : > { %10029 = vmatprep.mubr.msk.f32.mxu1 %vm777_vm0, %v17389_v37  ;;  %v17434_v37 = vld [vmem:[#allocation35_spill] sm:$0xff] }
 0x450   : > { %10030 = vmatmul.mubr.msk.f32.gmra.mrb[26].mxu1 %vm777_vm0, %v17390_v23 }
 0x451   : > { %10032 = vmatprep.mubr.msk.f32.mxu1 %vm777_vm0, %v17391_v12 }
 0x454   : > { %10033 = vmatmul.mubr.msk.f32.gmra.mrb[28].mxu1 %vm777_vm0, %v17392_v11  ;;  %v17435_v11 = vld [vmem:[#allocation38_spill] sm:$0xff] }
 0x455   : > { %10035 = vmatprep.mubr.msk.f32.mxu1 %vm777_vm0, %v5665_v57  ;;  %v17436_v57 = vld [vmem:[#allocation189_spill] sm:$0xff] }
 0x458   : > { %10036 = vmatmul.mubr.msk.f32.gmra.mrb[30].mxu1 %vm777_vm0, %v17393_v39 }
 0x459   : > { %10040 = vmatprep.mubr.msk.f32.mxu1 %vm777_vm0, %v17395_v52 }
 0x45c   : > { %10041 = vmatmul.mubr.msk.f32.vlgmr.msra.gmra.mrb[0].mxu1 %vm777_vm0, %v17396_v45 }
 0x45d   : > { %10043 = vmatprep.mubr.msk.f32.mxu1 %vm777_vm0, %v17397_v6  ;;  %v17437_v6 = vld [vmem:[#allocation164_spill] sm:$0xff] }
 0x460   : > { %10044 = vmatmul.mubr.msk.f32.gmra.mrb[2].mxu1 %vm777_vm0, %v17398_v61 }
 0x461   : > { %10046 = vmatprep.mubr.msk.f32.mxu1 %vm777_vm0, %v17399_v34 }
 0x464   : > { %10047 = vmatmul.mubr.msk.f32.gmra.mrb[4].mxu1 %vm777_vm0, %v17400_v15  ;;  %v17438_v15 = vld [vmem:[#allocation83_spill] sm:$0xff] }
 0x465   : > { %10049 = vmatprep.mubr.msk.f32.mxu1 %vm777_vm0, %v17401_v26 }
 0x468   : > { %10050 = vmatmul.mubr.msk.f32.gmra.mrb[6].mxu1 %vm777_vm0, %v17402_v50 }
 0x469   : > { %10052 = vmatprep.mubr.msk.f32.mxu1 %vm777_vm0, %v17403_v55  ;;  %v17439_v55 = vld [vmem:[#allocation51_spill] sm:$0xff] }
 0x46c   : > { %10053 = vmatmul.mubr.msk.f32.gmra.mrb[8].mxu1 %vm777_vm0, %v17404_v2 }
 0x46d   : > { %10055 = vmatprep.mubr.msk.f32.mxu1 %vm777_vm0, %v17405_v54 }
 0x470   : > { %10056 = vmatmul.mubr.msk.f32.gmra.mrb[10].mxu1 %vm777_vm0, %v17406_v0  ;;  %v17440_v0 = vld [vmem:[#allocation82_spill] sm:$0xff] }
 0x471   : > { %10058 = vmatprep.mubr.msk.f32.mxu1 %vm777_vm0, %v17407_v36 }
 0x474   : > { %10059 = vmatmul.mubr.msk.f32.gmra.mrb[12].mxu1 %vm777_vm0, %v17408_v62 }
 0x475   : > { %10061 = vmatprep.mubr.msk.f32.mxu1 %vm777_vm0, %v17409_v3  ;;  %v17441_v3 = vld [vmem:[#allocation53_spill] sm:$0xff] }
 0x478   : > { %10062 = vmatmul.mubr.msk.f32.gmra.mrb[14].mxu1 %vm777_vm0, %v17410_v58 }
 0x479   : > { %10064 = vmatprep.mubr.msk.f32.mxu1 %vm777_vm0, %v17411_v46 }
 0x47c   : > { %10065 = vmatmul.mubr.msk.f32.gmra.mrb[16].mxu1 %vm777_vm0, %v17412_v9  ;;  %v17442_v9 = vld [vmem:[#allocation85_spill] sm:$0xff] }
 0x47d   : > { %10067 = vmatprep.mubr.msk.f32.mxu1 %vm777_vm0, %v17413_v53 }
 0x480   : > { %10068 = vmatmul.mubr.msk.f32.gmra.mrb[18].mxu1 %vm777_vm0, %v17414_v1 }
 0x481   : > { %10070 = vmatprep.mubr.msk.f32.mxu1 %vm777_vm0, %v17415_v16  ;;  %v17443_v16 = vld [vmem:[#allocation50_spill] sm:$0xff] }
 0x484   : > { %10071 = vmatmul.mubr.msk.f32.gmra.mrb[20].mxu1 %vm777_vm0, %v17416_v24 }
 0x485   : > { %10073 = vmatprep.mubr.msk.f32.mxu1 %vm777_vm0, %v17417_v32 }
 0x488   : > { %10074 = vmatmul.mubr.msk.f32.gmra.mrb[22].mxu1 %vm777_vm0, %v17418_v41  ;;  %v17444_v41 = vld [vmem:[#allocation86_spill] sm:$0xff] }
 0x489   : > { %10076 = vmatprep.mubr.msk.f32.mxu1 %vm777_vm0, %v17419_v42 }
 0x48c   : > { %10077 = vmatmul.mubr.msk.f32.gmra.mrb[24].mxu1 %vm777_vm0, %v17420_v63  ;;  %v14692_v63 = vld [vmem:[%s17445_s30] ss:$0 sm:$0xff]  ;;  %s9047_s30 = sshll.u32 %s11254_s2, 4  ;;  %s11109_s2 = smov [#allocation3]  }
 0x48d   : > { %10079 = vmatprep.mubr.msk.f32.mxu1 %vm777_vm0, %v17421_v8  ;;  %s16495_s28 = scalar_lea.hbm %s16560_s23, %s9047_s30 }
 0x490   : > { %10080 = vmatmul.mubr.msk.f32.gmra.mrb[26].mxu1 %vm777_vm0, %v17424_v31 }
 0x491   : > { %10082 = vmatprep.mubr.msk.f32.mxu1 %vm777_vm0, %v17425_v30 }
 0x494   : > { %10083 = vmatmul.mubr.msk.f32.gmra.mrb[28].mxu1 %vm777_vm0, %v17426_v43 }
 0x495   : > { %10085 = vmatprep.mubr.msk.f32.mxu1 %vm777_vm0, %v6054_v49 }
 0x498   : > { %10086 = vmatmul.mubr.msk.f32.gmra.mrb[30].mxu1 %vm777_vm0, %v6056_v25 }
 0x52f   : > { %v10042_v13 = vpop.f32.mrb[0].mxu1 }
 0x530   : > { %v10452_v17 = vadd.f32 %v10042_v13, %v17429_v33  ;;  %v6187_v14 = vpop.f32.mrb[1].mxu1  ;;  %v17449_v13 = vld [vmem:[#allocation91_spill] sm:$0xff] }
 0x531   : > { %v10453_v44 = vadd.f32 %v6187_v14, %v17430_v21 }
 0x532   : > { %v14697_v30 = vadd.f32 %v10452_v17, %v14692_v63 }
 0x533   : > { %v10045_v10 = vpop.f32.mrb[2].mxu1  ;;  %v14700_v35 = vadd.f32 %v10453_v44, %v14692_v63 }
 0x534   : > { %v10454_v59 = vadd.f32 %v10045_v10, %v17431_v18  ;;  %v6197_v51 = vpop.f32.mrb[3].mxu1 }
 0x535   : > { %v10455_v56 = vadd.f32 %v6197_v51, %v17432_v38  ;;  %v10270_v17 = vpack.c.bf16 %v14697_v30, %v14700_v35  ;;  %v17450_v38 = vld [vmem:[#allocation54_spill] sm:$0xff] }
 0x536   : > { %v14715_v21 = vadd.f32 %v10454_v59, %v14692_v63 }
 0x537   : > { %v10048_v40 = vpop.f32.mrb[4].mxu1  ;;  %v14718_v44 = vadd.f32 %v10455_v56, %v14692_v63 }
 0x538   : > { %v10456_v27 = vadd.f32 %v10048_v40, %v17433_v5  ;;  %v6207_v48 = vpop.f32.mrb[5].mxu1 }
 0x539   : > { %v10457_v23 = vadd.f32 %v6207_v48, %v17434_v37  ;;  %v17451_v48 = vld [vmem:[#allocation103_spill] sm:$0xff]  ;;  %v10274_v56 = vpack.c.bf16 %v14715_v21, %v14718_v44 }
 0x53b   : > { %v10051_v12 = vpop.f32.mrb[6].mxu1 }
 0x53c   : > { %v10458_v39 = vadd.f32 %v10051_v12, %v17435_v11  ;;  %v6217_v29 = vpop.f32.mrb[7].mxu1  ;;  %v14733_v12 = vadd.f32 %v10456_v27, %v14692_v63  ;;  %v14736_v11 = vadd.f32 %v10457_v23, %v14692_v63 }
 0x53d   : > { %v10459_v52 = vadd.f32 %v6217_v29, %v17436_v57 }
 0x53e   : > { %v10278_v23 = vpack.c.bf16 %v14733_v12, %v14736_v11 }
 0x53f   : > { %v10054_v45 = vpop.f32.mrb[8].mxu1 }
 0x540   : > { %v14666_v61 = vadd.f32 %v10054_v45, %v17437_v6  ;;  %v6227_v34 = vpop.f32.mrb[9].mxu1  ;;  %v17452_v6 = vld [vmem:[#allocation57_spill] sm:$0xff] }
 0x541   : > { %v14669_v26 = vadd.f32 %v6227_v34, %v17438_v15 }
 0x543   : > { %v10057_v50 = vpop.f32.mrb[10].mxu1 }
 0x544   : > { %v14672_v2 = vadd.f32 %v10057_v50, %v17439_v55  ;;  %v6237_v54 = vpop.f32.mrb[11].mxu1  ;;  %v17453_v50 = vld [vmem:[#allocation104_spill] sm:$0xff] }
 0x545   : > { %v14675_v36 = vadd.f32 %v6237_v54, %v17440_v0  ;;  %v14751_v54 = vadd.f32 %v10458_v39, %v14692_v63  ;;  %v14754_v0 = vadd.f32 %v10459_v52, %v14692_v63 }
 0x547   : > { %v10060_v62 = vpop.f32.mrb[12].mxu1  ;;  %v10282_v52 = vpack.c.bf16 %v14751_v54, %v14754_v0 }
 0x548   : > { %v14678_v58 = vadd.f32 %v10060_v62, %v17441_v3  ;;  %v6247_v46 = vpop.f32.mrb[13].mxu1 }
 0x549   : > { %v14681_v53 = vadd.f32 %v6247_v46, %v17442_v9  ;;  %v17454_v9 = vld [vmem:[#allocation56_spill] sm:$0xff] }
 0x54b   : > { %v10063_v1 = vpop.f32.mrb[14].mxu1 }
 0x54c   : > { %v14684_v24 = vadd.f32 %v10063_v1, %v17443_v16  ;;  %v6257_v32 = vpop.f32.mrb[15].mxu1 }
 0x54d   : > { %v14687_v42 = vadd.f32 %v6257_v32, %v17444_v41  ;;  %v17455_v32 = vld [vmem:[#allocation111_spill] sm:$0xff] }
 0x54f   : > { %v10066_v8 = vpop.f32.mrb[16].mxu1 }
 0x550   : > { %v10468_v28 = vadd.f32 %v10066_v8, %v17446_v7  ;;  %v6267_v19 = vpop.f32.mrb[17].mxu1  ;;  %v14770_v8 = vadd.f32 %v14666_v61, %v14692_v63  ;;  %v14774_v7 = vadd.f32 %v14669_v26, %v14692_v63 }
 0x551   : > { %v10469_v31 = vadd.f32 %v6267_v19, %v17447_v47 }
 0x552   : > { %v14703_v4 = vadd.f32 %v10468_v28, %v14692_v63  ;;  %v10286_v26 = vpack.c.bf16 %v14770_v8, %v14774_v7 }
 0x553   : > { %v14706_v43 = vadd.f32 %v10469_v31, %v14692_v63  ;;  %v10069_v22 = vpop.f32.mrb[18].mxu1  ;;  %v17456_v31 = vld [vmem:[#allocation59_spill] sm:$0xff] }
 0x554   : > { %v10470_v49 = vadd.f32 %v10069_v22, %v17448_v60  ;;  %v6277_v25 = vpop.f32.mrb[19].mxu1 }
 0x555   : > { %v10471_v33 = vadd.f32 %v6277_v25, %v17449_v13  ;;  %v10268_v14 = vpack.c.bf16 %v14703_v4, %v14706_v43  ;;  %v14790_v13 = vadd.f32 %v14672_v2, %v14692_v63 }
 0x556   : > { %v14721_v10 = vadd.f32 %v10470_v49, %v14692_v63  ;;  %v17457_v49 = vld [vmem:[#allocation112_spill] sm:$0xff] }
 0x557   : > { %v14724_v18 = vadd.f32 %v10471_v33, %v14692_v63  ;;  %v10072_v51 = vpop.f32.mrb[20].mxu1  ;;  %10269 = vmatprep.subr.bf16.mxu0 %v10268_v14  ;;  %v14794_v33 = vadd.f32 %v14675_v36, %v14692_v63 }
 0x558   : > { %v10472_v40 = vadd.f32 %v10072_v51, %v17450_v38  ;;  %v6287_v5 = vpop.f32.mrb[21].mxu1  ;;  %10271 = vmatpush3.bf16.msra.mxu0 %v10270_v17  ;;  %v17458_v38 = vld [vmem:[#allocation58_spill] sm:$0xff] }
 0x559   : > { %v10473_v37 = vadd.f32 %v6287_v5, %v17451_v48  ;;  %v10272_v59 = vpack.c.bf16 %v14721_v10, %v14724_v18  ;;  %v17459_v48 = vld [vmem:[#allocation30_spill] sm:$0xff]  ;;  %v10290_v36 = vpack.c.bf16 %v14790_v13, %v14794_v33 }
 0x55a   : > { %v14739_v29 = vadd.f32 %v10472_v40, %v14692_v63 }
 0x55b   : > { %v14742_v57 = vadd.f32 %v10473_v37, %v14692_v63  ;;  %v10075_v45 = vpop.f32.mrb[22].mxu1  ;;  %10273 = vmatprep.subr.bf16.mxu0 %v10272_v59  ;;  %v14810_v59 = vadd.f32 %v14678_v58, %v14692_v63 }
 0x55c   : > { %v10474_v34 = vadd.f32 %v10075_v45, %v17452_v6  ;;  %v6297_v15 = vpop.f32.mrb[23].mxu1  ;;  %10275 = vmatpush3.bf16.msra.mxu0 %v10274_v56  ;;  %v14814_v56 = vadd.f32 %v14681_v53, %v14692_v63 }
 0x55d   : > { %v10475_v55 = vadd.f32 %v6297_v15, %v17453_v50  ;;  %v10276_v27 = vpack.c.bf16 %v14739_v29, %v14742_v57  ;;  %v17460_v15 = vld [vmem:[#allocation61_spill] sm:$0xff] }
 0x55e   : > { %v14757_v62 = vadd.f32 %v10474_v34, %v14692_v63  ;;  %v10294_v53 = vpack.c.bf16 %v14810_v59, %v14814_v56 }
 0x55f   : > { %v14760_v3 = vadd.f32 %v10475_v55, %v14692_v63  ;;  %v10078_v46 = vpop.f32.mrb[24].mxu1  ;;  %10277 = vmatprep.subr.bf16.mxu0 %v10276_v27  ;;  %v17461_v27 = vld [vmem:[#allocation31_spill] sm:$0xff] }
 0x560   : > { %v10476_v1 = vadd.f32 %v10078_v46, %v17454_v9  ;;  %v6307_v16 = vpop.f32.mrb[25].mxu1  ;;  %10279 = vmatpush3.bf16.msra.mxu0 %v10278_v23  ;;  %v14830_v46 = vadd.f32 %v14684_v24, %v14692_v63  ;;  %v14834_v9 = vadd.f32 %v14687_v42, %v14692_v63  ;;  %v6487_v24 = vld [vmem:[%s16547_s10] sm:$0xff]  ;;  %v6488_v42 = vld [vmem:[%s16547_s10 + $0x8] sm:$0xff] }
 0x561   : > { %v10477_v41 = vadd.f32 %v6307_v16, %v17455_v32  ;;  %v10280_v39 = vpack.c.bf16 %v14757_v62, %v14760_v3 }
 0x562   : > { %v14777_v28 = vadd.f32 %v10476_v1, %v14692_v63 }
 0x563   : > { %v14780_v19 = vadd.f32 %v10477_v41, %v14692_v63  ;;  %v10081_v47 = vpop.f32.mrb[26].mxu1  ;;  %10281 = vmatprep.subr.bf16.mxu0 %v10280_v39  ;;  %v10298_v41 = vpack.c.bf16 %v14830_v46, %v14834_v9  ;;  %v16793_v39 = vmov 0.0|0.0  }
 0x564   : > { %v10478_v22 = vadd.f32 %v10081_v47, %v17456_v31  ;;  %v6317_v60 = vpop.f32.mrb[27].mxu1  ;;  %10283 = vmatpush3.bf16.msra.mxu0 %v10282_v52  ;;  %v6489_v52 = vld [vmem:[%s16547_s10 + $0x10] sm:$0xff]  ;;  %v6490_v47 = vld [vmem:[%s16547_s10 + $0x18] sm:$0xff] }
 0x565   : > { %v10479_v25 = vadd.f32 %v6317_v60, %v17457_v49  ;;  %v10284_v61 = vpack.c.bf16 %v14777_v28, %v14780_v19  ;;  %v14863_v31 = vpack.c.bf16 %v6490_v47, %v6489_v52  ;;  %v6492_v60 = vld [vmem:[%s16547_s10 + $0x28] sm:$0xff] }
 0x566   : > { %v14797_v14 = vadd.f32 %v10478_v22, %v14692_v63  ;;  %v6491_v22 = vld [vmem:[%s16547_s10 + $0x20] sm:$0xff] }
 0x567   : > { %v14800_v17 = vadd.f32 %v10479_v25, %v14692_v63  ;;  %v10084_v51 = vpop.f32.mrb[28].mxu1  ;;  %10285 = vmatprep.subr.bf16.mxu0 %v10284_v61  ;;  %v14873_v49 = vpack.c.bf16 %v6492_v60, %v6491_v22  ;;  %v6493_v25 = vld [vmem:[%s16547_s10 + $0x30] sm:$0xff]  ;;  %v6494_v61 = vld [vmem:[%s16547_s10 + $0x38] sm:$0xff] }
 0x568   : > { %v10480_v40 = vadd.f32 %v10084_v51, %v17458_v38  ;;  %v6327_v5 = vpop.f32.mrb[29].mxu1  ;;  %10287 = vmatpush3.bf16.msra.mxu0 %v10286_v26  ;;  %v14884_v26 = vpack.c.bf16 %v6494_v61, %v6493_v25  ;;  %v17462_v51 = vmov 0.0  }
 0x569   : > { %v10481_v37 = vadd.f32 %v6327_v5, %v17459_v48  ;;  %v10288_v2 = vpack.c.bf16 %v14797_v14, %v14800_v17 }
 0x56a   : > { %v14817_v45 = vadd.f32 %v10480_v40, %v14692_v63 }
 0x56b   : > { %v14820_v6 = vadd.f32 %v10481_v37, %v14692_v63  ;;  %v10087_v34 = vpop.f32.mrb[30].mxu1  ;;  %10289 = vmatprep.subr.bf16.mxu0 %v10288_v2 }
 0x56c   : > { %v10482_v50 = vadd.f32 %v10087_v34, %v17460_v15  ;;  %v6337_v55 = vpop.f32.mrb[31].mxu1  ;;  %10291 = vmatpush3.bf16.msra.mxu0 %v10290_v36  ;;  %v17463_v36 = vld [vmem:[#allocation29_spill] sm:$0xff] }
 0x56d   : > { %v10483_v23 = vadd.f32 %v6337_v55, %v17461_v27  ;;  %v10292_v58 = vpack.c.bf16 %v14817_v45, %v14820_v6 }
 0x56e   : > { %v14837_v1 = vadd.f32 %v10482_v50, %v14692_v63 }
 0x56f   : > { %v14840_v16 = vadd.f32 %v10483_v23, %v14692_v63  ;;  %10293 = vmatprep.subr.bf16.mxu0 %v10292_v58  ;;  %v14852_v63 = vpack.c.bf16 %v6488_v42, %v6487_v24 }
 0x570   : > { %10295 = vmatpush3.bf16.msra.mxu0 %v10294_v53 }
 0x571   : > { %v10296_v32 = vpack.c.bf16 %v14837_v1, %v14840_v16 }
 0x573   : > { %10297 = vmatprep.subr.bf16.mxu0 %v10296_v32 }
 0x574   : > { %10299 = vmatpush3.bf16.msra.mxu0 %v10298_v41 }
 0x575   : > { %10300 = vmatprep.subr.bf16.mxu0 %v16793_v39 }
 0x577   : > { %6482 = vmatmul.mubr.f32.vlgmr.msra.gmra.mrb[128].mxu0 %v16795_v20 }
 0x578   : > { %10302 = vmatpush3.bf16.msra.mxu0 %v14852_v63  ;;  %10104 = vmatprep.mubr.msk.f32.mxu0 %vm11108_vm9, %v17462_v51 }
 0x579   : > { %10303 = vmatprep.subr.bf16.mxu0 %v16793_v39 }
 0x57c   : > { %10305 = vmatpush3.bf16.msra.mxu0 %v14863_v31 }
 0x57d   : > { %10306 = vmatprep.subr.bf16.mxu0 %v16793_v39 }
 0x580   : > { %10308 = vmatpush3.bf16.msra.mxu0 %v14873_v49 }
 0x581   : > { %10309 = vmatprep.subr.bf16.mxu0 %v16793_v39 }
 0x584   : > { %10311 = vmatpush3.bf16.msra.mxu0 %v14884_v26 }
 0x64a   : > { %v9417_v38 = vpop.f32.mrb[128].mxu0 }
 0x64b   : > { %v9418_v40 = vpop.f32.mrb[129].mxu0 }
 0x64c   : > { %v9419_v5 = vadd.f32 %v9418_v40, %v9417_v38 }
 0x64e   : > { %10105 = vmatmul.mubr.msk.f32.vlgmr.msra.gmra.mrb[130].mxu0 %vm6495_vm10, %v9419_v5 }
 0x64f   : > { %6703 = vmatprep.mubr.f32.mxu0 %v16795_v20 }
 0x721   : > { %v6565_v48 = vpop.f32.mrb[130].mxu0 }
 0x722   : > { %v10106_v37 = vpop.f32.mrb[131].mxu0  ;;  %v6570_v2 = vmul.f32 0.00048828125, %v6565_v48 }
 0x724   : > { %v14892_v34 = vrot.slane %v6570_v2, %v17463_v36 }
 0x726   : > { %v14896_v15 = vsub.f32 %v14700_v35, %v14892_v34  ;;  %v14900_v50 = vsub.f32 %v14697_v30, %v14892_v34  ;;  %v14904_v55 = vsub.f32 %v14706_v43, %v14892_v34  ;;  %v14908_v27 = vsub.f32 %v14703_v4, %v14892_v34 }
 0x727   : > { %v14912_v23 = vsub.f32 %v14724_v18, %v14892_v34  ;;  %v14916_v35 = vsub.f32 %v14721_v10, %v14892_v34  ;;  %v14924_v43 = vsub.f32 %v14718_v44, %v14892_v34  ;;  %v14928_v4 = vsub.f32 %v14715_v21, %v14892_v34 }
 0x728   : > { %v6607_v30 = vmul.f32 %v14896_v15, %v14896_v15  ;;  %v6608_v58 = vmul.f32 %v14900_v50, %v14900_v50  ;;  %v14932_v18 = vsub.f32 %v14742_v57, %v14892_v34  ;;  %v14936_v10 = vsub.f32 %v14739_v29, %v14892_v34 }
 0x729   : > { %v6623_v53 = vmul.f32 %v14904_v55, %v14904_v55  ;;  %v6624_v32 = vmul.f32 %v14908_v27, %v14908_v27  ;;  %v6625_v44 = vmul.f32 %v14912_v23, %v14912_v23  ;;  %v6626_v21 = vmul.f32 %v14916_v35, %v14916_v35 }
 0x72a   : > { %v10314_v24 = vpack.c.bf16 %v6608_v58, %v6607_v30  ;;  %v14948_v57 = vsub.f32 %v14736_v11, %v14892_v34  ;;  %v14952_v29 = vsub.f32 %v14733_v12, %v14892_v34  ;;  %v14956_v41 = vsub.f32 %v14760_v3, %v14892_v34 }
 0x72b   : > { %v10312_v42 = vpack.c.bf16 %v6624_v32, %v6623_v53  ;;  %v6609_v52 = vmul.f32 %v14924_v43, %v14924_v43  ;;  %v6610_v47 = vmul.f32 %v14928_v4, %v14928_v4  ;;  %v14964_v22 = vsub.f32 %v14757_v62, %v14892_v34 }
 0x72c   : > { %v10316_v11 = vpack.c.bf16 %v6626_v21, %v6625_v44  ;;  %v6627_v12 = vmul.f32 %v14932_v18, %v14932_v18  ;;  %v6628_v60 = vmul.f32 %v14936_v10, %v14936_v10  ;;  %v14972_v3 = vsub.f32 %v14754_v0, %v14892_v34 }
 0x72d   : > { %10313 = vmatprep.subr.bf16.mxu0 %v10312_v42  ;;  %v14976_v25 = vsub.f32 %v14751_v54, %v14892_v34  ;;  %v14980_v62 = vsub.f32 %v14780_v19, %v14892_v34  ;;  %v6611_v61 = vmul.f32 %v14948_v57, %v14948_v57  ;;  %v6612_v38 = vmul.f32 %v14952_v29, %v14952_v29 }
 0x72e   : > { %10315 = vmatpush3.bf16.msra.mxu0 %v10314_v24  ;;  %v10318_v40 = vpack.c.bf16 %v6610_v47, %v6609_v52  ;;  %v14988_v0 = vsub.f32 %v14777_v28, %v14892_v34  ;;  %v10320_v5 = vpack.c.bf16 %v6628_v60, %v6627_v12  ;;  %v6629_v54 = vmul.f32 %v14956_v41, %v14956_v41 }
 0x72f   : > { %10317 = vmatprep.subr.bf16.mxu0 %v10316_v11  ;;  %v6630_v48 = vmul.f32 %v14964_v22, %v14964_v22  ;;  %v14996_v19 = vsub.f32 %v14774_v7, %v14892_v34  ;;  %v15000_v37 = vsub.f32 %v14770_v8, %v14892_v34  ;;  %v15004_v28 = vsub.f32 %v14800_v17, %v14892_v34 }
 0x730   : > { %v6613_v2 = vmul.f32 %v14972_v3, %v14972_v3  ;;  %v6614_v30 = vmul.f32 %v14976_v25, %v14976_v25  ;;  %v10322_v58 = vpack.c.bf16 %v6612_v38, %v6611_v61  ;;  %v15012_v7 = vsub.f32 %v14797_v14, %v14892_v34 }
 0x731   : > { %v10324_v53 = vpack.c.bf16 %v6630_v48, %v6629_v54  ;;  %v6631_v8 = vmul.f32 %v14980_v62, %v14980_v62  ;;  %v6632_v32 = vmul.f32 %v14988_v0, %v14988_v0  ;;  %v15020_v17 = vsub.f32 %v14794_v33, %v14892_v34 }
 0x732   : > { %10319 = vmatpush3.bf16.msra.mxu0 %v10318_v40  ;;  %v15024_v44 = vsub.f32 %v14790_v13, %v14892_v34  ;;  %v15028_v14 = vsub.f32 %v14820_v6, %v14892_v34  ;;  %v6615_v24 = vmul.f32 %v14996_v19, %v14996_v19  ;;  %v6616_v21 = vmul.f32 %v15000_v37, %v15000_v37 }
 0x733   : > { %10321 = vmatprep.subr.bf16.mxu0 %v10320_v5  ;;  %v10326_v42 = vpack.c.bf16 %v6614_v30, %v6613_v2  ;;  %v15036_v33 = vsub.f32 %v14817_v45, %v14892_v34  ;;  %v10328_v52 = vpack.c.bf16 %v6632_v32, %v6631_v8  ;;  %v6633_v13 = vmul.f32 %v15004_v28, %v15004_v28 }
 0x734   : > { %v6634_v47 = vmul.f32 %v15012_v7, %v15012_v7  ;;  %v15044_v6 = vsub.f32 %v14814_v56, %v14892_v34  ;;  %v15048_v11 = vsub.f32 %v14810_v59, %v14892_v34  ;;  %v15052_v45 = vsub.f32 %v14840_v16, %v14892_v34 }
 0x735   : > { %v6617_v12 = vmul.f32 %v15020_v17, %v15020_v17  ;;  %v6618_v60 = vmul.f32 %v15024_v44, %v15024_v44  ;;  %v10330_v61 = vpack.c.bf16 %v6616_v21, %v6615_v24  ;;  %v15060_v56 = vsub.f32 %v14837_v1, %v14892_v34 }
 0x736   : > { %10323 = vmatpush3.bf16.msra.mxu0 %v10322_v58  ;;  %v10332_v38 = vpack.c.bf16 %v6634_v47, %v6633_v13  ;;  %v6635_v59 = vmul.f32 %v15028_v14, %v15028_v14  ;;  %v6636_v40 = vmul.f32 %v15036_v33, %v15036_v33  ;;  %v15068_v16 = vsub.f32 %v14834_v9, %v14892_v34 }
 0x737   : > { %10325 = vmatprep.subr.bf16.mxu0 %v10324_v53  ;;  %v6590_v5 = vsub.f32 %v14830_v46, %v14892_v34  ;;  %v6619_v1 = vmul.f32 %v15044_v6, %v15044_v6  ;;  %v6620_v54 = vmul.f32 %v15048_v11, %v15048_v11  ;;  %v10334_v48 = vpack.c.bf16 %v6618_v60, %v6617_v12 }
 0x738   : > { %v10336_v2 = vpack.c.bf16 %v6636_v40, %v6635_v59  ;;  %v6637_v30 = vmul.f32 %v15052_v45, %v15052_v45  ;;  %v6638_v58 = vmul.f32 %v15060_v56, %v15060_v56  ;;  %v6621_v9 = vmul.f32 %v15068_v16, %v15068_v16 }
 0x739   : > { %v6622_v46 = vmul.f32 %v6590_v5, %v6590_v5  ;;  %v10338_v34 = vpack.c.bf16 %v6620_v54, %v6619_v1 }
 0x73a   : > { %10327 = vmatpush3.bf16.msra.mxu0 %v10326_v42  ;;  %v10340_v53 = vpack.c.bf16 %v6638_v58, %v6637_v30 }
 0x73b   : > { %10329 = vmatprep.subr.bf16.mxu0 %v10328_v52  ;;  %v10342_v8 = vpack.c.bf16 %v6622_v46, %v6621_v9 }
 0x73e   : > { %10331 = vmatpush3.bf16.msra.mxu0 %v10330_v61 }
 0x73f   : > { %10333 = vmatprep.subr.bf16.mxu0 %v10332_v38 }
 0x742   : > { %10335 = vmatpush3.bf16.msra.mxu0 %v10334_v48 }
 0x743   : > { %10337 = vmatprep.subr.bf16.mxu0 %v10336_v2 }
 0x746   : > { %10339 = vmatpush3.bf16.msra.mxu0 %v10338_v34 }
 0x747   : > { %10341 = vmatprep.subr.bf16.mxu0 %v10340_v53 }
 0x74a   : > { %10343 = vmatpush3.bf16.msra.mxu0 %v10342_v8  ;;  %v15150_v8 = vld [vmem:[%s16549_s12] ss:$0 sm:$0xff] }
 0x74b   : > { %10344 = vmatprep.subr.bf16.mxu0 %v16793_v39 }
 0x74d   : > { %6704 = vmatmul.mubr.f32.vlgmr.msra.gmra.mrb[132].mxu0 %v16795_v20 }
 0x74e   : > { %10346 = vmatpush3.bf16.msra.mxu0 %v14852_v63  ;;  %10123 = vmatprep.mubr.msk.f32.mxu0 %vm11108_vm9, %v17462_v51 }
 0x74f   : > { %10347 = vmatprep.subr.bf16.mxu0 %v16793_v39 }
 0x752   : > { %10349 = vmatpush3.bf16.msra.mxu0 %v14863_v31 }
 0x753   : > { %10350 = vmatprep.subr.bf16.mxu0 %v16793_v39 }
 0x756   : > { %10352 = vmatpush3.bf16.msra.mxu0 %v14873_v49 }
 0x757   : > { %10353 = vmatprep.subr.bf16.mxu0 %v16793_v39 }
 0x75a   : > { %10355 = vmatpush3.bf16.msra.mxu0 %v14884_v26 }
 0x820   : > { %v9461_v32 = vpop.f32.mrb[132].mxu0 }
 0x821   : > { %v9462_v24 = vpop.f32.mrb[133].mxu0 }
 0x822   : > { %v9463_v21 = vadd.f32 %v9462_v24, %v9461_v32 }
 0x824   : > { %10124 = vmatmul.mubr.msk.f32.vlgmr.msra.gmra.mrb[134].mxu0 %vm6495_vm10, %v9463_v21 }
 0x8f7   : > { %v6778_v63 = vpop.f32.mrb[134].mxu0 }
 0x8f8   : > { %v6782_v42 = vmul.f32 0.00048828125, %v6778_v63  ;;  %v10125_v52 = vpop.f32.mrb[135].mxu0 }
 0x8fa   : > { %v6783_v13 = vadd.f32 1e-05, %v6782_v42 }
 0x8fc   : > { %10883 = vrsqrt.f32 %v6783_v13 }
 0x906   : > { %v10884_v47 = vpop.eup %10883 }
 0x907   : > { %v6788_v31 = vrot.slane %v10884_v47, %v17463_v36 }
 0x909   : > { %v6789_v12 = vmul.f32 %v6788_v31, %v14896_v15  ;;  %v6790_v49 = vmul.f32 %v6788_v31, %v14900_v50  ;;  %v6791_v60 = vmul.f32 %v6788_v31, %v14924_v43  ;;  %v6792_v26 = vmul.f32 %v6788_v31, %v14928_v4 }
 0x90a   : > { %v6793_v61 = vmul.f32 %v6788_v31, %v14948_v57  ;;  %v6794_v38 = vmul.f32 %v6788_v31, %v14952_v29  ;;  %v6795_v59 = vmul.f32 %v6788_v31, %v14972_v3  ;;  %v6796_v40 = vmul.f32 %v6788_v31, %v14976_v25  ;;  %v15113_v29 = vld [vmem:[%s16548_s11] ss:$0 sm:$0xff] }
 0x90b   : > { %v6797_v1 = vmul.f32 %v6788_v31, %v14996_v19  ;;  %v6798_v54 = vmul.f32 %v6788_v31, %v15000_v37  ;;  %v6799_v15 = vmul.f32 %v6788_v31, %v15020_v17  ;;  %v6800_v50 = vmul.f32 %v6788_v31, %v15024_v44 }
 0x90c   : > { %v6801_v43 = vmul.f32 %v6788_v31, %v15044_v6  ;;  %v6802_v4 = vmul.f32 %v6788_v31, %v15048_v11  ;;  %v6804_v48 = vmul.f32 %v6788_v31, %v6590_v5  ;;  %v6805_v57 = vmul.f32 %v6788_v31, %v14904_v55 }
 0x90d   : > { %v6806_v3 = vmul.f32 %v6788_v31, %v14908_v27  ;;  %v6807_v25 = vmul.f32 %v6788_v31, %v14912_v23  ;;  %v6808_v19 = vmul.f32 %v6788_v31, %v14916_v35  ;;  %v6809_v37 = vmul.f32 %v6788_v31, %v14932_v18 }
 0x90e   : > { %v6810_v17 = vmul.f32 %v6788_v31, %v14936_v10  ;;  %v6811_v44 = vmul.f32 %v6788_v31, %v14956_v41  ;;  %v6812_v6 = vmul.f32 %v6788_v31, %v14964_v22  ;;  %v6813_v55 = vmul.f32 %v6788_v31, %v14980_v62 }
 0x90f   : > { %v6814_v11 = vmul.f32 %v6788_v31, %v14988_v0  ;;  %v6815_v5 = vmul.f32 %v6788_v31, %v15004_v28  ;;  %v6816_v27 = vmul.f32 %v6788_v31, %v15012_v7  ;;  %v6817_v23 = vmul.f32 %v6788_v31, %v15028_v14 }
 0x910   : > { %v6818_v35 = vmul.f32 %v6788_v31, %v15036_v33  ;;  %v6819_v18 = vmul.f32 %v6788_v31, %v15052_v45  ;;  %v6820_v10 = vmul.f32 %v6788_v31, %v15060_v56  ;;  %v6843_v41 = vmul.f32 %v15113_v29, %v6804_v48 }
 0x911   : > { %v6844_v22 = vmul.f32 %v15113_v29, %v6805_v57  ;;  %v6845_v62 = vmul.f32 %v15113_v29, %v6806_v3  ;;  %v6846_v0 = vmul.f32 %v15113_v29, %v6807_v25  ;;  %v6847_v28 = vmul.f32 %v15113_v29, %v6808_v19 }
 0x912   : > { %v6848_v7 = vmul.f32 %v15113_v29, %v6809_v37  ;;  %v6849_v14 = vmul.f32 %v15113_v29, %v6810_v17  ;;  %v6850_v33 = vmul.f32 %v15113_v29, %v6811_v44  ;;  %v6851_v45 = vmul.f32 %v15113_v29, %v6812_v6  ;;  %v7765_v17 = vld [vmem:[%s16550_s13 + $0x10] sm:$0xff]  ;;  %v7766_v44 = vld [vmem:[%s16550_s13 + $0x18] sm:$0xff] }
 0x913   : > { %v6852_v56 = vmul.f32 %v15113_v29, %v6813_v55  ;;  %v6853_v2 = vmul.f32 %v15113_v29, %v6814_v11  ;;  %v6854_v30 = vmul.f32 %v15113_v29, %v6815_v5  ;;  %v6855_v58 = vmul.f32 %v15113_v29, %v6816_v27 }
 0x914   : > { %v6856_v9 = vmul.f32 %v15113_v29, %v6817_v23  ;;  %v6857_v46 = vmul.f32 %v15113_v29, %v6818_v35  ;;  %v6858_v34 = vmul.f32 %v15113_v29, %v6819_v18  ;;  %v6859_v53 = vmul.f32 %v15113_v29, %v6820_v10 }
 0x915   : > { %v6803_v32 = vmul.f32 %v6788_v31, %v15068_v16  ;;  %v6828_v24 = vmul.f32 %v15113_v29, %v6789_v12  ;;  %v6829_v21 = vmul.f32 %v15113_v29, %v6790_v49  ;;  %v6830_v63 = vmul.f32 %v15113_v29, %v6791_v60 }
 0x916   : > { %v6831_v42 = vmul.f32 %v15113_v29, %v6792_v26  ;;  %v6832_v52 = vmul.f32 %v15113_v29, %v6793_v61  ;;  %v6833_v13 = vmul.f32 %v15113_v29, %v6794_v38  ;;  %v6834_v47 = vmul.f32 %v15113_v29, %v6795_v59 }
 0x917   : > { %v6835_v48 = vmul.f32 %v15113_v29, %v6796_v40  ;;  %v6836_v57 = vmul.f32 %v15113_v29, %v6797_v1  ;;  %v6837_v16 = vmul.f32 %v15113_v29, %v6798_v54  ;;  %v6838_v31 = vmul.f32 %v15113_v29, %v6799_v15 }
 0x918   : > { %v6839_v12 = vmul.f32 %v15113_v29, %v6800_v50  ;;  %v6840_v49 = vmul.f32 %v15113_v29, %v6801_v43  ;;  %v6841_v60 = vmul.f32 %v15113_v29, %v6802_v4  ;;  %v15168_v26 = vadd.f32 %v15150_v8, %v6843_v41  ;;  %v7763_v43 = vld [vmem:[%s16550_s13] sm:$0xff]  ;;  %v7764_v4 = vld [vmem:[%s16550_s13 + $0x8] sm:$0xff] }
 0x919   : > { %v15171_v61 = vadd.f32 %v15150_v8, %v6844_v22  ;;  %v15174_v38 = vadd.f32 %v15150_v8, %v6845_v62  ;;  %v15177_v59 = vadd.f32 %v15150_v8, %v6846_v0  ;;  %v15180_v40 = vadd.f32 %v15150_v8, %v6847_v28  ;;  %v7768_v0 = vld [vmem:[%s16550_s13 + $0x28] sm:$0xff] }
 0x91a   : > { %17464 = vst [vmem:[#allocation60_spill] sm:$0xff] %v15168_v26  ;;  %v15183_v1 = vadd.f32 %v15150_v8, %v6848_v7  ;;  %v15186_v54 = vadd.f32 %v15150_v8, %v6849_v14  ;;  %v15189_v15 = vadd.f32 %v15150_v8, %v6850_v33  ;;  %v15192_v50 = vadd.f32 %v15150_v8, %v6851_v45 }
 0x91b   : > { %17465 = vst [vmem:[#allocation123_spill] sm:$0xff] %v15171_v61  ;;  %17466 = vst [vmem:[#allocation63_spill] sm:$0xff] %v15174_v38  ;;  %v15201_v3 = vadd.f32 %v15150_v8, %v6852_v56  ;;  %v15204_v25 = vadd.f32 %v15150_v8, %v6853_v2  ;;  %v15207_v19 = vadd.f32 %v15150_v8, %v6854_v30 }
 0x91c   : > { %17467 = vst [vmem:[#allocation124_spill] sm:$0xff] %v15177_v59  ;;  %17468 = vst [vmem:[#allocation62_spill] sm:$0xff] %v15180_v40  ;;  %v15210_v37 = vadd.f32 %v15150_v8, %v6855_v58  ;;  %v15219_v6 = vadd.f32 %v15150_v8, %v6856_v9  ;;  %v15222_v55 = vadd.f32 %v15150_v8, %v6857_v46 }
 0x91d   : > { %17469 = vst [vmem:[#allocation131_spill] sm:$0xff] %v15183_v1  ;;  %17470 = vst [vmem:[#allocation65_spill] sm:$0xff] %v15186_v54  ;;  %v15225_v11 = vadd.f32 %v15150_v8, %v6858_v34  ;;  %v15228_v5 = vadd.f32 %v15150_v8, %v6859_v53  ;;  %v6842_v27 = vmul.f32 %v15113_v29, %v6803_v32  ;;  %v7767_v29 = vld [vmem:[%s16550_s13 + $0x20] sm:$0xff]  ;;  %v7769_v53 = vld [vmem:[%s16550_s13 + $0x30] sm:$0xff]  ;;  %v15366_v39 = vmul.f32 0.70710677, %v15207_v19 }
 0x91e   : > { %17471 = vst [vmem:[#allocation132_spill] sm:$0xff] %v15189_v15  ;;  %17472 = vst [vmem:[#allocation37_spill] sm:$0xff] %v15192_v50  ;;  %v15232_v23 = vadd.f32 %v15150_v8, %v6828_v24  ;;  %v6868_v35 = vadd.f32 %v15150_v8, %v6829_v21  ;;  %v10356_v18 = vpack.c.bf16 %v7764_v4, %v7763_v43  ;;  %v7770_v32 = vld [vmem:[%s16550_s13 + $0x38] sm:$0xff]  ;;  %v15333_v4 = vmul.f32 0.70710677, %v15168_v26 }
 0x91f   : > { %17473 = vst [vmem:[#allocation145_spill] sm:$0xff] %v15201_v3  ;;  %17474 = vst [vmem:[#allocation40_spill] sm:$0xff] %v15204_v25  ;;  %v15236_v10 = vadd.f32 %v15150_v8, %v6830_v63  ;;  %v15239_v41 = vadd.f32 %v15150_v8, %v6831_v42  ;;  %v15242_v22 = vadd.f32 %v15150_v8, %v6832_v52  ;;  %v15369_v20 = vmul.f32 0.70710677, %v15210_v37 }
 0x920   : > { %17475 = vst [vmem:[#allocation158_spill] sm:$0xff] %v15207_v19  ;;  %17476 = vst [vmem:[#allocation44_spill] sm:$0xff] %v15210_v37  ;;  %v10360_v62 = vpack.c.bf16 %v7766_v44, %v7765_v17  ;;  %v15251_v28 = vadd.f32 %v15150_v8, %v6833_v13  ;;  %v15254_v7 = vadd.f32 %v15150_v8, %v6834_v47  ;;  %10357 = vmatprep.subr.bf16.mxu0 %v10356_v18 }
 0x921   : > { %17477 = vst [vmem:[#allocation74_spill] sm:$0xff] %v15219_v6  ;;  %17478 = vst [vmem:[#allocation169_spill] sm:$0xff] %v15222_v55  ;;  %v15257_v14 = vadd.f32 %v15150_v8, %v6835_v48  ;;  %v15260_v33 = vadd.f32 %v15150_v8, %v6836_v57  ;;  %v15263_v45 = vadd.f32 %v15150_v8, %v6837_v16  ;;  %10359 = vmatpush3.bf16.msra.mxu0 %v10356_v18 }
 0x922   : > { %17479 = vst [vmem:[#allocation76_spill] sm:$0xff] %v15225_v11  ;;  %17480 = vst [vmem:[#allocation78_spill] sm:$0xff] %v15228_v5  ;;  %v15266_v56 = vadd.f32 %v15150_v8, %v6838_v31  ;;  %v15269_v2 = vadd.f32 %v15150_v8, %v6839_v12  ;;  %v15272_v30 = vadd.f32 %v15150_v8, %v6840_v49  ;;  %v15277_v9 = vmul.f32 0.5, %v6868_v35 }
 0x923   : > { %17481 = vst [vmem:[#allocation84_spill] sm:$0xff] %v15236_v10  ;;  %17482 = vst [vmem:[#allocation87_spill] sm:$0xff] %v15239_v41  ;;  %v15275_v58 = vadd.f32 %v15150_v8, %v6841_v60  ;;  %v15280_v46 = vmul.f32 0.70710677, %v15232_v23  ;;  %10361 = vmatprep.subr.bf16.mxu0 %v10360_v62  ;;  %v10364_v34 = vpack.c.bf16 %v7768_v0, %v7767_v29  ;;  %v15291_v21 = vmul.f32 0.70710677, %v6868_v35 }
 0x924   : > { %17483 = vst [vmem:[#allocation152_spill] sm:$0xff] %v15242_v22  ;;  %17484 = vst [vmem:[#allocation160_spill] sm:$0xff] %v15251_v28  ;;  %v15289_v24 = vadd.f32 %v15150_v8, %v6842_v27  ;;  %v15294_v63 = vmul.f32 0.70710677, %v15236_v10  ;;  %v15297_v42 = vmul.f32 0.70710677, %v15239_v41  ;;  %v10368_v49 = vpack.c.bf16 %v7770_v32, %v7769_v53 }
 0x925   : > { %17485 = vst [vmem:[#allocation45_spill] sm:$0xff] %v15254_v7  ;;  %17486 = vst [vmem:[#allocation163_spill] sm:$0xff] %v15257_v14  ;;  %v15300_v52 = vmul.f32 0.70710677, %v15242_v22  ;;  %v15303_v13 = vmul.f32 0.70710677, %v15251_v28  ;;  %10363 = vmatpush3.bf16.msra.mxu0 %v10360_v62 }
 0x926   : > { %17487 = vst [vmem:[#allocation170_spill] sm:$0xff] %v15260_v33  ;;  %17488 = vst [vmem:[#allocation89_spill] sm:$0xff] %v15263_v45  ;;  %v15306_v47 = vmul.f32 0.70710677, %v15254_v7  ;;  %v15309_v8 = vmul.f32 0.70710677, %v15257_v14  ;;  %10365 = vmatprep.subr.bf16.mxu0 %v10364_v34 }
 0x927   : > { %17489 = vst [vmem:[#allocation95_spill] sm:$0xff] %v15266_v56  ;;  %17490 = vst [vmem:[#allocation96_spill] sm:$0xff] %v15269_v2  ;;  %v15312_v48 = vmul.f32 0.70710677, %v15260_v33  ;;  %v15315_v57 = vmul.f32 0.70710677, %v15263_v45 }
 0x928   : > { %17491 = vst [vmem:[#allocation98_spill] sm:$0xff] %v15272_v30  ;;  %17492 = vst [vmem:[#allocation99_spill] sm:$0xff] %v15275_v58  ;;  %v15318_v16 = vmul.f32 0.70710677, %v15266_v56  ;;  %v15321_v31 = vmul.f32 0.70710677, %v15269_v2 }
 0x929   : > { %17493 = vst [vmem:[#allocation107_spill] sm:$0xff] %v15277_v9  ;;  %17494 = vst [vmem:[#allocation108_spill] sm:$0xff] %v15280_v46  ;;  %v15324_v12 = vmul.f32 0.70710677, %v15272_v30  ;;  %v15327_v60 = vmul.f32 0.70710677, %v15275_v58  ;;  %10367 = vmatpush3.bf16.msra.mxu0 %v10364_v34 }
 0x92a   : > { %17495 = vst [vmem:[#allocation115_spill] sm:$0xff] %v15289_v24  ;;  %17496 = vst [vmem:[#allocation116_spill] sm:$0xff] %v15291_v21  ;;  %v15330_v43 = vmul.f32 0.70710677, %v15289_v24  ;;  %v15336_v17 = vmul.f32 0.70710677, %v15171_v61  ;;  %10369 = vmatprep.subr.bf16.mxu0 %v10368_v49 }
 0x92b   : > { %17497 = vst [vmem:[#allocation121_spill] sm:$0xff] %v15294_v63  ;;  %17498 = vst [vmem:[#allocation122_spill] sm:$0xff] %v15297_v42  ;;  %v15339_v44 = vmul.f32 0.70710677, %v15174_v38  ;;  %v15342_v27 = vmul.f32 0.70710677, %v15177_v59 }
 0x92c   : > { %17499 = vst [vmem:[#allocation127_spill] sm:$0xff] %v15300_v52  ;;  %17500 = vst [vmem:[#allocation128_spill] sm:$0xff] %v15303_v13  ;;  %v15345_v35 = vmul.f32 0.70710677, %v15180_v40  ;;  %v15348_v18 = vmul.f32 0.70710677, %v15183_v1 }
 0x92d   : > { %17501 = vst [vmem:[#allocation135_spill] sm:$0xff] %v15306_v47  ;;  %17502 = vst [vmem:[#allocation136_spill] sm:$0xff] %v15309_v8  ;;  %v15351_v62 = vmul.f32 0.70710677, %v15186_v54  ;;  %v15354_v29 = vmul.f32 0.70710677, %v15189_v15  ;;  %10371 = vmatpush3.bf16.msra.mxu0 %v10368_v49 }
 0x92e   : > { %17503 = vst [vmem:[#allocation36_spill] sm:$0xff] %v15312_v48  ;;  %17504 = vst [vmem:[#allocation141_spill] sm:$0xff] %v15315_v57  ;;  %v15357_v0 = vmul.f32 0.70710677, %v15192_v50  ;;  %v15360_v53 = vmul.f32 0.70710677, %v15201_v3 }
 0x92f   : > { %17505 = vst [vmem:[#allocation39_spill] sm:$0xff] %v15318_v16  ;;  %17506 = vst [vmem:[#allocation148_spill] sm:$0xff] %v15321_v31  ;;  %v15363_v32 = vmul.f32 0.70710677, %v15204_v25  ;;  %v15372_v34 = vmul.f32 0.70710677, %v15219_v6 }
 0x930   : > { %17507 = vst [vmem:[#allocation153_spill] sm:$0xff] %v15324_v12  ;;  %17508 = vst [vmem:[#allocation154_spill] sm:$0xff] %v15327_v60  ;;  %v15375_v36 = vmul.f32 0.70710677, %v15222_v55  ;;  %v15378_v51 = vmul.f32 0.70710677, %v15225_v11 }
 0x931   : > { %17509 = vst [vmem:[#allocation42_spill] sm:$0xff] %v15330_v43  ;;  %17510 = vst [vmem:[#allocation43_spill] sm:$0xff] %v15333_v4  ;;  %v15381_v3 = vmul.f32 0.70710677, %v15228_v5  ;;  %v15384_v25 = vand.u32 2147483647, %v15280_v46 }
 0x932   : > { %17511 = vst [vmem:[#allocation165_spill] sm:$0xff] %v15336_v17  ;;  %17512 = vst [vmem:[#allocation166_spill] sm:$0xff] %v15339_v44  ;;  %v15387_v19 = vand.u32 2147483647, %v15291_v21  ;;  %v15390_v37 = vand.u32 2147483647, %v15294_v63 }
 0x933   : > { %17513 = vst [vmem:[#allocation47_spill] sm:$0xff] %v15342_v27  ;;  %17514 = vst [vmem:[#allocation46_spill] sm:$0xff] %v15345_v35  ;;  %v15393_v6 = vand.u32 2147483647, %v15297_v42  ;;  %v15396_v55 = vand.u32 2147483647, %v15300_v52 }
 0x934   : > { %17515 = vst [vmem:[#allocation138_spill] sm:$0xff] %v15348_v18  ;;  %17516 = vst [vmem:[#allocation64_spill] sm:$0xff] %v15351_v62  ;;  %v15399_v11 = vand.u32 2147483647, %v15303_v13  ;;  %v15402_v5 = vand.u32 2147483647, %v15306_v47 }
 0x935   : > { %17517 = vst [vmem:[#allocation144_spill] sm:$0xff] %v15354_v29  ;;  %17518 = vst [vmem:[#allocation67_spill] sm:$0xff] %v15357_v0  ;;  %v15405_v50 = vand.u32 2147483647, %v15309_v8  ;;  %v15408_v49 = vand.u32 2147483647, %v15312_v48 }
 0x936   : > { %17519 = vst [vmem:[#allocation66_spill] sm:$0xff] %v15360_v53  ;;  %17520 = vst [vmem:[#allocation69_spill] sm:$0xff] %v15363_v32  ;;  %v15411_v15 = vand.u32 2147483647, %v15315_v57  ;;  %v15414_v54 = vand.u32 2147483647, %v15318_v16 }
 0x937   : > { %17521 = vst [vmem:[#allocation41_spill] sm:$0xff] %v15366_v39  ;;  %17522 = vst [vmem:[#allocation68_spill] sm:$0xff] %v15369_v20  ;;  %v15417_v1 = vand.u32 2147483647, %v15321_v31  ;;  %v15420_v40 = vand.u32 2147483647, %v15324_v12 }
 0x938   : > { %17523 = vst [vmem:[#allocation157_spill] sm:$0xff] %v15372_v34  ;;  %17524 = vst [vmem:[#allocation71_spill] sm:$0xff] %v15375_v36  ;;  %v15423_v59 = vand.u32 2147483647, %v15327_v60  ;;  %v15426_v38 = vand.u32 2147483647, %v15330_v43 }
 0x939   : > { %17525 = vst [vmem:[#allocation70_spill] sm:$0xff] %v15378_v51  ;;  %17526 = vst [vmem:[#allocation73_spill] sm:$0xff] %v15381_v3  ;;  %v15429_v61 = vand.u32 2147483647, %v15333_v4  ;;  %v15432_v26 = vand.u32 2147483647, %v15336_v17 }
 0x93a   : > { %v15435_v24 = vand.u32 2147483647, %v15339_v44  ;;  %v15438_v58 = vand.u32 2147483647, %v15342_v27  ;;  %v15441_v30 = vand.u32 2147483647, %v15345_v35 }
 0x93b   : > { %17527 = vst [vmem:[#allocation72_spill] sm:$0xff] %v15429_v61  ;;  %17528 = vst [vmem:[#allocation75_spill] sm:$0xff] %v15432_v26  ;;  %v15444_v60 = vand.u32 2147483647, %v15348_v18  ;;  %v15447_v43 = vand.u32 2147483647, %v15351_v62 }
 0x93c   : > { %17529 = vst [vmem:[#allocation77_spill] sm:$0xff] %v15435_v24  ;;  %17530 = vst [vmem:[#allocation79_spill] sm:$0xff] %v15438_v58  ;;  %v15450_v4 = vand.u32 2147483647, %v15354_v29  ;;  %v15453_v17 = vand.u32 2147483647, %v15357_v0 }
 0x93d   : > { %17531 = vst [vmem:[#allocation176_spill] sm:$0xff] %v15441_v30  ;;  %17532 = vst [vmem:[#allocation81_spill] sm:$0xff] %v15444_v60  ;;  %v15456_v44 = vand.u32 2147483647, %v15360_v53  ;;  %v15459_v27 = vand.u32 2147483647, %v15363_v32 }
 0x93e   : > { %17533 = vst [vmem:[#allocation88_spill] sm:$0xff] %v15447_v43  ;;  %17534 = vst [vmem:[#allocation93_spill] sm:$0xff] %v15450_v4  ;;  %v15462_v35 = vand.u32 2147483647, %v15366_v39  ;;  %v15465_v18 = vand.u32 2147483647, %v15369_v20 }
 0x93f   : > { %17535 = vst [vmem:[#allocation94_spill] sm:$0xff] %v15453_v17  ;;  %17536 = vst [vmem:[#allocation105_spill] sm:$0xff] %v15456_v44  ;;  %v15468_v62 = vand.u32 2147483647, %v15372_v34  ;;  %v15471_v29 = vand.u32 2147483647, %v15375_v36 }
 0x940   : > { %17537 = vst [vmem:[#allocation106_spill] sm:$0xff] %v15459_v27  ;;  %17538 = vst [vmem:[#allocation113_spill] sm:$0xff] %v15462_v35  ;;  %v15474_v0 = vand.u32 2147483647, %v15378_v51  ;;  %v15477_v53 = vand.u32 2147483647, %v15381_v3 }
 0x941   : > { %17539 = vst [vmem:[#allocation114_spill] sm:$0xff] %v15465_v18  ;;  %17540 = vst [vmem:[#allocation119_spill] sm:$0xff] %v15468_v62  ;;  %v7059_v32 = vmul.f32 0.3275911, %v15384_v25  ;;  %v7060_v39 = vmul.f32 0.3275911, %v15387_v19 }
 0x942   : > { %17541 = vst [vmem:[#allocation120_spill] sm:$0xff] %v15471_v29  ;;  %17542 = vst [vmem:[#allocation125_spill] sm:$0xff] %v15474_v0  ;;  %v7061_v2 = vmul.f32 0.3275911, %v15390_v37  ;;  %v7062_v20 = vmul.f32 0.3275911, %v15393_v6 }
 0x943   : > { %v7063_v34 = vmul.f32 0.3275911, %v15396_v55  ;;  %v7064_v12 = vmul.f32 0.3275911, %v15399_v11  ;;  %v7065_v36 = vmul.f32 0.3275911, %v15402_v5 }
 0x944   : > { %v7066_v51 = vmul.f32 0.3275911, %v15405_v50  ;;  %v7067_v56 = vmul.f32 0.3275911, %v15408_v49  ;;  %v7068_v3 = vmul.f32 0.3275911, %v15411_v15 }
 0x945   : > { %v7069_v31 = vmul.f32 0.3275911, %v15414_v54  ;;  %v7070_v16 = vmul.f32 0.3275911, %v15417_v1  ;;  %v7071_v45 = vmul.f32 0.3275911, %v15420_v40 }
 0x946   : > { %v7072_v57 = vmul.f32 0.3275911, %v15423_v59  ;;  %v7073_v33 = vmul.f32 0.3275911, %v15426_v38  ;;  %v7074_v48 = vmul.f32 0.3275911, %v15429_v61 }
 0x947   : > { %v7075_v14 = vmul.f32 0.3275911, %v15432_v26  ;;  %v7076_v8 = vmul.f32 0.3275911, %v15435_v24  ;;  %v7077_v7 = vmul.f32 0.3275911, %v15438_v58 }
 0x948   : > { %v7078_v47 = vmul.f32 0.3275911, %v15441_v30  ;;  %v7079_v28 = vmul.f32 0.3275911, %v15444_v60  ;;  %v7080_v13 = vmul.f32 0.3275911, %v15447_v43 }
 0x949   : > { %v7081_v22 = vmul.f32 0.3275911, %v15450_v4  ;;  %v7082_v41 = vmul.f32 0.3275911, %v15453_v17  ;;  %v7083_v9 = vmul.f32 0.3275911, %v15456_v44 }
 0x94a   : > { %v7084_v52 = vmul.f32 0.3275911, %v15459_v27  ;;  %v7085_v42 = vmul.f32 0.3275911, %v15462_v35  ;;  %v7086_v63 = vmul.f32 0.3275911, %v15465_v18 }
 0x94b   : > { %v7087_v10 = vmul.f32 0.3275911, %v15468_v62  ;;  %v7088_v46 = vmul.f32 0.3275911, %v15471_v29  ;;  %v7089_v21 = vmul.f32 0.3275911, %v15474_v0 }
 0x94c   : > { %v7090_v43 = vmul.f32 0.3275911, %v15477_v53  ;;  %v7091_v60 = vadd.f32 1.0, %v7059_v32  ;;  %v15512_v4 = vmul.f32 0.5, %v15232_v23  ;;  %v7092_v17 = vadd.f32 1.0, %v7060_v39 }
 0x94d   : > { %v7093_v44 = vadd.f32 1.0, %v7061_v2  ;;  %v7094_v30 = vadd.f32 1.0, %v7062_v20  ;;  %v7095_v27 = vadd.f32 1.0, %v7063_v34  ;;  %v7096_v58 = vadd.f32 1.0, %v7064_v12 }
 0x94e   : > { %17543 = vst [vmem:[#allocation126_spill] sm:$0xff] %v15512_v4  ;;  %v7097_v35 = vadd.f32 1.0, %v7065_v36  ;;  %v7098_v24 = vadd.f32 1.0, %v7066_v51  ;;  %v7099_v18 = vadd.f32 1.0, %v7067_v56  ;;  %v7100_v26 = vadd.f32 1.0, %v7068_v3  ;;  %v17561_v4 = vld [vmem:[#allocation77_spill] sm:$0xff] }
 0x94f   : > { %v7101_v62 = vadd.f32 1.0, %v7069_v31  ;;  %v15514_v61 = vadd.f32 1.0, %v7070_v16  ;;  %v15516_v29 = vadd.f32 1.0, %v7071_v45  ;;  %v15518_v0 = vadd.f32 1.0, %v7072_v57 }
 0x950   : > { %v15520_v32 = vadd.f32 1.0, %v7073_v33  ;;  %v15522_v23 = vadd.f32 1.0, %v7074_v48  ;;  %v15524_v39 = vadd.f32 1.0, %v7075_v14  ;;  %v15526_v20 = vadd.f32 1.0, %v7076_v8 }
 0x951   : > { %v15528_v2 = vadd.f32 1.0, %v7077_v7  ;;  %v15530_v51 = vadd.f32 1.0, %v7078_v47  ;;  %v15532_v36 = vadd.f32 1.0, %v7079_v28  ;;  %v15534_v3 = vadd.f32 1.0, %v7080_v13 }
 0x952   : > { %17544 = vst [vmem:[#allocation133_spill] sm:$0xff] %v15526_v20  ;;  %v15536_v45 = vadd.f32 1.0, %v7081_v22  ;;  %v15538_v56 = vadd.f32 1.0, %v7082_v41  ;;  %v15540_v33 = vadd.f32 1.0, %v7083_v9  ;;  %v15542_v48 = vadd.f32 1.0, %v7084_v52  ;;  %v17574_v20 = vld [vmem:[#allocation120_spill] sm:$0xff] }
 0x953   : > { %17545 = vst [vmem:[#allocation134_spill] sm:$0xff] %v15528_v2  ;;  %17546 = vst [vmem:[#allocation139_spill] sm:$0xff] %v15530_v51  ;;  %v15544_v14 = vadd.f32 1.0, %v7085_v42  ;;  %v15546_v8 = vadd.f32 1.0, %v7086_v63  ;;  %v15548_v7 = vadd.f32 1.0, %v7087_v10  ;;  %v15550_v47 = vadd.f32 1.0, %v7088_v46 }
 0x954   : > { %17547 = vst [vmem:[#allocation140_spill] sm:$0xff] %v15532_v36  ;;  %17548 = vst [vmem:[#allocation146_spill] sm:$0xff] %v15534_v3  ;;  %v15552_v28 = vadd.f32 1.0, %v7089_v21  ;;  %v15554_v13 = vadd.f32 1.0, %v7090_v43  ;;  %10885 = vrcp.f32 %v7091_v60  ;;  %v7475_v41 = vsub.f32 0.0, %v15384_v25  ;;  %v17559_v43 = vld [vmem:[#allocation72_spill] sm:$0xff] }
 0x955   : > { %17549 = vst [vmem:[#allocation147_spill] sm:$0xff] %v15536_v45  ;;  %17550 = vst [vmem:[#allocation151_spill] sm:$0xff] %v15538_v56  ;;  %10887 = vrcp.f32 %v7092_v17  ;;  %v7476_v22 = vsub.f32 0.0, %v15387_v19  ;;  %v7477_v9 = vsub.f32 0.0, %v15390_v37  ;;  %v7478_v63 = vsub.f32 0.0, %v15393_v6  ;;  %v17567_v45 = vld [vmem:[#allocation94_spill] sm:$0xff] }
 0x956   : > { %17551 = vst [vmem:[#allocation159_spill] sm:$0xff] %v15540_v33  ;;  %17552 = vst [vmem:[#allocation171_spill] sm:$0xff] %v15542_v48  ;;  %10889 = vrcp.f32 %v7093_v44  ;;  %v7479_v10 = vsub.f32 0.0, %v15396_v55  ;;  %v7480_v46 = vsub.f32 0.0, %v15399_v11  ;;  %v7481_v21 = vsub.f32 0.0, %v15402_v5  ;;  %v17560_v44 = vld [vmem:[#allocation75_spill] sm:$0xff] }
 0x957   : > { %17553 = vst [vmem:[#allocation49_spill] sm:$0xff] %v15544_v14  ;;  %17554 = vst [vmem:[#allocation175_spill] sm:$0xff] %v15546_v8  ;;  %10891 = vrcp.f32 %v7094_v30  ;;  %v7482_v42 = vsub.f32 0.0, %v15405_v50  ;;  %v7483_v52 = vsub.f32 0.0, %v15408_v49  ;;  %v7484_v57 = vsub.f32 0.0, %v15411_v15  ;;  %v17564_v8 = vld [vmem:[#allocation81_spill] sm:$0xff] }
 0x958   : > { %17555 = vst [vmem:[#allocation92_spill] sm:$0xff] %v15548_v7  ;;  %17556 = vst [vmem:[#allocation179_spill] sm:$0xff] %v15550_v47  ;;  %10893 = vrcp.f32 %v7095_v27  ;;  %v7485_v16 = vsub.f32 0.0, %v15414_v54  ;;  %v7486_v31 = vsub.f32 0.0, %v15417_v1  ;;  %v7487_v12 = vsub.f32 0.0, %v15420_v40  ;;  %v17563_v47 = vld [vmem:[#allocation176_spill] sm:$0xff] }
 0x959   : > { %17557 = vst [vmem:[#allocation180_spill] sm:$0xff] %v15552_v28  ;;  %17558 = vst [vmem:[#allocation80_spill] sm:$0xff] %v15554_v13  ;;  %10895 = vrcp.f32 %v7096_v58  ;;  %v7488_v60 = vsub.f32 0.0, %v15423_v59  ;;  %v7489_v30 = vsub.f32 0.0, %v15426_v38  ;;  %v7490_v17 = vsub.f32 0.0, %v17559_v43  ;;  %v17562_v13 = vld [vmem:[#allocation79_spill] sm:$0xff] }
 0x95a   : > { %10897 = vrcp.f32 %v7097_v35  ;;  %v7491_v34 = vsub.f32 0.0, %v17560_v44  ;;  %v7492_v27 = vsub.f32 0.0, %v17561_v4  ;;  %v7493_v28 = vsub.f32 0.0, %v17562_v13  ;;  %v17565_v14 = vld [vmem:[#allocation88_spill] sm:$0xff]  ;;  %v17566_v33 = vld [vmem:[#allocation93_spill] sm:$0xff]  ;;  %v17569_v51 = vld [vmem:[#allocation106_spill] sm:$0xff] }
 0x95b   : > { %10899 = vrcp.f32 %v7098_v24  ;;  %v7494_v7 = vsub.f32 0.0, %v17563_v47  ;;  %v7495_v58 = vsub.f32 0.0, %v17564_v8  ;;  %v7496_v48 = vsub.f32 0.0, %v17565_v14  ;;  %v17568_v3 = vld [vmem:[#allocation105_spill] sm:$0xff]  ;;  %v17572_v47 = vld [vmem:[#allocation114_spill] sm:$0xff]  ;;  %v17573_v8 = vld [vmem:[#allocation119_spill] sm:$0xff] }
 0x95c   : > { %10901 = vrcp.f32 %v7099_v18  ;;  %v7497_v56 = vsub.f32 0.0, %v17566_v33  ;;  %v7498_v35 = vsub.f32 0.0, %v17567_v45  ;;  %v7499_v36 = vsub.f32 0.0, %v17568_v3  ;;  %v17570_v4 = vld [vmem:[#allocation113_spill] sm:$0xff] }
 0x95d   : > { %10903 = vrcp.f32 %v7100_v26  ;;  %v7500_v2 = vsub.f32 0.0, %v17569_v51  ;;  %v7501_v24 = vsub.f32 0.0, %v17570_v4  ;;  %v7502_v13 = vsub.f32 0.0, %v17572_v47  ;;  %v17576_v26 = vld [vmem:[#allocation125_spill] sm:$0xff] }
 0x95e   : > { %v15583_v44 = vpop.eup %10885  ;;  %10905 = vrcp.f32 %v7101_v62  ;;  %v7503_v18 = vsub.f32 0.0, %v17573_v8  ;;  %v7504_v14 = vsub.f32 0.0, %v17574_v20  ;;  %v7505_v45 = vsub.f32 0.0, %v17576_v26 }
 0x95f   : > { %17571 = vst [vmem:[#allocation100_spill] sm:$0xff] %v15583_v44  ;;  %v15588_v43 = vpop.eup %10887  ;;  %10907 = vrcp.f32 %v15514_v61  ;;  %v7506_v3 = vsub.f32 0.0, %v15477_v53  ;;  %v7507_v51 = vmul.f32 %v7475_v41, %v15384_v25  ;;  %v7508_v62 = vmul.f32 %v7476_v22, %v15387_v19 }
 0x960   : > { %17575 = vst [vmem:[#allocation101_spill] sm:$0xff] %v15588_v43  ;;  %v15594_v4 = vpop.eup %10889  ;;  %10909 = vrcp.f32 %v15516_v29  ;;  %v7509_v44 = vmul.f32 %v7477_v9, %v15390_v37  ;;  %v7510_v20 = vmul.f32 %v7478_v63, %v15393_v6  ;;  %v7511_v61 = vmul.f32 %v7479_v10, %v15396_v55  ;;  %v17578_v9 = vld [vmem:[#allocation133_spill] sm:$0xff]  ;;  %v17581_v10 = vld [vmem:[#allocation79_spill] sm:$0xff] }
 0x961   : > { %v15600_v8 = vpop.eup %10891  ;;  %10911 = vrcp.f32 %v15518_v0  ;;  %v7512_v43 = vmul.f32 %v7480_v46, %v15399_v11  ;;  %v7513_v25 = vmul.f32 %v7481_v21, %v15402_v5  ;;  %v7514_v19 = vmul.f32 %v7482_v42, %v15405_v50  ;;  %v17580_v63 = vld [vmem:[#allocation77_spill] sm:$0xff]  ;;  %v17582_v21 = vld [vmem:[#allocation134_spill] sm:$0xff] }
 0x962   : > { %v15606_v41 = vpop.eup %10893  ;;  %10913 = vrcp.f32 %v15520_v32  ;;  %v7515_v37 = vmul.f32 %v7483_v52, %v15408_v49  ;;  %v7516_v6 = vmul.f32 %v7484_v57, %v15411_v15  ;;  %v7517_v55 = vmul.f32 %v7485_v16, %v15414_v54  ;;  %v17577_v32 = vld [vmem:[#allocation72_spill] sm:$0xff]  ;;  %v17584_v42 = vld [vmem:[#allocation81_spill] sm:$0xff] }
 0x963   : > { %v15612_v29 = vpop.eup %10895  ;;  %10915 = vrcp.f32 %v15522_v23  ;;  %v7518_v11 = vmul.f32 %v7486_v31, %v15417_v1  ;;  %v7519_v5 = vmul.f32 %v7487_v12, %v15420_v40  ;;  %v7520_v50 = vmul.f32 %v7488_v60, %v15423_v59  ;;  %v17579_v23 = vld [vmem:[#allocation75_spill] sm:$0xff]  ;;  %v17585_v52 = vld [vmem:[#allocation88_spill] sm:$0xff]  ;;  %v17587_v60 = vld [vmem:[#allocation94_spill] sm:$0xff] }
 0x964   : > { %v15618_v0 = vpop.eup %10897  ;;  %10917 = vrcp.f32 %v15524_v39  ;;  %v7521_v49 = vmul.f32 %v7489_v30, %v15426_v38  ;;  %v7522_v15 = vmul.f32 %v7490_v17, %v17577_v32  ;;  %v7523_v54 = vmul.f32 %v7491_v34, %v17579_v23  ;;  %v17583_v39 = vld [vmem:[#allocation176_spill] sm:$0xff]  ;;  %v17586_v31 = vld [vmem:[#allocation139_spill] sm:$0xff]  ;;  %v17588_v17 = vld [vmem:[#allocation105_spill] sm:$0xff] }
 0x965   : > { %v15624_v22 = vpop.eup %10899  ;;  %10919 = vrcp.f32 %v17578_v9  ;;  %v7524_v1 = vmul.f32 %v7492_v27, %v17580_v63  ;;  %v7525_v40 = vmul.f32 %v7493_v28, %v17581_v10  ;;  %v7526_v59 = vmul.f32 %v7494_v7, %v17583_v39  ;;  %v17589_v27 = vld [vmem:[#allocation140_spill] sm:$0xff]  ;;  %v17590_v32 = vld [vmem:[#allocation106_spill] sm:$0xff]  ;;  %v17591_v9 = vld [vmem:[#allocation113_spill] sm:$0xff] }
 0x966   : > { %v15630_v46 = vpop.eup %10901  ;;  %10921 = vrcp.f32 %v17582_v21  ;;  %v7527_v38 = vmul.f32 %v7495_v58, %v17584_v42  ;;  %v7528_v57 = vmul.f32 %v7496_v48, %v17585_v52  ;;  %v7529_v12 = vmul.f32 %v7497_v56, %v17566_v33  ;;  %v17592_v63 = vld [vmem:[#allocation146_spill] sm:$0xff]  ;;  %v17593_v10 = vld [vmem:[#allocation119_spill] sm:$0xff]  ;;  %v17594_v33 = vld [vmem:[#allocation120_spill] sm:$0xff] }
 0x967   : > { %v15636_v16 = vpop.eup %10903  ;;  %10923 = vrcp.f32 %v17586_v31  ;;  %v7530_v30 = vmul.f32 %v7498_v35, %v17587_v60  ;;  %v7531_v28 = vmul.f32 %v7499_v36, %v17588_v17  ;;  %v7532_v7 = vmul.f32 %v7500_v2, %v17590_v32  ;;  %v17595_v42 = vld [vmem:[#allocation147_spill] sm:$0xff]  ;;  %v17598_v60 = vld [vmem:[#allocation116_spill] sm:$0xff] }
 0x968   : > { %v15642_v34 = vpop.eup %10905  ;;  %10925 = vrcp.f32 %v17589_v27  ;;  %v7533_v58 = vmul.f32 %v7501_v24, %v17591_v9  ;;  %v7534_v48 = vmul.f32 %v7502_v13, %v17572_v47  ;;  %v7535_v56 = vmul.f32 %v7503_v18, %v17593_v10  ;;  %v17596_v52 = vld [vmem:[#allocation151_spill] sm:$0xff] }
 0x969   : > { %v15648_v23 = vpop.eup %10907  ;;  %10927 = vrcp.f32 %v17592_v63  ;;  %v15653_v35 = vmul.f32 %v7504_v14, %v17594_v33  ;;  %v15656_v36 = vmul.f32 %v7505_v45, %v17576_v26  ;;  %v15661_v2 = vmul.f32 %v7506_v3, %v15477_v53  ;;  %v17603_v63 = vld [vmem:[#allocation175_spill] sm:$0xff]  ;;  %v17605_v33 = vld [vmem:[#allocation92_spill] sm:$0xff] }
 0x96a   : > { %v15658_v21 = vpop.eup %10909  ;;  %v7539_v24 = vmul.f32 1.442695, %v7507_v51  ;;  %v15663_v39 = vmul.f32 1.442695, %v7508_v62  ;;  %v15665_v47 = vmul.f32 1.442695, %v7509_v44  ;;  %10929 = vrcp.f32 %v17595_v42 }
 0x96b   : > { %v15667_v13 = vpop.eup %10911  ;;  %v15670_v18 = vmul.f32 1.442695, %v7510_v20  ;;  %v15672_v14 = vmul.f32 1.442695, %v7511_v61  ;;  %v15674_v45 = vmul.f32 1.442695, %v7512_v43  ;;  %10931 = vrcp.f32 %v17596_v52 }
 0x96c   : > { %v15676_v26 = vpop.eup %10913  ;;  %v15679_v53 = vmul.f32 1.442695, %v7513_v25  ;;  %v15681_v51 = vmul.f32 1.442695, %v7514_v19  ;;  %v15683_v3 = vmul.f32 1.442695, %v7515_v37 }
 0x96d   : > { %v15685_v44 = vpop.eup %10915  ;;  %v17597_v62 = vld [vmem:[#allocation159_spill] sm:$0xff]  ;;  %v15688_v20 = vmul.f32 1.442695, %v7516_v6  ;;  %v15690_v61 = vmul.f32 1.442695, %v7517_v55  ;;  %vm6964_vm11 = vcmp.ge.f32.partialorder %v17598_v60, 0.0 }
 0x96e   : > { %10933 = vrcp.f32 %v17597_v62  ;;  %v15692_v43 = vmul.f32 1.442695, %v7518_v11  ;;  %v15694_v31 = vpop.eup %10917  ;;  %v17599_v25 = vld [vmem:[#allocation171_spill] sm:$0xff]  ;;  %v15698_v19 = vmul.f32 1.442695, %v7519_v5  ;;  %v17601_v6 = vld [vmem:[#allocation49_spill] sm:$0xff] }
 0x96f   : > { %10935 = vrcp.f32 %v17599_v25  ;;  %v15700_v37 = vmul.f32 1.442695, %v7520_v50  ;;  %v15702_v17 = vmul.f32 1.442695, %v7521_v49  ;;  %v15704_v27 = vpop.eup %10919  ;;  %v15707_v55 = vmul.f32 1.442695, %v7522_v15 }
 0x970   : > { %17600 = vst [vmem:[#allocation102_spill] sm:$0xff] %v15704_v27  ;;  %10937 = vrcp.f32 %v17601_v6  ;;  %v15709_v11 = vmul.f32 1.442695, %v7523_v54  ;;  %v15711_v32 = vmul.f32 1.442695, %v7524_v1  ;;  %v15713_v9 = vpop.eup %10921  ;;  %v17606_v1 = vld [vmem:[#allocation100_spill] sm:$0xff] }
 0x971   : > { %17602 = vst [vmem:[#allocation109_spill] sm:$0xff] %v15713_v9  ;;  %10939 = vrcp.f32 %v17603_v63  ;;  %v15716_v5 = vmul.f32 1.442695, %v7525_v40  ;;  %v15718_v50 = vmul.f32 1.442695, %v7526_v59  ;;  %v15722_v10 = vpop.eup %10923  ;;  %v17608_v62 = vld [vmem:[#allocation179_spill] sm:$0xff] }
 0x972   : > { %v15720_v49 = vmul.f32 1.442695, %v7527_v38  ;;  %17604 = vst [vmem:[#allocation110_spill] sm:$0xff] %v15722_v10  ;;  %10941 = vrcp.f32 %v17605_v33  ;;  %v15725_v15 = vmul.f32 1.442695, %v7528_v57  ;;  %v15730_v52 = vpop.eup %10925  ;;  %v17609_v38 = vld [vmem:[#allocation101_spill] sm:$0xff] }
 0x973   : > { %v15727_v54 = vmul.f32 1.442695, %v7529_v12  ;;  %v7187_v42 = vmul.f32 1.0614054, %v17606_v1  ;;  %17607 = vst [vmem:[#allocation117_spill] sm:$0xff] %v15730_v52  ;;  %10943 = vrcp.f32 %v17608_v62  ;;  %v15738_v6 = vpop.eup %10927  ;;  %v17611_v63 = vld [vmem:[#allocation180_spill] sm:$0xff] }
 0x974   : > { %v15733_v40 = vmul.f32 1.442695, %v7530_v30  ;;  %v15735_v59 = vmul.f32 1.442695, %v7531_v28  ;;  %v7188_v25 = vmul.f32 1.0614054, %v17609_v38  ;;  %10945 = vrcp.f32 %v17611_v63  ;;  %v15749_v28 = vpop.eup %10929 }
 0x975   : > { %17610 = vst [vmem:[#allocation118_spill] sm:$0xff] %v15738_v6  ;;  %v15741_v57 = vmul.f32 1.442695, %v7532_v7  ;;  %v7219_v12 = vadd.f32 -1.4531521, %v7187_v42  ;;  %v17612_v10 = vld [vmem:[#allocation80_spill] sm:$0xff]  ;;  %v15755_v6 = vpop.eup %10931 }
 0x976   : > { %v7189_v33 = vmul.f32 1.0614054, %v15594_v4  ;;  %10947 = vrcp.f32 %v17612_v10  ;;  %v15745_v52 = vmul.f32 1.442695, %v7533_v58  ;;  %v15747_v62 = vmul.f32 1.442695, %v7534_v48 }
 0x977   : > { %v7220_v30 = vadd.f32 -1.4531521, %v7188_v25  ;;  %17613 = vst [vmem:[#allocation32_spill] sm:$0xff] %v15749_v28  ;;  %v15751_v9 = vmul.f32 1.442695, %v7535_v56  ;;  %v17614_v27 = vld [vmem:[#allocation108_spill] sm:$0xff]  ;;  %v7251_v63 = vmul.f32 %v17606_v1, %v7219_v12  ;;  %10949 = vpow2.f32 %v7539_v24 }
 0x978   : > { %vm6963_vm12 = vcmp.ge.f32.partialorder %v17614_v27, 0.0  ;;  %v7221_v7 = vadd.f32 -1.4531521, %v7189_v33  ;;  %17615 = vst [vmem:[#allocation33_spill] sm:$0xff] %v15755_v6  ;;  %v15758_v42 = vmul.f32 1.442695, %v15653_v35  ;;  %v15762_v10 = vpop.eup %10933  ;;  %10951 = vpow2.f32 %v15663_v39 }
 0x979   : > { %v7252_v58 = vmul.f32 %v17609_v38, %v7220_v30  ;;  %v7190_v48 = vmul.f32 1.0614054, %v15600_v8  ;;  %17617 = vst [vmem:[#allocation130_spill] sm:$0xff] %v15762_v10  ;;  %v15765_v56 = vmul.f32 1.442695, %v15656_v36  ;;  %v15771_v33 = vpop.eup %10935  ;;  %v17621_v35 = vmov -1.0  }
 0x97a   : > { %17616 = vst [vmem:[#allocation129_spill] sm:$0xff] %v15758_v42  ;;  %v15768_v27 = vmul.f32 1.442695, %v15661_v2  ;;  %v7283_v25 = vadd.f32 1.4214138, %v7251_v63  ;;  %v7253_v12 = vmul.f32 %v15594_v4, %v7221_v7  ;;  %17620 = vst [vmem:[#allocation142_spill] sm:$0xff] %v15771_v33  ;;  %v15777_v28 = vpop.eup %10937  ;;  %10953 = vpow2.f32 %v15665_v47 }
 0x97b   : > { %17618 = vst [vmem:[#allocation34_spill] sm:$0xff] %v15765_v56  ;;  %v15775_v24 = vsel %vm6963_vm12, 1.0, %v17621_v35  ;;  %v7284_v30 = vadd.f32 1.4214138, %v7252_v58  ;;  %v7222_v6 = vadd.f32 -1.4531521, %v7190_v48  ;;  %10955 = vpow2.f32 %v15670_v18 }
 0x97c   : > { %17619 = vst [vmem:[#allocation137_spill] sm:$0xff] %v15768_v27  ;;  %17622 = vst [vmem:[#allocation143_spill] sm:$0xff] %v15777_v28  ;;  %v7315_v36 = vmul.f32 %v17606_v1, %v7283_v25  ;;  %v15783_v2 = vsel %vm6964_vm11, 1.0, %v17621_v35  ;;  %v7285_v63 = vadd.f32 1.4214138, %v7253_v12  ;;  %v15786_v27 = vpop.eup %10939  ;;  %v17624_v58 = vld [vmem:[#allocation84_spill] sm:$0xff]  ;;  %10957 = vpow2.f32 %v15672_v14 }
 0x97d   : > { %v7191_v7 = vmul.f32 1.0614054, %v15606_v41  ;;  %17623 = vst [vmem:[#allocation149_spill] sm:$0xff] %v15786_v27  ;;  %v7316_v39 = vmul.f32 %v17609_v38, %v7284_v30  ;;  %v15791_v48 = vmul.f32 0.5, %v17624_v58  ;;  %v7254_v56 = vmul.f32 %v15600_v8, %v7222_v6  ;;  %v15794_v25 = vpop.eup %10941  ;;  %v17626_v60 = vld [vmem:[#allocation121_spill] sm:$0xff]  ;;  %v17627_v27 = vld [vmem:[#allocation122_spill] sm:$0xff] }
 0x97e   : > { %17625 = vst [vmem:[#allocation150_spill] sm:$0xff] %v15794_v25  ;;  %v7347_v28 = vadd.f32 -0.28449672, %v7315_v36  ;;  %vm6965_vm13 = vcmp.ge.f32.partialorder %v17626_v60, 0.0  ;;  %v7317_v12 = vmul.f32 %v15594_v4, %v7285_v63  ;;  %v15798_v10 = vpop.eup %10943  ;;  %vm6966_vm14 = vcmp.ge.f32.partialorder %v17627_v27, 0.0 }
 0x97f   : > { %v7223_v33 = vadd.f32 -1.4531521, %v7191_v7  ;;  %v7348_v47 = vadd.f32 -0.28449672, %v7316_v39  ;;  %v7286_v30 = vadd.f32 1.4214138, %v7254_v56  ;;  %v15802_v58 = vpop.eup %10945  ;;  %10959 = vpow2.f32 %v15674_v45 }
 0x980   : > { %v7379_v6 = vmul.f32 %v17606_v1, %v7347_v28  ;;  %v7349_v36 = vadd.f32 -0.28449672, %v7317_v12  ;;  %v15807_v42 = vpop.eup %10947  ;;  %v6997_v18 = vsel %vm6965_vm13, 1.0, %v17621_v35  ;;  %v6998_v28 = vsel %vm6966_vm14, 1.0, %v17621_v35 }
 0x981   : > { %v7255_v25 = vmul.f32 %v15606_v41, %v7223_v33  ;;  %17628 = vst [vmem:[#allocation155_spill] sm:$0xff] %v15807_v42  ;;  %v7380_v63 = vmul.f32 %v17609_v38, %v7348_v47  ;;  %v7318_v56 = vmul.f32 %v15600_v8, %v7286_v30  ;;  %v10950_v39 = vpop.eup %10949  ;;  %10961 = vpow2.f32 %v15679_v53 }
 0x982   : > { %v7411_v27 = vadd.f32 0.2548296, %v7379_v6  ;;  %v7381_v14 = vmul.f32 %v15594_v4, %v7349_v36  ;;  %v7192_v45 = vmul.f32 1.0614054, %v15612_v29  ;;  %10963 = vpow2.f32 %v15681_v51  ;;  %v10952_v6 = vpop.eup %10951 }
 0x983   : > { %v7287_v7 = vadd.f32 1.4214138, %v7255_v25  ;;  %v7412_v33 = vadd.f32 0.2548296, %v7380_v63  ;;  %v7350_v12 = vadd.f32 -0.28449672, %v7318_v56  ;;  %10965 = vpow2.f32 %v15683_v3 }
 0x984   : > { %v7443_v60 = vmul.f32 %v17606_v1, %v7411_v27  ;;  %v7413_v47 = vadd.f32 0.2548296, %v7381_v14  ;;  %v7224_v42 = vadd.f32 -1.4531521, %v7192_v45  ;;  %10967 = vpow2.f32 %v15688_v20  ;;  %v17629_v56 = vld [vmem:[#allocation127_spill] sm:$0xff]  ;;  %v10954_v1 = vpop.eup %10953 }
 0x985   : > { %v7319_v30 = vmul.f32 %v15606_v41, %v7287_v7  ;;  %v7444_v36 = vmul.f32 %v17609_v38, %v7412_v33  ;;  %v7382_v25 = vmul.f32 %v15600_v8, %v7350_v12  ;;  %vm6967_vm15 = vcmp.ge.f32.partialorder %v17629_v56, 0.0  ;;  %v10956_v20 = vpop.eup %10955 }
 0x986   : > { %v7603_v53 = vmul.f32 %v10950_v39, %v7443_v60  ;;  %v7445_v63 = vmul.f32 %v15594_v4, %v7413_v47  ;;  %10969 = vpow2.f32 %v15690_v61  ;;  %v7256_v3 = vmul.f32 %v15612_v29, %v7224_v42  ;;  %v10958_v45 = vpop.eup %10957 }
 0x987   : > { %v7351_v51 = vadd.f32 -0.28449672, %v7319_v30  ;;  %v7604_v27 = vmul.f32 %v10952_v6, %v7444_v36  ;;  %v7414_v14 = vadd.f32 0.2548296, %v7382_v25  ;;  %10971 = vpow2.f32 %v15692_v43 }
 0x988   : > { %v7635_v38 = vsub.f32 1.0, %v7603_v53  ;;  %v7605_v7 = vmul.f32 %v10954_v1, %v7445_v63  ;;  %10973 = vpow2.f32 %v15698_v19  ;;  %v7288_v12 = vadd.f32 1.4214138, %v7256_v3  ;;  %v17632_v3 = vld [vmem:[#allocation87_spill] sm:$0xff] }
 0x989   : > { %v7383_v33 = vmul.f32 %v15606_v41, %v7351_v51  ;;  %v7636_v4 = vsub.f32 1.0, %v7604_v27  ;;  %v7446_v39 = vmul.f32 %v15600_v8, %v7414_v14  ;;  %10975 = vpow2.f32 %v15700_v37  ;;  %v10960_v47 = vpop.eup %10959 }
 0x98a   : > { %v7667_v61 = vmul.f32 %v7635_v38, %v15775_v24  ;;  %v7637_v60 = vsub.f32 1.0, %v7605_v7  ;;  %10977 = vpow2.f32 %v15702_v17  ;;  %v7320_v6 = vmul.f32 %v15612_v29, %v7288_v12  ;;  %v17630_v17 = vld [vmem:[#allocation126_spill] sm:$0xff] }
 0x98b   : > { %v7415_v42 = vadd.f32 0.2548296, %v7383_v33  ;;  %v7668_v43 = vmul.f32 %v7636_v4, %v15783_v2  ;;  %v7606_v30 = vmul.f32 %v10956_v20, %v7446_v39  ;;  %10979 = vpow2.f32 %v15707_v55  ;;  %v15841_v25 = vpop.eup %10961 }
 0x98c   : > { %v7699_v19 = vadd.f32 1.0, %v7667_v61  ;;  %v7669_v8 = vmul.f32 %v7637_v60, %v6997_v18  ;;  %10981 = vpow2.f32 %v15709_v11  ;;  %v7352_v53 = vadd.f32 -0.28449672, %v7320_v6  ;;  %v15844_v63 = vpop.eup %10963  ;;  %v17634_v61 = vld [vmem:[#allocation128_spill] sm:$0xff] }
 0x98d   : > { %v7447_v36 = vmul.f32 %v15606_v41, %v7415_v42  ;;  %v7700_v37 = vadd.f32 1.0, %v7668_v43  ;;  %v7638_v24 = vsub.f32 1.0, %v7606_v30  ;;  %10983 = vpow2.f32 %v15711_v32  ;;  %v15848_v55 = vpop.eup %10965  ;;  %v17631_v41 = vld [vmem:[#allocation107_spill] sm:$0xff] }
 0x98e   : > { %v7731_v2 = vmul.f32 %v7699_v19, %v17630_v17  ;;  %v7701_v51 = vadd.f32 1.0, %v7669_v8  ;;  %10985 = vpow2.f32 %v15716_v5  ;;  %v7384_v11 = vmul.f32 %v15612_v29, %v7352_v53  ;;  %v15853_v14 = vpop.eup %10967 }
 0x98f   : > { %v7607_v1 = vmul.f32 %v10958_v45, %v7447_v36  ;;  %v7732_v18 = vmul.f32 %v7700_v37, %v17631_v41  ;;  %v7670_v27 = vmul.f32 %v7638_v24, %v6998_v28  ;;  %10987 = vpow2.f32 %v15718_v50  ;;  %v17636_v37 = vld [vmem:[#allocation135_spill] sm:$0xff] }
 0x990   : > { %10142 = vmatprep.mubr.msk.f32.mxu0 %vm6495_vm10, %v7731_v2  ;;  %v7733_v32 = vmul.f32 %v7701_v51, %v15791_v48  ;;  %v6902_v38 = vmul.f32 0.5, %v17632_v3  ;;  %v15859_v33 = vpop.eup %10969  ;;  %10989 = vpow2.f32 %v15720_v49  ;;  %v6999_v28 = vsel %vm6967_vm15, 1.0, %v17621_v35  ;;  %v17633_v48 = vld [vmem:[#allocation152_spill] sm:$0xff] }
 0x991   : > { %v7639_v7 = vsub.f32 1.0, %v7607_v1  ;;  %10143 = vmatmul.mubr.msk.f32.vlgmr.msra.gmra.mrb[136].mxu0 %vm6495_vm10, %v7732_v18  ;;  %v7702_v5 = vadd.f32 1.0, %v7670_v27  ;;  %v7416_v20 = vadd.f32 0.2548296, %v7384_v11  ;;  %v15866_v50 = vpop.eup %10971  ;;  %10991 = vpow2.f32 %v15725_v15  ;;  %v17637_v27 = vld [vmem:[#allocation45_spill] sm:$0xff] }
 0x992   : > { %10145 = vmatprep.mubr.msk.f32.mxu0 %vm6495_vm10, %v7733_v32  ;;  %v6903_v4 = vmul.f32 0.5, %v17633_v48  ;;  %v7193_v12 = vmul.f32 1.0614054, %v15618_v0  ;;  %v15872_v49 = vpop.eup %10973  ;;  %10993 = vpow2.f32 %v15727_v54  ;;  %vm6968_vm1 = vcmp.ge.f32.partialorder %v17634_v61, 0.0  ;;  %v17635_v54 = vld [vmem:[#allocation160_spill] sm:$0xff] }
 0x993   : > { %v7671_v39 = vmul.f32 %v7639_v7, %v6999_v28  ;;  %v7734_v45 = vmul.f32 %v7702_v5, %v6902_v38  ;;  %v7448_v56 = vmul.f32 %v15612_v29, %v7416_v20  ;;  %v15877_v60 = vpop.eup %10975  ;;  %10995 = vpow2.f32 %v15733_v40  ;;  %v17638_v7 = vld [vmem:[#allocation136_spill] sm:$0xff] }
 0x994   : > { %v7225_v42 = vadd.f32 -1.4531521, %v7193_v12  ;;  %v7194_v43 = vmul.f32 1.0614054, %v15624_v22  ;;  %v15881_v30 = vpop.eup %10977  ;;  %10997 = vpow2.f32 %v15735_v59  ;;  %v6904_v6 = vmul.f32 0.5, %v17635_v54 }
 0x995   : > { %v7703_v15 = vadd.f32 1.0, %v7671_v39  ;;  %10146 = vmatmul.mubr.msk.f32.gmra.mrb[138].mxu0 %vm6495_vm10, %v7734_v45  ;;  %v7608_v19 = vmul.f32 %v10960_v47, %v7448_v56  ;;  %v7195_v8 = vmul.f32 1.0614054, %v15630_v46  ;;  %v15887_v29 = vpop.eup %10979  ;;  %vm6969_vm2 = vcmp.ge.f32.partialorder %v17636_v37, 0.0 }
 0x996   : > { %v7257_v40 = vmul.f32 %v15618_v0, %v7225_v42  ;;  %v7226_v24 = vadd.f32 -1.4531521, %v7194_v43  ;;  %v15891_v53 = vpop.eup %10981  ;;  %10999 = vpow2.f32 %v15741_v57  ;;  %v7000_v59 = vsel %vm6968_vm1, 1.0, %v17621_v35  ;;  %v17640_v42 = vld [vmem:[#allocation36_spill] sm:$0xff] }
 0x997   : > { %v7735_v36 = vmul.f32 %v7703_v15, %v6903_v4  ;;  %v7640_v17 = vsub.f32 1.0, %v7608_v19  ;;  %v7227_v47 = vadd.f32 -1.4531521, %v7195_v8  ;;  %v15897_v2 = vpop.eup %10983  ;;  %11001 = vpow2.f32 %v15745_v52  ;;  %v17639_v4 = vld [vmem:[#allocation163_spill] sm:$0xff] }
 0x998   : > { %v7289_v51 = vadd.f32 1.4214138, %v7257_v40  ;;  %v7258_v1 = vmul.f32 %v15624_v22, %v7226_v24  ;;  %v7196_v41 = vmul.f32 1.0614054, %v15636_v16  ;;  %v15903_v18 = vpop.eup %10985  ;;  %v15906_v11 = vmul.f32 0.5, %v17637_v27 }
 0x999   : > { %10148 = vmatprep.mubr.msk.f32.mxu0 %vm6495_vm10, %v7735_v36  ;;  %v7672_v57 = vmul.f32 %v7640_v17, %v7000_v59  ;;  %v15911_v32 = vsel %vm6969_vm2, 1.0, %v17621_v35  ;;  %v7259_v52 = vmul.f32 %v15630_v46, %v7227_v47  ;;  %v15914_v3 = vpop.eup %10987  ;;  %vm6970_vm3 = vcmp.ge.f32.partialorder %v17638_v7, 0.0 }
 0x99a   : > { %v7321_v38 = vmul.f32 %v15618_v0, %v7289_v51  ;;  %v7290_v5 = vadd.f32 1.4214138, %v7258_v1  ;;  %v7228_v28 = vadd.f32 -1.4531521, %v7196_v41  ;;  %v15918_v20 = vpop.eup %10989  ;;  %v15921_v39 = vmul.f32 0.5, %v17639_v4  ;;  %v17641_v1 = vld [vmem:[#allocation170_spill] sm:$0xff] }
 0x99b   : > { %v7704_v48 = vadd.f32 1.0, %v7672_v57  ;;  %v7291_v12 = vadd.f32 1.4214138, %v7259_v52  ;;  %v7197_v45 = vmul.f32 1.0614054, %v15642_v34  ;;  %v15924_v61 = vpop.eup %10991  ;;  %vm6971_vm5 = vcmp.ge.f32.partialorder %v17640_v42, 0.0 }
 0x99c   : > { %v7353_v56 = vadd.f32 -0.28449672, %v7321_v38  ;;  %v7322_v15 = vmul.f32 %v15624_v22, %v7290_v5  ;;  %v7260_v43 = vmul.f32 %v15636_v16, %v7228_v28  ;;  %v15929_v54 = vpop.eup %10993  ;;  %v7002_v8 = vsel %vm6970_vm3, 1.0, %v17621_v35  ;;  %v17642_v4 = vld [vmem:[#allocation141_spill] sm:$0xff] }
 0x99d   : > { %v7736_v19 = vmul.f32 %v7704_v48, %v6904_v6  ;;  %v7323_v36 = vmul.f32 %v15630_v46, %v7291_v12  ;;  %v7229_v37 = vadd.f32 -1.4531521, %v7197_v45  ;;  %v15933_v40 = vpop.eup %10995  ;;  %v7198_v47 = vmul.f32 1.0614054, %v15648_v23 }
 0x99e   : > { %v7385_v24 = vmul.f32 %v15618_v0, %v7353_v56  ;;  %v7354_v59 = vadd.f32 -0.28449672, %v7322_v15  ;;  %v7292_v17 = vadd.f32 1.4214138, %v7260_v43  ;;  %v15937_v51 = vpop.eup %10997  ;;  %v15941_v41 = vmul.f32 0.5, %v17641_v1 }
 0x99f   : > { %10149 = vmatmul.mubr.msk.f32.gmra.mrb[140].mxu0 %vm6495_vm10, %v7736_v19  ;;  %v7003_v6 = vsel %vm6971_vm5, 1.0, %v17621_v35  ;;  %v7355_v57 = vadd.f32 -0.28449672, %v7323_v36  ;;  %v7261_v27 = vmul.f32 %v15642_v34, %v7229_v37  ;;  %v7230_v5 = vadd.f32 -1.4531521, %v7198_v47  ;;  %v17644_v37 = vld [vmem:[#allocation89_spill] sm:$0xff] }
 0x9a0   : > { %v7417_v52 = vadd.f32 0.2548296, %v7385_v24  ;;  %v7386_v38 = vmul.f32 %v15624_v22, %v7354_v59  ;;  %v7324_v7 = vmul.f32 %v15636_v16, %v7292_v17  ;;  %v15947_v28 = vpop.eup %10999  ;;  %vm6972_vm4 = vcmp.ge.f32.partialorder %v17642_v4, 0.0 }
 0x9a1   : > { %v7387_v48 = vmul.f32 %v15630_v46, %v7355_v57  ;;  %v7293_v12 = vadd.f32 1.4214138, %v7261_v27  ;;  %v7199_v45 = vmul.f32 1.0614054, %v15658_v21  ;;  %v15952_v56 = vpop.eup %11001  ;;  %v7262_v19 = vmul.f32 %v15648_v23, %v7230_v5 }
 0x9a2   : > { %17643 = vst [vmem:[#allocation156_spill] sm:$0xff] %v15952_v56  ;;  %v7449_v15 = vmul.f32 %v15618_v0, %v7417_v52  ;;  %v7418_v42 = vadd.f32 0.2548296, %v7386_v38  ;;  %v7356_v43 = vadd.f32 -0.28449672, %v7324_v7  ;;  %v6908_v24 = vmul.f32 0.5, %v17644_v37 }
 0x9a3   : > { %v7419_v36 = vadd.f32 0.2548296, %v7387_v48  ;;  %v7325_v59 = vmul.f32 %v15642_v34, %v7293_v12  ;;  %v7231_v17 = vadd.f32 -1.4531521, %v7199_v45  ;;  %v7294_v27 = vadd.f32 1.4214138, %v7262_v19 }
 0x9a4   : > { %v7609_v47 = vmul.f32 %v15841_v25, %v7449_v15  ;;  %v7450_v1 = vmul.f32 %v15624_v22, %v7418_v42  ;;  %v7388_v57 = vmul.f32 %v15636_v16, %v7356_v43  ;;  %v7004_v0 = vsel %vm6972_vm4, 1.0, %v17621_v35  ;;  %v17645_v12 = vld [vmem:[#allocation39_spill] sm:$0xff] }
 0x9a5   : > { %v7451_v56 = vmul.f32 %v15630_v46, %v7419_v36  ;;  %v7357_v52 = vadd.f32 -0.28449672, %v7325_v59  ;;  %v7263_v38 = vmul.f32 %v15658_v21, %v7231_v17  ;;  %v7326_v25 = vmul.f32 %v15648_v23, %v7294_v27 }
 0x9a6   : > { %v7641_v7 = vsub.f32 1.0, %v7609_v47  ;;  %v7610_v5 = vmul.f32 %v15844_v63, %v7450_v1  ;;  %v7420_v48 = vadd.f32 0.2548296, %v7388_v57  ;;  %vm6973_vm6 = vcmp.ge.f32.partialorder %v17645_v12, 0.0 }
 0x9a7   : > { %v7611_v22 = vmul.f32 %v15848_v55, %v7451_v56  ;;  %v7389_v45 = vmul.f32 %v15642_v34, %v7357_v52  ;;  %v7295_v46 = vadd.f32 1.4214138, %v7263_v38  ;;  %v7358_v43 = vadd.f32 -0.28449672, %v7326_v25 }
 0x9a8   : > { %v7673_v15 = vmul.f32 %v7641_v7, %v15911_v32  ;;  %v7642_v4 = vsub.f32 1.0, %v7610_v5  ;;  %v7452_v42 = vmul.f32 %v15636_v16, %v7420_v48  ;;  %v7200_v37 = vmul.f32 1.0614054, %v15667_v13 }
 0x9a9   : > { %v7643_v19 = vsub.f32 1.0, %v7611_v22  ;;  %v7421_v36 = vadd.f32 0.2548296, %v7389_v45  ;;  %v7327_v63 = vmul.f32 %v15658_v21, %v7295_v46  ;;  %v7390_v56 = vmul.f32 %v15648_v23, %v7358_v43 }
 0x9aa   : > { %v7705_v59 = vadd.f32 1.0, %v7673_v15  ;;  %v7674_v17 = vmul.f32 %v7642_v4, %v7002_v8  ;;  %v7612_v55 = vmul.f32 %v15853_v14, %v7452_v42  ;;  %v7232_v57 = vadd.f32 -1.4531521, %v7200_v37 }
 0x9ab   : > { %v7675_v47 = vmul.f32 %v7643_v19, %v7003_v6  ;;  %v7453_v1 = vmul.f32 %v15642_v34, %v7421_v36  ;;  %v7359_v32 = vadd.f32 -0.28449672, %v7327_v63  ;;  %v7422_v38 = vadd.f32 0.2548296, %v7390_v56  ;;  %v17646_v34 = vld [vmem:[#allocation148_spill] sm:$0xff] }
 0x9ac   : > { %v7737_v16 = vmul.f32 %v7705_v59, %v15906_v11  ;;  %v7706_v27 = vadd.f32 1.0, %v7674_v17  ;;  %v7644_v52 = vsub.f32 1.0, %v7612_v55  ;;  %v7264_v8 = vmul.f32 %v15667_v13, %v7232_v57 }
 0x9ad   : > { %v7707_v7 = vadd.f32 1.0, %v7675_v47  ;;  %v7613_v5 = vmul.f32 %v15859_v33, %v7453_v1  ;;  %v7391_v48 = vmul.f32 %v15658_v21, %v7359_v32  ;;  %vm6974_vm7 = vcmp.ge.f32.partialorder %v17646_v34, 0.0  ;;  %v17649_v47 = vld [vmem:[#allocation96_spill] sm:$0xff] }
 0x9ae   : > { %10151 = vmatprep.mubr.msk.f32.mxu0 %vm6495_vm10, %v7737_v16  ;;  %v7738_v14 = vmul.f32 %v7706_v27, %v15921_v39  ;;  %v7676_v6 = vmul.f32 %v7644_v52, %v7004_v0  ;;  %v7454_v25 = vmul.f32 %v15648_v23, %v7422_v38  ;;  %v7296_v46 = vadd.f32 1.4214138, %v7264_v8  ;;  %v17647_v0 = vld [vmem:[#allocation95_spill] sm:$0xff] }
 0x9af   : > { %v7739_v11 = vmul.f32 %v7707_v7, %v15941_v41  ;;  %v7645_v22 = vsub.f32 1.0, %v7613_v5  ;;  %v7423_v45 = vadd.f32 0.2548296, %v7391_v48  ;;  %v7005_v15 = vsel %vm6973_vm6, 1.0, %v17621_v35  ;;  %v17650_v48 = vld [vmem:[#allocation98_spill] sm:$0xff] }
 0x9b0   : > { %10152 = vmatmul.mubr.msk.f32.gmra.mrb[142].mxu0 %vm6495_vm10, %v7738_v14  ;;  %v7708_v33 = vadd.f32 1.0, %v7676_v6  ;;  %v7614_v4 = vmul.f32 %v15866_v50, %v7454_v25  ;;  %v7201_v39 = vmul.f32 1.0614054, %v15676_v26  ;;  %v6909_v23 = vmul.f32 0.5, %v17647_v0  ;;  %v17648_v50 = vld [vmem:[#allocation153_spill] sm:$0xff]  ;;  %v17651_v25 = vld [vmem:[#allocation154_spill] sm:$0xff] }
 0x9b1   : > { %10154 = vmatprep.mubr.msk.f32.mxu0 %vm6495_vm10, %v7739_v11  ;;  %v7677_v42 = vmul.f32 %v7645_v22, %v7005_v15  ;;  %v7455_v41 = vmul.f32 %v15658_v21, %v7423_v45  ;;  %v7328_v43 = vmul.f32 %v15667_v13, %v7296_v46  ;;  %v7006_v36 = vsel %vm6974_vm7, 1.0, %v17621_v35  ;;  %v17652_v22 = vld [vmem:[#allocation129_spill] sm:$0xff] }
 0x9b2   : > { %v7740_v19 = vmul.f32 %v7708_v33, %v6908_v24  ;;  %v7646_v12 = vsub.f32 1.0, %v7614_v4  ;;  %v7233_v63 = vadd.f32 -1.4531521, %v7201_v39  ;;  %vm6975_vm8 = vcmp.ge.f32.partialorder %v17648_v50, 0.0  ;;  %v11023_v33 = vld [vmem:[%s11298_s27 + $0x80] sm:$0xff]  ;;  %v11024_v15 = vld [vmem:[%s11298_s27 + $0x88] sm:$0xff] }
 0x9b3   : > { %v7709_v37 = vadd.f32 1.0, %v7677_v42  ;;  %v7615_v59 = vmul.f32 %v15872_v49, %v7455_v41  ;;  %v7360_v17 = vadd.f32 -0.28449672, %v7328_v43  ;;  %11003 = vpow2.f32 %v15747_v62  ;;  %v17653_v42 = vld [vmem:[#allocation102_spill] sm:$0xff]  ;;  %v17654_v43 = vld [vmem:[#allocation99_spill] sm:$0xff] }
 0x9b4   : > { %10155 = vmatmul.mubr.msk.f32.gmra.mrb[144].mxu0 %vm6495_vm10, %v7740_v19  ;;  %v7678_v21 = vmul.f32 %v7646_v12, %v7006_v36  ;;  %v7265_v55 = vmul.f32 %v15676_v26, %v7233_v63  ;;  %v7202_v24 = vmul.f32 1.0614054, %v15685_v44  ;;  %v6910_v1 = vmul.f32 0.5, %v17649_v47  ;;  %v17659_v47 = vld [vmem:[#allocation109_spill] sm:$0xff] }
 0x9b5   : > { %v7741_v56 = vmul.f32 %v7709_v37, %v6909_v23  ;;  %v7647_v32 = vsub.f32 1.0, %v7615_v59  ;;  %v7392_v57 = vmul.f32 %v15667_v13, %v7360_v17  ;;  %v7007_v27 = vsel %vm6975_vm8, 1.0, %v17621_v35  ;;  %v17655_v37 = vld [vmem:[#allocation42_spill] sm:$0xff]  ;;  %v17656_v59 = vld [vmem:[#allocation13_spill] sm:$0xff]  ;;  %v17657_v17 = vld [vmem:[#allocation12_spill] sm:$0xff] }
 0x9b6   : > { %v7710_v16 = vadd.f32 1.0, %v7678_v21  ;;  %v7297_v49 = vadd.f32 1.4214138, %v7265_v55  ;;  %v7234_v52 = vadd.f32 -1.4531521, %v7202_v24  ;;  %11005 = vpow2.f32 %v15751_v9 }
 0x9b7   : > { %10157 = vmatprep.mubr.msk.f32.mxu0 %vm6495_vm10, %v7741_v56  ;;  %v7679_v62 = vmul.f32 %v7647_v32, %v7007_v27  ;;  %v7424_v38 = vadd.f32 0.2548296, %v7392_v57  ;;  %v7203_v7 = vmul.f32 1.0614054, %v15694_v31  ;;  %v6911_v8 = vmul.f32 0.5, %v17650_v48  ;;  %v11025_v32 = vld [vmem:[%s11298_s27 + $0x90] sm:$0xff] }
 0x9b8   : > { %v7742_v5 = vmul.f32 %v7710_v16, %v6910_v1  ;;  %v7329_v14 = vmul.f32 %v15676_v26, %v7297_v49  ;;  %v7266_v6 = vmul.f32 %v15685_v44, %v7234_v52  ;;  %vm6976_vm11 = vcmp.ge.f32.partialorder %v17651_v25, 0.0  ;;  %v11026_v57 = vld [vmem:[%s11298_s27 + $0x98] sm:$0xff] }
 0x9b9   : > { %v7711_v34 = vadd.f32 1.0, %v7679_v62  ;;  %v7456_v9 = vmul.f32 %v15667_v13, %v7424_v38  ;;  %v7235_v11 = vadd.f32 -1.4531521, %v7203_v7  ;;  %11007 = vpow2.f32 %v17652_v22  ;;  %v17660_v49 = vld [vmem:[#allocation115_spill] sm:$0xff]  ;;  %v17663_v22 = vld [vmem:[#allocation14_spill] sm:$0xff] }
 0x9ba   : > { %10158 = vmatmul.mubr.msk.f32.gmra.mrb[146].mxu0 %vm6495_vm10, %v7742_v5  ;;  %v7361_v45 = vadd.f32 -0.28449672, %v7329_v14  ;;  %v7298_v46 = vadd.f32 1.4214138, %v7266_v6  ;;  %v10372_v4 = vpack.c.bf16 %v11024_v15, %v11023_v33  ;;  %v7204_v41 = vmul.f32 1.0614054, %v17653_v42 }
 0x9bb   : > { %v7743_v39 = vmul.f32 %v7711_v34, %v6911_v8  ;;  %v7616_v0 = vmul.f32 %v15877_v60, %v7456_v9  ;;  %v7267_v23 = vmul.f32 %v15694_v31, %v7235_v11  ;;  %v6912_v13 = vmul.f32 0.5, %v17654_v43  ;;  %v17661_v34 = vld [vmem:[#allocation43_spill] sm:$0xff]  ;;  %v17665_v15 = vld [vmem:[#allocation110_spill] sm:$0xff] }
 0x9bc   : > { %v7008_v19 = vsel %vm6976_vm11, 1.0, %v17621_v35  ;;  %v7393_v36 = vmul.f32 %v15676_v26, %v7361_v45  ;;  %v7330_v12 = vmul.f32 %v15685_v44, %v7298_v46  ;;  %10373 = vmatprep.subr.bf16.mxu0 %v10372_v4  ;;  %vm6977_vm12 = vcmp.ge.f32.partialorder %v17655_v37, 0.0  ;;  %v17662_v11 = vld [vmem:[#allocation15_spill] sm:$0xff] }
 0x9bd   : > { %10160 = vmatprep.mubr.msk.f32.mxu0 %vm6495_vm10, %v7743_v39  ;;  %v7648_v63 = vsub.f32 1.0, %v7616_v0  ;;  %v7299_v60 = vadd.f32 1.4214138, %v7267_v23  ;;  %v7236_v50 = vadd.f32 -1.4531521, %v7204_v41  ;;  %v17658_v21 = vpack.c.bf16 %v17656_v59, %v17657_v17  ;;  %v16033_v55 = vpop.eup %11003  ;;  %v17666_v0 = vld [vmem:[#allocation60_spill] sm:$0xff] }
 0x9be   : > { %v7425_v24 = vadd.f32 0.2548296, %v7393_v36  ;;  %v7362_v56 = vadd.f32 -0.28449672, %v7330_v12  ;;  %v7205_v1 = vmul.f32 1.0614054, %v17659_v47  ;;  %v10376_v16 = vpack.c.bf16 %v11026_v57, %v11025_v32 }
 0x9bf   : > { %10375 = vmatpush3.bf16.msra.mxu0 %v17658_v21  ;;  %v7680_v27 = vmul.f32 %v7648_v63, %v7008_v19  ;;  %v6913_v52 = vmul.f32 0.5, %v17660_v49  ;;  %v7331_v62 = vmul.f32 %v15694_v31, %v7299_v60  ;;  %v7268_v38 = vmul.f32 %v17653_v42, %v7236_v50  ;;  %v17669_v57 = vld [vmem:[#allocation117_spill] sm:$0xff] }
 0x9c0   : > { %v7009_v7 = vsel %vm6977_vm12, 1.0, %v17621_v35  ;;  %v7457_v5 = vmul.f32 %v15676_v26, %v7425_v24  ;;  %v7394_v48 = vmul.f32 %v15685_v44, %v7362_v56  ;;  %v7237_v8 = vadd.f32 -1.4531521, %v7205_v1  ;;  %10377 = vmatprep.subr.bf16.mxu0 %v10376_v16  ;;  %v16044_v14 = vpop.eup %11005 }
 0x9c1   : > { %v7712_v6 = vadd.f32 1.0, %v7680_v27  ;;  %vm6978_vm13 = vcmp.ge.f32.partialorder %v17661_v34, 0.0  ;;  %v7363_v25 = vadd.f32 -0.28449672, %v7331_v62  ;;  %v7300_v9 = vadd.f32 1.4214138, %v7268_v38 }
 0x9c2   : > { %v17664_v45 = vpack.c.bf16 %v17662_v11, %v17663_v22  ;;  %v7617_v46 = vmul.f32 %v15881_v30, %v7457_v5  ;;  %v7426_v33 = vadd.f32 0.2548296, %v7394_v48  ;;  %v7269_v26 = vmul.f32 %v17659_v47, %v7237_v8 }
 0x9c3   : > { %v7206_v4 = vmul.f32 1.0614054, %v17665_v15  ;;  %v7744_v39 = vmul.f32 %v7712_v6, %v6912_v13  ;;  %v6914_v23 = vmul.f32 0.5, %v17666_v0  ;;  %v7395_v41 = vmul.f32 %v15694_v31, %v7363_v25  ;;  %v16056_v19 = vpop.eup %11007  ;;  %v17667_v13 = vld [vmem:[#allocation165_spill] sm:$0xff] }
 0x9c4   : > { %10379 = vmatpush3.bf16.msra.mxu0 %v17664_v45  ;;  %v7332_v43 = vmul.f32 %v17653_v42, %v7300_v9  ;;  %v7649_v36 = vsub.f32 1.0, %v7617_v46  ;;  %v7458_v12 = vmul.f32 %v15685_v44, %v7426_v33  ;;  %v7301_v63 = vadd.f32 1.4214138, %v7269_v26  ;;  %v17668_v44 = vld [vmem:[#allocation123_spill] sm:$0xff]  ;;  %v17670_v9 = vld [vmem:[#allocation166_spill] sm:$0xff]  ;;  %v11028_v26 = vld [vmem:[%s11298_s27 + $0xa8] sm:$0xff] }
 0x9c5   : > { %v7238_v37 = vadd.f32 -1.4531521, %v7206_v4  ;;  %10161 = vmatmul.mubr.msk.f32.gmra.mrb[148].mxu0 %vm6495_vm10, %v7744_v39  ;;  %v7010_v30 = vsel %vm6978_vm13, 1.0, %v17621_v35  ;;  %vm6979_vm14 = vcmp.ge.f32.partialorder %v17667_v13, 0.0  ;;  %v7427_v60 = vadd.f32 0.2548296, %v7395_v41 }
 0x9c6   : > { %v7364_v50 = vadd.f32 -0.28449672, %v7332_v43  ;;  %v7681_v59 = vmul.f32 %v7649_v36, %v7009_v7  ;;  %v7618_v17 = vmul.f32 %v15887_v29, %v7458_v12  ;;  %v7333_v21 = vmul.f32 %v17659_v47, %v7301_v63  ;;  %v11027_v33 = vld [vmem:[%s11298_s27 + $0xa0] sm:$0xff]  ;;  %v17671_v41 = vld [vmem:[#allocation118_spill] sm:$0xff] }
 0x9c7   : > { %v7270_v24 = vmul.f32 %v17665_v15, %v7238_v37  ;;  %v6915_v56 = vmul.f32 0.5, %v17668_v44  ;;  %v7459_v1 = vmul.f32 %v15694_v31, %v7427_v60  ;;  %v7207_v16 = vmul.f32 1.0614054, %v17669_v57 }
 0x9c8   : > { %v7396_v32 = vmul.f32 %v17653_v42, %v7364_v50  ;;  %v7713_v27 = vadd.f32 1.0, %v7681_v59  ;;  %v7650_v49 = vsub.f32 1.0, %v7618_v17  ;;  %v7365_v62 = vadd.f32 -0.28449672, %v7333_v21  ;;  %v17672_v50 = vld [vmem:[#allocation17_spill] sm:$0xff]  ;;  %v17673_v59 = vld [vmem:[#allocation16_spill] sm:$0xff] }
 0x9c9   : > { %v7302_v38 = vadd.f32 1.4214138, %v7270_v24  ;;  %v7011_v7 = vsel %vm6979_vm14, 1.0, %v17621_v35  ;;  %v7619_v29 = vmul.f32 %v15891_v53, %v7459_v1  ;;  %v7239_v48 = vadd.f32 -1.4531521, %v7207_v16 }
 0x9ca   : > { %v7428_v5 = vadd.f32 0.2548296, %v7396_v32  ;;  %v7745_v8 = vmul.f32 %v7713_v27, %v6913_v52  ;;  %v7682_v6 = vmul.f32 %v7650_v49, %v7010_v30  ;;  %v7397_v31 = vmul.f32 %v17659_v47, %v7365_v62  ;;  %v17677_v27 = vld [vmem:[#allocation63_spill] sm:$0xff] }
 0x9cb   : > { %v7334_v34 = vmul.f32 %v17665_v15, %v7302_v38  ;;  %v7651_v25 = vsub.f32 1.0, %v7619_v29  ;;  %vm6980_vm15 = vcmp.ge.f32.partialorder %v17670_v9, 0.0  ;;  %v7271_v22 = vmul.f32 %v17669_v57, %v7239_v48 }
 0x9cc   : > { %v7460_v11 = vmul.f32 %v17653_v42, %v7428_v5  ;;  %10163 = vmatprep.mubr.msk.f32.mxu0 %vm6495_vm10, %v7745_v8  ;;  %v7714_v45 = vadd.f32 1.0, %v7682_v6  ;;  %v7429_v53 = vadd.f32 0.2548296, %v7397_v31  ;;  %v10380_v52 = vpack.c.bf16 %v11028_v26, %v11027_v33 }
 0x9cd   : > { %v7366_v46 = vadd.f32 -0.28449672, %v7334_v34  ;;  %v7683_v4 = vmul.f32 %v7651_v25, %v7011_v7  ;;  %v7303_v0 = vadd.f32 1.4214138, %v7271_v22  ;;  %v7208_v43 = vmul.f32 1.0614054, %v17671_v41 }
 0x9ce   : > { %v7620_v39 = vmul.f32 %v15897_v2, %v7460_v11  ;;  %v7746_v36 = vmul.f32 %v7714_v45, %v6914_v23  ;;  %v7012_v12 = vsel %vm6980_vm15, 1.0, %v17621_v35  ;;  %v7461_v42 = vmul.f32 %v17659_v47, %v7429_v53  ;;  %10381 = vmatprep.subr.bf16.mxu0 %v10380_v52  ;;  %v17675_v2 = vld [vmem:[#allocation47_spill] sm:$0xff]  ;;  %v17676_v47 = vld [vmem:[#allocation32_spill] sm:$0xff] }
 0x9cf   : > { %v7398_v63 = vmul.f32 %v17665_v15, %v7366_v46  ;;  %v7715_v37 = vadd.f32 1.0, %v7683_v4  ;;  %v7335_v13 = vmul.f32 %v17669_v57, %v7303_v0  ;;  %v7240_v60 = vadd.f32 -1.4531521, %v7208_v43  ;;  %v17680_v46 = vld [vmem:[#allocation33_spill] sm:$0xff] }
 0x9d0   : > { %v7652_v30 = vsub.f32 1.0, %v7620_v39  ;;  %v17674_v17 = vpack.c.bf16 %v17672_v50, %v17673_v59  ;;  %10164 = vmatmul.mubr.msk.f32.gmra.mrb[150].mxu0 %vm6495_vm10, %v7746_v36  ;;  %vm6981_vm1 = vcmp.ge.f32.partialorder %v17675_v2, 0.0  ;;  %v7621_v23 = vmul.f32 %v15903_v18, %v7461_v42  ;;  %v11029_v4 = vld [vmem:[%s11298_s27 + $0xb0] sm:$0xff]  ;;  %v11030_v39 = vld [vmem:[%s11298_s27 + $0xb8] sm:$0xff] }
 0x9d1   : > { %v7430_v21 = vadd.f32 0.2548296, %v7398_v63  ;;  %v7209_v24 = vmul.f32 1.0614054, %v17676_v47  ;;  %v7747_v44 = vmul.f32 %v7715_v37, %v6915_v56  ;;  %v7367_v32 = vadd.f32 -0.28449672, %v7335_v13 }
 0x9d2   : > { %10383 = vmatpush3.bf16.msra.mxu0 %v17674_v17  ;;  %v7684_v1 = vmul.f32 %v7652_v30, %v7012_v12  ;;  %v7272_v16 = vmul.f32 %v17671_v41, %v7240_v60  ;;  %v6916_v49 = vmul.f32 0.5, %v17677_v27  ;;  %v7653_v62 = vsub.f32 1.0, %v7621_v23  ;;  %v17678_v56 = vld [vmem:[#allocation46_spill] sm:$0xff]  ;;  %v17684_v23 = vld [vmem:[#allocation19_spill] sm:$0xff] }
 0x9d3   : > { %v7462_v38 = vmul.f32 %v17665_v15, %v7430_v21  ;;  %v7241_v7 = vadd.f32 -1.4531521, %v7209_v24  ;;  %10166 = vmatprep.mubr.msk.f32.mxu0 %vm6495_vm10, %v7747_v44  ;;  %v7013_v5 = vsel %vm6981_vm1, 1.0, %v17621_v35  ;;  %v7399_v18 = vmul.f32 %v17669_v57, %v7367_v32  ;;  %v17679_v15 = vld [vmem:[#allocation124_spill] sm:$0xff]  ;;  %v17681_v63 = vld [vmem:[#allocation138_spill] sm:$0xff]  ;;  %v17687_v44 = vld [vmem:[#allocation131_spill] sm:$0xff] }
 0x9d4   : > { %v7716_v29 = vadd.f32 1.0, %v7684_v1  ;;  %v7304_v48 = vadd.f32 1.4214138, %v7272_v16  ;;  %v7685_v8 = vmul.f32 %v7653_v62, %v7013_v5  ;;  %vm6982_vm2 = vcmp.ge.f32.partialorder %v17678_v56, 0.0  ;;  %v17682_v13 = vld [vmem:[#allocation130_spill] sm:$0xff] }
 0x9d5   : > { %v7622_v6 = vmul.f32 %v15914_v3, %v7462_v38  ;;  %v7273_v31 = vmul.f32 %v17676_v47, %v7241_v7  ;;  %v6917_v25 = vmul.f32 0.5, %v17679_v15  ;;  %v7431_v9 = vadd.f32 0.2548296, %v7399_v18  ;;  %v17685_v21 = vld [vmem:[#allocation18_spill] sm:$0xff] }
 0x9d6   : > { %v7748_v34 = vmul.f32 %v7716_v29, %v6916_v49  ;;  %v7336_v11 = vmul.f32 %v17671_v41, %v7304_v48  ;;  %v7717_v22 = vadd.f32 1.0, %v7685_v8  ;;  %v7210_v33 = vmul.f32 1.0614054, %v17680_v46  ;;  %v17688_v29 = vld [vmem:[#allocation64_spill] sm:$0xff]  ;;  %v17689_v56 = vld [vmem:[#allocation142_spill] sm:$0xff] }
 0x9d7   : > { %v7654_v45 = vsub.f32 1.0, %v7622_v6  ;;  %v7305_v53 = vadd.f32 1.4214138, %v7273_v31  ;;  %v7014_v26 = vsel %vm6982_vm2, 1.0, %v17621_v35  ;;  %v7463_v52 = vmul.f32 %v17669_v57, %v7431_v9  ;;  %v17683_v57 = vld [vmem:[#allocation62_spill] sm:$0xff]  ;;  %v11031_v31 = vld [vmem:[%s11298_s27 + $0xc0] sm:$0xff] }
 0x9d8   : > { %10167 = vmatmul.mubr.msk.f32.gmra.mrb[152].mxu0 %vm6495_vm10, %v7748_v34  ;;  %v7368_v3 = vadd.f32 -0.28449672, %v7336_v11  ;;  %v10384_v0 = vpack.c.bf16 %v11030_v39, %v11029_v4  ;;  %v7749_v43 = vmul.f32 %v7717_v22, %v6917_v25  ;;  %v7242_v42 = vadd.f32 -1.4531521, %v7210_v33  ;;  %v11032_v34 = vld [vmem:[%s11298_s27 + $0xc8] sm:$0xff] }
 0x9d9   : > { %v7686_v36 = vmul.f32 %v7654_v45, %v7014_v26  ;;  %v7337_v12 = vmul.f32 %v17676_v47, %v7305_v53  ;;  %vm6983_vm3 = vcmp.ge.f32.partialorder %v17681_v63, 0.0  ;;  %v7623_v37 = vmul.f32 %v15918_v20, %v7463_v52  ;;  %v17690_v9 = vld [vmem:[#allocation65_spill] sm:$0xff]  ;;  %v17691_v53 = vld [vmem:[#allocation144_spill] sm:$0xff] }
 0x9da   : > { %v7400_v30 = vmul.f32 %v17671_v41, %v7368_v3  ;;  %10385 = vmatprep.subr.bf16.mxu0 %v10384_v0  ;;  %v7211_v60 = vmul.f32 1.0614054, %v17682_v13  ;;  %10169 = vmatprep.mubr.msk.f32.mxu0 %vm6495_vm10, %v7749_v43  ;;  %v6918_v50 = vmul.f32 0.5, %v17683_v57  ;;  %v7274_v2 = vmul.f32 %v17680_v46, %v7242_v42  ;;  %v17692_v0 = vld [vmem:[#allocation21_spill] sm:$0xff]  ;;  %v17693_v43 = vld [vmem:[#allocation20_spill] sm:$0xff]  ;;  %v17695_v42 = vld [vmem:[#allocation143_spill] sm:$0xff] }
 0x9db   : > { %v7718_v59 = vadd.f32 1.0, %v7686_v36  ;;  %v7369_v17 = vadd.f32 -0.28449672, %v7337_v12  ;;  %v17686_v24 = vpack.c.bf16 %v17684_v23, %v17685_v21  ;;  %v6919_v1 = vmul.f32 0.5, %v17687_v44  ;;  %v17698_v44 = vld [vmem:[#allocation149_spill] sm:$0xff] }
 0x9dc   : > { %v7655_v20 = vsub.f32 1.0, %v7623_v37  ;;  %v7432_v32 = vadd.f32 0.2548296, %v7400_v30  ;;  %v7243_v16 = vadd.f32 -1.4531521, %v7211_v60  ;;  %v7015_v49 = vsel %vm6983_vm3, 1.0, %v17621_v35 }
 0x9dd   : > { %10387 = vmatpush3.bf16.msra.mxu0 %v17686_v24  ;;  %v7750_v27 = vmul.f32 %v7718_v59, %v6918_v50  ;;  %v7401_v62 = vmul.f32 %v17676_v47, %v7369_v17  ;;  %v7306_v38 = vadd.f32 1.4214138, %v7274_v2  ;;  %vm6984_vm5 = vcmp.ge.f32.partialorder %v17688_v29, 0.0  ;;  %v17696_v30 = vld [vmem:[#allocation132_spill] sm:$0xff] }
 0x9de   : > { %v7687_v7 = vmul.f32 %v7655_v20, %v7015_v49  ;;  %v7464_v5 = vmul.f32 %v17671_v41, %v7432_v32  ;;  %v7275_v18 = vmul.f32 %v17682_v13, %v7243_v16  ;;  %v7212_v6 = vmul.f32 1.0614054, %v17689_v56  ;;  %v11034_v49 = vld [vmem:[%s11298_s27 + $0xd8] sm:$0xff] }
 0x9df   : > { %10170 = vmatmul.mubr.msk.f32.gmra.mrb[154].mxu0 %vm6495_vm10, %v7750_v27  ;;  %v7433_v48 = vadd.f32 0.2548296, %v7401_v62  ;;  %v7338_v8 = vmul.f32 %v17680_v46, %v7306_v38  ;;  %v10388_v15 = vpack.c.bf16 %v11032_v34, %v11031_v31  ;;  %v6920_v11 = vmul.f32 0.5, %v17690_v9  ;;  %v11033_v27 = vld [vmem:[%s11298_s27 + $0xd0] sm:$0xff] }
 0x9e0   : > { %v7719_v25 = vadd.f32 1.0, %v7687_v7  ;;  %v7624_v22 = vmul.f32 %v15924_v61, %v7464_v5  ;;  %v7307_v45 = vadd.f32 1.4214138, %v7275_v18  ;;  %vm6985_vm4 = vcmp.ge.f32.partialorder %v17691_v53, 0.0  ;;  %v17702_v53 = vld [vmem:[#allocation22_spill] sm:$0xff] }
 0x9e1   : > { %v7465_v41 = vmul.f32 %v17676_v47, %v7433_v48  ;;  %v7370_v33 = vadd.f32 -0.28449672, %v7338_v8  ;;  %v7244_v26 = vadd.f32 -1.4531521, %v7212_v6  ;;  %10389 = vmatprep.subr.bf16.mxu0 %v10388_v15  ;;  %v7016_v3 = vsel %vm6984_vm5, 1.0, %v17621_v35  ;;  %v17699_v48 = vld [vmem:[#allocation37_spill] sm:$0xff] }
 0x9e2   : > { %v7751_v52 = vmul.f32 %v7719_v25, %v6919_v1  ;;  %v7656_v4 = vsub.f32 1.0, %v7624_v22  ;;  %v7339_v39 = vmul.f32 %v17682_v13, %v7307_v45  ;;  %v17694_v36 = vpack.c.bf16 %v17692_v0, %v17693_v43 }
 0x9e3   : > { %v7625_v61 = vmul.f32 %v15929_v54, %v7465_v41  ;;  %v7402_v12 = vmul.f32 %v17680_v46, %v7370_v33  ;;  %v7276_v47 = vmul.f32 %v17689_v56, %v7244_v26  ;;  %v7213_v63 = vmul.f32 1.0614054, %v17695_v42  ;;  %v17697_v54 = vld [vmem:[#allocation67_spill] sm:$0xff] }
 0x9e4   : > { %10391 = vmatpush3.bf16.msra.mxu0 %v17694_v36  ;;  %10172 = vmatprep.mubr.msk.f32.mxu0 %vm6495_vm10, %v7751_v52  ;;  %v7688_v37 = vmul.f32 %v7656_v4, %v7016_v3  ;;  %v6921_v60 = vmul.f32 0.5, %v17696_v30  ;;  %v7017_v57 = vsel %vm6985_vm4, 1.0, %v17621_v35  ;;  %v7371_v50 = vadd.f32 -0.28449672, %v7339_v39  ;;  %v17704_v52 = vld [vmem:[#allocation150_spill] sm:$0xff]  ;;  %v17705_v39 = vld [vmem:[#allocation145_spill] sm:$0xff] }
 0x9e5   : > { %v7657_v59 = vsub.f32 1.0, %v7625_v61  ;;  %vm6986_vm6 = vcmp.ge.f32.partialorder %v17697_v54, 0.0  ;;  %v7434_v17 = vadd.f32 0.2548296, %v7402_v12  ;;  %v7308_v2 = vadd.f32 1.4214138, %v7276_v47 }
 0x9e6   : > { %v7720_v23 = vadd.f32 1.0, %v7688_v37  ;;  %v7403_v21 = vmul.f32 %v17682_v13, %v7371_v50  ;;  %v7245_v24 = vadd.f32 -1.4531521, %v7213_v63  ;;  %v7214_v1 = vmul.f32 1.0614054, %v17698_v44  ;;  %v17706_v37 = vld [vmem:[#allocation69_spill] sm:$0xff] }
 0x9e7   : > { %v7689_v20 = vmul.f32 %v7657_v59, %v7017_v57  ;;  %v7466_v32 = vmul.f32 %v17680_v46, %v7434_v17  ;;  %v7340_v16 = vmul.f32 %v17689_v56, %v7308_v2  ;;  %v10392_v62 = vpack.c.bf16 %v11034_v49, %v11033_v27  ;;  %v17700_v46 = vld [vmem:[#allocation66_spill] sm:$0xff] }
 0x9e8   : > { %v7752_v38 = vmul.f32 %v7720_v23, %v6920_v11  ;;  %v7435_v7 = vadd.f32 0.2548296, %v7403_v21  ;;  %v7277_v29 = vmul.f32 %v17695_v42, %v7245_v24  ;;  %v7246_v5 = vadd.f32 -1.4531521, %v7214_v1  ;;  %v11035_v21 = vld [vmem:[%s11298_s27 + $0xe0] sm:$0xff]  ;;  %v11036_v24 = vld [vmem:[%s11298_s27 + $0xe8] sm:$0xff] }
 0x9e9   : > { %v7721_v18 = vadd.f32 1.0, %v7689_v20  ;;  %v6922_v8 = vmul.f32 0.5, %v17699_v48  ;;  %v7626_v6 = vmul.f32 %v15933_v40, %v7466_v32  ;;  %v7372_v31 = vadd.f32 -0.28449672, %v7340_v16  ;;  %10393 = vmatprep.subr.bf16.mxu0 %v10392_v62  ;;  %v17701_v40 = vld [vmem:[#allocation23_spill] sm:$0xff]  ;;  %v17707_v62 = vld [vmem:[#allocation41_spill] sm:$0xff] }
 0x9ea   : > { %10173 = vmatmul.mubr.msk.f32.gmra.mrb[156].mxu0 %vm6495_vm10, %v7752_v38  ;;  %vm6987_vm7 = vcmp.ge.f32.partialorder %v17700_v46, 0.0  ;;  %v7467_v34 = vmul.f32 %v17682_v13, %v7435_v7  ;;  %v7309_v15 = vadd.f32 1.4214138, %v7277_v29  ;;  %v7278_v25 = vmul.f32 %v17698_v44, %v7246_v5  ;;  %v17709_v48 = vld [vmem:[#allocation24_spill] sm:$0xff] }
 0x9eb   : > { %v7753_v9 = vmul.f32 %v7721_v18, %v6921_v60  ;;  %v7018_v11 = vsel %vm6986_vm6, 1.0, %v17621_v35  ;;  %v7658_v22 = vsub.f32 1.0, %v7626_v6  ;;  %v7404_v45 = vmul.f32 %v17689_v56, %v7372_v31  ;;  %v17708_v18 = vld [vmem:[#allocation25_spill] sm:$0xff]  ;;  %v17711_v6 = vld [vmem:[#allocation34_spill] sm:$0xff] }
 0x9ec   : > { %v17703_v41 = vpack.c.bf16 %v17701_v40, %v17702_v53  ;;  %v7627_v33 = vmul.f32 %v15937_v51, %v7467_v34  ;;  %v7341_v26 = vmul.f32 %v17695_v42, %v7309_v15  ;;  %v7310_v13 = vadd.f32 1.4214138, %v7278_v25  ;;  %v17712_v15 = vld [vmem:[#allocation40_spill] sm:$0xff] }
 0x9ed   : > { %v7215_v3 = vmul.f32 1.0614054, %v17704_v52  ;;  %10175 = vmatprep.mubr.msk.f32.mxu0 %vm6495_vm10, %v7753_v9  ;;  %v7690_v4 = vmul.f32 %v7658_v22, %v7018_v11  ;;  %v6923_v0 = vmul.f32 0.5, %v17705_v39  ;;  %v7019_v43 = vsel %vm6987_vm7, 1.0, %v17621_v35  ;;  %v17713_v9 = vld [vmem:[#allocation156_spill] sm:$0xff] }
 0x9ee   : > { %10395 = vmatpush3.bf16.msra.mxu0 %v17703_v41  ;;  %v7436_v36 = vadd.f32 0.2548296, %v7404_v45  ;;  %v7659_v61 = vsub.f32 1.0, %v7627_v33  ;;  %v7373_v12 = vadd.f32 -0.28449672, %v7341_v26  ;;  %v7342_v51 = vmul.f32 %v17698_v44, %v7310_v13  ;;  %v17714_v26 = vld [vmem:[#allocation68_spill] sm:$0xff] }
 0x9ef   : > { %v7247_v47 = vadd.f32 -1.4531521, %v7215_v3  ;;  %v7722_v63 = vadd.f32 1.0, %v7690_v4  ;;  %vm6988_vm8 = vcmp.ge.f32.partialorder %v17706_v37, 0.0  ;;  %v7216_v60 = vmul.f32 1.0614054, %v15798_v10 }
 0x9f0   : > { %v7468_v30 = vmul.f32 %v17689_v56, %v7436_v36  ;;  %v7691_v57 = vmul.f32 %v7659_v61, %v7019_v43  ;;  %v7405_v50 = vmul.f32 %v17695_v42, %v7373_v12  ;;  %v7374_v59 = vadd.f32 -0.28449672, %v7342_v51  ;;  %v11037_v51 = vld [vmem:[%s11298_s27 + $0xf0] sm:$0xff] }
 0x9f1   : > { %v7279_v54 = vmul.f32 %v17704_v52, %v7247_v47  ;;  %v7754_v17 = vmul.f32 %v7722_v63, %v6922_v8  ;;  %v7248_v23 = vadd.f32 -1.4531521, %v7216_v60  ;;  %v10396_v1 = vpack.c.bf16 %v11036_v24, %v11035_v21  ;;  %v11038_v47 = vld [vmem:[%s11298_s27 + $0xf8] sm:$0xff]  ;;  %s715_s27 = sand.u32 1, %s11093_s5  }
 0x9f2   : > { %v7628_v2 = vmul.f32 %v15947_v28, %v7468_v30  ;;  %v7723_v20 = vadd.f32 1.0, %v7691_v57  ;;  %v7437_v32 = vadd.f32 0.2548296, %v7405_v50  ;;  %v7406_v16 = vmul.f32 %v17698_v44, %v7374_v59  ;;  %v17716_v57 = vld [vmem:[#allocation158_spill] sm:$0xff]  ;;  %s716_s4 = scalar_lea.vmem [#allocation3], %s715_s27  ;;  %s8530_s24 = scalar_lea.sflag [#allocation4], %s715_s27 }
 0x9f3   : > { %v7311_v56 = vadd.f32 1.4214138, %v7279_v54  ;;  %10176 = vmatmul.mubr.msk.f32.gmra.mrb[158].mxu0 %vm6495_vm10, %v7754_v17  ;;  %v7020_v27 = vsel %vm6988_vm8, 1.0, %v17621_v35  ;;  %vm6989_vm11 = vcmp.ge.f32.partialorder %v17707_v62, 0.0  ;;  %v7280_v28 = vmul.f32 %v15798_v10, %v7248_v23  ;;  %10397 = vmatprep.subr.bf16.mxu0 %v10396_v1  ;;  %v17718_v1 = vld [vmem:[#allocation27_spill] sm:$0xff]  ;;  %s8548_s7 = sshll.u32 %s716_s4, 4  ;;  %s16497_s7 = int_to_ptr.vmem [resolvable:$true] %s8548_s7 }
 0x9f4   : > { %v7660_v49 = vsub.f32 1.0, %v7628_v2  ;;  %v7755_v38 = vmul.f32 %v7723_v20, %v6923_v0  ;;  %v7469_v7 = vmul.f32 %v17695_v42, %v7437_v32  ;;  %v7438_v29 = vadd.f32 0.2548296, %v7406_v16  ;;  %v17715_v0 = vld [vmem:[#allocation155_spill] sm:$0xff]  ;;  %v17717_v2 = vld [vmem:[#allocation157_spill] sm:$0xff]  ;;  %v17719_v20 = vld [vmem:[#allocation26_spill] sm:$0xff] }
 0x9f5   : > { %v7343_v5 = vmul.f32 %v17704_v52, %v7311_v56  ;;  %v17710_v8 = vpack.c.bf16 %v17708_v18, %v17709_v48  ;;  %11009 = vpow2.f32 %v17711_v6  ;;  %v7312_v46 = vadd.f32 1.4214138, %v7280_v28  ;;  %v17721_v56 = vld [vmem:[#allocation44_spill] sm:$0xff] }
 0x9f6   : > { %v7692_v31 = vmul.f32 %v7660_v49, %v7020_v27  ;;  %v7217_v34 = vmul.f32 1.0614054, %v15802_v58  ;;  %10178 = vmatprep.mubr.msk.f32.mxu0 %vm6495_vm10, %v7755_v38  ;;  %v6924_v25 = vmul.f32 0.5, %v17712_v15  ;;  %v7629_v11 = vmul.f32 %v17713_v9, %v7469_v7 }
 0x9f7   : > { %10399 = vmatpush3.bf16.msra.mxu0 %v17710_v8  ;;  %v7470_v42 = vmul.f32 %v17698_v44, %v7438_v29  ;;  %v7375_v22 = vadd.f32 -0.28449672, %v7343_v5  ;;  %v7021_v40 = vsel %vm6989_vm11, 1.0, %v17621_v35  ;;  %v7344_v53 = vmul.f32 %v15798_v10, %v7312_v46  ;;  %v17722_v29 = vld [vmem:[#allocation137_spill] sm:$0xff]  ;;  %v17723_v8 = vld [vmem:[#allocation71_spill] sm:$0xff] }
 0x9f8   : > { %v7724_v45 = vadd.f32 1.0, %v7692_v31  ;;  %v7249_v41 = vadd.f32 -1.4531521, %v7217_v34  ;;  %v7661_v33 = vsub.f32 1.0, %v7629_v11  ;;  %vm6990_vm12 = vcmp.ge.f32.partialorder %v17714_v26, 0.0  ;;  %v17726_v26 = vld [vmem:[#allocation70_spill] sm:$0xff] }
 0x9f9   : > { %v7630_v13 = vmul.f32 %v16033_v55, %v7470_v42  ;;  %v7407_v3 = vmul.f32 %v17704_v52, %v7375_v22  ;;  %v7376_v44 = vadd.f32 -0.28449672, %v7344_v53  ;;  %v7218_v43 = vmul.f32 1.0614054, %v17715_v0  ;;  %v17725_v53 = vld [vmem:[#allocation169_spill] sm:$0xff] }
 0x9fa   : > { %v7756_v4 = vmul.f32 %v7724_v45, %v6924_v25  ;;  %v7281_v39 = vmul.f32 %v15802_v58, %v7249_v41  ;;  %v7693_v36 = vmul.f32 %v7661_v33, %v7021_v40  ;;  %v10400_v63 = vpack.c.bf16 %v11038_v47, %v11037_v51  ;;  %v17724_v25 = vld [vmem:[#allocation74_spill] sm:$0xff]  ;;  %v17728_v51 = vld [vmem:[#allocation76_spill] sm:$0xff] }
 0x9fb   : > { %v7662_v61 = vsub.f32 1.0, %v7630_v13  ;;  %v7439_v12 = vadd.f32 0.2548296, %v7407_v3  ;;  %v7022_v37 = vsel %vm6990_vm12, 1.0, %v17621_v35  ;;  %v7408_v55 = vmul.f32 %v15798_v10, %v7376_v44 }
 0x9fc   : > { %10179 = vmatmul.mubr.msk.f32.gmra.mrb[160].mxu0 %vm6495_vm10, %v7756_v4  ;;  %v7313_v30 = vadd.f32 1.4214138, %v7281_v39  ;;  %v7250_v60 = vadd.f32 -1.4531521, %v7218_v43  ;;  %v6925_v50 = vmul.f32 0.5, %v17716_v57  ;;  %v7725_v59 = vadd.f32 1.0, %v7693_v36  ;;  %10401 = vmatprep.subr.bf16.mxu0 %v10400_v63 }
 0x9fd   : > { %v7694_v54 = vmul.f32 %v7662_v61, %v7022_v37  ;;  %v7471_v17 = vmul.f32 %v17704_v52, %v7439_v12  ;;  %vm6991_vm13 = vcmp.ge.f32.partialorder %v17717_v2, 0.0  ;;  %v7440_v23 = vadd.f32 0.2548296, %v7408_v55  ;;  %v17727_v61 = vld [vmem:[#allocation73_spill] sm:$0xff]  ;;  %v16268_v2 = vld [vmem:[%s16551_s14] ss:$0 sm:$0xff] }
 0x9fe   : > { %v7345_v21 = vmul.f32 %v15802_v58, %v7313_v30  ;;  %v7282_v24 = vmul.f32 %v17715_v0, %v7250_v60  ;;  %v17720_v32 = vpack.c.bf16 %v17718_v1, %v17719_v20  ;;  %v7757_v16 = vmul.f32 %v7725_v59, %v6925_v50 }
 0x9ff   : > { %v6926_v27 = vmul.f32 0.5, %v17721_v56  ;;  %v7726_v49 = vadd.f32 1.0, %v7694_v54  ;;  %v7631_v62 = vmul.f32 %v16044_v14, %v7471_v17  ;;  %v11010_v28 = vpop.eup %11009  ;;  %v7472_v52 = vmul.f32 %v15798_v10, %v7440_v23 }
 0xa00   : > { %10403 = vmatpush3.bf16.msra.mxu0 %v17720_v32  ;;  %v7377_v38 = vadd.f32 -0.28449672, %v7345_v21  ;;  %v7314_v7 = vadd.f32 1.4214138, %v7282_v24  ;;  %11011 = vpow2.f32 %v17722_v29  ;;  %10181 = vmatprep.mubr.msk.f32.mxu0 %vm6495_vm10, %v7757_v16  ;;  %v7023_v18 = vsel %vm6991_vm13, 1.0, %v17621_v35 }
 0xa01   : > { %v7758_v5 = vmul.f32 %v7726_v49, %v6926_v27  ;;  %v7663_v48 = vsub.f32 1.0, %v7631_v62  ;;  %vm6992_vm14 = vcmp.ge.f32.partialorder %v17723_v8, 0.0  ;;  %v7632_v6 = vmul.f32 %v16056_v19, %v7472_v52  ;;  %v8204_v27 = vld [vmem:[%s16552_s15 + $0x8] sm:$0xff]  ;;  %v8203_v49 = vld [vmem:[%s16552_s15] sm:$0xff] }
 0xa02   : > { %v7409_v14 = vmul.f32 %v15802_v58, %v7377_v38  ;;  %v7346_v10 = vmul.f32 %v17715_v0, %v7314_v7  ;;  %v6927_v9 = vmul.f32 0.5, %v17724_v25  ;;  %v7024_v42 = vsel %vm6992_vm14, 1.0, %v17621_v35  ;;  %8220 = vmatprep.subr.mxu0 %v8204_v27 }
 0xa03   : > { %10182 = vmatmul.mubr.msk.f32.gmra.mrb[162].mxu0 %vm6495_vm10, %v7758_v5  ;;  %v7695_v31 = vmul.f32 %v7663_v48, %v7023_v18  ;;  %v7664_v46 = vsub.f32 1.0, %v7632_v6  ;;  %v6928_v41 = vmul.f32 0.5, %v17725_v53  ;;  %vm6993_vm15 = vcmp.ge.f32.partialorder %v17726_v26, 0.0 }
 0xa04   : > { %v7441_v34 = vadd.f32 0.2548296, %v7409_v14  ;;  %v7378_v15 = vadd.f32 -0.28449672, %v7346_v10  ;;  %v7025_v36 = vsel %vm6993_vm15, 1.0, %v17621_v35  ;;  %vm6994_vm1 = vcmp.ge.f32.partialorder %v17727_v61, 0.0 }
 0xa05   : > { %v7727_v11 = vadd.f32 1.0, %v7695_v31  ;;  %v7696_v22 = vmul.f32 %v7664_v46, %v7024_v42  ;;  %v6929_v47 = vmul.f32 0.5, %v17728_v51  ;;  %v7026_v55 = vsel %vm6994_vm1, 1.0, %v17621_v35 }
 0xa06   : > { %v7473_v45 = vmul.f32 %v15802_v58, %v7441_v34  ;;  %v7410_v19 = vmul.f32 %v17715_v0, %v7378_v15  ;;  %v17730_v54 = vmov 1.0   ;;  %v17731_v17 = vmov 0.0  }
 0xa07   : > { %v7759_v40 = vmul.f32 %v7727_v11, %v6927_v9  ;;  %v7728_v33 = vadd.f32 1.0, %v7696_v22 }
 0xa08   : > { %v7633_v13 = vmul.f32 %v11010_v28, %v7473_v45  ;;  %v7442_v3 = vadd.f32 0.2548296, %v7410_v19  ;;  %v17733_v28 = vmov 0.0|0.0  }
 0xa09   : > { %10184 = vmatprep.mubr.msk.f32.mxu0 %vm6495_vm10, %v7759_v40  ;;  %v7760_v4 = vmul.f32 %v7728_v33, %v6928_v41 }
 0xa0a   : > { %v7665_v44 = vsub.f32 1.0, %v7633_v13  ;;  %v7474_v39 = vmul.f32 %v17715_v0, %v7442_v3  ;;  %v11012_v43 = vpop.eup %11011  ;;  %v17729_v0 = vld [vmem:[#allocation78_spill] sm:$0xff] }
 0xa0b   : > { %10185 = vmatmul.mubr.msk.f32.gmra.mrb[164].mxu0 %vm6495_vm10, %v7760_v4  ;;  %v6930_v57 = vmul.f32 0.5, %v17729_v0 }
 0xa0c   : > { %v7697_v58 = vmul.f32 %v7665_v44, %v7025_v36  ;;  %v7634_v12 = vmul.f32 %v11012_v43, %v7474_v39 }
 0xa0e   : > { %v7729_v63 = vadd.f32 1.0, %v7697_v58  ;;  %v7666_v37 = vsub.f32 1.0, %v7634_v12 }
 0xa10   : > { %v7761_v30 = vmul.f32 %v7729_v63, %v6929_v47  ;;  %v7698_v60 = vmul.f32 %v7666_v37, %v7026_v55 }
 0xa12   : > { %10187 = vmatprep.mubr.msk.f32.mxu0 %vm6495_vm10, %v7761_v30  ;;  %v7730_v50 = vadd.f32 1.0, %v7698_v60 }
 0xa14   : > { %v7762_v59 = vmul.f32 %v7730_v50, %v6930_v57 }
 0xa16   : > { %10188 = vmatmul.mubr.msk.f32.gmra.mrb[166].mxu0 %vm6495_vm10, %v7762_v59 }
 0xa17   : > { %8195 = vmatprep.mubr.f32.mxu0 %v17730_v54 }
 0xa1a   : > { %8196 = vmatmul.mubr.f32.vlgmr.msra.gmra.mrb[168].mxu0 %v17730_v54 }
 0xa1b   : > { %8284 = vmatprep.mubr.f32.mxu0 %v17731_v17  ;;  %8221 = vmatpush1.msra.mxu0 %v8203_v49 }
 0xa1c   : > { %10404 = vmatprep.subr.bf16.mxu0 %v17733_v28 }
 0xa64   : > { %v10144_v23 = vpop.f32.mrb[136].mxu0 }
 0xa65   : > { %v7946_v21 = vadd.f32 %v10144_v23, %v16268_v2  ;;  %v7940_v24 = vpop.f32.mrb[137].mxu0 }
 0xa66   : > { %v7941_v1 = vadd.f32 %v16268_v2, %v7940_v24 }
 0xa67   : > { %8100 = vst [vmem:[%s16275_s0 + $0x8] sm:$0xff] %v7946_v21 }
 0xa68   : > { %8099 = vst [vmem:[%s16275_s0] sm:$0xff] %v7941_v1  ;;  %v10147_v20 = vpop.f32.mrb[138].mxu0 }
 0xa69   : > { %v7956_v32 = vadd.f32 %v10147_v20, %v16268_v2  ;;  %v7950_v16 = vpop.f32.mrb[139].mxu0 }
 0xa6a   : > { %v7951_v56 = vadd.f32 %v16268_v2, %v7950_v16 }
 0xa6b   : > { %8102 = vst [vmem:[%s16275_s0 + $0x18] sm:$0xff] %v7956_v32 }
 0xa6c   : > { %8101 = vst [vmem:[%s16275_s0 + $0x10] sm:$0xff] %v7951_v56 }
 0xa72   : > { %v10150_v62 = vpop.f32.mrb[140].mxu0 }
 0xa73   : > { %v7966_v52 = vadd.f32 %v10150_v62, %v16268_v2  ;;  %v7960_v38 = vpop.f32.mrb[141].mxu0  ;;  %v8345_v62 = vld [vmem:[%s16554_s17] sm:$0xff] }
 0xa74   : > { %v7961_v7 = vadd.f32 %v16268_v2, %v7960_v38 }
 0xa75   : > { %8104 = vst [vmem:[%s16275_s0 + $0x28] sm:$0xff] %v7966_v52  ;;  %v8346_v52 = vld [vmem:[%s16554_s17 + $0x8] sm:$0xff] }
 0xa76   : > { %8103 = vst [vmem:[%s16275_s0 + $0x20] sm:$0xff] %v7961_v7  ;;  %v10405_v38 = vpack.c.bf16 %v8346_v52, %v8345_v62  ;;  %v8348_v7 = vld [vmem:[%s16554_s17 + $0x18] sm:$0xff] }
 0xa83   : > { %v10153_v29 = vpop.f32.mrb[142].mxu0 }
 0xa84   : > { %v7976_v5 = vadd.f32 %v10153_v29, %v16268_v2  ;;  %v7970_v18 = vpop.f32.mrb[143].mxu0 }
 0xa85   : > { %v7971_v48 = vadd.f32 %v16268_v2, %v7970_v18  ;;  %v8350_v18 = vld [vmem:[%s16554_s17 + $0x28] sm:$0xff] }
 0xa86   : > { %8106 = vst [vmem:[%s16275_s0 + $0x38] sm:$0xff] %v7976_v5  ;;  %v8349_v5 = vld [vmem:[%s16554_s17 + $0x20] sm:$0xff] }
 0xa87   : > { %8105 = vst [vmem:[%s16275_s0 + $0x30] sm:$0xff] %v7971_v48  ;;  %v10156_v8 = vpop.f32.mrb[144].mxu0  ;;  %v10411_v48 = vpack.c.bf16 %v8350_v18, %v8349_v5  ;;  %v8433_v5 = vld [vmem:[%s16556_s19] sm:$0xff]  ;;  %v8434_v18 = vld [vmem:[%s16556_s19 + $0x8] sm:$0xff] }
 0xa88   : > { %v7986_v6 = vadd.f32 %v10156_v8, %v16268_v2  ;;  %v7980_v14 = vpop.f32.mrb[145].mxu0  ;;  %v8351_v8 = vld [vmem:[%s16554_s17 + $0x30] sm:$0xff] }
 0xa89   : > { %v7981_v10 = vadd.f32 %v16268_v2, %v7980_v14 }
 0xa8a   : > { %8108 = vst [vmem:[%s16275_s0 + $0x48] sm:$0xff] %v7986_v6  ;;  %v8352_v6 = vld [vmem:[%s16554_s17 + $0x38] sm:$0xff] }
 0xa8b   : > { %8107 = vst [vmem:[%s16275_s0 + $0x40] sm:$0xff] %v7981_v10  ;;  %v10414_v14 = vpack.c.bf16 %v8352_v6, %v8351_v8  ;;  %v8353_v10 = vld [vmem:[%s16554_s17 + $0x40] sm:$0xff] }
 0xa8d   : > { %v10159_v31 = vpop.f32.mrb[146].mxu0 }
 0xa8e   : > { %v7996_v46 = vadd.f32 %v10159_v31, %v16268_v2  ;;  %v7990_v34 = vpop.f32.mrb[147].mxu0  ;;  %v8354_v31 = vld [vmem:[%s16554_s17 + $0x48] sm:$0xff] }
 0xa8f   : > { %v7991_v15 = vadd.f32 %v16268_v2, %v7990_v34  ;;  %v8355_v34 = vld [vmem:[%s16554_s17 + $0x50] sm:$0xff] }
 0xa90   : > { %8110 = vst [vmem:[%s16275_s0 + $0x58] sm:$0xff] %v7996_v46  ;;  %v10417_v46 = vpack.c.bf16 %v8354_v31, %v8353_v10 }
 0xa91   : > { %8109 = vst [vmem:[%s16275_s0 + $0x50] sm:$0xff] %v7991_v15  ;;  %v8356_v15 = vld [vmem:[%s16554_s17 + $0x58] sm:$0xff] }
 0xa98   : > { %v10162_v25 = vpop.f32.mrb[148].mxu0 }
 0xa99   : > { %v8006_v9 = vadd.f32 %v10162_v25, %v16268_v2  ;;  %v8000_v11 = vpop.f32.mrb[149].mxu0  ;;  %v10420_v25 = vpack.c.bf16 %v8356_v15, %v8355_v34  ;;  %v8436_v34 = vld [vmem:[%s16556_s19 + $0x18] sm:$0xff] }
 0xa9a   : > { %v8001_v42 = vadd.f32 %v16268_v2, %v8000_v11  ;;  %v8358_v11 = vld [vmem:[%s16554_s17 + $0x68] sm:$0xff] }
 0xa9b   : > { %8112 = vst [vmem:[%s16275_s0 + $0x68] sm:$0xff] %v8006_v9  ;;  %v8357_v9 = vld [vmem:[%s16554_s17 + $0x60] sm:$0xff] }
 0xa9c   : > { %8111 = vst [vmem:[%s16275_s0 + $0x60] sm:$0xff] %v8001_v42  ;;  %v10423_v42 = vpack.c.bf16 %v8358_v11, %v8357_v9  ;;  %v8437_v11 = vld [vmem:[%s16556_s19 + $0x20] sm:$0xff] }
 0xaa3   : > { %v10165_v22 = vpop.f32.mrb[150].mxu0 }
 0xaa4   : > { %v8016_v45 = vadd.f32 %v10165_v22, %v16268_v2  ;;  %v8010_v19 = vpop.f32.mrb[151].mxu0  ;;  %v8359_v22 = vld [vmem:[%s16554_s17 + $0x70] sm:$0xff] }
 0xaa5   : > { %v8011_v40 = vadd.f32 %v16268_v2, %v8010_v19 }
 0xaa6   : > { %8114 = vst [vmem:[%s16275_s0 + $0x78] sm:$0xff] %v8016_v45  ;;  %v8360_v45 = vld [vmem:[%s16554_s17 + $0x78] sm:$0xff] }
 0xaa7   : > { %8113 = vst [vmem:[%s16275_s0 + $0x70] sm:$0xff] %v8011_v40  ;;  %v10426_v19 = vpack.c.bf16 %v8360_v45, %v8359_v22  ;;  %v8205_v40 = vld [vmem:[%s16553_s16] sm:$0x3] }
 0xaab   : > { %v10168_v53 = vpop.f32.mrb[152].mxu0 }
 0xaac   : > { %v8026_v41 = vadd.f32 %v10168_v53, %v16268_v2  ;;  %v8020_v33 = vpop.f32.mrb[153].mxu0  ;;  %v17734_v53 = vld [vmem:[#allocation29_spill] sm:$0xff] }
 0xaad   : > { %v8021_v26 = vadd.f32 %v16268_v2, %v8020_v33  ;;  %v17735_v33 = vld [vmem:[#allocation28_spill] sm:$0xff] }
 0xaae   : > { %8116 = vst [vmem:[%s16275_s0 + $0x88] sm:$0xff] %v8026_v41  ;;  %v8210_v41 = vrot.slane %v8205_v40, %v17734_v53 }
 0xaaf   : > { %8115 = vst [vmem:[%s16275_s0 + $0x80] sm:$0xff] %v8021_v26  ;;  %v17736_v26 = vsub.s32 1, %v17735_v33  ;;  %v8442_v33 = vld [vmem:[%s16556_s19 + $0x48] sm:$0xff] }
 0xab2   : > { %v10171_v13 = vpop.f32.mrb[154].mxu0 }
 0xab3   : > { %v8036_v3 = vadd.f32 %v10171_v13, %v16268_v2  ;;  %v8030_v4 = vpop.f32.mrb[155].mxu0  ;;  %v8214_v13 = vrot.slane %v8205_v40, %v17736_v26 }
 0xab4   : > { %v8031_v44 = vadd.f32 %v16268_v2, %v8030_v4 }
 0xab5   : > { %8118 = vst [vmem:[%s16275_s0 + $0x98] sm:$0xff] %v8036_v3 }
 0xab6   : > { %8117 = vst [vmem:[%s16275_s0 + $0x90] sm:$0xff] %v8031_v44 }
 0xabd   : > { %v10174_v39 = vpop.f32.mrb[156].mxu0 }
 0xabe   : > { %v8046_v43 = vadd.f32 %v10174_v39, %v16268_v2  ;;  %v8040_v36 = vpop.f32.mrb[157].mxu0 }
 0xabf   : > { %v8041_v58 = vadd.f32 %v16268_v2, %v8040_v36 }
 0xac0   : > { %8120 = vst [vmem:[%s16275_s0 + $0xa8] sm:$0xff] %v8046_v43 }
 0xac1   : > { %8119 = vst [vmem:[%s16275_s0 + $0xa0] sm:$0xff] %v8041_v58 }
 0xac6   : > { %v10177_v61 = vpop.f32.mrb[158].mxu0 }
 0xac7   : > { %v8056_v12 = vadd.f32 %v10177_v61, %v16268_v2  ;;  %v8050_v51 = vpop.f32.mrb[159].mxu0 }
 0xac8   : > { %v8051_v47 = vadd.f32 %v16268_v2, %v8050_v51 }
 0xac9   : > { %8122 = vst [vmem:[%s16275_s0 + $0xb8] sm:$0xff] %v8056_v12 }
 0xaca   : > { %8121 = vst [vmem:[%s16275_s0 + $0xb0] sm:$0xff] %v8051_v47 }
 0xacf   : > { %v10180_v63 = vpop.f32.mrb[160].mxu0 }
 0xad0   : > { %v8066_v37 = vadd.f32 %v10180_v63, %v16268_v2  ;;  %v8060_v55 = vpop.f32.mrb[161].mxu0 }
 0xad1   : > { %v8061_v30 = vadd.f32 %v16268_v2, %v8060_v55 }
 0xad2   : > { %8124 = vst [vmem:[%s16275_s0 + $0xc8] sm:$0xff] %v8066_v37 }
 0xad3   : > { %8123 = vst [vmem:[%s16275_s0 + $0xc0] sm:$0xff] %v8061_v30 }
 0xad6   : > { %v10183_v60 = vpop.f32.mrb[162].mxu0 }
 0xad7   : > { %v8076_v0 = vadd.f32 %v10183_v60, %v16268_v2  ;;  %v8070_v57 = vpop.f32.mrb[163].mxu0 }
 0xad8   : > { %v8071_v50 = vadd.f32 %v16268_v2, %v8070_v57 }
 0xad9   : > { %8126 = vst [vmem:[%s16275_s0 + $0xd8] sm:$0xff] %v8076_v0 }
 0xada   : > { %8125 = vst [vmem:[%s16275_s0 + $0xd0] sm:$0xff] %v8071_v50 }
 0xade   : > { %v10186_v59 = vpop.f32.mrb[164].mxu0 }
 0xadf   : > { %v8086_v54 = vadd.f32 %v10186_v59, %v16268_v2  ;;  %v8080_v23 = vpop.f32.mrb[165].mxu0 }
 0xae0   : > { %v8081_v21 = vadd.f32 %v16268_v2, %v8080_v23 }
 0xae1   : > { %8128 = vst [vmem:[%s16275_s0 + $0xe8] sm:$0xff] %v8086_v54 }
 0xae2   : > { %8127 = vst [vmem:[%s16275_s0 + $0xe0] sm:$0xff] %v8081_v21 }
 0xae9   : > { %v10189_v24 = vpop.f32.mrb[166].mxu0 }
 0xaea   : > { %v8096_v1 = vadd.f32 %v10189_v24, %v16268_v2  ;;  %v8090_v20 = vpop.f32.mrb[167].mxu0 }
 0xaeb   : > { %v8091_v32 = vadd.f32 %v16268_v2, %v8090_v20  ;;  %v8347_v2 = vld [vmem:[%s16554_s17 + $0x10] sm:$0xff] }
 0xaec   : > { %8130 = vst [vmem:[%s16275_s0 + $0xf8] sm:$0xff] %v8096_v1  ;;  %v10408_v29 = vpack.c.bf16 %v8348_v7, %v8347_v2 }
 0xaed   : > { %8129 = vst [vmem:[%s16275_s0 + $0xf0] sm:$0xff] %v8091_v32  ;;  %v9545_v16 = vpop.f32.mrb[168].mxu0  ;;  %s11039_s0 = scalar_lea.vmem %s16497_s7, 16 }
 0xaee   : > { %v9546_v56 = vpop.f32.mrb[169].mxu0  ;;  %p11040_p11 = scmp.ne.s32.totalorder %s16497_s7, %s11039_s0 }
 0xaef   : > { %v9547_v27 = vadd.f32 %v9546_v56, %v9545_v16 }
 0xaf0   : > { %p11041_p12 = pnand %p11040_p11, %p11271_p5 }
 0xaf1   : > { %v8202_v49 = vmul.f32 0.00390625, %v9547_v27 }
 0xaf2   : > { %p11042_p13 = pneg %p11041_p12 }
 0xaf3   : > { %9046 = vmatmul.mubr.msk.f32.vlgmr.msra.gmra.mrb[170].mxu0 %vm777_vm0, %v8202_v49 }
 0xaf4   : > { %10222 = vmatprep.mubr.msk.f32.mxu0 %vm11108_vm9, %v17731_v17  ;;  %10406 = vmatpush3.bf16.msra.mxu0 %v10405_v38 }
 0xaf5   : > { %10407 = vmatprep.subr.bf16.mxu0 %v17733_v28 }
 0xaf8   : > { %10409 = vmatpush3.bf16.msra.mxu0 %v10408_v29 }
 0xaf9   : > { %10410 = vmatprep.subr.bf16.mxu0 %v17733_v28 }
 0xafc   : > { %10412 = vmatpush3.bf16.msra.mxu0 %v10411_v48 }
 0xafd   : > { %10413 = vmatprep.subr.bf16.mxu0 %v17733_v28 }
 0xb00   : > { %10415 = vmatpush3.bf16.msra.mxu0 %v10414_v14  ;;  %v10429_v14 = vpack.c.bf16 %v8434_v18, %v8433_v5 }
 0xb01   : > { %10416 = vmatprep.subr.bf16.mxu0 %v17733_v28 }
 0xb04   : > { %10418 = vmatpush3.bf16.msra.mxu0 %v10417_v46  ;;  %v8435_v46 = vld [vmem:[%s16556_s19 + $0x10] sm:$0xff] }
 0xb05   : > { %10419 = vmatprep.subr.bf16.mxu0 %v17733_v28 }
 0xb08   : > { %10421 = vmatpush3.bf16.msra.mxu0 %v10420_v25  ;;  %v10432_v25 = vpack.c.bf16 %v8436_v34, %v8435_v46 }
 0xb09   : > { %10422 = vmatprep.subr.bf16.mxu0 %v17733_v28 }
 0xb0c   : > { %10424 = vmatpush3.bf16.msra.mxu0 %v10423_v42  ;;  %v8438_v42 = vld [vmem:[%s16556_s19 + $0x28] sm:$0xff] }
 0xb0d   : > { %10425 = vmatprep.subr.bf16.mxu0 %v17733_v28  ;;  %v10435_v22 = vpack.c.bf16 %v8438_v42, %v8437_v11 }
 0xb10   : > { %10427 = vmatpush3.bf16.msra.mxu0 %v10426_v19  ;;  %v8440_v19 = vld [vmem:[%s16556_s19 + $0x38] sm:$0xff] }
 0xb11   : > { %10428 = vmatprep.subr.bf16.mxu0 %v17733_v28 }
 0xbc6   : > { %v8286_v3 = vpop.f32.mrb[170].mxu0 }
 0xbc7   : > { %v8287_v4 = vadd.f32 %v8286_v3, %v8210_v41  ;;  %v8288_v44 = vpop.f32.mrb[171].mxu0  ;;  %v8441_v41 = vld [vmem:[%s16556_s19 + $0x40] sm:$0xff] }
 0xbc8   : > { %v16413_v39 = vadd.f32 %v8288_v44, %v8214_v13  ;;  %v10441_v13 = vpack.c.bf16 %v8442_v33, %v8441_v41  ;;  %v8444_v44 = vld [vmem:[%s16556_s19 + $0x58] sm:$0xff] }
 0xbc9   : > { %v8293_v43 = vmul.f32 0.70710677, %v8287_v4  ;;  %v8291_v8 = vmul.f32 0.5, %v8287_v4  ;;  %v8443_v4 = vld [vmem:[%s16556_s19 + $0x50] sm:$0xff] }
 0xbca   : > { %v16416_v36 = vmul.f32 0.70710677, %v16413_v39 }
 0xbcb   : > { %v8299_v58 = vand.u32 2147483647, %v8293_v43  ;;  %vm8295_vm0 = vcmp.ge.f32.partialorder %v8293_v43, 0.0  ;;  %v10444_v43 = vpack.c.bf16 %v8444_v44, %v8443_v4 }
 0xbcc   : > { %v8300_v61 = vand.u32 2147483647, %v16416_v36  ;;  %v8297_v38 = vsel %vm8295_vm0, 1.0, %v17621_v35 }
 0xbcd   : > { %v8301_v12 = vmul.f32 0.3275911, %v8299_v58  ;;  %v8327_v37 = vsub.f32 0.0, %v8299_v58 }
 0xbce   : > { %v8302_v51 = vmul.f32 0.3275911, %v8300_v61  ;;  %v8328_v52 = vsub.f32 0.0, %v8300_v61 }
 0xbcf   : > { %v8303_v47 = vadd.f32 1.0, %v8301_v12  ;;  %v8329_v30 = vmul.f32 %v8327_v37, %v8299_v58  ;;  %v8446_v12 = vld [vmem:[%s16556_s19 + $0x68] sm:$0xff]  ;;  %v8448_v37 = vld [vmem:[%s16556_s19 + $0x78] sm:$0xff] }
 0xbd0   : > { %v8304_v63 = vadd.f32 1.0, %v8302_v51  ;;  %v8330_v48 = vmul.f32 %v8328_v52, %v8300_v61  ;;  %v8445_v61 = vld [vmem:[%s16556_s19 + $0x60] sm:$0xff] }
 0xbd1   : > { %11013 = vrcp.f32 %v8303_v47  ;;  %v8331_v50 = vmul.f32 1.442695, %v8329_v30  ;;  %v10447_v47 = vpack.c.bf16 %v8446_v12, %v8445_v61 }
 0xbd2   : > { %11015 = vrcp.f32 %v8304_v63  ;;  %v8333_v15 = vmul.f32 1.442695, %v8330_v48 }
 0xbd3   : > { %11017 = vpow2.f32 %v8331_v50 }
 0xbd4   : > { %11019 = vpow2.f32 %v8333_v15 }
 0xbdb   : > { %v11014_v55 = vpop.eup %11013 }
 0xbdc   : > { %v8309_v60 = vmul.f32 1.0614054, %v11014_v55  ;;  %v11016_v57 = vpop.eup %11015 }
 0xbdd   : > { %v8310_v23 = vmul.f32 1.0614054, %v11016_v57  ;;  %v11018_v27 = vpop.eup %11017 }
 0xbde   : > { %v8311_v0 = vadd.f32 -1.4531521, %v8309_v60  ;;  %v11020_v26 = vpop.eup %11019 }
 0xbdf   : > { %v8312_v1 = vadd.f32 -1.4531521, %v8310_v23 }
 0xbe0   : > { %v8313_v59 = vmul.f32 %v11014_v55, %v8311_v0  ;;  %v8361_v0 = vld [vmem:[%s16555_s18] sm:$0x1] }
 0xbe1   : > { %v8314_v16 = vmul.f32 %v11016_v57, %v8312_v1 }
 0xbe2   : > { %v8315_v54 = vadd.f32 1.4214138, %v8313_v59 }
 0xbe3   : > { %v8316_v62 = vadd.f32 1.4214138, %v8314_v16 }
 0xbe4   : > { %v8317_v21 = vmul.f32 %v11014_v55, %v8315_v54 }
 0xbe5   : > { %v8318_v29 = vmul.f32 %v11016_v57, %v8316_v62 }
 0xbe6   : > { %v8319_v24 = vadd.f32 -0.28449672, %v8317_v21 }
 0xbe7   : > { %v8320_v31 = vadd.f32 -0.28449672, %v8318_v29 }
 0xbe8   : > { %v8321_v20 = vmul.f32 %v11014_v55, %v8319_v24 }
 0xbe9   : > { %v8322_v9 = vmul.f32 %v11016_v57, %v8320_v31 }
 0xbea   : > { %v8323_v32 = vadd.f32 0.2548296, %v8321_v20 }
 0xbeb   : > { %v8324_v45 = vadd.f32 0.2548296, %v8322_v9 }
 0xbec   : > { %v8325_v56 = vmul.f32 %v11014_v55, %v8323_v32 }
 0xbed   : > { %v8326_v53 = vmul.f32 %v11016_v57, %v8324_v45 }
 0xbee   : > { %v8335_v49 = vmul.f32 %v11018_v27, %v8325_v56 }
 0xbef   : > { %v8336_v3 = vmul.f32 %v11020_v26, %v8326_v53 }
 0xbf0   : > { %v8337_v2 = vsub.f32 1.0, %v8335_v49 }
 0xbf1   : > { %v8338_v58 = vsub.f32 1.0, %v8336_v3 }
 0xbf2   : > { %v8339_v7 = vmul.f32 %v8337_v2, %v8297_v38 }
 0xbf4   : > { %v8341_v6 = vadd.f32 1.0, %v8339_v7 }
 0xbf6   : > { %v8343_v10 = vmul.f32 %v8341_v6, %v8291_v8 }
 0xbf8   : > { %10223 = vmatmul.mubr.f32.vlgmr.msra.gmra.mrb[172].mxu0 %v8343_v10 }
 0xbf9   : > { %10430 = vmatpush3.bf16.msra.mxu0 %v10429_v14  ;;  %10257 = vmatprep.mubr.msk.f32.mxu0 %vm11108_vm9, %v17731_v17  ;;  %v8439_v17 = vld [vmem:[%s16556_s19 + $0x30] sm:$0xff]  ;;  %vm8296_vm9 = vcmp.ge.f32.partialorder %v16416_v36, 0.0 }
 0xbfa   : > { %10431 = vmatprep.subr.bf16.mxu0 %v17733_v28  ;;  %v10438_v40 = vpack.c.bf16 %v8440_v19, %v8439_v17  ;;  %v8298_v51 = vsel %vm8296_vm9, 1.0, %v17621_v35  ;;  %v8447_v36 = vld [vmem:[%s16556_s19 + $0x70] sm:$0xff]  ;;  %v8292_v35 = vmul.f32 0.5, %v16413_v39 }
 0xbfb   : > { %v8340_v63 = vmul.f32 %v8338_v58, %v8298_v51  ;;  %v10450_v55 = vpack.c.bf16 %v8448_v37, %v8447_v36 }
 0xbfd   : > { %10433 = vmatpush3.bf16.msra.mxu0 %v10432_v25  ;;  %v8342_v30 = vadd.f32 1.0, %v8340_v63 }
 0xbfe   : > { %10434 = vmatprep.subr.bf16.mxu0 %v17733_v28 }
 0xbff   : > { %v8344_v60 = vmul.f32 %v8342_v30, %v8292_v35 }
 0xc01   : > { %10436 = vmatpush3.bf16.msra.mxu0 %v10435_v22 }
 0xc02   : > { %10437 = vmatprep.subr.bf16.mxu0 %v17733_v28 }
 0xc05   : > { %10439 = vmatpush3.bf16.msra.mxu0 %v10438_v40 }
 0xc06   : > { %10440 = vmatprep.subr.bf16.mxu0 %v17733_v28 }
 0xc09   : > { %10442 = vmatpush3.bf16.msra.mxu0 %v10441_v13 }
 0xc0a   : > { %10443 = vmatprep.subr.bf16.mxu0 %v17733_v28 }
 0xc0d   : > { %10445 = vmatpush3.bf16.msra.mxu0 %v10444_v43 }
 0xc0e   : > { %10446 = vmatprep.subr.bf16.mxu0 %v17733_v28 }
 0xc11   : > { %10448 = vmatpush3.bf16.msra.mxu0 %v10447_v47 }
 0xc12   : > { %10449 = vmatprep.subr.bf16.mxu0 %v17733_v28  ;;  %v8449_v28 = vld [vmem:[%s16557_s20] sm:$0x1] }
 0xc15   : > { %10451 = vmatpush3.bf16.msra.mxu0 %v10450_v55 }
 0xc18   : > { %10258 = vmatmul.mubr.f32.vlgmr.msra.gmra.mrb[174].mxu0 %v8344_v60 }
 0xccb   : > { %v8428_v57 = vpop.f32.mrb[172].mxu0 }
 0xccc   : > { %v8429_v50 = vadd.f32 %v8428_v57, %v8361_v0  ;;  %v10224_v59 = vpop.f32.mrb[173].mxu0 }
 0xcce   : > { %8432 = vst [vmem:[%s729_s26] sm:$0x1] %v8429_v50  ;;  %s11043_s26 = sshll.u32 %s11109_s2, 4  ;;  %s11044_s26 = int_to_ptr.vmem [resolvable:$false] %s11043_s26 }
 0xccf   : > { %s11045_s1 = scalar_lea.vmem %s11044_s26, 32  ;;  %p11046_p0 = scmp.lt.s32.totalorder %s16497_s7, %s11044_s26 }
 0xcd0   : > { %p11047_p1 = scmp.lt.s32.totalorder %s11045_s1, %s11039_s0 }
 0xcd2   : > { %p11048_p2 = por %p11047_p1, %p11046_p0 }
 0xcd4   : > { %p11049_p3 = pnand %p11048_p2, %p11042_p13 }
 0xceb   : > { %v8516_v39 = vpop.f32.mrb[174].mxu0 }
 0xcec   : > { %v8517_v54 = vadd.f32 %v8516_v39, %v8449_v28  ;;  %v10259_v23 = vpop.f32.mrb[175].mxu0 }
 0xcee   : > { %8520 = vst [vmem:[%s716_s4] sm:$0x1] %v8517_v54 }
 0xcef   : > { %11052 = shalt.err (!%p11049_p3)
}
 0xcf0   : > { %s11053_s4 = scalar_lea.hbm %s16495_s28, 16  ;;  %s11057_s30 = scalar_lea.hbm %s16560_s23, 32 }
 0xcf1   : > { %p11054_p4 = scmp.ne.s32.totalorder %s16495_s28, %s11053_s4  ;;  %p11058_p9 = scmp.lt.u32.totalorder %s16495_s28, %s16560_s23 }
 0xcf2   : > { %p11059_p10 = scmp.lt.u32.totalorder %s11057_s30, %s11053_s4  ;;  %p11061_p12 = scmp.lt.u32.totalorder %s11053_s4, %s16495_s28 }
 0xcf3   : > { %p11055_p7 = pnand %p11054_p4, %p11271_p5 }
 0xcf4   : > { %p11060_p11 = por %p11059_p10, %p11058_p9 }
 0xcf5   : > { %p11056_p8 = pneg %p11055_p7 }
 0xcf6   : > { %p11062_p13 = por %p11061_p12, %p11060_p11 }
 0xcf8   : > { %p11063_p0 = pnand %p11062_p13, %p11056_p8 }
 0xcfa   : > { %11066 = shalt.err (!%p11063_p0)
}
 0xcfb   : > { %10708 = dma.vmem_to_hbm [thread:$0]  (%p11271_p5), %s16497_s7, 16, %s16495_s28, %s8530_s24  }
 0xcfc PF: > { %s17737_s0 = sld [smem:[#allocation8_spill]]  ;;  %s17738_s2 = sld [smem:[#allocation6_spill]] }
 0xd02   : > { %p10714_p1 = scmp.ge.s32.totalorder %s17737_s0, 2  ;;  %s8574_s1 = sand.u32 1, %s17738_s2  }
 0xd03   : > { %s8575_s27 = scalar_lea.sflag [#allocation4], %s8574_s1 }
 0xd04   : > { %p10711_p2 = pnand %p10714_p1, %p11275_p6 }
 0xd06   : > { %11084 = dma.done.wait (!%p10711_p2), %s8575_s27, 16  }
 0xd07   : > { %11086 = vsyncadd (!%p10711_p2), %s8575_s27, 4294967280  ;;  %s17740_s26 = sld [smem:[#allocation9_spill]]  ;;  %s17741_s4 = sld [smem:[#allocation7_spill]] }
 0xd08   : > { %s17742_s1 = sld [smem:[#allocation10_spill]]  ;;  %s17743_s25 = smov %s11093_s5 }
 0xd0d   : > { %p35_p3 = scmp.ge.s32.totalorder %s17740_s26, 4   ;;  %s17744_s5 = smov %s17741_s4 }
 0xd0f   :  { %37 = sbr.rel (!%p35_p3) target bundleno = 17 (0x11), region = 163 }
 0xd16   :  { %8579 = vsyncpa [#allocation4], 1 }
 0xd17   :  { %8581 = vsyncpa [#allocation4 + $0x1], 1 }

</bundles_post_ra>
